<compile_context>
chip_gen: v7x
topology: tpu7x:2x2x1
jax: 0.10.0
libtpu: 0.0.40
codegen_flags: <defaults>
</compile_context>

<pallas_src>
import numpy as np
import jax
import jax.numpy as jnp
from jax import lax
from jax.experimental import pallas as pl
from jax.experimental.pallas import tpu as pltpu

# ----- PseTae default hyper-parameters -----
INPUT_DIM   = 10
MLP1        = [10, 32, 64]
EXTRA_SIZE  = 4
MLP2_OUT    = 128                    # mlp2 = [128 + extra_size, 128]
N_HEAD      = 4
D_K         = 32
D_MODEL     = MLP2_OUT               # d_model=None -> in_channels
MLP3        = [512, 128, 128]        # 512 == n_head * d_model
MLP4        = [128, 64, 32]
NUM_CLASSES = 20
T_PE        = 1000
MAX_SHIFT   = 100                    # max_temporal_shift
MAX_POS     = 365
EPS_BN      = 1e-5
EPS_LN      = 1e-5

PAD  = 128                           # every hidden width padded to one 128-lane slab
CPAD = 16                            # pixel-channel pad; lane CPAD-1 carries the mask
EPAD = 16                            # extra-feature pad

# ----- small example shapes -----
B, T, S = 2, 8, 16                   # batch, sequence length, pixels per set

# bias-slab row indices (packed (15,128) f32 constant)
(B1A, B1B, B2, GIN, BIN, BQ, BK, BFC2,
 B3A, B3B, GOUT, BOUT, BD1, BD2, BD3) = range(15)
# weight-stack slice indices (packed (10,128,128) bf16 constant)
(W1B, W2M, W2S, WQ, WK, WFC2, W3B, WD1, WD2, WD3) = range(10)


# =====================================================================
# Fused PseTae kernel: one grid step processes Bb batch samples.
# =====================================================================
def _build_kernel(Bb, T_, S_):
    N = Bb * T_                          # (batch,time) samples per step
    inv_T = 1.0 / float(T_)
    inv_sqrt_dk = 1.0 / float(np.sqrt(D_K))

    def kernel(px_ref, ex_ref, pe_ref,
               hsum_ref, w1a_ref, w2e_ref, w3a_ref, wstack_ref, bias_ref,
               out_ref):
        f32, bf16 = jnp.float32, jnp.bfloat16
        bias = bias_ref[...]                               # (15, 128) f32

        def brow(i):                                       # (1, 128) row of the slab
            return bias[i:i + 1, :]

        # ---------------- Pixel-Set Encoder ---------------------------------
        x = px_ref[...]                                    # (R, CPAD) bf16, mask in lane CPAD-1
        mcol = x[:, CPAD - 1:CPAD].astype(f32)             # (R, 1) pixel-validity mask
        ha = jnp.maximum(jnp.dot(x, w1a_ref[...],
                                 preferred_element_type=f32) + brow(B1A), 0.0)
        hb = jnp.maximum(jnp.dot(ha.astype(bf16), wstack_ref[W1B],
                                 preferred_element_type=f32) + brow(B1B), 0.0)   # (R,128) f32

        # masked mean / two-pass unbiased std pooling over the pixel axis.
        # (reshape splits the leading row dim; sums run over the sublane axis.)
        hm3 = (hb * mcol).reshape(N, S_, PAD)              # masked activations
        h3  = hb.reshape(N, S_, PAD)
        m3  = mcol.reshape(N, S_, 1)

        cnt = jnp.sum(m3, axis=1)                          # (N, 1) valid-pixel count
        inv_cnt = pl.reciprocal(jnp.maximum(cnt, 1.0), approx=True)
        mean = jnp.sum(hm3, axis=1) * inv_cnt              # (N, 128)

        cntk = jnp.maximum(jnp.sum(m3, axis=1, keepdims=True), 1.0)      # (N,1,1)
        meank = jnp.sum(hm3, axis=1, keepdims=True) * pl.reciprocal(cntk, approx=True)
        dc = (h3 - meank) * m3                             # centered & masked (two-pass)
        ss = jnp.sum(dc * dc, axis=1)                      # (N, 128)
        var = ss * pl.reciprocal(jnp.maximum(cnt - 1.0, 1.0), approx=True)
        std = jnp.sqrt(var + 1e-31)

        e = ex_ref[...]                                    # (N, EPAD)
        feats = jnp.maximum(
            jnp.dot(mean.astype(bf16), wstack_ref[W2M], preferred_element_type=f32)
            + jnp.dot(std.astype(bf16), wstack_ref[W2S], preferred_element_type=f32)
            + jnp.dot(e.astype(bf16), w2e_ref[...], preferred_element_type=f32)
            + brow(B2), 0.0)                               # (N, 128) spatial features

        # ---------------- Temporal Attention Encoder ------------------------
        mu = jnp.mean(feats, axis=-1, keepdims=True)       # input LayerNorm (f32)
        v0 = jnp.mean((feats - mu) ** 2, axis=-1, keepdims=True)
        xn = (feats - mu) * lax.rsqrt(v0 + EPS_LN) * brow(GIN) + brow(BIN)
        xp = xn + pe_ref[...]                              # + positional encoding
        xpb = xp.astype(bf16)

        qf = jnp.dot(xpb, wstack_ref[WQ], preferred_element_type=f32) + brow(BQ)
        kf = jnp.dot(xpb, wstack_ref[WK], preferred_element_type=f32) + brow(BK)

        # fc2 (eval BN folded) is affine, so it commutes with the temporal mean
        # of q: apply per-timestep (better MXU row fill), then mean over time.
        q2 = jnp.dot(qf.astype(bf16), wstack_ref[WFC2],
                     preferred_element_type=f32) + brow(BFC2)            # (N,128)
        q2m = jnp.sum(q2.reshape(Bb, T_, PAD), axis=1, keepdims=True) * inv_T   # (Bb,1,128)

        prod = (kf.reshape(Bb, T_, PAD) * q2m).reshape(N, PAD)
        logits = jnp.dot(prod.astype(bf16), hsum_ref[...],
                         preferred_element_type=f32) * inv_sqrt_dk       # (N, n_head)

        # per-sample, per-head softmax over time (f32)
        l3 = logits.reshape(Bb, T_, N_HEAD)
        mx = jnp.max(l3, axis=1, keepdims=True)
        ea = jnp.exp(l3 - mx)
        den = jnp.sum(ea, axis=1, keepdims=True)
        attn = (ea * pl.reciprocal(den, approx=True)).reshape(N, N_HEAD).astype(bf16)

        # heads fused: z = concat_h(attn_h * x_pe) -> ONE K=512 MXU matmul
        z = jnp.concatenate([attn[:, hh:hh + 1] * xpb for hh in range(N_HEAD)],
                            axis=-1)                                      # (N, 512) bf16
        y = jnp.dot(z, w3a_ref[...], preferred_element_type=f32)          # (N, 128)

        # per-sample segment sum over time, then mlp3 tail
        h1 = jnp.maximum(jnp.sum(y.reshape(Bb, T_, PAD), axis=1) + brow(B3A), 0.0)   # (Bb,128)
        h2 = jnp.maximum(jnp.dot(h1.astype(bf16), wstack_ref[W3B],
                                 preferred_element_type=f32) + brow(B3B), 0.0)

        mu2 = jnp.mean(h2, axis=-1, keepdims=True)          # output LayerNorm
        v2 = jnp.mean((h2 - mu2) ** 2, axis=-1, keepdims=True)
        tfeat = (h2 - mu2) * lax.rsqrt(v2 + EPS_LN) * brow(GOUT) + brow(BOUT)

        # ---------------- decoder MLP4 (widths padded to 128 lanes) ---------
        d1 = jnp.maximum(jnp.dot(tfeat.astype(bf16), wstack_ref[WD1],
                                 preferred_element_type=f32) + brow(BD1), 0.0)
        d2 = jnp.maximum(jnp.dot(d1.astype(bf16), wstack_ref[WD2],
                                 preferred_element_type=f32) + brow(BD2), 0.0)
        out_ref[...] = jnp.dot(d2.astype(bf16), wstack_ref[WD3],
                               preferred_element_type=f32) + brow(BD3)    # (Bb, 128)

    return kernel


# =====================================================================
# Parameters: synthetic init, eval-BN folded, padded to 128 lanes, packed.
# =====================================================================
def make_params():
    key = jax.random.PRNGKey(0)
    ks = iter(jax.random.split(key, 128))

    def lin(fi, fo):
        w = jax.random.normal(next(ks), (fi, fo), jnp.float32) / np.sqrt(fi)
        b = 0.01 * jax.random.normal(next(ks), (1, fo), jnp.float32)
        return w, b

    def bn(d):  # eval-mode BatchNorm -> per-feature scale/shift
        g = 1.0 + 0.1 * jax.random.normal(next(ks), (1, d), jnp.float32)
        be = 0.1 * jax.random.normal(next(ks), (1, d), jnp.float32)
        rm = 0.1 * jax.random.normal(next(ks), (1, d), jnp.float32)
        rv = jax.random.uniform(next(ks), (1, d), jnp.float32, minval=0.5, maxval=1.5)
        s = g * lax.rsqrt(rv + EPS_BN)
        return s, be - rm * s

    def ln(d):
        g = 1.0 + 0.1 * jax.random.normal(next(ks), (1, d), jnp.float32)
        be = 0.1 * jax.random.normal(next(ks), (1, d), jnp.float32)
        return g, be

    def fold(w, b, s, t):                    # Linear followed by eval-mode BN
        return w * s, b * s + t

    def pc(w, n=PAD):                        # pad output features (columns) with zeros
        return jnp.pad(w, ((0, 0), (0, n - w.shape[1])))

    def pr(w, n=PAD):                        # pad input features (rows) with zeros
        return jnp.pad(w, ((0, n - w.shape[0]), (0, 0)))

    # --- PixelSetEncoder ---
    w1a, b1a = lin(INPUT_DIM, MLP1[1]); w1a, b1a = fold(w1a, b1a, *bn(MLP1[1]))
    w1b, b1b = lin(MLP1[1], MLP1[2]);   w1b, b1b = fold(w1b, b1b, *bn(MLP1[2]))
    w2, b2 = lin(2 * MLP1[2] + EXTRA_SIZE, MLP2_OUT)
    w2, b2 = fold(w2, b2, *bn(MLP2_OUT))
    w2m, w2s, w2e = w2[:MLP1[2]], w2[MLP1[2]:2 * MLP1[2]], w2[2 * MLP1[2]:]

    # --- TemporalAttentionEncoder ---
    gin, bin_ = ln(D_MODEL)
    wq, bq = lin(D_MODEL, N_HEAD * D_K)
    bnqs, bnqt = bn(N_HEAD * D_K)
    wfc2, bfc2 = lin(N_HEAD * D_K, N_HEAD * D_K)
    bfc2 = bnqt @ wfc2 + bfc2                # fold BN (applied before fc2) into fc2
    wfc2 = wfc2 * bnqs.reshape(-1, 1)
    wk, bk = lin(D_MODEL, N_HEAD * D_K)
    w3a, b3a = lin(MLP3[0], MLP3[1]); w3a, b3a = fold(w3a, b3a, *bn(MLP3[1]))
    w3b, b3b = lin(MLP3[1], MLP3[2]); w3b, b3b = fold(w3b, b3b, *bn(MLP3[2]))
    gout, bout = ln(MLP3[2])

    # --- decoder ---
    wd1, bd1 = lin(MLP4[0], MLP4[1]); wd1, bd1 = fold(wd1, bd1, *bn(MLP4[1]))
    wd2, bd2 = lin(MLP4[1], MLP4[2]); wd2, bd2 = fold(wd2, bd2, *bn(MLP4[2]))
    wd3, bd3 = lin(MLP4[2], NUM_CLASSES)

    # --- pack: one bf16 weight stack + one f32 bias slab (all lane-dense) ---
    wstack = jnp.stack([
        pr(pc(w1b)),                                   # W1B
        pr(w2m), pr(w2s),                              # W2M, W2S
        wq, wk, wfc2,                                  # WQ, WK, WFC2
        w3b,                                           # W3B
        pc(wd1), pc(pr(wd2)), pc(pr(wd3)),             # WD1, WD2, WD3
    ]).astype(jnp.bfloat16)                            # (10, 128, 128)

    bias = jnp.concatenate([
        pc(b1a), pc(b1b), b2,                          # B1A, B1B, B2
        gin, bin_, bq, bk, bfc2,                       # GIN, BIN, BQ, BK, BFC2
        b3a, b3b, gout, bout,                          # B3A, B3B, GOUT, BOUT
        pc(bd1), pc(bd2), pc(bd3),                     # BD1, BD2, BD3
    ], axis=0).astype(jnp.float32)                     # (15, 128)

    return {
        'w1a': pr(pc(w1a), CPAD).astype(jnp.bfloat16),   # (16,128), rows>=10 zero (mask lane ignored)
        'w2e': pr(w2e, EPAD).astype(jnp.bfloat16),       # (16, 128)
        'w3a': w3a.astype(jnp.bfloat16),                 # (512, 128) fused-head weight
        'wstack': wstack,
        'bias': bias,
    }


def sinusoid_table(n_pos, d, temperature=1000.0):
    pos = np.arange(n_pos, dtype=np.float64)[:, None]
    i = np.arange(d)[None, :]
    angle = pos / np.power(temperature, 2.0 * (i // 2) / d)
    tab = np.zeros((n_pos, d), dtype=np.float64)
    tab[:, 0::2] = np.sin(angle[:, 0::2])
    tab[:, 1::2] = np.cos(angle[:, 1::2])
    return jnp.asarray(tab, dtype=jnp.float32)


def _const_spec(arr):
    nd = arr.ndim
    return pl.BlockSpec(arr.shape, lambda g, _n=nd: (0,) * _n)


# =====================================================================
# Forward wrapper: layout glue + one pallas_call over batch chunks.
# =====================================================================
def psetae_forward(pixels, mask, positions, extra, gdd, params):
    # gdd unused: module defaults with_gdd_extra=False, with_gdd_enc=False
    B_, T_, C_, S_ = pixels.shape
    f32 = jnp.float32

    # Samples per grid step: Bb*T big enough to fill the MXU M dim (target ~256
    # rows), Bb a multiple of 8 (aligned lane-dense (Bb,128) output block), and
    # Gb >= 2 so dimension_semantics=("parallel",) can use both v7x TensorCores.
    Bb = max(8, min(32, 8 * ((B_ + 15) // 16)))
    Gb = max(2, -(-B_ // Bb))
    Bp = Gb * Bb
    N = Bb * T_                      # (batch,time) samples per step
    R = N * S_                       # pixel rows per step

    def padb(a):
        return a if Bp == B_ else jnp.pad(a, [(0, Bp - B_)] + [(0, 0)] * (a.ndim - 1))

    # TODO(synk): store the pixel tensor feature-last (B,T,S,C) upstream and drop
    # this one-off XLA transpose of the largest input.
    pxf = jnp.transpose(padb(pixels.astype(f32)), (0, 1, 3, 2))            # (Bp,T,S,C)
    mkf = padb(mask.astype(f32))                                           # (Bp,T,S)
    px = jnp.concatenate(
        [pxf, jnp.zeros((Bp, T_, S_, CPAD - 1 - C_), f32), mkf[..., None]],
        axis=-1).reshape(Bp * T_ * S_, CPAD).astype(jnp.bfloat16)          # mask rides in lane CPAD-1

    ex = padb(extra.astype(f32)).reshape(Bp * T_, EXTRA_SIZE)
    ex = jnp.pad(ex, ((0, 0), (0, EPAD - EXTRA_SIZE)))                     # (Bp*T, 16)
    table = sinusoid_table(MAX_POS + 2 * MAX_SHIFT + 1, D_MODEL, T_PE)
    pe = table[padb(positions) + MAX_SHIFT].reshape(Bp * T_, D_MODEL).astype(f32)

    # tiny per-head summation selector (0/1 -> exact in bf16)
    hsum = jnp.asarray(((np.arange(N_HEAD * D_K)[:, None] // D_K) ==
                        np.arange(N_HEAD)[None, :]).astype(np.float32)).astype(jnp.bfloat16)

    kernel = _build_kernel(Bb, T_, S_)

    out = pl.pallas_call(
        kernel,
        out_shape=jax.ShapeDtypeStruct((Bp, PAD), f32),
        grid=(Gb,),
        in_specs=[
            pl.BlockSpec((R, CPAD), lambda g: (g, 0)),            # pixels (+ mask lane)
            pl.BlockSpec((N, EPAD), lambda g: (g, 0)),            # extra features
            pl.BlockSpec((N, D_MODEL), lambda g: (g, 0)),         # positional encoding
            _const_spec(hsum),
            _const_spec(params['w1a']), _const_spec(params['w2e']),
            _const_spec(params['w3a']), _const_spec(params['wstack']),
            _const_spec(params['bias']),
        ],
        out_specs=pl.BlockSpec((Bb, PAD), lambda g: (g, 0)),      # lane-dense logits slab
        compiler_params=pltpu.CompilerParams(
            dimension_semantics=("parallel",),
            vmem_limit_bytes=48 * 1024 * 1024),
    )(px, ex, pe, hsum,
      params['w1a'], params['w2e'], params['w3a'], params['wstack'], params['bias'])

    return out[:B_, :NUM_CLASSES]


if __name__ == "__main__":
    params = make_params()
    dkey = jax.random.PRNGKey(0)
    k1, k2, k3, k4 = jax.random.split(dkey, 4)
    pixels = jax.random.normal(k1, (B, T, INPUT_DIM, S), jnp.float32)
    mask = (jax.random.uniform(k2, (B, T, S)) > 0.3).astype(jnp.float32)
    mask = mask.at[..., :2].set(1.0)          # guarantee >=2 valid pixels per set
    positions = jax.random.randint(k3, (B, T), 0, MAX_POS, dtype=jnp.int32)
    extra = jax.random.normal(k4, (B, T, EXTRA_SIZE), jnp.float32)
    gdd = jnp.zeros((B, T), jnp.float32)

    fwd = jax.jit(psetae_forward)
    logits = fwd(pixels, mask, positions, extra, gdd, params)
    logits = jax.block_until_ready(logits)
    assert logits.shape == (B, NUM_CLASSES)
    assert bool(jnp.all(jnp.isfinite(logits)))
    print("KERNEL_OK")
</pallas_src>

<mosaic_0001>
module attributes {stable_mosaic.version = 11 : i64} {
  func.func @kernel(%arg0: i32, %arg1: memref<1024x16xbf16, #tpu.memory_space<vmem>>, %arg2: memref<64x16xf32, #tpu.memory_space<vmem>>, %arg3: memref<64x128xf32, #tpu.memory_space<vmem>>, %arg4: memref<128x4xbf16, #tpu.memory_space<vmem>>, %arg5: memref<16x128xbf16, #tpu.memory_space<vmem>>, %arg6: memref<16x128xbf16, #tpu.memory_space<vmem>>, %arg7: memref<512x128xbf16, #tpu.memory_space<vmem>>, %arg8: memref<10x128x128xbf16, #tpu.memory_space<vmem>>, %arg9: memref<15x128xf32, #tpu.memory_space<vmem>>, %arg10: memref<8x128xf32, #tpu.memory_space<vmem>>) attributes {dimension_semantics = [#tpu.dimension_semantics<parallel>], iteration_bounds = array<i64: 2>, scalar_prefetch = 0 : i64, scratch_operands = 0 : i64, tpu.core_type = #tpu.core_type<tc>, window_params = [{transform_indices = @transform_0, window_bounds = array<i64: 1024, 16>}, {transform_indices = @transform_1, window_bounds = array<i64: 64, 16>}, {transform_indices = @transform_2, window_bounds = array<i64: 64, 128>}, {pipeline_mode = #tpu.pipeline_mode<synchronous>, transform_indices = @transform_3, window_bounds = array<i64: 128, 4>}, {pipeline_mode = #tpu.pipeline_mode<synchronous>, transform_indices = @transform_4, window_bounds = array<i64: 16, 128>}, {pipeline_mode = #tpu.pipeline_mode<synchronous>, transform_indices = @transform_5, window_bounds = array<i64: 16, 128>}, {pipeline_mode = #tpu.pipeline_mode<synchronous>, transform_indices = @transform_6, window_bounds = array<i64: 512, 128>}, {pipeline_mode = #tpu.pipeline_mode<synchronous>, transform_indices = @transform_7, window_bounds = array<i64: 10, 128, 128>}, {pipeline_mode = #tpu.pipeline_mode<synchronous>, transform_indices = @transform_8, window_bounds = array<i64: 15, 128>}, {transform_indices = @transform_9, window_bounds = array<i64: 8, 128>}]} {
    %c0 = arith.constant 0 : index
    %c0_0 = arith.constant 0 : index
    %0 = vector.load %arg9[%c0, %c0_0] : memref<15x128xf32, #tpu.memory_space<vmem>>, vector<15x128xf32>
    %c0_1 = arith.constant 0 : index
    %c0_2 = arith.constant 0 : index
    %1 = vector.load %arg1[%c0_1, %c0_2] : memref<1024x16xbf16, #tpu.memory_space<vmem>>, vector<1024x16xbf16>
    %2 = vector.extract_strided_slice %1 {offsets = [0, 15], sizes = [1024, 1], strides = [1, 1]} : vector<1024x16xbf16> to vector<1024x1xbf16>
    %3 = arith.extf %2 : vector<1024x1xbf16> to vector<1024x1xf32>
    %c0_3 = arith.constant 0 : index
    %c0_4 = arith.constant 0 : index
    %4 = vector.load %arg5[%c0_3, %c0_4] : memref<16x128xbf16, #tpu.memory_space<vmem>>, vector<16x128xbf16>
    %cst = arith.constant dense<0.000000e+00> : vector<1024x128xf32>
    %5 = tpu.matmul %1, %4, %cst {dimension_numbers = #tpu.dot_dimension_numbers<[1], [0], [0], [1], [0, 0, 1, 1], [], []>} : vector<1024x16xbf16>, vector<16x128xbf16>, vector<1024x128xf32> -> vector<1024x128xf32>
    %6 = vector.extract_strided_slice %0 {offsets = [0, 0], sizes = [1, 128], strides = [1, 1]} : vector<15x128xf32> to vector<1x128xf32>
    %7 = vector.broadcast %6 : vector<1x128xf32> to vector<1024x128xf32>
    %8 = arith.addf %5, %7 : vector<1024x128xf32>
    %cst_5 = arith.constant 0.000000e+00 : f32
    %9 = vector.broadcast %cst_5 : f32 to vector<1024x128xf32>
    %10 = arith.maximumf %8, %9 : vector<1024x128xf32>
    %11 = arith.truncf %10 : vector<1024x128xf32> to vector<1024x128xbf16>
    %c0_6 = arith.constant 0 : index
    %c0_7 = arith.constant 0 : index
    %c0_8 = arith.constant 0 : index
    %12 = vector.load %arg8[%c0_6, %c0_7, %c0_8] : memref<10x128x128xbf16, #tpu.memory_space<vmem>>, vector<1x128x128xbf16>
    %13 = vector.shape_cast %12 : vector<1x128x128xbf16> to vector<128x128xbf16>
    %cst_9 = arith.constant dense<0.000000e+00> : vector<1024x128xf32>
    %14 = tpu.matmul %11, %13, %cst_9 {dimension_numbers = #tpu.dot_dimension_numbers<[1], [0], [0], [1], [0, 0, 1, 1], [], []>} : vector<1024x128xbf16>, vector<128x128xbf16>, vector<1024x128xf32> -> vector<1024x128xf32>
    %15 = vector.extract_strided_slice %0 {offsets = [1, 0], sizes = [1, 128], strides = [1, 1]} : vector<15x128xf32> to vector<1x128xf32>
    %16 = vector.broadcast %15 : vector<1x128xf32> to vector<1024x128xf32>
    %17 = arith.addf %14, %16 : vector<1024x128xf32>
    %cst_10 = arith.constant 0.000000e+00 : f32
    %18 = vector.broadcast %cst_10 : f32 to vector<1024x128xf32>
    %19 = arith.maximumf %17, %18 : vector<1024x128xf32>
    %20 = vector.broadcast %3 : vector<1024x1xf32> to vector<1024x128xf32>
    %21 = arith.mulf %19, %20 : vector<1024x128xf32>
    %22 = vector.shape_cast %21 : vector<1024x128xf32> to vector<64x16x128xf32>
    %23 = vector.shape_cast %19 : vector<1024x128xf32> to vector<64x16x128xf32>
    %24 = vector.shape_cast %3 : vector<1024x1xf32> to vector<64x16x1xf32>
    %cst_11 = arith.constant dense<0.000000e+00> : vector<64x1xf32>
    %25 = vector.multi_reduction <add>, %24, %cst_11 [1] : vector<64x16x1xf32> to vector<64x1xf32>
    %cst_12 = arith.constant 1.000000e+00 : f32
    %26 = vector.broadcast %cst_12 : f32 to vector<64x1xf32>
    %27 = arith.maximumf %25, %26 : vector<64x1xf32>
    %28 = tpu.reciprocal %27 {approx = true} : vector<64x1xf32> -> vector<64x1xf32>
    %cst_13 = arith.constant dense<0.000000e+00> : vector<64x128xf32>
    %29 = vector.multi_reduction <add>, %22, %cst_13 [1] : vector<64x16x128xf32> to vector<64x128xf32>
    %30 = vector.broadcast %28 : vector<64x1xf32> to vector<64x128xf32>
    %31 = arith.mulf %29, %30 : vector<64x128xf32>
    %cst_14 = arith.constant dense<0.000000e+00> : vector<64x1xf32>
    %32 = vector.multi_reduction <add>, %24, %cst_14 [1] : vector<64x16x1xf32> to vector<64x1xf32>
    %33 = vector.shape_cast %32 : vector<64x1xf32> to vector<64x1x1xf32>
    %cst_15 = arith.constant 1.000000e+00 : f32
    %34 = vector.broadcast %cst_15 : f32 to vector<64x1x1xf32>
    %35 = arith.maximumf %33, %34 : vector<64x1x1xf32>
    %cst_16 = arith.constant dense<0.000000e+00> : vector<64x128xf32>
    %36 = vector.multi_reduction <add>, %22, %cst_16 [1] : vector<64x16x128xf32> to vector<64x128xf32>
    %37 = vector.shape_cast %36 : vector<64x128xf32> to vector<64x1x128xf32>
    %38 = tpu.reciprocal %35 {approx = true} : vector<64x1x1xf32> -> vector<64x1x1xf32>
    %39 = vector.broadcast %38 : vector<64x1x1xf32> to vector<64x1x128xf32>
    %40 = arith.mulf %37, %39 : vector<64x1x128xf32>
    %41 = vector.broadcast %40 : vector<64x1x128xf32> to vector<64x16x128xf32>
    %42 = arith.subf %23, %41 : vector<64x16x128xf32>
    %43 = vector.broadcast %24 : vector<64x16x1xf32> to vector<64x16x128xf32>
    %44 = arith.mulf %42, %43 : vector<64x16x128xf32>
    %45 = arith.mulf %44, %44 : vector<64x16x128xf32>
    %cst_17 = arith.constant dense<0.000000e+00> : vector<64x128xf32>
    %46 = vector.multi_reduction <add>, %45, %cst_17 [1] : vector<64x16x128xf32> to vector<64x128xf32>
    %cst_18 = arith.constant 1.000000e+00 : f32
    %47 = vector.broadcast %cst_18 : f32 to vector<64x1xf32>
    %48 = arith.subf %25, %47 : vector<64x1xf32>
    %cst_19 = arith.constant 1.000000e+00 : f32
    %49 = vector.broadcast %cst_19 : f32 to vector<64x1xf32>
    %50 = arith.maximumf %48, %49 : vector<64x1xf32>
    %51 = tpu.reciprocal %50 {approx = true} : vector<64x1xf32> -> vector<64x1xf32>
    %52 = vector.broadcast %51 : vector<64x1xf32> to vector<64x128xf32>
    %53 = arith.mulf %46, %52 : vector<64x128xf32>
    %cst_20 = arith.constant 9.99999979E-32 : f32
    %54 = vector.broadcast %cst_20 : f32 to vector<64x128xf32>
    %55 = arith.addf %53, %54 : vector<64x128xf32>
    %56 = math.sqrt %55 : vector<64x128xf32>
    %c0_21 = arith.constant 0 : index
    %c0_22 = arith.constant 0 : index
    %57 = vector.load %arg2[%c0_21, %c0_22] : memref<64x16xf32, #tpu.memory_space<vmem>>, vector<64x16xf32>
    %58 = arith.truncf %31 : vector<64x128xf32> to vector<64x128xbf16>
    %c1 = arith.constant 1 : index
    %c0_23 = arith.constant 0 : index
    %c0_24 = arith.constant 0 : index
    %59 = vector.load %arg8[%c1, %c0_23, %c0_24] : memref<10x128x128xbf16, #tpu.memory_space<vmem>>, vector<1x128x128xbf16>
    %60 = vector.shape_cast %59 : vector<1x128x128xbf16> to vector<128x128xbf16>
    %cst_25 = arith.constant dense<0.000000e+00> : vector<64x128xf32>
    %61 = tpu.matmul %58, %60, %cst_25 {dimension_numbers = #tpu.dot_dimension_numbers<[1], [0], [0], [1], [0, 0, 1, 1], [], []>} : vector<64x128xbf16>, vector<128x128xbf16>, vector<64x128xf32> -> vector<64x128xf32>
    %62 = arith.truncf %56 : vector<64x128xf32> to vector<64x128xbf16>
    %c2 = arith.constant 2 : index
    %c0_26 = arith.constant 0 : index
    %c0_27 = arith.constant 0 : index
    %63 = vector.load %arg8[%c2, %c0_26, %c0_27] : memref<10x128x128xbf16, #tpu.memory_space<vmem>>, vector<1x128x128xbf16>
    %64 = vector.shape_cast %63 : vector<1x128x128xbf16> to vector<128x128xbf16>
    %cst_28 = arith.constant dense<0.000000e+00> : vector<64x128xf32>
    %65 = tpu.matmul %62, %64, %cst_28 {dimension_numbers = #tpu.dot_dimension_numbers<[1], [0], [0], [1], [0, 0, 1, 1], [], []>} : vector<64x128xbf16>, vector<128x128xbf16>, vector<64x128xf32> -> vector<64x128xf32>
    %66 = arith.addf %61, %65 : vector<64x128xf32>
    %67 = arith.truncf %57 : vector<64x16xf32> to vector<64x16xbf16>
    %c0_29 = arith.constant 0 : index
    %c0_30 = arith.constant 0 : index
    %68 = vector.load %arg6[%c0_29, %c0_30] : memref<16x128xbf16, #tpu.memory_space<vmem>>, vector<16x128xbf16>
    %cst_31 = arith.constant dense<0.000000e+00> : vector<64x128xf32>
    %69 = tpu.matmul %67, %68, %cst_31 {dimension_numbers = #tpu.dot_dimension_numbers<[1], [0], [0], [1], [0, 0, 1, 1], [], []>} : vector<64x16xbf16>, vector<16x128xbf16>, vector<64x128xf32> -> vector<64x128xf32>
    %70 = arith.addf %66, %69 : vector<64x128xf32>
    %71 = vector.extract_strided_slice %0 {offsets = [2, 0], sizes = [1, 128], strides = [1, 1]} : vector<15x128xf32> to vector<1x128xf32>
    %72 = vector.broadcast %71 : vector<1x128xf32> to vector<64x128xf32>
    %73 = arith.addf %70, %72 : vector<64x128xf32>
    %cst_32 = arith.constant 0.000000e+00 : f32
    %74 = vector.broadcast %cst_32 : f32 to vector<64x128xf32>
    %75 = arith.maximumf %73, %74 : vector<64x128xf32>
    %cst_33 = arith.constant dense<0.000000e+00> : vector<64xf32>
    %76 = vector.multi_reduction <add>, %75, %cst_33 [1] : vector<64x128xf32> to vector<64xf32>
    %77 = vector.shape_cast %76 : vector<64xf32> to vector<64x1xf32>
    %cst_34 = arith.constant 1.280000e+02 : f32
    %78 = vector.broadcast %cst_34 : f32 to vector<64x1xf32>
    %79 = arith.divf %77, %78 : vector<64x1xf32>
    %80 = vector.broadcast %79 : vector<64x1xf32> to vector<64x128xf32>
    %81 = arith.subf %75, %80 : vector<64x128xf32>
    %82 = arith.mulf %81, %81 : vector<64x128xf32>
    %cst_35 = arith.constant dense<0.000000e+00> : vector<64xf32>
    %83 = vector.multi_reduction <add>, %82, %cst_35 [1] : vector<64x128xf32> to vector<64xf32>
    %84 = vector.shape_cast %83 : vector<64xf32> to vector<64x1xf32>
    %cst_36 = arith.constant 1.280000e+02 : f32
    %85 = vector.broadcast %cst_36 : f32 to vector<64x1xf32>
    %86 = arith.divf %84, %85 : vector<64x1xf32>
    %87 = vector.broadcast %79 : vector<64x1xf32> to vector<64x128xf32>
    %88 = arith.subf %75, %87 : vector<64x128xf32>
    %cst_37 = arith.constant 9.99999974E-6 : f32
    %89 = vector.broadcast %cst_37 : f32 to vector<64x1xf32>
    %90 = arith.addf %86, %89 : vector<64x1xf32>
    %91 = math.rsqrt %90 : vector<64x1xf32>
    %92 = vector.broadcast %91 : vector<64x1xf32> to vector<64x128xf32>
    %93 = arith.mulf %88, %92 : vector<64x128xf32>
    %94 = vector.extract_strided_slice %0 {offsets = [3, 0], sizes = [1, 128], strides = [1, 1]} : vector<15x128xf32> to vector<1x128xf32>
    %95 = vector.broadcast %94 : vector<1x128xf32> to vector<64x128xf32>
    %96 = arith.mulf %93, %95 : vector<64x128xf32>
    %97 = vector.extract_strided_slice %0 {offsets = [4, 0], sizes = [1, 128], strides = [1, 1]} : vector<15x128xf32> to vector<1x128xf32>
    %98 = vector.broadcast %97 : vector<1x128xf32> to vector<64x128xf32>
    %99 = arith.addf %96, %98 : vector<64x128xf32>
    %c0_38 = arith.constant 0 : index
    %c0_39 = arith.constant 0 : index
    %100 = vector.load %arg3[%c0_38, %c0_39] : memref<64x128xf32, #tpu.memory_space<vmem>>, vector<64x128xf32>
    %101 = arith.addf %99, %100 : vector<64x128xf32>
    %102 = arith.truncf %101 : vector<64x128xf32> to vector<64x128xbf16>
    %c3 = arith.constant 3 : index
    %c0_40 = arith.constant 0 : index
    %c0_41 = arith.constant 0 : index
    %103 = vector.load %arg8[%c3, %c0_40, %c0_41] : memref<10x128x128xbf16, #tpu.memory_space<vmem>>, vector<1x128x128xbf16>
    %104 = vector.shape_cast %103 : vector<1x128x128xbf16> to vector<128x128xbf16>
    %cst_42 = arith.constant dense<0.000000e+00> : vector<64x128xf32>
    %105 = tpu.matmul %102, %104, %cst_42 {dimension_numbers = #tpu.dot_dimension_numbers<[1], [0], [0], [1], [0, 0, 1, 1], [], []>} : vector<64x128xbf16>, vector<128x128xbf16>, vector<64x128xf32> -> vector<64x128xf32>
    %106 = vector.extract_strided_slice %0 {offsets = [5, 0], sizes = [1, 128], strides = [1, 1]} : vector<15x128xf32> to vector<1x128xf32>
    %107 = vector.broadcast %106 : vector<1x128xf32> to vector<64x128xf32>
    %108 = arith.addf %105, %107 : vector<64x128xf32>
    %c4 = arith.constant 4 : index
    %c0_43 = arith.constant 0 : index
    %c0_44 = arith.constant 0 : index
    %109 = vector.load %arg8[%c4, %c0_43, %c0_44] : memref<10x128x128xbf16, #tpu.memory_space<vmem>>, vector<1x128x128xbf16>
    %110 = vector.shape_cast %109 : vector<1x128x128xbf16> to vector<128x128xbf16>
    %cst_45 = arith.constant dense<0.000000e+00> : vector<64x128xf32>
    %111 = tpu.matmul %102, %110, %cst_45 {dimension_numbers = #tpu.dot_dimension_numbers<[1], [0], [0], [1], [0, 0, 1, 1], [], []>} : vector<64x128xbf16>, vector<128x128xbf16>, vector<64x128xf32> -> vector<64x128xf32>
    %112 = vector.extract_strided_slice %0 {offsets = [6, 0], sizes = [1, 128], strides = [1, 1]} : vector<15x128xf32> to vector<1x128xf32>
    %113 = vector.broadcast %112 : vector<1x128xf32> to vector<64x128xf32>
    %114 = arith.addf %111, %113 : vector<64x128xf32>
    %115 = arith.truncf %108 : vector<64x128xf32> to vector<64x128xbf16>
    %c5 = arith.constant 5 : index
    %c0_46 = arith.constant 0 : index
    %c0_47 = arith.constant 0 : index
    %116 = vector.load %arg8[%c5, %c0_46, %c0_47] : memref<10x128x128xbf16, #tpu.memory_space<vmem>>, vector<1x128x128xbf16>
    %117 = vector.shape_cast %116 : vector<1x128x128xbf16> to vector<128x128xbf16>
    %cst_48 = arith.constant dense<0.000000e+00> : vector<64x128xf32>
    %118 = tpu.matmul %115, %117, %cst_48 {dimension_numbers = #tpu.dot_dimension_numbers<[1], [0], [0], [1], [0, 0, 1, 1], [], []>} : vector<64x128xbf16>, vector<128x128xbf16>, vector<64x128xf32> -> vector<64x128xf32>
    %119 = vector.extract_strided_slice %0 {offsets = [7, 0], sizes = [1, 128], strides = [1, 1]} : vector<15x128xf32> to vector<1x128xf32>
    %120 = vector.broadcast %119 : vector<1x128xf32> to vector<64x128xf32>
    %121 = arith.addf %118, %120 : vector<64x128xf32>
    %122 = vector.shape_cast %121 : vector<64x128xf32> to vector<8x8x128xf32>
    %cst_49 = arith.constant dense<0.000000e+00> : vector<8x128xf32>
    %123 = vector.multi_reduction <add>, %122, %cst_49 [1] : vector<8x8x128xf32> to vector<8x128xf32>
    %124 = vector.shape_cast %123 : vector<8x128xf32> to vector<8x1x128xf32>
    %cst_50 = arith.constant 1.250000e-01 : f32
    %125 = vector.broadcast %cst_50 : f32 to vector<8x1x128xf32>
    %126 = arith.mulf %124, %125 : vector<8x1x128xf32>
    %127 = vector.shape_cast %114 : vector<64x128xf32> to vector<8x8x128xf32>
    %128 = vector.broadcast %126 : vector<8x1x128xf32> to vector<8x8x128xf32>
    %129 = arith.mulf %127, %128 : vector<8x8x128xf32>
    %130 = vector.shape_cast %129 : vector<8x8x128xf32> to vector<64x128xf32>
    %131 = arith.truncf %130 : vector<64x128xf32> to vector<64x128xbf16>
    %c0_51 = arith.constant 0 : index
    %c0_52 = arith.constant 0 : index
    %132 = vector.load %arg4[%c0_51, %c0_52] : memref<128x4xbf16, #tpu.memory_space<vmem>>, vector<128x4xbf16>
    %cst_53 = arith.constant dense<0.000000e+00> : vector<64x4xf32>
    %133 = tpu.matmul %131, %132, %cst_53 {dimension_numbers = #tpu.dot_dimension_numbers<[1], [0], [0], [1], [0, 0, 1, 1], [], []>} : vector<64x128xbf16>, vector<128x4xbf16>, vector<64x4xf32> -> vector<64x4xf32>
    %cst_54 = arith.constant 0.176776692 : f32
    %134 = vector.broadcast %cst_54 : f32 to vector<64x4xf32>
    %135 = arith.mulf %133, %134 : vector<64x4xf32>
    %136 = vector.shape_cast %135 : vector<64x4xf32> to vector<8x8x4xf32>
    %cst_55 = arith.constant dense<0xFF800000> : vector<8x4xf32>
    %137 = vector.multi_reduction <maximumf>, %136, %cst_55 [1] : vector<8x8x4xf32> to vector<8x4xf32>
    %138 = vector.shape_cast %137 : vector<8x4xf32> to vector<8x1x4xf32>
    %139 = vector.broadcast %138 : vector<8x1x4xf32> to vector<8x8x4xf32>
    %140 = arith.subf %136, %139 : vector<8x8x4xf32>
    %141 = math.exp %140 : vector<8x8x4xf32>
    %cst_56 = arith.constant dense<0.000000e+00> : vector<8x4xf32>
    %142 = vector.multi_reduction <add>, %141, %cst_56 [1] : vector<8x8x4xf32> to vector<8x4xf32>
    %143 = vector.shape_cast %142 : vector<8x4xf32> to vector<8x1x4xf32>
    %144 = tpu.reciprocal %143 {approx = true} : vector<8x1x4xf32> -> vector<8x1x4xf32>
    %145 = vector.broadcast %144 : vector<8x1x4xf32> to vector<8x8x4xf32>
    %146 = arith.mulf %141, %145 : vector<8x8x4xf32>
    %147 = vector.shape_cast %146 : vector<8x8x4xf32> to vector<64x4xf32>
    %148 = arith.truncf %147 : vector<64x4xf32> to vector<64x4xbf16>
    %149 = vector.extract_strided_slice %148 {offsets = [0, 0], sizes = [64, 1], strides = [1, 1]} : vector<64x4xbf16> to vector<64x1xbf16>
    %150 = vector.broadcast %149 : vector<64x1xbf16> to vector<64x128xbf16>
    %151 = arith.mulf %150, %102 : vector<64x128xbf16>
    %152 = vector.extract_strided_slice %148 {offsets = [0, 1], sizes = [64, 1], strides = [1, 1]} : vector<64x4xbf16> to vector<64x1xbf16>
    %153 = vector.broadcast %152 : vector<64x1xbf16> to vector<64x128xbf16>
    %154 = arith.mulf %153, %102 : vector<64x128xbf16>
    %155 = vector.extract_strided_slice %148 {offsets = [0, 2], sizes = [64, 1], strides = [1, 1]} : vector<64x4xbf16> to vector<64x1xbf16>
    %156 = vector.broadcast %155 : vector<64x1xbf16> to vector<64x128xbf16>
    %157 = arith.mulf %156, %102 : vector<64x128xbf16>
    %158 = vector.extract_strided_slice %148 {offsets = [0, 3], sizes = [64, 1], strides = [1, 1]} : vector<64x4xbf16> to vector<64x1xbf16>
    %159 = vector.broadcast %158 : vector<64x1xbf16> to vector<64x128xbf16>
    %160 = arith.mulf %159, %102 : vector<64x128xbf16>
    %161 = tpu.concatenate %151, %154, %157, %160 in 1 : vector<64x128xbf16>, vector<64x128xbf16>, vector<64x128xbf16>, vector<64x128xbf16> -> vector<64x512xbf16>
    %c0_57 = arith.constant 0 : index
    %c0_58 = arith.constant 0 : index
    %162 = vector.load %arg7[%c0_57, %c0_58] : memref<512x128xbf16, #tpu.memory_space<vmem>>, vector<512x128xbf16>
    %cst_59 = arith.constant dense<0.000000e+00> : vector<64x128xf32>
    %163 = tpu.matmul %161, %162, %cst_59 {dimension_numbers = #tpu.dot_dimension_numbers<[1], [0], [0], [1], [0, 0, 1, 1], [], []>} : vector<64x512xbf16>, vector<512x128xbf16>, vector<64x128xf32> -> vector<64x128xf32>
    %164 = vector.shape_cast %163 : vector<64x128xf32> to vector<8x8x128xf32>
    %cst_60 = arith.constant dense<0.000000e+00> : vector<8x128xf32>
    %165 = vector.multi_reduction <add>, %164, %cst_60 [1] : vector<8x8x128xf32> to vector<8x128xf32>
    %166 = vector.extract_strided_slice %0 {offsets = [8, 0], sizes = [1, 128], strides = [1, 1]} : vector<15x128xf32> to vector<1x128xf32>
    %167 = vector.broadcast %166 : vector<1x128xf32> to vector<8x128xf32>
    %168 = arith.addf %165, %167 : vector<8x128xf32>
    %cst_61 = arith.constant 0.000000e+00 : f32
    %169 = vector.broadcast %cst_61 : f32 to vector<8x128xf32>
    %170 = arith.maximumf %168, %169 : vector<8x128xf32>
    %171 = arith.truncf %170 : vector<8x128xf32> to vector<8x128xbf16>
    %c6 = arith.constant 6 : index
    %c0_62 = arith.constant 0 : index
    %c0_63 = arith.constant 0 : index
    %172 = vector.load %arg8[%c6, %c0_62, %c0_63] : memref<10x128x128xbf16, #tpu.memory_space<vmem>>, vector<1x128x128xbf16>
    %173 = vector.shape_cast %172 : vector<1x128x128xbf16> to vector<128x128xbf16>
    %cst_64 = arith.constant dense<0.000000e+00> : vector<8x128xf32>
    %174 = tpu.matmul %171, %173, %cst_64 {dimension_numbers = #tpu.dot_dimension_numbers<[1], [0], [0], [1], [0, 0, 1, 1], [], []>} : vector<8x128xbf16>, vector<128x128xbf16>, vector<8x128xf32> -> vector<8x128xf32>
    %175 = vector.extract_strided_slice %0 {offsets = [9, 0], sizes = [1, 128], strides = [1, 1]} : vector<15x128xf32> to vector<1x128xf32>
    %176 = vector.broadcast %175 : vector<1x128xf32> to vector<8x128xf32>
    %177 = arith.addf %174, %176 : vector<8x128xf32>
    %cst_65 = arith.constant 0.000000e+00 : f32
    %178 = vector.broadcast %cst_65 : f32 to vector<8x128xf32>
    %179 = arith.maximumf %177, %178 : vector<8x128xf32>
    %cst_66 = arith.constant dense<0.000000e+00> : vector<8xf32>
    %180 = vector.multi_reduction <add>, %179, %cst_66 [1] : vector<8x128xf32> to vector<8xf32>
    %181 = vector.shape_cast %180 : vector<8xf32> to vector<8x1xf32>
    %cst_67 = arith.constant 1.280000e+02 : f32
    %182 = vector.broadcast %cst_67 : f32 to vector<8x1xf32>
    %183 = arith.divf %181, %182 : vector<8x1xf32>
    %184 = vector.broadcast %183 : vector<8x1xf32> to vector<8x128xf32>
    %185 = arith.subf %179, %184 : vector<8x128xf32>
    %186 = arith.mulf %185, %185 : vector<8x128xf32>
    %cst_68 = arith.constant dense<0.000000e+00> : vector<8xf32>
    %187 = vector.multi_reduction <add>, %186, %cst_68 [1] : vector<8x128xf32> to vector<8xf32>
    %188 = vector.shape_cast %187 : vector<8xf32> to vector<8x1xf32>
    %cst_69 = arith.constant 1.280000e+02 : f32
    %189 = vector.broadcast %cst_69 : f32 to vector<8x1xf32>
    %190 = arith.divf %188, %189 : vector<8x1xf32>
    %191 = vector.broadcast %183 : vector<8x1xf32> to vector<8x128xf32>
    %192 = arith.subf %179, %191 : vector<8x128xf32>
    %cst_70 = arith.constant 9.99999974E-6 : f32
    %193 = vector.broadcast %cst_70 : f32 to vector<8x1xf32>
    %194 = arith.addf %190, %193 : vector<8x1xf32>
    %195 = math.rsqrt %194 : vector<8x1xf32>
    %196 = vector.broadcast %195 : vector<8x1xf32> to vector<8x128xf32>
    %197 = arith.mulf %192, %196 : vector<8x128xf32>
    %198 = vector.extract_strided_slice %0 {offsets = [10, 0], sizes = [1, 128], strides = [1, 1]} : vector<15x128xf32> to vector<1x128xf32>
    %199 = vector.broadcast %198 : vector<1x128xf32> to vector<8x128xf32>
    %200 = arith.mulf %197, %199 : vector<8x128xf32>
    %201 = vector.extract_strided_slice %0 {offsets = [11, 0], sizes = [1, 128], strides = [1, 1]} : vector<15x128xf32> to vector<1x128xf32>
    %202 = vector.broadcast %201 : vector<1x128xf32> to vector<8x128xf32>
    %203 = arith.addf %200, %202 : vector<8x128xf32>
    %204 = arith.truncf %203 : vector<8x128xf32> to vector<8x128xbf16>
    %c7 = arith.constant 7 : index
    %c0_71 = arith.constant 0 : index
    %c0_72 = arith.constant 0 : index
    %205 = vector.load %arg8[%c7, %c0_71, %c0_72] : memref<10x128x128xbf16, #tpu.memory_space<vmem>>, vector<1x128x128xbf16>
    %206 = vector.shape_cast %205 : vector<1x128x128xbf16> to vector<128x128xbf16>
    %cst_73 = arith.constant dense<0.000000e+00> : vector<8x128xf32>
    %207 = tpu.matmul %204, %206, %cst_73 {dimension_numbers = #tpu.dot_dimension_numbers<[1], [0], [0], [1], [0, 0, 1, 1], [], []>} : vector<8x128xbf16>, vector<128x128xbf16>, vector<8x128xf32> -> vector<8x128xf32>
    %208 = vector.extract_strided_slice %0 {offsets = [12, 0], sizes = [1, 128], strides = [1, 1]} : vector<15x128xf32> to vector<1x128xf32>
    %209 = vector.broadcast %208 : vector<1x128xf32> to vector<8x128xf32>
    %210 = arith.addf %207, %209 : vector<8x128xf32>
    %cst_74 = arith.constant 0.000000e+00 : f32
    %211 = vector.broadcast %cst_74 : f32 to vector<8x128xf32>
    %212 = arith.maximumf %210, %211 : vector<8x128xf32>
    %213 = arith.truncf %212 : vector<8x128xf32> to vector<8x128xbf16>
    %c8 = arith.constant 8 : index
    %c0_75 = arith.constant 0 : index
    %c0_76 = arith.constant 0 : index
    %214 = vector.load %arg8[%c8, %c0_75, %c0_76] : memref<10x128x128xbf16, #tpu.memory_space<vmem>>, vector<1x128x128xbf16>
    %215 = vector.shape_cast %214 : vector<1x128x128xbf16> to vector<128x128xbf16>
    %cst_77 = arith.constant dense<0.000000e+00> : vector<8x128xf32>
    %216 = tpu.matmul %213, %215, %cst_77 {dimension_numbers = #tpu.dot_dimension_numbers<[1], [0], [0], [1], [0, 0, 1, 1], [], []>} : vector<8x128xbf16>, vector<128x128xbf16>, vector<8x128xf32> -> vector<8x128xf32>
    %217 = vector.extract_strided_slice %0 {offsets = [13, 0], sizes = [1, 128], strides = [1, 1]} : vector<15x128xf32> to vector<1x128xf32>
    %218 = vector.broadcast %217 : vector<1x128xf32> to vector<8x128xf32>
    %219 = arith.addf %216, %218 : vector<8x128xf32>
    %cst_78 = arith.constant 0.000000e+00 : f32
    %220 = vector.broadcast %cst_78 : f32 to vector<8x128xf32>
    %221 = arith.maximumf %219, %220 : vector<8x128xf32>
    %222 = arith.truncf %221 : vector<8x128xf32> to vector<8x128xbf16>
    %c9 = arith.constant 9 : index
    %c0_79 = arith.constant 0 : index
    %c0_80 = arith.constant 0 : index
    %223 = vector.load %arg8[%c9, %c0_79, %c0_80] : memref<10x128x128xbf16, #tpu.memory_space<vmem>>, vector<1x128x128xbf16>
    %224 = vector.shape_cast %223 : vector<1x128x128xbf16> to vector<128x128xbf16>
    %cst_81 = arith.constant dense<0.000000e+00> : vector<8x128xf32>
    %225 = tpu.matmul %222, %224, %cst_81 {dimension_numbers = #tpu.dot_dimension_numbers<[1], [0], [0], [1], [0, 0, 1, 1], [], []>} : vector<8x128xbf16>, vector<128x128xbf16>, vector<8x128xf32> -> vector<8x128xf32>
    %226 = vector.extract_strided_slice %0 {offsets = [14, 0], sizes = [1, 128], strides = [1, 1]} : vector<15x128xf32> to vector<1x128xf32>
    %227 = vector.broadcast %226 : vector<1x128xf32> to vector<8x128xf32>
    %228 = arith.addf %225, %227 : vector<8x128xf32>
    %c0_82 = arith.constant 0 : index
    %c0_83 = arith.constant 0 : index
    %229 = vector.load %arg10[%c0_82, %c0_83] : memref<8x128xf32, #tpu.memory_space<vmem>>, vector<8x128xf32>
    tpu.vector_store %arg10[%c0_82, %c0_83], %228 {strides = array<i32>} : memref<8x128xf32, #tpu.memory_space<vmem>>, vector<8x128xf32>,
    return
  }
  func.func @transform_0(%arg0: i32) -> (i32, i32) {
    %c0_i32 = arith.constant 0 : i32
    %c0_i32_0 = arith.constant 0 : i32
    return %arg0, %c0_i32 : i32, i32
  }
  func.func @transform_1(%arg0: i32) -> (i32, i32) {
    %c0_i32 = arith.constant 0 : i32
    %c0_i32_0 = arith.constant 0 : i32
    return %arg0, %c0_i32 : i32, i32
  }
  func.func @transform_2(%arg0: i32) -> (i32, i32) {
    %c0_i32 = arith.constant 0 : i32
    %c0_i32_0 = arith.constant 0 : i32
    return %arg0, %c0_i32 : i32, i32
  }
  func.func @transform_3(%arg0: i32) -> (i32, i32) {
    %c0_i32 = arith.constant 0 : i32
    %c0_i32_0 = arith.constant 0 : i32
    %c0_i32_1 = arith.constant 0 : i32
    return %c0_i32, %c0_i32_0 : i32, i32
  }
  func.func @transform_4(%arg0: i32) -> (i32, i32) {
    %c0_i32 = arith.constant 0 : i32
    %c0_i32_0 = arith.constant 0 : i32
    %c0_i32_1 = arith.constant 0 : i32
    return %c0_i32, %c0_i32_0 : i32, i32
  }
  func.func @transform_5(%arg0: i32) -> (i32, i32) {
    %c0_i32 = arith.constant 0 : i32
    %c0_i32_0 = arith.constant 0 : i32
    %c0_i32_1 = arith.constant 0 : i32
    return %c0_i32, %c0_i32_0 : i32, i32
  }
  func.func @transform_6(%arg0: i32) -> (i32, i32) {
    %c0_i32 = arith.constant 0 : i32
    %c0_i32_0 = arith.constant 0 : i32
    %c0_i32_1 = arith.constant 0 : i32
    return %c0_i32, %c0_i32_0 : i32, i32
  }
  func.func @transform_7(%arg0: i32) -> (i32, i32, i32) {
    %c0_i32 = arith.constant 0 : i32
    %c0_i32_0 = arith.constant 0 : i32
    %c0_i32_1 = arith.constant 0 : i32
    %c0_i32_2 = arith.constant 0 : i32
    return %c0_i32, %c0_i32_0, %c0_i32_1 : i32, i32, i32
  }
  func.func @transform_8(%arg0: i32) -> (i32, i32) {
    %c0_i32 = arith.constant 0 : i32
    %c0_i32_0 = arith.constant 0 : i32
    %c0_i32_1 = arith.constant 0 : i32
    return %c0_i32, %c0_i32_0 : i32, i32
  }
  func.func @transform_9(%arg0: i32) -> (i32, i32) {
    %c0_i32 = arith.constant 0 : i32
    %c0_i32_0 = arith.constant 0 : i32
    return %arg0, %c0_i32 : i32, i32
  }
}

</mosaic_0001>

<bundles_post_ra>
// kernel: psetae_forward.1
= control target key start
LH: loop header
LB: loop body
LE: loop exit
PB: predicated region body
PF: predicated region fallthrough
CT: control target
= control target key end

     0   :  { %s12232_s30 = smov 0   ;;  %s18718_s0 = inlined_call_operand.vmem [shape: bf16[2048,16], index: 0, kind: input, shape index: {}]   ;;  %s18719_s1 = inlined_call_operand.vmem [shape: f32[128,16], index: 1, kind: input, shape index: {}]   ;;  %s18720_s2 = inlined_call_operand.vmem [shape: f32[128,128], index: 2, kind: input, shape index: {}]   ;;  %s18721_s3 = inlined_call_operand.vmem [shape: bf16[128,4], index: 3, kind: input, shape index: {}]   ;;  %s18722_s4 = inlined_call_operand.vmem [shape: bf16[16,128], index: 4, kind: input, shape index: {}]   ;;  %s18723_s5 = inlined_call_operand.vmem [shape: bf16[16,128], index: 5, kind: input, shape index: {}]   ;;  %s18724_s6 = inlined_call_operand.vmem [shape: bf16[512,128], index: 6, kind: input, shape index: {}]   ;;  %s18725_s7 = inlined_call_operand.vmem [shape: bf16[10,128,128], index: 7, kind: input, shape index: {}]   ;;  %s18726_s8 = inlined_call_operand.vmem [shape: f32[15,128], index: 8, kind: input, shape index: {}]   ;;  %s18727_s9 = inlined_call_operand.vmem [shape: f32[16,128], index: 9, kind: output, shape index: {}]  }
   0x1 LB: > { %s12238_s10 = sadd.s32 4294967295, %s12173_s30   ;;  %p9792_p0 = scmp.ge.s32.totalorder %s12173_s30, 1  ;;  %s12173_s30 = sphi %s12232_s30, %s19_s30  }
   0x2   : > { %p310_p1 = scmp.lt.s32.totalorder %s12173_s30, 3 }
   0x4   : > { %p311_p2 = pnand %p9792_p0, %p310_p1 }
   0x6   : > { %314 = sbr.rel (%p311_p2) target bundleno = 4193 (0x1061), region = 56 }
   0xd   : > { %v11469_v0 = vld [vmem:[%s18722_s4] sm:$0xff]   ;;  %s9793_s13 = sshll.u32 %s12238_s10, 7  ;;  %v12175_v1 = vmov 15   ;;  %vm19098_vm0 = vcmask 130048   ;;  %vm3407_vm1 = vcmask 130168   ;;  %vm7162_vm2 = vcmask 1041409  }
   0xe   : > { %p356_p3 = scmp.lt.s32.totalorder %s9793_s13, 255  ;;  %10594 = vmatprep.subr.bf16.mxu0 %v11469_v0  ;;  %11144 = vset.pattern.permute.xlu1 %v12175_v1  ;;  %vm7164_vm3 = vcmask 1042434   ;;  %vm7166_vm4 = vcmask 1043459   ;;  %vm7168_vm5 = vcmask 1044484   ;;  %s9795_s15 = sshll.u32 %s12238_s10, 3 }
   0xf   : > { %10595 = vmatpush3.bf16.msra.mxu0 %v11469_v0  ;;  %11133 = vset.pattern.permute.xlu0 %v12175_v1  ;;  %p18024_p4 = scmp.lt.s32.totalorder %s9795_s15, 15  ;;  %p373_p5 = scmp.lt.s32.totalorder %s12238_s10, 1 }
  0x10   : > { %s20408_s13 = smov (!%p356_p3, %s9793_s13), 255 }
  0x11   : > { %s9794_s14 = sshll.u32 %s20408_s13, 2  ;;  %s20410_s15 = smov (!%p18024_p4, %s9795_s15), 15 }
  0x12   : > { %s12249_s17 = scalar_lea.vmem %s18718_s0, %s9794_s14  ;;  %s20412_s10 = smov (!%p373_p5, %s12238_s10), 1 }
  0x13   : > { %v380_v2 = vld [vmem:[%s12249_s17] sm:$0xff]   ;;  %v382_v3 = vld [vmem:[%s12249_s17 + $0x8] sm:$0xff]   ;;  %v384_v19 = vld [vmem:[%s12249_s17 + $0x10] sm:$0xff]   ;;  %s9799_s16 = sshll.u32 %s20412_s10, 3 }
  0x14   : > { %v12254_v4 = vld [vmem:[%s12249_s17 + $0x40] sm:$0xff]   ;;  %v12259_v7 = vld [vmem:[%s12249_s17 + $0x48] sm:$0xff]   ;;  %v508_v8 = vunpack.c.l.bf16 %v380_v2  ;;  %v509_v9 = vunpack.c.h.bf16 %v380_v2  ;;  %10596 = vmatprep.mubr.msk.bf16.mxu0 %vm19098_vm0, %v380_v2  ;;  %v12273_v20 = vld [vmem:[%s12249_s17 + $0x50] sm:$0xff]   ;;  %v510_v27 = vunpack.c.l.bf16 %v382_v3  ;;  %v511_v28 = vunpack.c.h.bf16 %v382_v3 }
  0x15   : > { %v524_v5 = vunpack.c.l.bf16 %v12254_v4  ;;  %v525_v6 = vunpack.c.h.bf16 %v12254_v4  ;;  %v526_v10 = vunpack.c.l.bf16 %v12259_v7  ;;  %v527_v14 = vunpack.c.h.bf16 %v12259_v7  ;;  %10597 = vmatmul.mubr.msk.bf16.vlgmr.msra.gmra.mrb[0].mxu0 %vm19098_vm0, %v382_v3  ;;  %v12280_v25 = vld [vmem:[%s12249_s17 + $0x18] sm:$0xff]   ;;  %v414_v41 = vld [vmem:[%s12249_s17 + $0x88] sm:$0xff]   ;;  %v412_v50 = vld [vmem:[%s12249_s17 + $0x80] sm:$0xff]  }
  0x16   : > { %v3409_v16 = vsel %vm3407_vm1, %v509_v9, 0.0  ;;  %v11134_v17 = vpack.i.bf16 %v509_v9, %v508_v8  ;;  %v3408_v18 = vsel %vm3407_vm1, %v508_v8, 0.0  ;;  %v528_v29 = vunpack.c.l.bf16 %v12273_v20  ;;  %10600 = vmatprep.mubr.msk.bf16.mxu0 %vm19098_vm0, %v384_v19  ;;  %v12308_v55 = vld [vmem:[%s12249_s17 + $0x20] sm:$0xff]   ;;  %v12312_v58 = vld [vmem:[%s12249_s17 + $0x28] sm:$0xff]   ;;  %v12324_v2 = vld [vmem:[%s12249_s17 + $0x58] sm:$0xff]  }
  0x17   : > { %v3481_v11 = vsel %vm3407_vm1, %v525_v6, 0.0  ;;  %v11145_v12 = vpack.i.bf16 %v525_v6, %v524_v5  ;;  %v3480_v13 = vsel %vm3407_vm1, %v524_v5, 0.0  ;;  %v12275_v21 = vadd.f32 %v3409_v16, %v3408_v18  ;;  %v430_v60 = vld [vmem:[%s12249_s17 + $0xc8] sm:$0xff]   ;;  %v428_v62 = vld [vmem:[%s12249_s17 + $0xc0] sm:$0xff]  }
  0x18   : > { %v12267_v15 = vadd.f32 %v3481_v11, %v3480_v13  ;;  %v3490_v22 = vsel %vm3407_vm1, %v527_v14, 0.0  ;;  %v11150_v23 = vpack.i.bf16 %v527_v14, %v526_v10  ;;  %v3489_v24 = vsel %vm3407_vm1, %v526_v10, 0.0  ;;  %11135 = vperm.xlu0 %11133, %v11134_v17  }
  0x19   : > { %11146 = vperm.xlu1 %11144, %v11145_v12   ;;  %v12282_v26 = vadd.f32 %v3490_v22, %v3489_v24  ;;  %v3418_v30 = vsel %vm3407_vm1, %v511_v28, 0.0  ;;  %v11139_v31 = vpack.i.bf16 %v511_v28, %v510_v27  ;;  %v3417_v32 = vsel %vm3407_vm1, %v510_v27, 0.0  ;;  %v12343_v27 = vld [vmem:[%s12249_s17 + $0x30] sm:$0xff]  }
  0x1a   : > { %v529_v33 = vunpack.c.h.bf16 %v12273_v20  ;;  %v3498_v34 = vsel %vm3407_vm1, %v528_v29, 0.0  ;;  %v12290_v35 = vadd.f32 %v3418_v30, %v3417_v32  ;;  %v512_v36 = vunpack.c.l.bf16 %v384_v19  ;;  %v432_v32 = vld [vmem:[%s12249_s17 + $0xd0] sm:$0xff]  }
  0x1b   : > { %v513_v39 = vunpack.c.h.bf16 %v384_v19  ;;  %v542_v46 = vunpack.c.l.bf16 %v414_v41  ;;  %v543_v47 = vunpack.c.h.bf16 %v414_v41  ;;  %v540_v53 = vunpack.c.l.bf16 %v412_v50 }
  0x1c   : > { %11140 = vperm.xlu0 %11133, %v11139_v31   ;;  %v3499_v37 = vsel %vm3407_vm1, %v529_v33, 0.0  ;;  %v11160_v38 = vpack.i.bf16 %v529_v33, %v528_v29  ;;  %v3426_v44 = vsel %vm3407_vm1, %v512_v36, 0.0  ;;  %v541_v54 = vunpack.c.h.bf16 %v412_v50  ;;  %v12347_v29 = vld [vmem:[%s12249_s17 + $0x38] sm:$0xff]  }
  0x1d   : > { %11151 = vperm.xlu1 %11144, %v11150_v23   ;;  %10601 = vmatmul.mubr.msk.bf16.gmra.mrb[4].mxu0 %vm19098_vm0, %v12280_v25  ;;  %v12295_v40 = vadd.f32 %v3499_v37, %v3498_v34  ;;  %v3427_v42 = vsel %vm3407_vm1, %v513_v39, 0.0  ;;  %v11155_v43 = vpack.i.bf16 %v513_v39, %v512_v36  ;;  %v11170_v48 = vpack.i.bf16 %v543_v47, %v542_v46 }
  0x1e   : > { %v12300_v45 = vadd.f32 %v3427_v42, %v3426_v44  ;;  %v3562_v49 = vsel %vm3407_vm1, %v543_v47, 0.0  ;;  %v3561_v51 = vsel %vm3407_vm1, %v542_v46, 0.0  ;;  %v3553_v56 = vsel %vm3407_vm1, %v541_v54, 0.0  ;;  %10604 = vmatprep.mubr.msk.bf16.mxu0 %vm19098_vm0, %v12308_v55  ;;  %v12370_v46 = vld [vmem:[%s12249_s17 + $0x60] sm:$0xff]  }
  0x1f   : > { %v12305_v52 = vadd.f32 %v3562_v49, %v3561_v51  ;;  %v11165_v57 = vpack.i.bf16 %v541_v54, %v540_v53  ;;  %v3552_v59 = vsel %vm3407_vm1, %v540_v53, 0.0  ;;  %v558_v63 = vunpack.c.l.bf16 %v430_v60 }
  0x20   : > { %11156 = vperm.xlu0 %11133, %v11155_v43   ;;  %v12316_v61 = vadd.f32 %v3553_v56, %v3552_v59  ;;  %v559_v0 = vunpack.c.h.bf16 %v430_v60  ;;  %v556_v1 = vunpack.c.l.bf16 %v428_v62  ;;  %v557_v9 = vunpack.c.h.bf16 %v428_v62 }
  0x21   : > { %11161 = vperm.xlu1 %11144, %v11160_v38   ;;  %v3633_v6 = vsel %vm3407_vm1, %v558_v63, 0.0  ;;  %v530_v11 = vunpack.c.l.bf16 %v12324_v2  ;;  %v531_v12 = vunpack.c.h.bf16 %v12324_v2  ;;  %v514_v23 = vunpack.c.l.bf16 %v12280_v25 }
  0x22   : > { %v3634_v3 = vsel %vm3407_vm1, %v559_v0, 0.0  ;;  %v11180_v5 = vpack.i.bf16 %v559_v0, %v558_v63  ;;  %v3624_v10 = vsel %vm3407_vm1, %v556_v1, 0.0  ;;  %v3625_v13 = vsel %vm3407_vm1, %v557_v9, 0.0  ;;  %v434_v63 = vld [vmem:[%s12249_s17 + $0xd8] sm:$0xff]  }
  0x23   : > { %v12328_v8 = vadd.f32 %v3634_v3, %v3633_v6  ;;  %v11175_v14 = vpack.i.bf16 %v557_v9, %v556_v1  ;;  %v12334_v16 = vadd.f32 %v3625_v13, %v3624_v10  ;;  %v3508_v17 = vsel %vm3407_vm1, %v531_v12, 0.0  ;;  %v12390_v6 = vld [vmem:[%s12249_s17 + $0x98] sm:$0xff]  }
  0x24   : > { %11166 = vperm.xlu0 %11133, %v11165_v57   ;;  %v11190_v18 = vpack.i.bf16 %v531_v12, %v530_v11  ;;  %v3507_v19 = vsel %vm3407_vm1, %v530_v11, 0.0  ;;  %v515_v24 = vunpack.c.h.bf16 %v12280_v25  ;;  %v3435_v28 = vsel %vm3407_vm1, %v514_v23, 0.0  ;;  %v12358_v25 = vld [vmem:[%s12249_s17 + $0x90] sm:$0xff]  }
  0x25   : > { %11171 = vperm.xlu1 %11144, %v11170_v48   ;;  %10605 = vmatmul.mubr.msk.bf16.gmra.mrb[8].mxu0 %vm19098_vm0, %v12312_v58  ;;  %v12338_v22 = vadd.f32 %v3508_v17, %v3507_v19  ;;  %v560_v34 = vunpack.c.l.bf16 %v432_v32  ;;  %v561_v36 = vunpack.c.h.bf16 %v432_v32  ;;  %v544_v42 = vunpack.c.l.bf16 %v12358_v25 }
  0x26   : > { %v3436_v30 = vsel %vm3407_vm1, %v515_v24, 0.0  ;;  %v11185_v31 = vpack.i.bf16 %v515_v24, %v514_v23  ;;  %10608 = vmatprep.mubr.msk.bf16.mxu0 %vm19098_vm0, %v12343_v27  ;;  %v545_v43 = vunpack.c.h.bf16 %v12358_v25  ;;  %v533_v50 = vunpack.c.h.bf16 %v12370_v46 }
  0x27   : > { %v12351_v33 = vadd.f32 %v3436_v30, %v3435_v28  ;;  %v3643_v37 = vsel %vm3407_vm1, %v561_v36, 0.0  ;;  %v11200_v38 = vpack.i.bf16 %v561_v36, %v560_v34  ;;  %v3642_v39 = vsel %vm3407_vm1, %v560_v34, 0.0 }
  0x28   : > { %11176 = vperm.xlu0 %11133, %v11175_v14   ;;  %v12364_v41 = vadd.f32 %v3643_v37, %v3642_v39  ;;  %v3570_v44 = vsel %vm3407_vm1, %v544_v42, 0.0  ;;  %v3571_v47 = vsel %vm3407_vm1, %v545_v43, 0.0  ;;  %v11195_v48 = vpack.i.bf16 %v545_v43, %v544_v42  ;;  %v12399_v14 = vld [vmem:[%s12249_s17 + $0x68] sm:$0xff]  }
  0x29   : > { %11181 = vperm.xlu1 %11144, %v11180_v5   ;;  %v12373_v49 = vadd.f32 %v3571_v47, %v3570_v44  ;;  %v516_v53 = vunpack.c.l.bf16 %v12308_v55  ;;  %v3517_v54 = vsel %vm3407_vm1, %v533_v50, 0.0  ;;  %v517_v59 = vunpack.c.h.bf16 %v12308_v55 }
  0x2a   : > { %v3483_v60 = vrot.slane %v12267_v15, 4  ;;  %v3411_v0 = vrot.slane %v12275_v21, 4  ;;  %v3492_v1 = vrot.slane %v12282_v26, 4  ;;  %v562_v55 = vunpack.c.l.bf16 %v434_v63 }
  0x2b   : > { %v3444_v62 = vsel %vm3407_vm1, %v516_v53, 0.0  ;;  %v3445_v3 = vsel %vm3407_vm1, %v517_v59, 0.0  ;;  %v11205_v5 = vpack.i.bf16 %v517_v59, %v516_v53  ;;  %v563_v10 = vunpack.c.h.bf16 %v434_v63 }
  0x2c   : > { %11186 = vperm.xlu0 %11133, %v11185_v31   ;;  %v12392_v9 = vadd.f32 %v3445_v3, %v3444_v62  ;;  %v3484_v11 = vadd.f32 %v3483_v60, %v12267_v15  ;;  %v3412_v17 = vadd.f32 %v3411_v0, %v12275_v21  ;;  %v546_v19 = vunpack.c.l.bf16 %v12390_v6 }
  0x2d   : > { %11191 = vperm.xlu1 %11144, %v11190_v18   ;;  %10609 = vmatmul.mubr.msk.bf16.gmra.mrb[12].mxu0 %vm19098_vm0, %v12347_v29  ;;  %v3652_v12 = vsel %vm3407_vm1, %v563_v10, 0.0  ;;  %v11220_v13 = vpack.i.bf16 %v563_v10, %v562_v55  ;;  %v3651_v18 = vsel %vm3407_vm1, %v562_v55, 0.0  ;;  %v3493_v23 = vadd.f32 %v3492_v1, %v12282_v26 }
  0x2e   : > { %10612 = vmatprep.mubr.msk.bf16.mxu0 %vm19098_vm0, %v12254_v4  ;;  %v532_v4 = vunpack.c.l.bf16 %v12370_v46  ;;  %v12405_v24 = vadd.f32 %v3652_v12, %v3651_v18  ;;  %v3420_v15 = vrot.slane %v12290_v35, 4  ;;  %v534_v28 = vunpack.c.l.bf16 %v12399_v14 }
  0x2f   : > { %v3485_v30 = vrot.slane %v3484_v11, 2  ;;  %v3501_v31 = vrot.slane %v12295_v40, 4  ;;  %v3429_v21 = vrot.slane %v12300_v45, 4  ;;  %v3579_v32 = vsel %vm3407_vm1, %v546_v19, 0.0 }
  0x30   : > { %11196 = vperm.xlu0 %11133, %v11195_v48   ;;  %v3516_v51 = vsel %vm3407_vm1, %v532_v4, 0.0  ;;  %v11210_v56 = vpack.i.bf16 %v533_v50, %v532_v4  ;;  %v3413_v34 = vrot.slane %v3412_v17, 2  ;;  %v535_v37 = vunpack.c.h.bf16 %v12399_v14 }
  0x31   : > { %11201 = vperm.xlu1 %11144, %v11200_v38   ;;  %v12380_v57 = vadd.f32 %v3517_v54, %v3516_v51  ;;  %v3494_v38 = vrot.slane %v3493_v23, 2  ;;  %v3421_v39 = vadd.f32 %v3420_v15, %v12290_v35  ;;  %v3502_v47 = vadd.f32 %v3501_v31, %v12295_v40 }
  0x32   : > { %v3526_v43 = vsel %vm3407_vm1, %v535_v37, 0.0  ;;  %v11230_v44 = vpack.i.bf16 %v535_v37, %v534_v28  ;;  %v3430_v48 = vadd.f32 %v3429_v21, %v12300_v45  ;;  %v3486_v4 = vadd.f32 %v3485_v30, %v3484_v11  ;;  %v12429_v45 = vld [vmem:[%s12249_s17 + $0xe0] sm:$0xff]  }
  0x33   : > { %v3414_v50 = vadd.f32 %v3413_v34, %v3412_v17  ;;  %v3525_v51 = vsel %vm3407_vm1, %v534_v28, 0.0  ;;  %v518_v35 = vunpack.c.l.bf16 %v12312_v58  ;;  %v3495_v54 = vadd.f32 %v3494_v38, %v3493_v23 }
  0x34   : > { %11206 = vperm.xlu0 %11133, %v11205_v5   ;;  %v12422_v53 = vadd.f32 %v3526_v43, %v3525_v51  ;;  %v519_v59 = vunpack.c.h.bf16 %v12312_v58  ;;  %v3503_v60 = vrot.slane %v3502_v47, 2  ;;  %v3431_v62 = vrot.slane %v3430_v48, 2 }
  0x35   : > { %11211 = vperm.xlu1 %11144, %v11210_v56   ;;  %10613 = vmatmul.mubr.msk.bf16.gmra.mrb[16].mxu0 %vm19098_vm0, %v12259_v7  ;;  %v547_v7 = vunpack.c.h.bf16 %v12390_v6  ;;  %v3422_v56 = vrot.slane %v3421_v39, 2  ;;  %v3564_v63 = vrot.slane %v12305_v52, 4  ;;  %v3453_v40 = vsel %vm3407_vm1, %v518_v35, 0.0 }
  0x36   : > { %v3487_v0 = vrot.slane %v3486_v4, 1  ;;  %v3415_v1 = vrot.slane %v3414_v50, 1  ;;  %v3555_v3 = vrot.slane %v12316_v61, 4  ;;  %v3454_v5 = vsel %vm3407_vm1, %v519_v59, 0.0  ;;  %10616 = vmatprep.mubr.msk.bf16.mxu0 %vm19098_vm0, %v12273_v20 }
  0x37   : > { %v3580_v36 = vsel %vm3407_vm1, %v547_v7, 0.0  ;;  %v11215_v26 = vpack.i.bf16 %v547_v7, %v546_v19  ;;  %v11225_v55 = vpack.i.bf16 %v519_v59, %v518_v35  ;;  %v12433_v10 = vadd.f32 %v3454_v5, %v3453_v40  ;;  %v12438_v19 = vld [vmem:[%s12249_s17 + $0xa0] sm:$0xff]  }
  0x38   : > { %v12416_v42 = vadd.f32 %v3580_v36, %v3579_v32  ;;  %v3496_v11 = vrot.slane %v3495_v54, 1  ;;  %v3636_v58 = vrot.slane %v12328_v8, 4  ;;  %v3423_v12 = vadd.f32 %v3422_v56, %v3421_v39 }
  0x39   : > { %11221 = vperm.xlu1 %11144, %v11220_v13   ;;  %11216 = vperm.xlu0 %11133, %v11215_v26   ;;  %v3504_v13 = vadd.f32 %v3503_v60, %v3502_v47  ;;  %v3432_v17 = vadd.f32 %v3431_v62, %v3430_v48  ;;  %v3565_v18 = vadd.f32 %v3564_v63, %v12305_v52  ;;  %v3627_v7 = vrot.slane %v12334_v16, 4  ;;  %v12461_v26 = vld [vmem:[%s12249_s17 + $0x70] sm:$0xff]  }
  0x3a   : > { %v3556_v23 = vadd.f32 %v3555_v3, %v12316_v61  ;;  %v564_v15 = vunpack.c.l.bf16 %v12429_v45  ;;  %v565_v28 = vunpack.c.h.bf16 %v12429_v45  ;;  %v12446_v30 = vadd.f32 %v3487_v0, %v3486_v4 }
  0x3b   : > { %v12450_v52 = vadd.f32 %v3415_v1, %v3414_v50  ;;  %v3637_v31 = vadd.f32 %v3636_v58, %v12328_v8  ;;  %v548_v20 = vunpack.c.l.bf16 %v12438_v19  ;;  %v12458_v21 = vadd.f32 %v3496_v11, %v3495_v54  ;;  %v12491_v11 = vld [vmem:[%s12249_s17 + $0xe8] sm:$0xff]  }
  0x3c   : > { %v11240_v61 = vpack.i.bf16 %v565_v28, %v564_v15  ;;  %v3424_v32 = vrot.slane %v3423_v12, 1  ;;  %v3505_v34 = vrot.slane %v3504_v13, 1  ;;  %v3566_v36 = vrot.slane %v3565_v18, 2 }
  0x3d   : > { %11231 = vperm.xlu1 %11144, %v11230_v44   ;;  %11226 = vperm.xlu0 %11133, %v11225_v55   ;;  %v3433_v37 = vrot.slane %v3432_v17, 1  ;;  %v3628_v38 = vadd.f32 %v3627_v7, %v12334_v16  ;;  %v549_v8 = vunpack.c.h.bf16 %v12438_v19  ;;  %v3992_v39 = vmax.f32 %v12446_v30, 1.0 }
  0x3e   : > { %10617 = vmatmul.mubr.msk.bf16.gmra.mrb[20].mxu0 %vm19098_vm0, %v12324_v2  ;;  %v3557_v2 = vrot.slane %v3556_v23, 2  ;;  %v3510_v43 = vrot.slane %v12338_v22, 4  ;;  %v3984_v44 = vmax.f32 %v12450_v52, 1.0  ;;  %v3638_v47 = vrot.slane %v3637_v31, 2 }
  0x3f   : > { %v11235_v48 = vpack.i.bf16 %v549_v8, %v548_v20  ;;  %v536_v4 = vunpack.c.l.bf16 %v12461_v26  ;;  %v3993_v50 = vmax.f32 %v12458_v21, 1.0  ;;  %v12474_v16 = vadd.f32 %v3424_v32, %v3423_v12  ;;  %10620 = vmatprep.mubr.msk.bf16.mxu0 %vm19098_vm0, %v12370_v46 }
  0x40   : > { %v12476_v51 = vadd.f32 %v3505_v34, %v3504_v13  ;;  %v3567_v35 = vadd.f32 %v3566_v36, %v3565_v18  ;;  %v12478_v54 = vadd.f32 %v3433_v37, %v3432_v17  ;;  %v3558_v56 = vadd.f32 %v3557_v2, %v3556_v23  ;;  %v12504_v34 = vld [vmem:[%s12249_s17 + $0xa8] sm:$0xff]  }
  0x41   : > { %11241 = vperm.xlu1 %11144, %v11240_v61   ;;  %v3629_v59 = vrot.slane %v3628_v38, 2  ;;  %11236 = vperm.xlu0 %11133, %v11235_v48   ;;  %v537_v60 = vunpack.c.h.bf16 %v12461_v26  ;;  %11719 = vrcp.f32 %v3992_v39  ;;  %v3511_v62 = vadd.f32 %v3510_v43, %v12338_v22 }
  0x42   : > { %v3438_v63 = vrot.slane %v12351_v33, 4  ;;  %11721 = vrcp.f32 %v3984_v44  ;;  %v3639_v40 = vadd.f32 %v3638_v47, %v3637_v31  ;;  %v520_v1 = vunpack.c.l.bf16 %v12343_v27 }
  0x43   : > { %v11250_v0 = vpack.i.bf16 %v537_v60, %v536_v4  ;;  %11723 = vrcp.f32 %v3993_v50  ;;  %v3985_v3 = vmax.f32 %v12474_v16, 1.0  ;;  %v3994_v5 = vmax.f32 %v12476_v51, 1.0  ;;  %v12523_v50 = vld [vmem:[%s12249_s17 + $0x78] sm:$0xff]  }
  0x44   : > { %v3568_v55 = vrot.slane %v3567_v35, 1  ;;  %v3986_v22 = vmax.f32 %v12478_v54, 1.0  ;;  %v3559_v58 = vrot.slane %v3558_v56, 1  ;;  %v3630_v12 = vadd.f32 %v3629_v59, %v3628_v38 }
  0x45   : > { %11251 = vperm.xlu1 %11144, %v11250_v0   ;;  %v521_v13 = vunpack.c.h.bf16 %v12343_v27  ;;  %v3512_v17 = vrot.slane %v3511_v62, 2  ;;  %v3439_v18 = vadd.f32 %v3438_v63, %v12351_v33  ;;  %v3645_v23 = vrot.slane %v12364_v41, 4 }
  0x46   : > { %v3640_v7 = vrot.slane %v3639_v40, 1  ;;  %v3573_v31 = vrot.slane %v12373_v49, 4  ;;  %v3519_v61 = vrot.slane %v12380_v57, 4  ;;  %11725 = vrcp.f32 %v3985_v3  ;;  %10621 = vmatmul.mubr.msk.bf16.gmra.mrb[24].mxu0 %vm19098_vm0, %v12399_v14 }
  0x47   : > { %v11245_v32 = vpack.i.bf16 %v521_v13, %v520_v1  ;;  %v12506_v36 = vadd.f32 %v3568_v55, %v3567_v35  ;;  %11727 = vrcp.f32 %v3994_v5  ;;  %v18732_v33 = vunpack.c.l.bf16 %v12491_v11  ;;  %10624 = vmatprep.mubr.msk.bf16.mxu0 %vm19098_vm0, %v12461_v26  ;;  %v12629_v26 = vld [vmem:[%s12249_s17 + $0xf8] sm:$0xff]  }
  0x48   : > { %v18733_v37 = vunpack.c.h.bf16 %v12491_v11  ;;  %v3631_v2 = vrot.slane %v3630_v12, 1  ;;  %v3513_v38 = vadd.f32 %v3512_v17, %v3511_v62  ;;  %v3440_v39 = vrot.slane %v3439_v18, 2 }
  0x49   : > { %11246 = vperm.xlu0 %11133, %v11245_v32   ;;  %v3646_v43 = vadd.f32 %v3645_v23, %v12364_v41  ;;  %v3574_v44 = vadd.f32 %v3573_v31, %v12373_v49  ;;  %v3447_v47 = vrot.slane %v12392_v9, 4  ;;  %v3654_v46 = vrot.slane %v12405_v24, 4 }
  0x4a   : > { %v11260_v48 = vpack.i.bf16 %v18733_v37, %v18732_v33  ;;  %v4001_v41 = vmax.f32 %v12506_v36, 1.0  ;;  %v3520_v59 = vadd.f32 %v3519_v61, %v12380_v57  ;;  %v3582_v14 = vrot.slane %v12416_v42, 4 }
  0x4b   : > { %v12525_v35 = vpop.eup %11719  ;;  %v18728_v49 = vunpack.c.l.bf16 %v12504_v34  ;;  %11729 = vrcp.f32 %v3986_v22  ;;  %v12533_v63 = vadd.f32 %v3559_v58, %v3558_v56  ;;  %v12535_v0 = vadd.f32 %v3640_v7, %v3639_v40 }
  0x4c   : > { %v12531_v62 = vpop.eup %11721  ;;  %11261 = vperm.xlu1 %11144, %v11260_v48   ;;  %v18729_v3 = vunpack.c.h.bf16 %v12504_v34  ;;  %v12540_v55 = vadd.f32 %v3631_v2, %v3630_v12  ;;  %v3514_v17 = vrot.slane %v3513_v38, 1  ;;  %v3647_v57 = vrot.slane %v3646_v43, 2 }
  0x4d   : > { %v12538_v5 = vpop.eup %11723  ;;  %v18730_v23 = vunpack.c.l.bf16 %v12523_v50  ;;  %v3441_v31 = vadd.f32 %v3440_v39, %v3439_v18  ;;  %v3575_v61 = vrot.slane %v3574_v44, 2  ;;  %v3448_v32 = vadd.f32 %v3447_v47, %v12392_v9 }
  0x4e   : > { %v3655_v56 = vadd.f32 %v3654_v46, %v12405_v24  ;;  %v3521_v22 = vrot.slane %v3520_v59, 2  ;;  %v3583_v40 = vadd.f32 %v3582_v14, %v12416_v42  ;;  %v11255_v58 = vpack.i.bf16 %v18729_v3, %v18728_v49  ;;  %10625 = vmatmul.mubr.msk.bf16.gmra.mrb[28].mxu0 %vm19098_vm0, %v12523_v50 }
  0x4f   : > { %v18731_v12 = vunpack.c.h.bf16 %v12523_v50  ;;  %11731 = vrcp.f32 %v4001_v41  ;;  %v4000_v7 = vmax.f32 %v12533_v63, 1.0  ;;  %v4009_v18 = vmax.f32 %v12535_v0, 1.0 }
  0x50   : > { %v12552_v2 = vpop.eup %11725  ;;  %v12555_v9 = vadd.f32 %v3514_v17, %v3513_v38  ;;  %v3648_v24 = vadd.f32 %v3647_v57, %v3646_v43  ;;  %11256 = vperm.xlu0 %11133, %v11255_v58   ;;  %v3576_v47 = vadd.f32 %v3575_v61, %v3574_v44  ;;  %v3449_v46 = vrot.slane %v3448_v32, 2 }
  0x51   : > { %v11270_v42 = vpack.i.bf16 %v18731_v12, %v18730_v23  ;;  %v12561_v39 = vpop.eup %11727  ;;  %v3656_v48 = vrot.slane %v3655_v56, 2  ;;  %v3528_v41 = vrot.slane %v12422_v53, 4  ;;  %v4008_v14 = vmax.f32 %v12540_v55, 1.0  ;;  %v12584_v12 = vld [vmem:[%s12249_s17 + $0xf0] sm:$0xff]  }
  0x52   : > { %19112 = vst [vmem:[#allocation2_spill] sm:$0xff] %v12555_v9  ;;  %v3442_v49 = vrot.slane %v3441_v31, 1  ;;  %v3522_v3 = vadd.f32 %v3521_v22, %v3520_v59  ;;  %v3584_v38 = vrot.slane %v3583_v40, 2  ;;  %11733 = vrcp.f32 %v4000_v7 }
  0x53   : > { %11271 = vperm.xlu1 %11144, %v11270_v42   ;;  %v3661_v43 = vsel %vm3407_vm1, %v565_v28, 0.0  ;;  %v3660_v44 = vsel %vm3407_vm1, %v564_v15, 0.0  ;;  %v18734_v17 = vunpack.c.l.bf16 %v12347_v29  ;;  %11735 = vrcp.f32 %v4009_v18 }
  0x54   : > { %v3995_v57 = vmax.f32 %v12555_v9, 1.0  ;;  %v3649_v61 = vrot.slane %v3648_v24, 1  ;;  %v18735_v59 = vunpack.c.h.bf16 %v12347_v29  ;;  %v3577_v58 = vrot.slane %v3576_v47, 1 }
  0x55   : > { %v12574_v22 = vpop.eup %11729  ;;  %v3450_v7 = vadd.f32 %v3449_v46, %v3448_v32  ;;  %v3657_v42 = vadd.f32 %v3656_v48, %v3655_v56  ;;  %v3529_v28 = vadd.f32 %v3528_v41, %v12422_v53  ;;  %v3523_v45 = vrot.slane %v3522_v3, 1  ;;  %v12593_v32 = vld [vmem:[%s12249_s17 + $0xb0] sm:$0xff]  }
  0x56   : > { %v3662_v23 = vadd.f32 %v3661_v43, %v3660_v44  ;;  %v3589_v15 = vsel %vm3407_vm1, %v549_v8, 0.0  ;;  %v3588_v18 = vsel %vm3407_vm1, %v548_v20, 0.0  ;;  %11737 = vrcp.f32 %v4008_v14 }
  0x57   : > { %v12586_v33 = vadd.f32 %v3442_v49, %v3441_v31  ;;  %v3585_v37 = vadd.f32 %v3584_v38, %v3583_v40  ;;  %v11265_v53 = vpack.i.bf16 %v18735_v59, %v18734_v17  ;;  %11739 = vrcp.f32 %v3995_v57 }
  0x58   : > { %v3451_v8 = vrot.slane %v3450_v7, 1  ;;  %v3658_v46 = vrot.slane %v3657_v42, 1  ;;  %v3530_v48 = vrot.slane %v3529_v28, 2  ;;  %v3456_v20 = vrot.slane %v12433_v10, 4 }
  0x59   : > { %19113 = vst [vmem:[#allocation3_spill] sm:$0xff] %v12586_v33  ;;  %v12595_v56 = vpop.eup %11731  ;;  %11266 = vperm.xlu0 %11133, %v11265_v53   ;;  %v3663_v41 = vrot.slane %v3662_v23, 4  ;;  %v3590_v49 = vadd.f32 %v3589_v15, %v3588_v18  ;;  %v18736_v31 = vunpack.c.l.bf16 %v12584_v12  ;;  %v18737_v40 = vunpack.c.h.bf16 %v12584_v12 }
  0x5a   : > { %v3987_v14 = vmax.f32 %v12586_v33, 1.0  ;;  %v12603_v38 = vadd.f32 %v3649_v61, %v3648_v24  ;;  %v12605_v43 = vadd.f32 %v3577_v58, %v3576_v47  ;;  %v3586_v44 = vrot.slane %v3585_v37, 1 }
  0x5b   : > { %v3535_v57 = vsel %vm3407_vm1, %v537_v60, 0.0  ;;  %v3534_v15 = vsel %vm3407_vm1, %v536_v4, 0.0  ;;  %v11280_v24 = vpack.i.bf16 %v18737_v40, %v18736_v31  ;;  %v12622_v58 = vadd.f32 %v3523_v45, %v3522_v3 }
  0x5c   : > { %19114 = vst [vmem:[#allocation4_spill] sm:$0xff] %v12603_v38  ;;  %19115 = vst [vmem:[#allocation5_spill] sm:$0xff] %v12605_v43  ;;  %v12620_v61 = vpop.eup %11733  ;;  %v12624_v18 = vadd.f32 %v3451_v8, %v3450_v7  ;;  %v12626_v53 = vadd.f32 %v3658_v46, %v3657_v42  ;;  %v3531_v60 = vadd.f32 %v3530_v48, %v3529_v28  ;;  %v3591_v31 = vrot.slane %v3590_v49, 4  ;;  %v12644_v28 = vld [vmem:[%s12249_s17 + $0xb8] sm:$0xff]  }
  0x5d   : > { %19116 = vst [vmem:[#allocation6_spill] sm:$0xff] %v12622_v58  ;;  %v12631_v4 = vpop.eup %11735  ;;  %v3457_v17 = vadd.f32 %v3456_v20, %v12433_v10  ;;  %v3664_v59 = vadd.f32 %v3663_v41, %v3662_v23  ;;  %11281 = vperm.xlu1 %11144, %v11280_v24   ;;  %v18738_v40 = vunpack.c.h.bf16 %v12593_v32  ;;  %v12635_v47 = vadd.f32 %v3586_v44, %v3585_v37 }
  0x5e   : > { %19117 = vst [vmem:[#allocation7_spill] sm:$0xff] %v12624_v18  ;;  %19118 = vst [vmem:[#allocation8_spill] sm:$0xff] %v12626_v53  ;;  %v3536_v3 = vadd.f32 %v3535_v57, %v3534_v15  ;;  %v3463_v7 = vsel %vm3407_vm1, %v521_v13, 0.0  ;;  %v3462_v42 = vsel %vm3407_vm1, %v520_v1, 0.0  ;;  %v19120_v10 = vunpack.c.h.bf16 %v12491_v11 }
  0x5f   : > { %19119 = vst [vmem:[#allocation9_spill] sm:$0xff] %v12635_v47  ;;  %v19121_v45 = vunpack.c.l.bf16 %v12491_v11  ;;  %v19122_v8 = vunpack.c.l.bf16 %v12593_v32  ;;  %v4010_v1 = vmax.f32 %v12603_v38, 1.0  ;;  %v4002_v48 = vmax.f32 %v12605_v43, 1.0 }
  0x60   : > { %v3670_v23 = vsel %vm3407_vm1, %v19120_v10, 0.0  ;;  %v12657_v27 = vpop.eup %11737  ;;  %v3996_v20 = vmax.f32 %v12622_v58, 1.0  ;;  %v3532_v41 = vrot.slane %v3531_v60, 1  ;;  %v3458_v57 = vrot.slane %v3457_v17, 2 }
  0x61   : > { %v3669_v37 = vsel %vm3407_vm1, %v19121_v45, 0.0  ;;  %v11275_v46 = vpack.i.bf16 %v18738_v40, %v19122_v8  ;;  %v12662_v44 = vpop.eup %11739  ;;  %v3665_v15 = vrot.slane %v3664_v59, 2  ;;  %v3592_v24 = vadd.f32 %v3591_v31, %v3590_v49 }
  0x62   : > { %v18745_v10 = vunpack.c.h.bf16 %v12629_v26  ;;  %v3988_v45 = vmax.f32 %v12624_v18, 1.0  ;;  %v3537_v8 = vrot.slane %v3536_v3, 4  ;;  %v3464_v40 = vadd.f32 %v3463_v7, %v3462_v42 }
  0x63   : > { %11276 = vperm.xlu0 %11133, %v11275_v46   ;;  %v3671_v13 = vadd.f32 %v3670_v23, %v3669_v37  ;;  %v4011_v38 = vmax.f32 %v12626_v53, 1.0  ;;  %v4003_v43 = vmax.f32 %v12635_v47, 1.0  ;;  %v19123_v58 = vunpack.c.l.bf16 %v12629_v26 }
  0x64   : > { %11741 = vrcp.f32 %v3987_v14  ;;  %v12673_v31 = vadd.f32 %v3532_v41, %v3531_v60  ;;  %v19125_v46 = vunpack.c.h.bf16 %v12504_v34  ;;  %v19126_v42 = vunpack.c.l.bf16 %v12504_v34  ;;  %v12153_v60 = vld [vmem:[%s12249_s17 + $0x80] sm:$0xff]  }
  0x65   : > { %v11290_v33 = vpack.i.bf16 %v18745_v10, %v19123_v58  ;;  %v3459_v37 = vadd.f32 %v3458_v57, %v3457_v17  ;;  %v3666_v47 = vadd.f32 %v3665_v15, %v3664_v59  ;;  %v3593_v53 = vrot.slane %v3592_v24, 2  ;;  %10628 = vmatprep.mubr.msk.bf16.mxu0 %vm19098_vm0, %v12153_v60  ;;  %v12154_v59 = vld [vmem:[%s12249_s17 + $0x88] sm:$0xff]  }
  0x66   : > { %19124 = vst [vmem:[#allocation10_spill] sm:$0xff] %v12673_v31  ;;  %v3598_v7 = vsel %vm3407_vm1, %v19125_v46, 0.0  ;;  %v3597_v23 = vsel %vm3407_vm1, %v19126_v42, 0.0  ;;  %v18755_v58 = vunpack.c.h.bf16 %v12644_v28  ;;  %v3538_v10 = vadd.f32 %v3537_v8, %v3536_v3  ;;  %10629 = vmatmul.mubr.msk.bf16.gmra.mrb[32].mxu0 %vm19098_vm0, %v12154_v59 }
  0x67   : > { %11291 = vperm.xlu1 %11144, %v11290_v33   ;;  %v3465_v49 = vrot.slane %v3464_v40, 4  ;;  %v3672_v14 = vrot.slane %v3671_v13, 4  ;;  %v3599_v41 = vadd.f32 %v3598_v7, %v3597_v23  ;;  %v19127_v18 = vunpack.c.h.bf16 %v12523_v50  ;;  %10632 = vmatprep.mubr.msk.bf16.mxu0 %vm19098_vm0, %v12358_v25 }
  0x68   : > { %v19128_v9 = vunpack.c.l.bf16 %v12523_v50  ;;  %v19129_v17 = vunpack.c.l.bf16 %v12644_v28  ;;  %11743 = vrcp.f32 %v4010_v1  ;;  %v3460_v3 = vrot.slane %v3459_v37, 1 }
  0x69   : > { %v3544_v46 = vsel %vm3407_vm1, %v19127_v18, 0.0  ;;  %11745 = vrcp.f32 %v4002_v48  ;;  %v3997_v18 = vmax.f32 %v12673_v31, 1.0  ;;  %v3667_v50 = vrot.slane %v3666_v47, 1 }
  0x6a   : > { %v3543_v42 = vsel %vm3407_vm1, %v19128_v9, 0.0  ;;  %v11285_v33 = vpack.i.bf16 %v18755_v58, %v19129_v17  ;;  %v12697_v57 = vadd.f32 %v3593_v53, %v3592_v24  ;;  %v3539_v9 = vrot.slane %v3538_v10, 2  ;;  %v12709_v24 = vld [vmem:[%s12249_s17 + $0x108] sm:$0xff]   ;;  %v12831_v58 = vld [vmem:[%s12249_s17 + $0x150] sm:$0xff]  }
  0x6b   : > { %4567 = vperm.xlu1 %11144, %v12552_v2   ;;  %v3466_v15 = vadd.f32 %v3465_v49, %v3464_v40  ;;  %v3600_v8 = vrot.slane %v3599_v41, 4  ;;  %v3545_v1 = vadd.f32 %v3544_v46, %v3543_v42  ;;  %11747 = vrcp.f32 %v3996_v20 }
  0x6c   : > { %11286 = vperm.xlu0 %11133, %v11285_v33   ;;  %v19130_v48 = vunpack.c.h.bf16 %v12347_v29  ;;  %v19131_v7 = vunpack.c.l.bf16 %v12347_v29  ;;  %11749 = vrcp.f32 %v3988_v45  ;;  %v3673_v23 = vadd.f32 %v3672_v14, %v3671_v13  ;;  %v12723_v13 = vld [vmem:[%s12249_s17 + $0x100] sm:$0xff]  }
  0x6d   : > { %11751 = vrcp.f32 %v4011_v38  ;;  %v19132_v25 = vunpack.c.h.bf16 %v12584_v12  ;;  %v19133_v49 = vunpack.c.l.bf16 %v12584_v12  ;;  %v3595_v60 = vrot.slane %v12697_v57, 1 }
  0x6e   : > { %v3472_v2 = vsel %vm3407_vm1, %v19130_v48, 0.0  ;;  %v3471_v53 = vsel %vm3407_vm1, %v19131_v7, 0.0  ;;  %v12713_v40 = vpop.eup %11741  ;;  %v3467_v46 = vrot.slane %v3466_v15, 2  ;;  %v3546_v45 = vrot.slane %v3545_v1, 4  ;;  %10633 = vmatmul.mubr.msk.bf16.gmra.mrb[36].mxu0 %vm19098_vm0, %v12390_v6 }
  0x6f   : > { %4607 = vperm.xlu1 %11144, %v12538_v5   ;;  %v3679_v20 = vsel %vm3407_vm1, %v19132_v25, 0.0  ;;  %v3678_v29 = vsel %vm3407_vm1, %v19133_v49, 0.0  ;;  %11753 = vrcp.f32 %v4003_v43  ;;  %v12727_v5 = vadd.f32 %v3667_v50, %v3666_v47  ;;  %10636 = vmatprep.mubr.msk.bf16.mxu0 %vm19098_vm0, %v12438_v19 }
  0x70   : > { %4562 = vperm.xlu0 %11133, %v12531_v62   ;;  %v12725_v62 = vadd.f32 %v3460_v3, %v3459_v37  ;;  %v3674_v38 = vrot.slane %v3673_v23, 2  ;;  %v3473_v14 = vadd.f32 %v3472_v2, %v3471_v53  ;;  %v3680_v42 = vadd.f32 %v3679_v20, %v3678_v29 }
  0x71   : > { %19135 = vst [vmem:[#allocation12_spill] sm:$0xff] %v12727_v5  ;;  %v18754_v17 = vunpack.c.l.bf16 %v12709_v24  ;;  %v12734_v59 = vadd.f32 %v3539_v9, %v3538_v10  ;;  %v3601_v48 = vadd.f32 %v3600_v8, %v3599_v41  ;;  %v18750_v43 = vunpack.c.h.bf16 %v12709_v24 }
  0x72   : > { %19134 = vst [vmem:[#allocation11_spill] sm:$0xff] %v12725_v62  ;;  %v12732_v33 = vpop.eup %11743  ;;  %v18748_v47 = vunpack.c.h.bf16 %v12723_v13  ;;  %v3547_v3 = vadd.f32 %v3546_v45, %v3545_v1  ;;  %v19137_v50 = vunpack.c.l.bf16 %v12593_v32  ;;  %v3468_v41 = vadd.f32 %v3467_v46, %v3466_v15  ;;  %v12774_v45 = vld [vmem:[%s12249_s17 + $0x148] sm:$0xff]  }
  0x73   : > { %4612 = vperm.xlu1 %11144, %v12561_v39   ;;  %v12740_v37 = vpop.eup %11745  ;;  %v3705_v6 = vsel %vm3407_vm1, %v18754_v17, 0.0  ;;  %v3706_v9 = vsel %vm3407_vm1, %v18750_v43, 0.0  ;;  %v18749_v8 = vunpack.c.l.bf16 %v12723_v13  ;;  %v3675_v2 = vadd.f32 %v3674_v38, %v3673_v23 }
  0x74   : > { %4602 = vperm.xlu0 %11133, %v12525_v35   ;;  %v19136_v35 = vunpack.c.h.bf16 %v12593_v32  ;;  %v3606_v10 = vsel %vm3407_vm1, %v19137_v50, 0.0  ;;  %v3697_v1 = vsel %vm3407_vm1, %v18748_v47, 0.0  ;;  %v3474_v7 = vrot.slane %v3473_v14, 4 }
  0x75   : > { %v3681_v19 = vrot.slane %v3680_v42, 4  ;;  %v12762_v15 = vadd.f32 %v3706_v9, %v3705_v6  ;;  %v12764_v53 = vpop.eup %11747  ;;  %11755 = vrcp.f32 %v3997_v18  ;;  %v3696_v20 = vsel %vm3407_vm1, %v18749_v8, 0.0 }
  0x76   : > { %v3607_v39 = vsel %vm3407_vm1, %v19136_v35, 0.0  ;;  %v12769_v49 = vpop.eup %11749  ;;  %v3602_v29 = vrot.slane %v3601_v48, 2  ;;  %v3548_v23 = vrot.slane %v3547_v3, 2  ;;  %v12771_v46 = vadd.f32 %v3697_v1, %v3696_v20  ;;  %10637 = vmatmul.mubr.msk.bf16.gmra.mrb[40].mxu0 %vm19098_vm0, %v12504_v34 }
  0x77   : > { %4647 = vperm.xlu1 %11144, %v12595_v56   ;;  %v3608_v25 = vadd.f32 %v3607_v39, %v3606_v10  ;;  %v12779_v56 = vpop.eup %11751  ;;  %v3989_v38 = vmax.f32 %v12725_v62, 1.0  ;;  %v4012_v18 = vmax.f32 %v12727_v5, 1.0  ;;  %v12784_v35 = vadd.f32 %v3595_v60, %v12697_v57  ;;  %10640 = vmatprep.mubr.msk.bf16.mxu0 %vm19098_vm0, %v12593_v32 }
  0x78   : > { %4572 = vperm.xlu0 %11133, %v12574_v22   ;;  %v12777_v22 = vld [vmem:[%s12249_s17 + $0x140] sm:$0xff]   ;;  %v3541_v39 = vrot.slane %v12734_v59, 1  ;;  %v3469_v50 = vrot.slane %v3468_v41, 1  ;;  %v3676_v10 = vrot.slane %v3675_v2, 1  ;;  %v3475_v6 = vadd.f32 %v3474_v7, %v3473_v14 }
  0x79   : > { %19138 = vst [vmem:[#allocation13_spill] sm:$0xff] %v12784_v35  ;;  %v3682_v9 = vadd.f32 %v3681_v19, %v3680_v42  ;;  %v12789_v1 = vpop.eup %11753  ;;  %v3609_v20 = vrot.slane %v3608_v25, 4  ;;  %v18752_v47 = vunpack.c.l.bf16 %v12774_v45  ;;  %v18751_v57 = vunpack.c.h.bf16 %v12774_v45 }
  0x7a   : > { %v18753_v60 = vunpack.c.l.bf16 %v12777_v22  ;;  %v3603_v8 = vadd.f32 %v3602_v29, %v3601_v48  ;;  %v3549_v43 = vadd.f32 %v3548_v23, %v3547_v3  ;;  %v19139_v14 = vunpack.c.l.bf16 %v12629_v26 }
  0x7b   : > { %4687 = vperm.xlu1 %11144, %v12631_v4   ;;  %v18756_v4 = vunpack.c.h.bf16 %v12777_v22  ;;  %v19140_v42 = vunpack.c.h.bf16 %v12629_v26  ;;  %v3778_v7 = vsel %vm3407_vm1, %v18751_v57, 0.0  ;;  %v3777_v48 = vsel %vm3407_vm1, %v18752_v47, 0.0 }
  0x7c   : > { %4642 = vperm.xlu0 %11133, %v12620_v61   ;;  %v3687_v61 = vsel %vm3407_vm1, %v19139_v14, 0.0  ;;  %v3768_v32 = vsel %vm3407_vm1, %v18753_v60, 0.0  ;;  %v3476_v3 = vrot.slane %v3475_v6, 2  ;;  %v3683_v19 = vrot.slane %v3682_v9, 2 }
  0x7d   : > { %v3688_v34 = vsel %vm3407_vm1, %v19140_v42, 0.0  ;;  %v12816_v29 = vadd.f32 %v3778_v7, %v3777_v48  ;;  %v3769_v23 = vsel %vm3407_vm1, %v18756_v4, 0.0  ;;  %v4004_v14 = vmax.f32 %v12784_v35, 1.0 }
  0x7e   : > { %v3610_v42 = vadd.f32 %v3609_v20, %v3608_v25  ;;  %v12822_v57 = vadd.f32 %v3769_v23, %v3768_v32  ;;  %v12825_v47 = vadd.f32 %v3541_v39, %v12734_v59  ;;  %v12827_v60 = vadd.f32 %v3469_v50, %v3468_v41  ;;  %10641 = vmatmul.mubr.msk.bf16.gmra.mrb[44].mxu0 %vm19098_vm0, %v12644_v28 }
  0x7f   : > { %4617 = vperm.xlu1 %11144, %v12662_v44   ;;  %v3689_v17 = vadd.f32 %v3688_v34, %v3687_v61  ;;  %v12833_v44 = vpop.eup %11755  ;;  %11757 = vrcp.f32 %v3989_v38  ;;  %v12835_v7 = vadd.f32 %v3676_v10, %v3675_v2  ;;  %v3604_v48 = vrot.slane %v3603_v8, 1 }
  0x80   : > { %4682 = vperm.xlu0 %11133, %v12657_v27   ;;  %19141 = vst [vmem:[#allocation14_spill] sm:$0xff] %v12825_v47  ;;  %19142 = vst [vmem:[#allocation15_spill] sm:$0xff] %v12827_v60  ;;  %v12155_v27 = vld [vmem:[%s12249_s17 + $0xc0] sm:$0xff]   ;;  %v3550_v4 = vrot.slane %v3549_v43, 1  ;;  %v3477_v25 = vadd.f32 %v3476_v3, %v3475_v6  ;;  %v3684_v20 = vadd.f32 %v3683_v19, %v3682_v9  ;;  %v19144_v32 = vunpack.c.h.bf16 %v12644_v28  ;;  %v12852_v9 = vld [vmem:[%s12249_s17 + $0x110] sm:$0xff]  }
  0x81   : > { %19143 = vst [vmem:[#allocation16_spill] sm:$0xff] %v12835_v7  ;;  %v19145_v41 = vunpack.c.l.bf16 %v12644_v28  ;;  %11759 = vrcp.f32 %v4012_v18  ;;  %v3611_v2 = vrot.slane %v3610_v42, 2  ;;  %v592_v38 = vunpack.c.l.bf16 %v12831_v58  ;;  %10644 = vmatprep.mubr.msk.bf16.mxu0 %vm19098_vm0, %v12155_v27 }
  0x82   : > { %v3616_v59 = vsel %vm3407_vm1, %v19144_v32, 0.0  ;;  %11761 = vrcp.f32 %v4004_v14  ;;  %v3998_v50 = vmax.f32 %v12825_v47, 1.0  ;;  %v3990_v10 = vmax.f32 %v12827_v60, 1.0  ;;  %v12157_v32 = vld [vmem:[%s12249_s17 + $0xd0] sm:$0xff]   ;;  %v13148_v47 = vld [vmem:[%s12249_s17 + $0x198] sm:$0xff]  }
  0x83   : > { %v3615_v39 = vsel %vm3407_vm1, %v19145_v41, 0.0  ;;  %4692 = vperm.xlu1 %11144, %v12732_v33   ;;  %v3690_v6 = vrot.slane %v3689_v17, 4  ;;  %v18769_v18 = vunpack.c.h.bf16 %v12831_v58  ;;  %v3786_v28 = vsel %vm3407_vm1, %v592_v38, 0.0 }
  0x84   : > { %4577 = vperm.xlu0 %11133, %v12713_v40   ;;  %v12854_v40 = vadd.f32 %v3604_v48, %v3603_v8  ;;  %v3617_v33 = vadd.f32 %v3616_v59, %v3615_v39  ;;  %v4013_v61 = vmax.f32 %v12835_v7, 1.0  ;;  %v12861_v34 = vadd.f32 %v3550_v4, %v3549_v43  ;;  %v12156_v8 = vld [vmem:[%s12249_s17 + $0xc8] sm:$0xff]  }
  0x85   : > { %v3478_v3 = vrot.slane %v3477_v25, 1  ;;  %v3685_v19 = vrot.slane %v3684_v20, 1  ;;  %v3612_v23 = vadd.f32 %v3611_v2, %v3610_v42  ;;  %v3787_v14 = vsel %vm3407_vm1, %v18769_v18, 0.0  ;;  %v11518_v42 = vld [vmem:[%s18725_s7] sm:$0xff]  }
  0x86   : > { %19146 = vst [vmem:[#allocation17_spill] sm:$0xff] %v12854_v40  ;;  %19147 = vst [vmem:[#allocation18_spill] sm:$0xff] %v12861_v34  ;;  %v18768_v27 = vunpack.c.l.bf16 %v12852_v9  ;;  %v3691_v48 = vadd.f32 %v3690_v6, %v3689_v17  ;;  %v12871_v59 = vadd.f32 %v3787_v14, %v3786_v28  ;;  %v18767_v43 = vunpack.c.h.bf16 %v12852_v9  ;;  %10645 = vmatmul.mubr.msk.bf16.gmra.mrb[48].mxu0 %vm19098_vm0, %v12156_v8  ;;  %v12895_v28 = vld [vmem:[%s12249_s17 + $0x188] sm:$0xff]  }
  0x87   : > { %4622 = vperm.xlu1 %11144, %v12764_v53   ;;  %11763 = vrcp.f32 %v3998_v50  ;;  %v3618_v4 = vrot.slane %v3617_v33, 4  ;;  %v3999_v17 = vmax.f32 %v12861_v34, 1.0  ;;  %v12887_v2 = vadd.f32 %v3478_v3, %v3477_v25  ;;  %10724 = vmatprep.subr.bf16.mxu1 %v11518_v42 }
  0x88   : > { %4652 = vperm.xlu0 %11133, %v12740_v37   ;;  %v4005_v37 = vmax.f32 %v12854_v40, 1.0  ;;  %v3714_v53 = vsel %vm3407_vm1, %v18768_v27, 0.0  ;;  %v3715_v41 = vsel %vm3407_vm1, %v18767_v43, 0.0  ;;  %11765 = vrcp.f32 %v3990_v10  ;;  %10648 = vmatprep.mubr.msk.bf16.mxu0 %vm19098_vm0, %v12157_v32  ;;  %v12158_v32 = vld [vmem:[%s12249_s17 + $0xd8] sm:$0xff]  }
  0x89   : > { %v11758_v39 = vpop.eup %11757  ;;  %19148 = vst [vmem:[#allocation19_spill] sm:$0xff] %v12887_v2  ;;  %v12889_v50 = vadd.f32 %v3685_v19, %v3684_v20  ;;  %v12892_v6 = vadd.f32 %v3715_v41, %v3714_v53  ;;  %11767 = vrcp.f32 %v4013_v61  ;;  %10725 = vmatpush3.bf16.msra.mxu1 %v11518_v42  ;;  %v3619_v25 = vadd.f32 %v3618_v4, %v3617_v33  ;;  %v11521_v20 = vld [vmem:[%s18725_s7 + $0x8] sm:$0xff]   ;;  %v12905_v19 = vld [vmem:[%s12249_s17 + $0x180] sm:$0xff]  }
  0x8a   : > { %11769 = vrcp.f32 %v4005_v37  ;;  %v18757_v61 = vunpack.c.h.bf16 %v12895_v28  ;;  %v3991_v8 = vmax.f32 %v12887_v2, 1.0  ;;  %v18765_v33 = vunpack.c.l.bf16 %v12895_v28  ;;  %10726 = vmatprep.subr.bf16.mxu1 %v11521_v20  ;;  %v12159_v53 = vld [vmem:[%s12249_s17 + $0xe0] sm:$0xff]  }
  0x8b   : > { %4697 = vperm.xlu1 %11144, %v12779_v56   ;;  %19149 = vst [vmem:[#allocation20_spill] sm:$0xff] %v12889_v50  ;;  %v3692_v56 = vrot.slane %v3691_v48, 2  ;;  %v11760_v10 = vpop.eup %11759  ;;  %11771 = vrcp.f32 %v3999_v17  ;;  %v4014_v14 = vmax.f32 %v12889_v50, 1.0  ;;  %v18759_v17 = vunpack.c.l.bf16 %v12905_v19 }
  0x8c   : > { %4582 = vperm.xlu0 %11133, %v12769_v49   ;;  %v3613_v49 = vrot.slane %v3612_v23, 1  ;;  %v11762_v3 = vpop.eup %11761  ;;  %v3849_v42 = vsel %vm3407_vm1, %v18765_v33, 0.0  ;;  %v18758_v41 = vunpack.c.h.bf16 %v12905_v19  ;;  %11773 = vrcp.f32 %v3991_v8  ;;  %v11533_v33 = vld [vmem:[%s18725_s7 + $0x38] sm:$0xff]  }
  0x8d   : > { %v3693_v4 = vadd.f32 %v3692_v56, %v3691_v48  ;;  %10727 = vmatpush3.bf16.msra.mxu1 %v11521_v20  ;;  %v3840_v20 = vsel %vm3407_vm1, %v18759_v17, 0.0  ;;  %11775 = vrcp.f32 %v4014_v14  ;;  %v19159_v43 = vunpack.c.h.bf16 %v12774_v45 }
  0x8e   : > { %v12911_v37 = vadd.f32 %v3613_v49, %v3612_v23  ;;  %v11522_v23 = vld [vmem:[%s18725_s7 + $0x10] sm:$0xff]   ;;  %10649 = vmatmul.mubr.msk.bf16.gmra.mrb[52].mxu0 %vm19098_vm0, %v12158_v32  ;;  %v3841_v56 = vsel %vm3407_vm1, %v18758_v41, 0.0  ;;  %v11525_v41 = vld [vmem:[%s18725_s7 + $0x18] sm:$0xff]  }
  0x8f   : > { %4627 = vperm.xlu1 %11144, %v12833_v44   ;;  %v3620_v44 = vrot.slane %v3619_v25, 2  ;;  %10728 = vmatprep.subr.bf16.mxu1 %v11522_v23 }
  0x90   : > { %4657 = vperm.xlu0 %11133, %v12789_v1   ;;  %19150 = vst [vmem:[#allocation21_spill] sm:$0xff] %v12911_v37  ;;  %v3850_v1 = vsel %vm3407_vm1, %v18757_v61, 0.0  ;;  %v4006_v61 = vmax.f32 %v12911_v37, 1.0  ;;  %10652 = vmatprep.mubr.msk.bf16.mxu0 %vm19098_vm0, %v12159_v53 }
  0x91   : > { %v12925_v48 = vadd.f32 %v3850_v1, %v3849_v42  ;;  %v11764_v49 = vpop.eup %11763  ;;  %10729 = vmatpush3.bf16.msra.mxu1 %v11522_v23  ;;  %v3694_v1 = vrot.slane %v3693_v4, 1  ;;  %v3621_v42 = vadd.f32 %v3620_v44, %v3619_v25  ;;  %v12947_v23 = vld [vmem:[%s12249_s17 + $0x1c0] sm:$0xff]  }
  0x92   : > { %v11766_v32 = vpop.eup %11765  ;;  %10730 = vmatprep.subr.bf16.mxu1 %v11525_v41  ;;  %11777 = vrcp.f32 %v4006_v61 }
  0x93   : > { %4702 = vperm.xlu1 %11144, %v11760_v10   ;;  %v12939_v10 = vld [vmem:[%s12249_s17 + $0x1c8] sm:$0xff]   ;;  %v11768_v17 = vpop.eup %11767  ;;  %v12949_v14 = vadd.f32 %v3694_v1, %v3693_v4  ;;  %v3622_v25 = vrot.slane %v3621_v42, 1  ;;  %v18761_v4 = vunpack.c.h.bf16 %v12947_v23 }
  0x94   : > { %4587 = vperm.xlu0 %11133, %v11758_v39   ;;  %v12936_v39 = vadd.f32 %v3841_v56, %v3840_v20  ;;  %v11770_v8 = vpop.eup %11769  ;;  %v18764_v53 = vunpack.c.l.bf16 %v12939_v10  ;;  %v18760_v56 = vunpack.c.h.bf16 %v12939_v10 }
  0x95   : > { %v11772_v20 = vpop.eup %11771  ;;  %10731 = vmatpush3.bf16.msra.mxu1 %v11525_v41  ;;  %19151 = vst [vmem:[#allocation22_spill] sm:$0xff] %v12949_v14  ;;  %v18762_v41 = vunpack.c.l.bf16 %v12947_v23  ;;  %v4015_v1 = vmax.f32 %v12949_v14, 1.0 }
  0x96   : > { %v3922_v44 = vsel %vm3407_vm1, %v18760_v56, 0.0  ;;  %10653 = vmatmul.mubr.msk.bf16.gmra.mrb[56].mxu0 %vm19098_vm0, %v12491_v11  ;;  %v12969_v56 = vadd.f32 %v3622_v25, %v3621_v42  ;;  %v11529_v11 = vld [vmem:[%s18725_s7 + $0x28] sm:$0xff]  }
  0x97   : > { %4632 = vperm.xlu1 %11144, %v11764_v49   ;;  %v11526_v49 = vld [vmem:[%s18725_s7 + $0x20] sm:$0xff]   ;;  %10656 = vmatprep.mubr.msk.bf16.mxu0 %vm19098_vm0, %v12584_v12  ;;  %v3912_v12 = vsel %vm3407_vm1, %v18762_v41, 0.0  ;;  %11779 = vrcp.f32 %v4015_v1  ;;  %v19154_v41 = vunpack.c.h.bf16 %v12709_v24  ;;  %v12998_v1 = vld [vmem:[%s12249_s17 + $0x118] sm:$0xff]  }
  0x98   : > { %4662 = vperm.xlu0 %11133, %v11762_v3   ;;  %v3921_v3 = vsel %vm3407_vm1, %v18764_v53, 0.0  ;;  %10732 = vmatprep.subr.bf16.mxu1 %v11526_v49  ;;  %19152 = vst [vmem:[#allocation23_spill] sm:$0xff] %v12969_v56 }
  0x99   : > { %v12962_v61 = vadd.f32 %v3922_v44, %v3921_v3  ;;  %10733 = vmatpush3.bf16.msra.mxu1 %v11526_v49  ;;  %v12981_v44 = vld [vmem:[%s12249_s17 + $0x158] sm:$0xff]   ;;  %v4007_v3 = vmax.f32 %v12969_v56, 1.0  ;;  %v13079_v56 = vpop.permute.xlu1 %11146 }
  0x9a   : > { %10734 = vmatprep.subr.bf16.mxu1 %v11529_v11  ;;  %v18763_v49 = vunpack.c.l.bf16 %v12981_v44  ;;  %19169 = vst [vmem:[#allocation27_spill] sm:$0xff] %v13079_v56  ;;  %v19179_v34 = vunpack.c.h.bf16 %v12981_v44 }
  0x9b   : > { %4707 = vperm.xlu1 %11144, %v11768_v17   ;;  %v3913_v17 = vsel %vm3407_vm1, %v18761_v4, 0.0  ;;  %v19153_v4 = vunpack.c.l.bf16 %v12709_v24  ;;  %11781 = vrcp.f32 %v4007_v3 }
  0x9c   : > { %4592 = vperm.xlu0 %11133, %v11766_v32   ;;  %v11774_v32 = vpop.eup %11773  ;;  %v12983_v25 = vadd.f32 %v3913_v17, %v3912_v12  ;;  %v18766_v12 = vunpack.c.h.bf16 %v12981_v44 }
  0x9d   : > { %v11776_v42 = vpop.eup %11775  ;;  %10735 = vmatpush3.bf16.msra.mxu1 %v11529_v11  ;;  %v11300_v17 = vpack.i.bf16 %v19154_v41, %v19153_v4  ;;  %v3795_v11 = vsel %vm3407_vm1, %v18763_v49, 0.0  ;;  %v18771_v41 = vunpack.c.l.bf16 %v12998_v1  ;;  %v19157_v49 = vunpack.c.h.bf16 %v12723_v13  ;;  %v13109_v2 = vpop.permute.xlu1 %11151 }
  0x9e   : > { %10657 = vmatmul.mubr.msk.bf16.gmra.mrb[60].mxu0 %vm19098_vm0, %v12629_v26  ;;  %v3796_v4 = vsel %vm3407_vm1, %v18766_v12, 0.0  ;;  %v18770_v26 = vunpack.c.h.bf16 %v12998_v1  ;;  %v19158_v12 = vunpack.c.l.bf16 %v12774_v45  ;;  %19175 = vst [vmem:[#allocation29_spill] sm:$0xff] %v13109_v2 }
  0x9f   : > { %4637 = vperm.xlu1 %11144, %v11772_v20   ;;  %v11778_v20 = vpop.eup %11777  ;;  %10660 = vmatprep.mubr.msk.bf16.mxu0 %vm19098_vm0, %v12723_v13  ;;  %v13023_v18 = vadd.f32 %v3796_v4, %v3795_v11  ;;  %v13045_v4 = vld [vmem:[%s12249_s17 + $0x190] sm:$0xff]  }
  0xa0   : > { %4667 = vperm.xlu0 %11133, %v11770_v8   ;;  %v11530_v8 = vld [vmem:[%s18725_s7 + $0x30] sm:$0xff]   ;;  %v11310_v27 = vpack.i.bf16 %v19159_v43, %v19158_v12  ;;  %v3724_v3 = vsel %vm3407_vm1, %v18770_v26, 0.0  ;;  %v19160_v43 = vunpack.c.l.bf16 %v12777_v22 }
  0xa1   : > { %10736 = vmatprep.subr.bf16.mxu1 %v11530_v8  ;;  %v11780_v11 = vpop.eup %11779  ;;  %v13145_v60 = vpop.permute.xlu1 %11161 }
  0xa2   : > { %10737 = vmatpush3.bf16.msra.mxu1 %v11530_v8  ;;  %v13034_v8 = vld [vmem:[%s12249_s17 + $0x1d0] sm:$0xff]   ;;  %19183 = vst [vmem:[#allocation31_spill] sm:$0xff] %v13145_v60  ;;  %v13166_v60 = vld [vmem:[%s12249_s17 + $0x168] sm:$0xff]  }
  0xa3   : > { %4712 = vperm.xlu1 %11144, %v11776_v42   ;;  %v19156_v42 = vunpack.c.l.bf16 %v12723_v13  ;;  %v3723_v13 = vsel %vm3407_vm1, %v18771_v41, 0.0  ;;  %10738 = vmatprep.subr.bf16.mxu1 %v11533_v33  ;;  %v13068_v41 = vld [vmem:[%s12249_s17 + $0x160] sm:$0xff]  }
  0xa4   : > { %4597 = vperm.xlu0 %11133, %v11774_v32   ;;  %v13005_v32 = vpop.permute.xlu0 %11135  ;;  %v596_v37 = vunpack.c.l.bf16 %v13068_v41 }
  0xa5   : > { %19155 = vst [vmem:[#allocation24_spill] sm:$0xff] %v13005_v32  ;;  %v11295_v53 = vpack.i.bf16 %v19157_v49, %v19156_v42  ;;  %v13031_v49 = vadd.f32 %v3724_v3, %v3723_v13  ;;  %v19163_v42 = vunpack.c.h.bf16 %v12831_v58  ;;  %v19167_v32 = vunpack.c.l.bf16 %v12895_v28 }
  0xa6   : > { %10739 = vmatpush3.bf16.msra.mxu1 %v11533_v33  ;;  %10661 = vmatmul.mubr.msk.bf16.gmra.mrb[64].mxu0 %vm19098_vm0, %v12709_v24  ;;  %v624_v33 = vunpack.c.l.bf16 %v13034_v8 }
  0xa7   : > { %11301 = vperm.xlu1 %11144, %v11300_v17   ;;  %10664 = vmatprep.mubr.msk.bf16.mxu0 %vm19098_vm0, %v12852_v9  ;;  %v11320_v3 = vpack.i.bf16 %v19163_v42, %v592_v38  ;;  %v19165_v38 = vunpack.c.l.bf16 %v12852_v9  ;;  %v19166_v42 = vunpack.c.h.bf16 %v12852_v9  ;;  %v597_v9 = vunpack.c.h.bf16 %v13068_v41 }
  0xa8   : > { %4672 = vperm.xlu0 %11133, %v11778_v20   ;;  %v19161_v20 = vunpack.c.h.bf16 %v12777_v22  ;;  %v13040_v12 = vpop.permute.xlu0 %11140  ;;  %v3930_v13 = vsel %vm3407_vm1, %v624_v33, 0.0 }
  0xa9   : > { %19162 = vst [vmem:[#allocation25_spill] sm:$0xff] %v13040_v12  ;;  %v11315_v12 = vpack.i.bf16 %v19166_v42, %v19165_v38  ;;  %v19171_v38 = vunpack.c.l.bf16 %v12905_v19  ;;  %v19172_v42 = vunpack.c.h.bf16 %v12905_v19  ;;  %v3805_v50 = vsel %vm3407_vm1, %v597_v9, 0.0 }
  0xaa   : > { %v11305_v17 = vpack.i.bf16 %v19161_v20, %v19160_v43  ;;  %v608_v43 = vunpack.c.l.bf16 %v13045_v4  ;;  %v11782_v20 = vpop.eup %11781 }
  0xab   : > { %11311 = vperm.xlu1 %11144, %v11310_v27   ;;  %v625_v27 = vunpack.c.h.bf16 %v13034_v8 }
  0xac   : > { %11296 = vperm.xlu0 %11133, %v11295_v53   ;;  %v13052_v53 = vld [vmem:[%s12249_s17 + $0x120] sm:$0xff]   ;;  %v13063_v8 = vpop.permute.xlu0 %11156 }
  0xad   : > { %v3931_v24 = vsel %vm3407_vm1, %v625_v27, 0.0  ;;  %19164 = vst [vmem:[#allocation26_spill] sm:$0xff] %v13063_v8 }
  0xae   : > { %v13061_v26 = vadd.f32 %v3931_v24, %v3930_v13  ;;  %v19168_v24 = vunpack.c.h.bf16 %v12895_v28  ;;  %10665 = vmatmul.mubr.msk.bf16.gmra.mrb[68].mxu0 %vm19098_vm0, %v12998_v1 }
  0xaf   : > { %4717 = vperm.xlu1 %11144, %v11780_v11   ;;  %v3858_v11 = vsel %vm3407_vm1, %v608_v43, 0.0  ;;  %10668 = vmatprep.mubr.msk.bf16.mxu0 %vm19098_vm0, %v13052_v53 }
  0xb0   : > { %11306 = vperm.xlu0 %11133, %v11305_v17   ;;  %v609_v17 = vunpack.c.h.bf16 %v13045_v4  ;;  %v11330_v13 = vpack.i.bf16 %v19168_v24, %v19167_v32  ;;  %v13094_v32 = vpop.permute.xlu0 %11166  ;;  %v11325_v24 = vpack.i.bf16 %v19172_v42, %v19171_v38  ;;  %v19177_v42 = vunpack.c.h.bf16 %v12947_v23 }
  0xb1   : > { %19170 = vst [vmem:[#allocation28_spill] sm:$0xff] %v13094_v32  ;;  %v581_v32 = vunpack.c.h.bf16 %v13052_v53 }
  0xb2   : > { %v3859_v8 = vsel %vm3407_vm1, %v609_v17, 0.0 }
  0xb3   : > { %11321 = vperm.xlu1 %11144, %v11320_v3   ;;  %v13083_v14 = vadd.f32 %v3859_v8, %v3858_v11  ;;  %v13088_v3 = vld [vmem:[%s12249_s17 + $0x128] sm:$0xff]   ;;  %v19173_v8 = vunpack.c.l.bf16 %v12939_v10  ;;  %v19174_v11 = vunpack.c.h.bf16 %v12939_v10  ;;  %v19176_v10 = vunpack.c.l.bf16 %v12947_v23  ;;  %v13133_v23 = vld [vmem:[%s12249_s17 + $0x138] sm:$0xff]  }
  0xb4   : > { %4677 = vperm.xlu0 %11133, %v11782_v20   ;;  %v13092_v20 = vld [vmem:[%s12249_s17 + $0x130] sm:$0xff]   ;;  %v3733_v7 = vsel %vm3407_vm1, %v581_v32, 0.0 }
  0xb5   : > { %v11340_v56 = vpack.i.bf16 %v19174_v11, %v19173_v8  ;;  %v11335_v8 = vpack.i.bf16 %v19177_v42, %v19176_v10  ;;  %v19178_v11 = vunpack.c.l.bf16 %v12981_v44  ;;  %v19181_v10 = vunpack.c.l.bf16 %v12998_v1 }
  0xb6   : > { %10669 = vmatmul.mubr.msk.bf16.gmra.mrb[72].mxu0 %vm19098_vm0, %v13088_v3  ;;  %v19182_v42 = vunpack.c.h.bf16 %v12998_v1  ;;  %v11355_v1 = vpack.i.bf16 %v609_v17, %v608_v43  ;;  %v13170_v43 = vpop.permute.xlu1 %11171 }
  0xb7   : > { %11331 = vperm.xlu1 %11144, %v11330_v13   ;;  %v580_v13 = vunpack.c.l.bf16 %v13052_v53  ;;  %v11350_v40 = vpack.i.bf16 %v19179_v34, %v19178_v11  ;;  %10672 = vmatprep.mubr.msk.bf16.mxu0 %vm19098_vm0, %v13092_v20  ;;  %v11360_v11 = vpack.i.bf16 %v625_v27, %v624_v33  ;;  %v11370_v33 = vpack.i.bf16 %v597_v9, %v596_v37 }
  0xb8   : > { %11316 = vperm.xlu0 %11133, %v11315_v12   ;;  %v3804_v12 = vsel %vm3407_vm1, %v596_v37, 0.0  ;;  %19186 = vst [vmem:[#allocation34_spill] sm:$0xff] %v13170_v43  ;;  %v599_v43 = vunpack.c.h.bf16 %v13166_v60 }
  0xb9   : > { %v13111_v38 = vadd.f32 %v3805_v50, %v3804_v12  ;;  %v3732_v53 = vsel %vm3407_vm1, %v580_v13, 0.0  ;;  %v11365_v9 = vpack.i.bf16 %v581_v32, %v580_v13 }
  0xba   : > { %v13125_v50 = vadd.f32 %v3733_v7, %v3732_v53  ;;  %v11345_v7 = vpack.i.bf16 %v19182_v42, %v19181_v10  ;;  %v610_v10 = vunpack.c.l.bf16 %v13148_v47  ;;  %v13187_v32 = vpop.permute.xlu1 %11181  ;;  %v3814_v13 = vsel %vm3407_vm1, %v599_v43, 0.0 }
  0xbb   : > { %11341 = vperm.xlu1 %11144, %v11340_v56   ;;  %v498_v56 = vld [vmem:[%s12249_s17 + $0x1d8] sm:$0xff]   ;;  %19189 = vst [vmem:[#allocation37_spill] sm:$0xff] %v13187_v32 }
  0xbc   : > { %11326 = vperm.xlu0 %11133, %v11325_v24   ;;  %v13128_v24 = vpop.permute.xlu0 %11176  ;;  %v626_v53 = vunpack.c.l.bf16 %v498_v56  ;;  %v627_v2 = vunpack.c.h.bf16 %v498_v56  ;;  %v611_v56 = vunpack.c.h.bf16 %v13148_v47  ;;  %v3867_v37 = vsel %vm3407_vm1, %v610_v10, 0.0 }
  0xbd   : > { %19180 = vst [vmem:[#allocation30_spill] sm:$0xff] %v13128_v24 }
  0xbe   : > { %10673 = vmatmul.mubr.msk.bf16.gmra.mrb[76].mxu0 %vm19098_vm0, %v13133_v23  ;;  %v3868_v42 = vsel %vm3407_vm1, %v611_v56, 0.0  ;;  %v11375_v31 = vpack.i.bf16 %v611_v56, %v610_v10 }
  0xbf   : > { %11351 = vperm.xlu1 %11144, %v11350_v40   ;;  %v3939_v40 = vsel %vm3407_vm1, %v626_v53, 0.0  ;;  %10676 = vmatprep.mubr.msk.bf16.mxu0 %vm19098_vm0, %v12777_v22  ;;  %v598_v22 = vunpack.c.l.bf16 %v13166_v60 }
  0xc0   : > { %11336 = vperm.xlu0 %11133, %v11335_v8   ;;  %v3940_v8 = vsel %vm3407_vm1, %v627_v2, 0.0  ;;  %v13154_v5 = vpop.permute.xlu0 %11186 }
  0xc1   : > { %19184 = vst [vmem:[#allocation32_spill] sm:$0xff] %v13154_v5  ;;  %v13156_v27 = vadd.f32 %v3940_v8, %v3939_v40  ;;  %v13175_v8 = vadd.f32 %v3868_v42, %v3867_v37 }
  0xc3   : > { %11361 = vperm.xlu1 %11144, %v11360_v11   ;;  %19185 = vst [vmem:[#allocation33_spill] sm:$0xff] %v13156_v27  ;;  %v11380_v11 = vpack.i.bf16 %v627_v2, %v626_v53  ;;  %19187 = vst [vmem:[#allocation35_spill] sm:$0xff] %v13175_v8  ;;  %v582_v2 = vunpack.c.l.bf16 %v13088_v3  ;;  %v11390_v53 = vpack.i.bf16 %v599_v43, %v598_v22  ;;  %v13264_v8 = vld [vmem:[%s12249_s17 + $0x1e8] sm:$0xff]  }
  0xc4   : > { %11346 = vperm.xlu0 %11133, %v11345_v7   ;;  %v13182_v62 = vpop.permute.xlu0 %11196  ;;  %19204 = vst [vmem:[#allocation52_spill] sm:$0xff] %v13264_v8 }
  0xc5   : > { %19188 = vst [vmem:[#allocation36_spill] sm:$0xff] %v13182_v62  ;;  %v3741_v10 = vsel %vm3407_vm1, %v582_v2, 0.0  ;;  %v13204_v62 = vpop.permute.xlu1 %11191 }
  0xc6   : > { %10677 = vmatmul.mubr.msk.bf16.gmra.mrb[80].mxu0 %vm19098_vm0, %v12774_v45  ;;  %v13202_v45 = vld [vmem:[%s12249_s17 + $0x1e0] sm:$0xff]   ;;  %19194 = vst [vmem:[#allocation42_spill] sm:$0xff] %v13204_v62 }
  0xc7   : > { %11371 = vperm.xlu1 %11144, %v11370_v33   ;;  %v583_v33 = vunpack.c.h.bf16 %v13088_v3  ;;  %19193 = vst [vmem:[#allocation41_spill] sm:$0xff] %v13202_v45  ;;  %10680 = vmatprep.mubr.msk.bf16.mxu0 %vm19098_vm0, %v12831_v58  ;;  %v13209_v3 = vld [vmem:[%s12249_s17 + $0x1a0] sm:$0xff]   ;;  %v629_v43 = vunpack.c.h.bf16 %v13202_v45 }
  0xc8   : > { %11356 = vperm.xlu0 %11133, %v11355_v1   ;;  %v3813_v1 = vsel %vm3407_vm1, %v598_v22, 0.0  ;;  %v13197_v37 = vpop.permute.xlu0 %11206  ;;  %v612_v58 = vunpack.c.l.bf16 %v13209_v3 }
  0xc9   : > { %v13193_v42 = vadd.f32 %v3814_v13, %v3813_v1  ;;  %v3742_v56 = vsel %vm3407_vm1, %v583_v33, 0.0  ;;  %19191 = vst [vmem:[#allocation39_spill] sm:$0xff] %v13197_v37  ;;  %v3949_v1 = vsel %vm3407_vm1, %v629_v43, 0.0 }
  0xcb   : > { %11381 = vperm.xlu1 %11144, %v11380_v11   ;;  %19190 = vst [vmem:[#allocation38_spill] sm:$0xff] %v13193_v42  ;;  %v13199_v11 = vadd.f32 %v3742_v56, %v3741_v10  ;;  %v3876_v56 = vsel %vm3407_vm1, %v612_v58, 0.0 }
  0xcc   : > { %11366 = vperm.xlu0 %11133, %v11365_v9   ;;  %v11385_v9 = vpack.i.bf16 %v583_v33, %v582_v2  ;;  %v13215_v22 = vpop.permute.xlu0 %11216  ;;  %v13222_v33 = vpop.permute.xlu1 %11201 }
  0xcd   : > { %19192 = vst [vmem:[#allocation40_spill] sm:$0xff] %v13199_v11  ;;  %19195 = vst [vmem:[#allocation43_spill] sm:$0xff] %v13215_v22 }
  0xce   : > { %10681 = vmatmul.mubr.msk.bf16.gmra.mrb[84].mxu0 %vm19098_vm0, %v12981_v44  ;;  %19197 = vst [vmem:[#allocation45_spill] sm:$0xff] %v13222_v33  ;;  %v613_v44 = vunpack.c.h.bf16 %v13209_v3  ;;  %v9945_v33 = vadd.f32 -1.0, %v12446_v30  ;;  %v584_v30 = vunpack.c.l.bf16 %v13092_v20 }
  0xcf   : > { %11391 = vperm.xlu1 %11144, %v11390_v53   ;;  %10684 = vmatprep.mubr.msk.bf16.mxu0 %vm19098_vm0, %v13068_v41  ;;  %v3780_v41 = vrot.slane %v12816_v29, 4 }
  0xd0   : > { %11376 = vperm.xlu0 %11133, %v11375_v31   ;;  %v628_v31 = vunpack.c.l.bf16 %v13202_v45  ;;  %v9946_v45 = vadd.f32 -1.0, %v12458_v21 }
  0xd2   : > { %v11400_v2 = vpack.i.bf16 %v629_v43, %v628_v31  ;;  %v3948_v13 = vsel %vm3407_vm1, %v628_v31, 0.0  ;;  %v3877_v43 = vsel %vm3407_vm1, %v613_v44, 0.0  ;;  %v11395_v31 = vpack.i.bf16 %v613_v44, %v612_v58  ;;  %v13247_v58 = vpop.permute.xlu1 %11211 }
  0xd3   : > { %v13220_v53 = vadd.f32 %v3949_v1, %v3948_v13  ;;  %v13236_v1 = vpop.permute.xlu0 %11226  ;;  %v13238_v13 = vadd.f32 %v3877_v43, %v3876_v56  ;;  %19200 = vst [vmem:[#allocation48_spill] sm:$0xff] %v13247_v58  ;;  %v5848_v56 = vmax.f32 %v9945_v33, 1.0  ;;  %v5849_v11 = vmax.f32 %v9946_v45, 1.0 }
  0xd4   : > { %11386 = vperm.xlu0 %11133, %v11385_v9   ;;  %11401 = vperm.xlu1 %11144, %v11400_v2   ;;  %v13229_v9 = vld [vmem:[%s12249_s17 + $0x170] sm:$0xff]   ;;  %19198 = vst [vmem:[#allocation46_spill] sm:$0xff] %v13236_v1  ;;  %v9938_v33 = vadd.f32 -1.0, %v12474_v16  ;;  %v9939_v45 = vadd.f32 -1.0, %v12478_v54  ;;  %v3699_v16 = vrot.slane %v12771_v46, 4  ;;  %v13282_v54 = vld [vmem:[%s12249_s17 + $0x1a8] sm:$0xff]  }
  0xd5   : > { %19196 = vst [vmem:[#allocation44_spill] sm:$0xff] %v13220_v53  ;;  %19199 = vst [vmem:[#allocation47_spill] sm:$0xff] %v13238_v13  ;;  %v600_v62 = vunpack.c.l.bf16 %v13229_v9  ;;  %v601_v32 = vunpack.c.h.bf16 %v13229_v9  ;;  %v9937_v53 = vadd.f32 -1.0, %v12450_v52  ;;  %11783 = vrcp.f32 %v5848_v56 }
  0xd6   : > { %10685 = vmatmul.mubr.msk.bf16.gmra.mrb[88].mxu0 %vm19098_vm0, %v13166_v60  ;;  %v5841_v56 = vmax.f32 %v9938_v33, 1.0  ;;  %v9962_v33 = vadd.f32 -1.0, %v12535_v0 }
  0xd7   : > { %v3823_v44 = vsel %vm3407_vm1, %v601_v32, 0.0  ;;  %v11410_v1 = vpack.i.bf16 %v601_v32, %v600_v62  ;;  %v3822_v43 = vsel %vm3407_vm1, %v600_v62, 0.0  ;;  %v5840_v13 = vmax.f32 %v9937_v53, 1.0  ;;  %v13253_v42 = vpop.permute.xlu0 %11236  ;;  %10688 = vmatprep.mubr.msk.bf16.mxu0 %vm19098_vm0, %v13229_v9 }
  0xd8   : > { %11396 = vperm.xlu0 %11133, %v11395_v31   ;;  %v585_v31 = vunpack.c.h.bf16 %v13092_v20  ;;  %19201 = vst [vmem:[#allocation49_spill] sm:$0xff] %v13253_v42  ;;  %v13255_v52 = vadd.f32 %v3823_v44, %v3822_v43  ;;  %v3750_v32 = vsel %vm3407_vm1, %v584_v30, 0.0  ;;  %v9947_v62 = vadd.f32 -1.0, %v12476_v51  ;;  %v13266_v20 = vpop.permute.xlu1 %11221 }
  0xd9   : > { %11411 = vperm.xlu1 %11144, %v11410_v1   ;;  %19205 = vst [vmem:[#allocation53_spill] sm:$0xff] %v13266_v20  ;;  %11785 = vrcp.f32 %v5840_v13  ;;  %v3708_v53 = vrot.slane %v12762_v15, 4  ;;  %v630_v51 = vunpack.c.l.bf16 %v13264_v8  ;;  %v631_v44 = vunpack.c.h.bf16 %v13264_v8 }
  0xda   : > { %19202 = vst [vmem:[#allocation50_spill] sm:$0xff] %v13255_v52  ;;  %v3751_v21 = vsel %vm3407_vm1, %v585_v31, 0.0  ;;  %v11405_v58 = vpack.i.bf16 %v585_v31, %v584_v30  ;;  %11787 = vrcp.f32 %v5849_v11  ;;  %v9954_v43 = vadd.f32 -1.0, %v12506_v36 }
  0xdb   : > { %v13261_v1 = vadd.f32 %v3751_v21, %v3750_v32  ;;  %v13279_v13 = vpop.permute.xlu0 %11246  ;;  %v9953_v30 = vadd.f32 -1.0, %v12533_v63  ;;  %v3958_v11 = vsel %vm3407_vm1, %v631_v44, 0.0  ;;  %v11420_v31 = vpack.i.bf16 %v631_v44, %v630_v51 }
  0xdc   : > { %11406 = vperm.xlu0 %11133, %v11405_v58   ;;  %v5850_v58 = vmax.f32 %v9947_v62, 1.0  ;;  %19206 = vst [vmem:[#allocation54_spill] sm:$0xff] %v13279_v13  ;;  %v3957_v60 = vsel %vm3407_vm1, %v630_v51, 0.0  ;;  %v5842_v32 = vmax.f32 %v9939_v45, 1.0  ;;  %v3709_v36 = vadd.f32 %v3708_v53, %v12762_v15  ;;  %v13295_v63 = vpop.permute.xlu1 %11231 }
  0xdd   : > { %19203 = vst [vmem:[#allocation51_spill] sm:$0xff] %v13261_v1  ;;  %v3700_v62 = vadd.f32 %v3699_v16, %v12771_v46  ;;  %v3771_v42 = vrot.slane %v12822_v57, 4  ;;  %19208 = vst [vmem:[#allocation56_spill] sm:$0xff] %v13295_v63  ;;  %v13297_v20 = vadd.f32 %v3958_v11, %v3957_v60  ;;  %11421 = vperm.xlu1 %11144, %v11420_v31   ;;  %v614_v51 = vunpack.c.l.bf16 %v13282_v54  ;;  %v13306_v1 = vld [vmem:[%s12249_s17 + $0x178] sm:$0xff]  }
  0xde   : > { %v615_v45 = vunpack.c.h.bf16 %v13282_v54  ;;  %11789 = vrcp.f32 %v5841_v56  ;;  %v5857_v0 = vmax.f32 %v9954_v43, 1.0  ;;  %v3781_v15 = vadd.f32 %v3780_v41, %v12816_v29  ;;  %10689 = vmatmul.mubr.msk.bf16.gmra.mrb[92].mxu0 %vm19098_vm0, %v13306_v1 }
  0xdf   : > { %19209 = vst [vmem:[#allocation57_spill] sm:$0xff] %v13297_v20  ;;  %11791 = vrcp.f32 %v5850_v58  ;;  %v5856_v46 = vmax.f32 %v9953_v30, 1.0  ;;  %v5865_v31 = vmax.f32 %v9962_v33, 1.0  ;;  %v9961_v60 = vadd.f32 -1.0, %v12540_v55  ;;  %v13311_v63 = vpop.permute.xlu0 %11256  ;;  %v13314_v29 = vpop.eup %11783  ;;  %10692 = vmatprep.mubr.msk.bf16.mxu0 %vm19098_vm0, %v12905_v19 }
  0xe0   : > { %v3886_v16 = vsel %vm3407_vm1, %v615_v45, 0.0  ;;  %v11415_v44 = vpack.i.bf16 %v615_v45, %v614_v51  ;;  %11793 = vrcp.f32 %v5842_v32  ;;  %19212 = vst [vmem:[#allocation60_spill] sm:$0xff] %v13311_v63  ;;  %v3885_v56 = vsel %vm3407_vm1, %v614_v51, 0.0  ;;  %v19214_v63 = vld [vmem:[#allocation2_spill] sm:$0xff]  ;;  %v13326_v52 = vpop.permute.xlu1 %11241 }
  0xe1   : > { %v3710_v43 = vrot.slane %v3709_v36, 2  ;;  %v3701_v58 = vrot.slane %v3700_v62, 2  ;;  %v3772_v41 = vadd.f32 %v3771_v42, %v12822_v57  ;;  %v13317_v30 = vadd.f32 %v3886_v16, %v3885_v56  ;;  %19215 = vst [vmem:[#allocation2_spill] sm:$0xff] %v13326_v52 }
  0xe2   : > { %11416 = vperm.xlu0 %11133, %v11415_v44   ;;  %11795 = vrcp.f32 %v5857_v0  ;;  %v3782_v32 = vrot.slane %v3781_v15, 2  ;;  %v602_v33 = vunpack.c.l.bf16 %v13306_v1  ;;  %v9948_v51 = vadd.f32 -1.0, %v19214_v63 }
  0xe3   : > { %19213 = vst [vmem:[#allocation61_spill] sm:$0xff] %v13317_v30  ;;  %v13319_v45 = vpop.eup %11785  ;;  %11797 = vrcp.f32 %v5856_v46  ;;  %v3789_v20 = vrot.slane %v12871_v59, 4  ;;  %v603_v57 = vunpack.c.h.bf16 %v13306_v1  ;;  %v5864_v42 = vmax.f32 %v9961_v60, 1.0  ;;  %v13331_v27 = vpop.permute.xlu0 %11266 }
  0xe4   : > { %v13322_v55 = vpop.eup %11787  ;;  %11799 = vrcp.f32 %v5865_v31  ;;  %v586_v16 = vunpack.c.l.bf16 %v13133_v23  ;;  %v3711_v44 = vadd.f32 %v3710_v43, %v3709_v36  ;;  %v3702_v0 = vadd.f32 %v3701_v58, %v3700_v62  ;;  %19216 = vst [vmem:[#allocation62_spill] sm:$0xff] %v13331_v27  ;;  %v13359_v27 = vld [vmem:[%s12249_s17 + $0x1f0] sm:$0xff]  }
  0xe5   : > { %v3773_v56 = vrot.slane %v3772_v41, 2  ;;  %v3831_v30 = vsel %vm3407_vm1, %v602_v33, 0.0  ;;  %v3783_v8 = vadd.f32 %v3782_v32, %v3781_v15  ;;  %v3832_v63 = vsel %vm3407_vm1, %v603_v57, 0.0  ;;  %19221 = vst [vmem:[#allocation65_spill] sm:$0xff] %v13359_v27 }
  0xe6   : > { %v11430_v46 = vpack.i.bf16 %v603_v57, %v602_v33  ;;  %v5851_v52 = vmax.f32 %v9948_v51, 1.0  ;;  %v3790_v31 = vadd.f32 %v3789_v20, %v12871_v59  ;;  %v3717_v36 = vrot.slane %v12892_v6, 4  ;;  %v13349_v59 = vpop.permute.xlu1 %11251  ;;  %10693 = vmatmul.mubr.msk.bf16.gmra.mrb[96].mxu0 %vm19098_vm0, %v12895_v28 }
  0xe7   : > { %v13342_v60 = vadd.f32 %v3832_v63, %v3831_v30  ;;  %v3759_v58 = vsel %vm3407_vm1, %v586_v16, 0.0  ;;  %v3712_v32 = vrot.slane %v3711_v44, 1  ;;  %v3852_v33 = vrot.slane %v12925_v48, 4  ;;  %19219 = vst [vmem:[#allocation63_spill] sm:$0xff] %v13349_v59  ;;  %v13382_v59 = vld [vmem:[%s12249_s17 + $0x1b0] sm:$0xff]   ;;  %10696 = vmatprep.mubr.msk.bf16.mxu0 %vm19098_vm0, %v13045_v4 }
  0xe8   : > { %v13135_v12 = vpop.f32.mrb[0].mxu0  ;;  %v13340_v62 = vpop.eup %11789  ;;  %11431 = vperm.xlu1 %11144, %v11430_v46   ;;  %11801 = vrcp.f32 %v5864_v42  ;;  %v3784_v30 = vrot.slane %v3783_v8, 1  ;;  %v3774_v57 = vadd.f32 %v3773_v56, %v3772_v41  ;;  %v3843_v63 = vrot.slane %v12936_v39, 4 }
  0xe9   : > { %v13137_v34 = vpop.f32.mrb[1].mxu0  ;;  %v3924_v46 = vrot.slane %v12962_v61, 4  ;;  %11803 = vrcp.f32 %v5851_v52  ;;  %v13369_v41 = vpop.permute.xlu0 %11276  ;;  %v3853_v52 = vadd.f32 %v3852_v33, %v12925_v48 }
  0xea   : > { %v13143_v24 = vpop.f32.mrb[2].mxu0  ;;  %v3775_v9 = vrot.slane %v3774_v57, 1 }
  0xeb   : > { %v13150_v35 = vpop.f32.mrb[3].mxu0  ;;  %v3925_v33 = vadd.f32 %v3924_v46, %v12962_v61 }
  0xee   : > { %10697 = vmatmul.mubr.msk.bf16.gmra.mrb[100].mxu0 %vm19098_vm0, %v13148_v47 }
  0xef   : > { %10700 = vmatprep.mubr.msk.bf16.mxu0 %vm19098_vm0, %v13209_v3 }
  0xf0   : > { %v13168_v7 = vpop.f32.mrb[4].mxu0 }
  0xf1   : > { %v13173_v17 = vpop.f32.mrb[5].mxu0 }
  0xf2   : > { %v13177_v40 = vpop.f32.mrb[6].mxu0 }
  0xf3   : > { %v13180_v5 = vpop.f32.mrb[7].mxu0 }
  0xf6   : > { %10701 = vmatmul.mubr.msk.bf16.gmra.mrb[104].mxu0 %vm19098_vm0, %v13282_v54 }
  0xf7   : > { %10704 = vmatprep.mubr.msk.bf16.mxu0 %vm19098_vm0, %v13382_v59 }
  0xf8   : > { %v13226_v10 = vpop.f32.mrb[8].mxu0 }
  0xf9   : > { %v13231_v22 = vpop.f32.mrb[9].mxu0 }
  0xfa   : > { %v13234_v37 = vpop.f32.mrb[10].mxu0 }
  0xfb   : > { %v13240_v2 = vpop.f32.mrb[11].mxu0 }
 0x100   : > { %v13287_v21 = vpop.f32.mrb[12].mxu0 }
 0x101   : > { %v13292_v13 = vpop.f32.mrb[13].mxu0 }
 0x102   : > { %19207 = vst [vmem:[#allocation55_spill] sm:$0xff] %v13292_v13  ;;  %v13302_v53 = vpop.f32.mrb[14].mxu0 }
 0x103   : > { %19210 = vst [vmem:[#allocation58_spill] sm:$0xff] %v13302_v53  ;;  %v13308_v11 = vpop.f32.mrb[15].mxu0  ;;  %v19217_v53 = vld [vmem:[#allocation3_spill] sm:$0xff] }
 0x104   : > { %19211 = vst [vmem:[#allocation59_spill] sm:$0xff] %v13308_v11  ;;  %v587_v11 = vunpack.c.h.bf16 %v13133_v23  ;;  %v13336_v13 = vadd.f32 -1.0, %v19217_v53  ;;  %19218 = vst [vmem:[#allocation3_spill] sm:$0xff] %v13342_v60  ;;  %v13346_v23 = vpop.eup %11791  ;;  %v3703_v53 = vrot.slane %v3702_v0, 1 }
 0x105   : > { %v13353_v51 = vpop.eup %11793 }
 0x106   : > { %v3760_v15 = vsel %vm3407_vm1, %v587_v11, 0.0  ;;  %v11425_v43 = vpack.i.bf16 %v587_v11, %v586_v16  ;;  %v3791_v11 = vrot.slane %v3790_v31, 2  ;;  %v3718_v16 = vadd.f32 %v3717_v36, %v12892_v6  ;;  %v13361_v60 = vpop.eup %11795 }
 0x107   : > { %v13351_v20 = vadd.f32 %v3760_v15, %v3759_v58  ;;  %19222 = vst [vmem:[#allocation66_spill] sm:$0xff] %v13361_v60  ;;  %v19223_v58 = vld [vmem:[#allocation4_spill] sm:$0xff]  ;;  %v13373_v56 = vpop.eup %11797  ;;  %v13375_v36 = vadd.f32 %v3712_v32, %v3711_v44  ;;  %v3915_v15 = vrot.slane %v12983_v25, 4  ;;  %v633_v44 = vunpack.c.h.bf16 %v13359_v27 }
 0x108   : > { %11426 = vperm.xlu0 %11133, %v11425_v43   ;;  %v13365_v42 = vadd.f32 -1.0, %v19223_v58  ;;  %19224 = vst [vmem:[#allocation4_spill] sm:$0xff] %v13369_v41  ;;  %v13371_v6 = vpop.f32.mrb[16].mxu0  ;;  %19226 = vst [vmem:[#allocation68_spill] sm:$0xff] %v13373_v56  ;;  %v13377_v43 = vadd.f32 %v3703_v53, %v3702_v0  ;;  %v13384_v58 = vpop.eup %11799  ;;  %v632_v41 = vunpack.c.l.bf16 %v13359_v27  ;;  %v3792_v32 = vadd.f32 %v3791_v11, %v3790_v31 }
 0x109   : > { %19220 = vst [vmem:[#allocation64_spill] sm:$0xff] %v13351_v20  ;;  %19225 = vst [vmem:[#allocation67_spill] sm:$0xff] %v13371_v6  ;;  %v13386_v20 = vadd.f32 %v3784_v30, %v3783_v8  ;;  %v13392_v0 = vpop.f32.mrb[17].mxu0  ;;  %v3719_v48 = vrot.slane %v3718_v16, 2  ;;  %v3844_v53 = vadd.f32 %v3843_v63, %v12936_v39  ;;  %v13396_v56 = vpop.permute.xlu1 %11261  ;;  %v3967_v30 = vsel %vm3407_vm1, %v633_v44, 0.0 }
 0x10a   : > { %19227 = vst [vmem:[#allocation69_spill] sm:$0xff] %v13375_v36  ;;  %19228 = vst [vmem:[#allocation70_spill] sm:$0xff] %v13377_v43  ;;  %v13398_v8 = vpop.f32.mrb[18].mxu0  ;;  %v3966_v1 = vsel %vm3407_vm1, %v632_v41, 0.0  ;;  %v616_v6 = vunpack.c.l.bf16 %v13382_v59  ;;  %v3854_v11 = vrot.slane %v3853_v52, 2  ;;  %v3916_v39 = vadd.f32 %v3915_v15, %v12983_v25  ;;  %v13419_v25 = vld [vmem:[%s12249_s17 + $0x1f8] sm:$0xff]   ;;  %v13421_v15 = vpop.eup %11801 }
 0x10b   : > { %19229 = vst [vmem:[#allocation71_spill] sm:$0xff] %v13384_v58  ;;  %19230 = vst [vmem:[#allocation72_spill] sm:$0xff] %v13386_v20  ;;  %v11440_v58 = vpack.i.bf16 %v633_v44, %v632_v41  ;;  %v13403_v27 = vpop.f32.mrb[19].mxu0  ;;  %v13407_v61 = vadd.f32 %v3967_v30, %v3966_v1  ;;  %v4017_v63 = vmax.f32 %v13375_v36, 1.0  ;;  %v4016_v46 = vmax.f32 %v13377_v43, 1.0 }
 0x10c   : > { %19231 = vst [vmem:[#allocation73_spill] sm:$0xff] %v13392_v0  ;;  %19232 = vst [vmem:[#allocation74_spill] sm:$0xff] %v13396_v56  ;;  %v617_v44 = vunpack.c.h.bf16 %v13382_v59  ;;  %v3894_v41 = vsel %vm3407_vm1, %v616_v6, 0.0  ;;  %v13413_v56 = vpop.permute.xlu0 %11286  ;;  %v3845_v31 = vrot.slane %v3844_v53, 2  ;;  %v3926_v0 = vrot.slane %v3925_v33, 2 }
 0x10d   : > { %19233 = vst [vmem:[#allocation75_spill] sm:$0xff] %v13398_v8  ;;  %19234 = vst [vmem:[#allocation76_spill] sm:$0xff] %v13403_v27  ;;  %11441 = vperm.xlu1 %11144, %v11440_v58   ;;  %v4025_v27 = vmax.f32 %v13386_v20, 1.0  ;;  %v13416_v8 = vadd.f32 %v3775_v9, %v3774_v57  ;;  %v3793_v30 = vrot.slane %v3792_v32, 1  ;;  %v3720_v1 = vadd.f32 %v3719_v48, %v3718_v16  ;;  %v13425_v60 = vpop.permute.xlu1 %11271  ;;  %v13429_v9 = vpop.eup %11803 }
 0x10e   : > { %19235 = vst [vmem:[#allocation77_spill] sm:$0xff] %v13407_v61  ;;  %19236 = vst [vmem:[#allocation78_spill] sm:$0xff] %v13413_v56  ;;  %v3895_v58 = vsel %vm3407_vm1, %v617_v44, 0.0  ;;  %v11435_v43 = vpack.i.bf16 %v617_v44, %v616_v6  ;;  %v3855_v36 = vadd.f32 %v3854_v11, %v3853_v52  ;;  %v3917_v61 = vrot.slane %v3916_v39, 2  ;;  %v13436_v44 = vld [vmem:[%s12249_s17 + $0x1b8] sm:$0xff]  }
 0x10f   : > { %19237 = vst [vmem:[#allocation79_spill] sm:$0xff] %v13419_v25  ;;  %v3798_v56 = vrot.slane %v13023_v18, 4  ;;  %19238 = vst [vmem:[#allocation80_spill] sm:$0xff] %v13425_v60  ;;  %v13427_v57 = vadd.f32 %v3895_v58, %v3894_v41  ;;  %11805 = vrcp.f32 %v4017_v63  ;;  %v3726_v20 = vrot.slane %v13031_v49, 4  ;;  %10705 = vmatmul.mubr.msk.bf16.gmra.mrb[108].mxu0 %vm19098_vm0, %v13436_v44 }
 0x110   : > { %19240 = vst [vmem:[#allocation82_spill] sm:$0xff] %v13429_v9  ;;  %11436 = vperm.xlu0 %11133, %v11435_v43   ;;  %v634_v16 = vunpack.c.l.bf16 %v13419_v25  ;;  %v635_v48 = vunpack.c.h.bf16 %v13419_v25  ;;  %11807 = vrcp.f32 %v4016_v46  ;;  %v4024_v6 = vmax.f32 %v13416_v8, 1.0  ;;  %v13441_v60 = vpop.permute.xlu0 %4562 }
 0x111   : > { %19239 = vst [vmem:[#allocation81_spill] sm:$0xff] %v13427_v57  ;;  %v3846_v52 = vadd.f32 %v3845_v31, %v3844_v53  ;;  %v3927_v11 = vadd.f32 %v3926_v0, %v3925_v33  ;;  %11809 = vrcp.f32 %v4025_v27  ;;  %v13438_v41 = vadd.f32 %v3793_v30, %v3792_v32  ;;  %19241 = vst [vmem:[#allocation83_spill] sm:$0xff] %v13441_v60  ;;  %v13449_v30 = vpop.permute.xlu1 %11281 }
 0x112   : > { %v3976_v58 = vsel %vm3407_vm1, %v635_v48, 0.0  ;;  %v11450_v63 = vpack.i.bf16 %v635_v48, %v634_v16  ;;  %v3721_v43 = vrot.slane %v3720_v1, 1  ;;  %v3856_v57 = vrot.slane %v3855_v36, 1  ;;  %19242 = vst [vmem:[#allocation84_spill] sm:$0xff] %v13449_v30 }
 0x113   : > { %v3918_v9 = vadd.f32 %v3917_v61, %v3916_v39  ;;  %v3799_v25 = vadd.f32 %v3798_v56, %v13023_v18  ;;  %v3727_v46 = vadd.f32 %v3726_v20, %v13031_v49  ;;  %v3975_v53 = vsel %vm3407_vm1, %v634_v16, 0.0 }
 0x114   : > { %11451 = vperm.xlu1 %11144, %v11450_v63   ;;  %v618_v0 = vunpack.c.l.bf16 %v13436_v44  ;;  %v619_v27 = vunpack.c.h.bf16 %v13436_v44  ;;  %v3847_v32 = vrot.slane %v3846_v52, 1  ;;  %v3928_v33 = vrot.slane %v3927_v11, 1 }
 0x115   : > { %v3933_v31 = vrot.slane %v13061_v26, 4  ;;  %v13451_v48 = vadd.f32 %v3976_v58, %v3975_v53  ;;  %v13455_v20 = vadd.f32 %v3721_v43, %v3720_v1  ;;  %v3919_v56 = vrot.slane %v3918_v9, 1  ;;  %v13463_v58 = vpop.permute.xlu0 %4602 }
 0x116   : > { %v3904_v39 = vsel %vm3407_vm1, %v619_v27, 0.0  ;;  %v11445_v18 = vpack.i.bf16 %v619_v27, %v618_v0  ;;  %v3903_v49 = vsel %vm3407_vm1, %v618_v0, 0.0  ;;  %v3800_v61 = vrot.slane %v3799_v25, 2  ;;  %19243 = vst [vmem:[#allocation85_spill] sm:$0xff] %v13463_v58 }
 0x117   : > { %v13457_v16 = vadd.f32 %v3904_v39, %v3903_v49  ;;  %v13459_v63 = vadd.f32 %v3856_v57, %v3855_v36  ;;  %v3728_v60 = vrot.slane %v3727_v46, 2  ;;  %v19244_v53 = vmax.f32 %v13336_v13, 1.0  ;;  %v13472_v36 = vpop.f32.mrb[20].mxu0 }
 0x118   : > { %11446 = vperm.xlu0 %11133, %v11445_v18   ;;  %v13467_v27 = vadd.f32 %v3847_v32, %v3846_v52  ;;  %v3934_v1 = vadd.f32 %v3933_v31, %v13061_v26  ;;  %v3861_v43 = vrot.slane %v13083_v14, 4  ;;  %5975 = vperm.xlu1 %11144, %v13340_v62   ;;  %v19245_v0 = vmax.f32 %v13365_v42, 1.0  ;;  %v13481_v52 = vpop.f32.mrb[21].mxu0  ;;  %v13486_v18 = vpop.permute.xlu1 %11291 }
 0x119   : > { %11811 = vrcp.f32 %v19244_v53  ;;  %v11806_v57 = vpop.eup %11805  ;;  %v4026_v19 = vmax.f32 %v13438_v41, 1.0  ;;  %v13477_v39 = vadd.f32 %v3928_v33, %v3927_v11  ;;  %v638_v13 = vlaneseq  ;;  %19246 = vst [vmem:[#allocation86_spill] sm:$0xff] %v13486_v18  ;;  %v19247_v11 = vld [vmem:[#allocation5_spill] sm:$0xff]  ;;  %v13497_v53 = vpop.f32.mrb[22].mxu0 }
 0x11a   : > { %11813 = vrcp.f32 %v19245_v0  ;;  %v11808_v26 = vpop.eup %11807  ;;  %v4018_v62 = vmax.f32 %v13455_v20, 1.0  ;;  %v13484_v32 = vadd.f32 %v3919_v56, %v3918_v9  ;;  %v3801_v31 = vadd.f32 %v3800_v61, %v3799_v25  ;;  %v19249_v9 = vld [vmem:[#allocation6_spill] sm:$0xff]  ;;  %v13511_v0 = vpop.permute.xlu0 %4572 }
 0x11b   : > { %11815 = vrcp.f32 %v4024_v6  ;;  %v11810_v42 = vpop.eup %11809  ;;  %v13491_v33 = vadd.f32 -1.0, %v19247_v11  ;;  %v4033_v28 = vmax.f32 %v13459_v63, 1.0  ;;  %v3729_v49 = vadd.f32 %v3728_v60, %v3727_v46  ;;  %v378_v60 = vld [vmem:[%s18726_s8] sm:$0xff]  ;;  %v13508_v46 = vpop.f32.mrb[23].mxu0  ;;  %19250 = vst [vmem:[#allocation6_spill] sm:$0xff] %v13511_v0 }
 0x11c   : > { %5970 = vperm.xlu0 %11133, %v13319_v45   ;;  %v13495_v6 = vshrl.u32 %v638_v13, 7  ;;  %v13500_v25 = vadd.f32 -1.0, %v19249_v9  ;;  %v4032_v56 = vmax.f32 %v13467_v27, 1.0  ;;  %v3935_v61 = vrot.slane %v3934_v1, 2  ;;  %6015 = vperm.xlu1 %11144, %v13322_v55  }
 0x11d   : > { %v3862_v4 = vadd.f32 %v3861_v43, %v13083_v14  ;;  %11817 = vrcp.f32 %v4026_v19  ;;  %v4041_v45 = vmax.f32 %v13477_v39, 1.0  ;;  %v4040_v11 = vmax.f32 %v13484_v32, 1.0 }
 0x11e   : > { %19248 = vst [vmem:[#allocation5_spill] sm:$0xff] %v13495_v6  ;;  %v18837_v13 = vsub.s32 0, %v13495_v6  ;;  %11819 = vrcp.f32 %v4018_v62  ;;  %v3802_v9 = vrot.slane %v3801_v31, 1  ;;  %v3730_v55 = vrot.slane %v3729_v49, 1  ;;  %v13524_v62 = vpop.permute.xlu1 %4567  ;;  %v19326_v6 = vld [vmem:[#allocation21_spill] sm:$0xff] }
 0x11f   : > { %11821 = vrcp.f32 %v4033_v28  ;;  %v13522_v58 = vadd.f32 %v3935_v61, %v3934_v1  ;;  %v3863_v0 = vrot.slane %v3862_v4, 2  ;;  %19251 = vst [vmem:[#allocation87_spill] sm:$0xff] %v13524_v62  ;;  %v19252_v1 = vld [vmem:[#allocation7_spill] sm:$0xff]  ;;  %v9959_v18 = vadd.f32 -1.0, %v19326_v6 }
 0x120   : > { %6010 = vperm.xlu0 %11133, %v13314_v29   ;;  %v13519_v43 = vrot.slane %v378_v60, %v18837_v13  ;;  %11823 = vrcp.f32 %v4032_v56  ;;  %4727 = vperm.xlu1 %11144, %v11806_v57   ;;  %v13537_v61 = vadd.f32 -1.0, %v19252_v1  ;;  %v13539_v57 = vadd.f32 %v3802_v9, %v3801_v31 }
 0x121   : > { %11825 = vrcp.f32 %v4041_v45  ;;  %v13554_v1 = vadd.f32 %v3863_v0, %v3862_v4 }
 0x122   : > { %v1204_v29 = vadd.f32 %v13135_v12, %v13519_v43  ;;  %v1196_v28 = vadd.f32 %v13137_v34, %v13519_v43  ;;  %v1207_v60 = vadd.f32 %v13143_v24, %v13519_v43  ;;  %11827 = vrcp.f32 %v4040_v11  ;;  %v13549_v24 = vpop.permute.xlu0 %4642 }
 0x123   : > { %v13534_v56 = vpop.eup %11811  ;;  %v1199_v47 = vadd.f32 %v13150_v35, %v13519_v43  ;;  %v13547_v34 = vadd.f32 %v3730_v55, %v3729_v49  ;;  %19253 = vst [vmem:[#allocation7_spill] sm:$0xff] %v13549_v24  ;;  %v1220_v11 = vadd.f32 %v13168_v7, %v13519_v43  ;;  %v13559_v55 = vpop.permute.xlu1 %4607  ;;  %v19262_v24 = vld [vmem:[#allocation73_spill] sm:$0xff] }
 0x124   : > { %v13545_v12 = vpop.eup %11813  ;;  %4722 = vperm.xlu0 %11133, %v11808_v26   ;;  %v1708_v45 = vmax.f32 %v1204_v29, 0.0  ;;  %v1709_v13 = vmax.f32 %v1207_v60, 0.0  ;;  %4767 = vperm.xlu1 %11144, %v11810_v42   ;;  %v1706_v3 = vmax.f32 %v1196_v28, 0.0  ;;  %v1212_v26 = vadd.f32 %v13173_v17, %v13519_v43  ;;  %19254 = vst [vmem:[#allocation88_spill] sm:$0xff] %v13559_v55 }
 0x125   : > { %v11816_v31 = vpop.eup %11815  ;;  %v1707_v35 = vmax.f32 %v1199_v47, 0.0  ;;  %v1223_v29 = vadd.f32 %v13177_v40, %v13519_v43  ;;  %v1215_v60 = vadd.f32 %v13180_v5, %v13519_v43  ;;  %v1712_v0 = vmax.f32 %v1220_v11, 0.0  ;;  %v12160_v11 = vld [vmem:[%s12249_s17 + $0x1c0] sm:$0xff]  }
 0x126   : > { %v1835_v49 = vpack.c.bf16 %v1709_v13, %v1708_v45  ;;  %v1710_v13 = vmax.f32 %v1212_v26, 0.0  ;;  %v1236_v17 = vadd.f32 %v13226_v10, %v13519_v43  ;;  %v1228_v5 = vadd.f32 %v13231_v22, %v13519_v43  ;;  %v13581_v10 = vpop.permute.xlu0 %4682  ;;  %10708 = vmatprep.mubr.msk.bf16.mxu0 %vm19098_vm0, %v12160_v11 }
 0x127   : > { %v1834_v7 = vpack.c.bf16 %v1707_v35, %v1706_v3  ;;  %v13565_v4 = vpop.eup %11817  ;;  %v1713_v40 = vmax.f32 %v1223_v29, 0.0  ;;  %v1711_v47 = vmax.f32 %v1215_v60, 0.0  ;;  %v1239_v45 = vadd.f32 %v13234_v37, %v13519_v43  ;;  %19255 = vst [vmem:[#allocation89_spill] sm:$0xff] %v13581_v10  ;;  %v13601_v59 = vpop.permute.xlu1 %4612 }
 0x128   : > { %4762 = vperm.xlu0 %11133, %v11816_v31   ;;  %v13570_v28 = vpop.eup %11819  ;;  %6020 = vperm.xlu1 %11144, %v13346_v23   ;;  %v10622_v31 = vpop.f32.mrb[24].mxu0  ;;  %v1231_v23 = vadd.f32 %v13240_v2, %v13519_v43  ;;  %v1252_v35 = vadd.f32 %v13287_v21, %v13519_v43  ;;  %v19256_v2 = vld [vmem:[#allocation55_spill] sm:$0xff]  ;;  %v19257_v21 = vld [vmem:[#allocation58_spill] sm:$0xff]  ;;  %v1260_v55 = vadd.f32 %v19262_v24, %v13519_v43 }
 0x129   : > { %10740 = vmatprep.mubr.bf16.mxu1 %v1834_v7  ;;  %v13577_v3 = vpop.eup %11821  ;;  %v1291_v22 = vpop.f32.mrb[25].mxu0  ;;  %v1837_v37 = vpack.c.bf16 %v1713_v40, %v1712_v0  ;;  %v1836_v29 = vpack.c.bf16 %v1711_v47, %v1710_v13  ;;  %v1716_v7 = vmax.f32 %v1236_v17, 0.0  ;;  %v1717_v54 = vmax.f32 %v1239_v45, 0.0  ;;  %19258 = vst [vmem:[#allocation55_spill] sm:$0xff] %v13601_v59  ;;  %v19259_v0 = vld [vmem:[#allocation66_spill] sm:$0xff]  ;;  %v19261_v47 = vld [vmem:[#allocation67_spill] sm:$0xff] }
 0x12a   : > { %10741 = vmatmul.mubr.bf16.vlgmr.msra.gmra.mrb[0].mxu1 %v1835_v49  ;;  %v13588_v26 = vpop.eup %11823  ;;  %v1714_v49 = vmax.f32 %v1228_v5, 0.0  ;;  %v1715_v14 = vmax.f32 %v1231_v23, 0.0  ;;  %v1244_v9 = vadd.f32 %v19256_v2, %v13519_v43  ;;  %v1255_v42 = vadd.f32 %v19257_v21, %v13519_v43  ;;  %v10623_v19 = vpop.f32.mrb[26].mxu0 }
 0x12b   : > { %v13592_v60 = vpop.eup %11825  ;;  %v13604_v13 = vpack.c.bf16 %v1717_v54, %v1716_v7  ;;  %10744 = vmatprep.mubr.bf16.mxu1 %v1836_v29  ;;  %v1720_v17 = vmax.f32 %v1252_v35, 0.0  ;;  %v1268_v5 = vadd.f32 %v19261_v47, %v13519_v43  ;;  %v1294_v45 = vpop.f32.mrb[27].mxu0  ;;  %v19263_v7 = vld [vmem:[#allocation75_spill] sm:$0xff]  ;;  %v19264_v35 = vld [vmem:[#allocation76_spill] sm:$0xff]  ;;  %v1276_v24 = vadd.f32 %v13481_v52, %v13519_v43 }
 0x12c   : > { %5980 = vperm.xlu0 %11133, %v13353_v51   ;;  %v13599_v10 = vpop.eup %11827  ;;  %6055 = vperm.xlu1 %11144, %v19259_v0   ;;  %v19260_v51 = vld [vmem:[#allocation59_spill] sm:$0xff]  ;;  %v1838_v23 = vpack.c.bf16 %v1715_v14, %v1714_v49  ;;  %v1718_v2 = vmax.f32 %v1244_v9, 0.0  ;;  %v1721_v21 = vmax.f32 %v1255_v42, 0.0  ;;  %v1271_v54 = vadd.f32 %v19263_v7, %v13519_v43  ;;  %v13616_v0 = vpop.permute.xlu0 %4577 }
 0x12d   : > { %v1247_v40 = vadd.f32 %v19260_v51, %v13519_v43  ;;  %v1724_v62 = vmax.f32 %v1268_v5, 0.0  ;;  %v1263_v29 = vadd.f32 %v19264_v35, %v13519_v43  ;;  %19265 = vst [vmem:[#allocation58_spill] sm:$0xff] %v13616_v0  ;;  %v19266_v51 = vld [vmem:[#allocation68_spill] sm:$0xff]  ;;  %v1722_v14 = vmax.f32 %v1260_v55, 0.0  ;;  %v19267_v42 = vld [vmem:[#allocation71_spill] sm:$0xff] }
 0x12e   : > { %v13619_v47 = vpack.c.bf16 %v1721_v21, %v1720_v17  ;;  %v1284_v9 = vadd.f32 %v13472_v36, %v13519_v43  ;;  %v1287_v7 = vadd.f32 %v13497_v53, %v13519_v43  ;;  %v3865_v35 = vrot.slane %v13554_v1, 1  ;;  %v13634_v17 = vpop.permute.xlu1 %4647  ;;  %v19270_v21 = vld [vmem:[#allocation33_spill] sm:$0xff] }
 0x12f   : > { %v1719_v59 = vmax.f32 %v1247_v40, 0.0  ;;  %v1725_v40 = vmax.f32 %v1271_v54, 0.0  ;;  %v1723_v5 = vmax.f32 %v1263_v29, 0.0  ;;  %v1279_v36 = vadd.f32 %v13508_v46, %v13519_v43  ;;  %19268 = vst [vmem:[#allocation66_spill] sm:$0xff] %v13634_v17 }
 0x130   : > { %6050 = vperm.xlu0 %11133, %v19266_v51   ;;  %6095 = vperm.xlu1 %11144, %v19267_v42   ;;  %v1728_v55 = vmax.f32 %v1284_v9, 0.0  ;;  %v1300_v52 = vadd.f32 %v10622_v31, %v13519_v43  ;;  %v1292_v44 = vadd.f32 %v1291_v22, %v13519_v43  ;;  %v3942_v31 = vrot.slane %v19270_v21, 4  ;;  %v13656_v9 = vpop.permute.xlu0 %4652  ;;  %v12161_v42 = vld [vmem:[%s12249_s17 + $0x1c8] sm:$0xff]  }
 0x131   : > { %v1840_v49 = vpack.c.bf16 %v1719_v59, %v1718_v2  ;;  %v13637_v59 = vpack.c.bf16 %v1725_v40, %v1724_v62  ;;  %v13639_v53 = vpack.c.bf16 %v1723_v5, %v1722_v14  ;;  %v1729_v2 = vmax.f32 %v1287_v7, 0.0  ;;  %v19272_v14 = vld [vmem:[#allocation35_spill] sm:$0xff]  ;;  %19273 = vst [vmem:[#allocation59_spill] sm:$0xff] %v13656_v9  ;;  %10709 = vmatmul.mubr.msk.bf16.gmra.mrb[112].mxu0 %vm19098_vm0, %v12161_v42  ;;  %v12163_v42 = vld [vmem:[%s12249_s17 + $0x1d8] sm:$0xff]  }
 0x132   : > { %10745 = vmatmul.mubr.bf16.gmra.mrb[4].mxu1 %v1837_v37  ;;  %v19269_v37 = vrot.slane %v13111_v38, 4  ;;  %v1726_v54 = vmax.f32 %v1276_v24, 0.0  ;;  %v1727_v11 = vmax.f32 %v1279_v36, 0.0  ;;  %v19271_v62 = vrot.slane %v13125_v50, 4 }
 0x133   : > { %10748 = vmatprep.mubr.bf16.mxu1 %v1838_v23  ;;  %v13651_v29 = vpack.c.bf16 %v1729_v2, %v1728_v55  ;;  %v1303_v22 = vadd.f32 %v10623_v19, %v13519_v43  ;;  %v1295_v51 = vadd.f32 %v1294_v45, %v13519_v43  ;;  %v1732_v40 = vmax.f32 %v1300_v52, 0.0  ;;  %v13674_v52 = vpop.permute.xlu1 %4687 }
 0x134   : > { %v3808_v46 = vadd.f32 %v19269_v37, %v13111_v38  ;;  %6090 = vperm.xlu0 %11133, %v13421_v15   ;;  %v3736_v23 = vadd.f32 %v19271_v62, %v13125_v50  ;;  %4772 = vperm.xlu1 %11144, %v13565_v4   ;;  %v3870_v38 = vrot.slane %v19272_v14, 4  ;;  %v12162_v15 = vld [vmem:[%s12249_s17 + $0x1d0] sm:$0xff]   ;;  %v13660_v24 = vpack.c.bf16 %v1727_v11, %v1726_v54  ;;  %v13694_v62 = vpop.permute.xlu0 %4582  ;;  %s9796_s17 = sshll.u32 %s20410_s15, 3 }
 0x135   : > { %v1730_v5 = vmax.f32 %v1292_v44, 0.0  ;;  %v1733_v7 = vmax.f32 %v1303_v22, 0.0  ;;  %v1731_v50 = vmax.f32 %v1295_v51, 0.0  ;;  %v4027_v4 = vmax.f32 %v13539_v57, 1.0  ;;  %v19275_v37 = vld [vmem:[#allocation8_spill] sm:$0xff]  ;;  %19276 = vst [vmem:[#allocation67_spill] sm:$0xff] %v13674_v52  ;;  %10712 = vmatprep.mubr.msk.bf16.mxu0 %vm19098_vm0, %v12162_v15  ;;  %s365_s20 = scalar_lea.vmem %s18719_s1, %s9796_s17  ;;  %s18232_s23 = scalar_lea.vmem %s18720_s2, %s9796_s17 }
 0x136   : > { %v19274_v55 = vrot.slane %v13522_v58, 1  ;;  %v3809_v45 = vrot.slane %v3808_v46, 2  ;;  %v3943_v36 = vadd.f32 %v3942_v31, %v19270_v21  ;;  %v5844_v2 = vmax.f32 %v13537_v61, 1.0  ;;  %19279 = vst [vmem:[#allocation73_spill] sm:$0xff] %v13694_v62  ;;  %v10626_v22 = vpop.f32.mrb[28].mxu0 }
 0x137   : > { %v13672_v54 = vadd.f32 -1.0, %v19275_v37  ;;  %v13677_v44 = vpack.c.bf16 %v1733_v7, %v1732_v40  ;;  %v13679_v11 = vpack.c.bf16 %v1731_v50, %v1730_v5  ;;  %v13684_v21 = vadd.f32 %v3865_v35, %v13554_v1  ;;  %v1307_v51 = vpop.f32.mrb[29].mxu0  ;;  %v13702_v15 = vpop.permute.xlu1 %4617 }
 0x138   : > { %v13666_v19 = vadd.f32 %v19274_v55, %v13522_v58  ;;  %4732 = vperm.xlu0 %11133, %v13570_v28   ;;  %4807 = vperm.xlu1 %11144, %v13577_v3   ;;  %v19277_v58 = vmax.f32 %v13491_v33, 1.0  ;;  %v3737_v28 = vrot.slane %v3736_v23, 2  ;;  %v3871_v61 = vadd.f32 %v3870_v38, %v19272_v14  ;;  %19280 = vst [vmem:[#allocation75_spill] sm:$0xff] %v13702_v15  ;;  %v19282_v55 = vld [vmem:[#allocation9_spill] sm:$0xff] }
 0x139   : > { %v19278_v31 = vmax.f32 %v13500_v25, 1.0  ;;  %v4019_v3 = vmax.f32 %v13547_v34, 1.0  ;;  %v3810_v1 = vadd.f32 %v3809_v45, %v3808_v46  ;;  %v3944_v35 = vrot.slane %v3943_v36, 2  ;;  %v10627_v46 = vpop.f32.mrb[30].mxu0  ;;  %v19283_v45 = vld [vmem:[#allocation82_spill] sm:$0xff]  ;;  %10713 = vmatmul.mubr.msk.bf16.gmra.mrb[116].mxu0 %vm19098_vm0, %v12163_v42  ;;  %v19288_v42 = vld [vmem:[#allocation44_spill] sm:$0xff] }
 0x13a   : > { %11829 = vrcp.f32 %v19277_v58  ;;  %10749 = vmatmul.mubr.bf16.gmra.mrb[8].mxu1 %v13604_v13  ;;  %v4042_v33 = vmax.f32 %v13666_v19, 1.0  ;;  %v5867_v25 = vmax.f32 %v13672_v54, 1.0  ;;  %v1316_v13 = vadd.f32 %v10626_v22, %v13519_v43  ;;  %v19284_v58 = vld [vmem:[#allocation10_spill] sm:$0xff] }
 0x13b   : > { %11831 = vrcp.f32 %v19278_v31  ;;  %10752 = vmatprep.mubr.bf16.mxu1 %v1840_v49  ;;  %v4034_v49 = vmax.f32 %v13684_v21, 1.0  ;;  %v3738_v14 = vadd.f32 %v3737_v28, %v3736_v23  ;;  %v3872_v38 = vrot.slane %v3871_v61, 2 }
 0x13c   : > { %11833 = vrcp.f32 %v4027_v4  ;;  %4802 = vperm.xlu0 %11133, %v13588_v26   ;;  %4847 = vperm.xlu1 %11144, %v13592_v60   ;;  %v1308_v26 = vadd.f32 %v1307_v51, %v13519_v43  ;;  %v1319_v40 = vadd.f32 %v10627_v46, %v13519_v43  ;;  %v3811_v5 = vrot.slane %v3810_v1, 1  ;;  %v19281_v60 = vld [vmem:[#allocation38_spill] sm:$0xff]  ;;  %v1310_v4 = vpop.f32.mrb[31].mxu0 }
 0x13d   : > { %11835 = vrcp.f32 %v5844_v2  ;;  %v3945_v7 = vadd.f32 %v3944_v35, %v3943_v36  ;;  %v3816_v50 = vrot.slane %v19281_v60, 4  ;;  %v9956_v23 = vadd.f32 -1.0, %v19282_v55  ;;  %v19287_v35 = vld [vmem:[#allocation41_spill] sm:$0xff] }
 0x13e   : > { %11837 = vrcp.f32 %v4019_v3  ;;  %v1736_v2 = vmax.f32 %v1316_v13, 0.0  ;;  %v1737_v37 = vmax.f32 %v1319_v40, 0.0  ;;  %v1311_v54 = vadd.f32 %v1310_v4, %v13519_v43  ;;  %10716 = vmatprep.mubr.msk.bf16.mxu0 %vm19098_vm0, %v19287_v35  ;;  %v19289_v4 = vld [vmem:[#allocation11_spill] sm:$0xff] }
 0x13f   : > { %11839 = vrcp.f32 %v4042_v33  ;;  %v9950_v28 = vadd.f32 -1.0, %v19284_v58  ;;  %v3739_v31 = vrot.slane %v3738_v14, 1  ;;  %v3873_v3 = vadd.f32 %v3872_v38, %v3871_v61  ;;  %v13712_v33 = vpop.permute.xlu0 %4657 }
 0x140   : > { %4842 = vperm.xlu0 %11133, %v13599_v10   ;;  %6025 = vperm.xlu1 %11144, %v19283_v45   ;;  %11841 = vrcp.f32 %v4034_v49  ;;  %19285 = vst [vmem:[#allocation76_spill] sm:$0xff] %v13712_v33  ;;  %v19286_v10 = vld [vmem:[#allocation40_spill] sm:$0xff]  ;;  %v1734_v22 = vmax.f32 %v1308_v26, 0.0  ;;  %v13720_v13 = vpack.c.bf16 %v1737_v37, %v1736_v2  ;;  %v1735_v51 = vmax.f32 %v1311_v54, 0.0  ;;  %v19291_v37 = vld [vmem:[#allocation47_spill] sm:$0xff] }
 0x141   : > { %v3744_v36 = vrot.slane %v19286_v10, 4  ;;  %v13722_v46 = vadd.f32 %v3811_v5, %v3810_v1  ;;  %v3946_v61 = vrot.slane %v3945_v7, 1  ;;  %v3817_v38 = vadd.f32 %v3816_v50, %v19281_v60 }
 0x142   : > { %10753 = vmatmul.mubr.bf16.gmra.mrb[12].mxu1 %v13619_v47  ;;  %v3951_v40 = vrot.slane %v19288_v42, 4  ;;  %11843 = vrcp.f32 %v5867_v25  ;;  %v9942_v55 = vadd.f32 -1.0, %v19289_v4  ;;  %v13733_v26 = vpack.c.bf16 %v1735_v51, %v1734_v22  ;;  %v19294_v4 = vld [vmem:[#allocation13_spill] sm:$0xff] }
 0x143   : > { %10756 = vmatprep.mubr.bf16.mxu1 %v13639_v53  ;;  %v13730_v53 = vpop.permute.xlu1 %4692  ;;  %v5859_v5 = vmax.f32 %v9956_v23, 1.0  ;;  %v13735_v45 = vadd.f32 %v3739_v31, %v3738_v14  ;;  %v3874_v60 = vrot.slane %v3873_v3, 1  ;;  %v5853_v2 = vmax.f32 %v9950_v28, 1.0  ;;  %v13745_v22 = vpop.permute.xlu0 %4587  ;;  %v19293_v31 = vld [vmem:[#allocation12_spill] sm:$0xff] }
 0x144   : > { %v11830_v49 = vpop.eup %11829  ;;  %5985 = vperm.xlu0 %11133, %v13534_v56   ;;  %19290 = vst [vmem:[#allocation68_spill] sm:$0xff] %v13730_v53  ;;  %6100 = vperm.xlu1 %11144, %v13545_v12   ;;  %v3745_v56 = vadd.f32 %v3744_v36, %v19286_v10  ;;  %v3879_v25 = vrot.slane %v19291_v37, 4  ;;  %v4028_v54 = vmax.f32 %v13722_v46, 1.0  ;;  %v13742_v58 = vadd.f32 %v3946_v61, %v3945_v7  ;;  %v19295_v61 = vld [vmem:[#allocation52_spill] sm:$0xff]  ;;  %v19300_v53 = vld [vmem:[#allocation14_spill] sm:$0xff] }
 0x145   : > { %v13727_v47 = vpop.eup %11831  ;;  %v3818_v35 = vrot.slane %v3817_v38, 2  ;;  %v3952_v12 = vadd.f32 %v3951_v40, %v19288_v42  ;;  %19292 = vst [vmem:[#allocation71_spill] sm:$0xff] %v13745_v22  ;;  %v5845_v23 = vmax.f32 %v9942_v55, 1.0  ;;  %v9965_v51 = vadd.f32 -1.0, %v19293_v31  ;;  %10717 = vmatmul.mubr.msk.bf16.gmra.mrb[120].mxu0 %vm19098_vm0, %v19295_v61  ;;  %v19297_v55 = vld [vmem:[#allocation65_spill] sm:$0xff]  ;;  %v10630_v31 = vpop.f32.mrb[32].mxu0 }
 0x146   : > { %v11834_v1 = vpop.eup %11833  ;;  %v13749_v28 = vadd.f32 -1.0, %v19294_v4  ;;  %11845 = vrcp.f32 %v5859_v5  ;;  %v4020_v36 = vmax.f32 %v13735_v45, 1.0  ;;  %v13752_v7 = vadd.f32 %v3874_v60, %v3873_v3  ;;  %10720 = vmatprep.mubr.msk.bf16.mxu0 %vm19098_vm0, %v19297_v55  ;;  %v19299_v55 = vld [vmem:[#allocation50_spill] sm:$0xff] }
 0x147   : > { %v13737_v50 = vpop.eup %11835  ;;  %11847 = vrcp.f32 %v5853_v2  ;;  %v3880_v42 = vadd.f32 %v3879_v25, %v19291_v37  ;;  %v13758_v40 = vpop.permute.xlu1 %4622  ;;  %v4043_v3 = vmax.f32 %v13742_v58, 1.0  ;;  %v3819_v5 = vadd.f32 %v3818_v35, %v3817_v38 }
 0x148   : > { %6060 = vperm.xlu0 %11133, %v11830_v49   ;;  %v11838_v14 = vpop.eup %11837  ;;  %4777 = vperm.xlu1 %11144, %v11834_v1   ;;  %v3746_v49 = vrot.slane %v3745_v56, 2  ;;  %19296 = vst [vmem:[#allocation33_spill] sm:$0xff] %v13758_v40  ;;  %11849 = vrcp.f32 %v4028_v54  ;;  %v3953_v60 = vrot.slane %v3952_v12, 2  ;;  %v5860_v2 = vmax.f32 %v13749_v28, 1.0  ;;  %v1323_v25 = vpop.f32.mrb[33].mxu0 }
 0x149   : > { %v11840_v10 = vpop.eup %11839  ;;  %11851 = vrcp.f32 %v5845_v23  ;;  %v1332_v37 = vadd.f32 %v10630_v31, %v13519_v43  ;;  %v4035_v4 = vmax.f32 %v13752_v7, 1.0  ;;  %v1324_v54 = vadd.f32 %v1323_v25, %v13519_v43  ;;  %v10631_v61 = vpop.f32.mrb[34].mxu0 }
 0x14a   : > { %10757 = vmatmul.mubr.bf16.gmra.mrb[16].mxu1 %v13637_v59  ;;  %v11842_v1 = vpop.eup %11841  ;;  %v5868_v59 = vmax.f32 %v9965_v51, 1.0  ;;  %11853 = vrcp.f32 %v4020_v36  ;;  %v3747_v35 = vadd.f32 %v3746_v49, %v3745_v56  ;;  %v3825_v23 = vrot.slane %v19299_v55, 4  ;;  %v1326_v28 = vpop.f32.mrb[35].mxu0 }
 0x14b   : > { %10760 = vmatprep.mubr.bf16.mxu1 %v13660_v24  ;;  %v13767_v24 = vpop.permute.xlu0 %4662  ;;  %v1335_v51 = vadd.f32 %v10631_v61, %v13519_v43  ;;  %11855 = vrcp.f32 %v4043_v3  ;;  %v3954_v31 = vadd.f32 %v3953_v60, %v3952_v12  ;;  %v1327_v36 = vadd.f32 %v1326_v28, %v13519_v43  ;;  %v13777_v9 = vpop.permute.xlu1 %4697  ;;  %v19303_v61 = vld [vmem:[#allocation57_spill] sm:$0xff]  ;;  %v19304_v3 = vld [vmem:[#allocation79_spill] sm:$0xff] }
 0x14c   : > { %4737 = vperm.xlu0 %11133, %v11838_v14   ;;  %4852 = vperm.xlu1 %11144, %v11840_v10   ;;  %19298 = vst [vmem:[#allocation35_spill] sm:$0xff] %v13767_v24  ;;  %v11844_v38 = vpop.eup %11843  ;;  %v3881_v14 = vrot.slane %v3880_v42, 2  ;;  %v3820_v10 = vrot.slane %v3819_v5, 1  ;;  %v13774_v52 = vadd.f32 -1.0, %v19300_v53  ;;  %v19301_v24 = vld [vmem:[#allocation51_spill] sm:$0xff]  ;;  %19302 = vst [vmem:[#allocation8_spill] sm:$0xff] %v13777_v9  ;;  %11857 = vrcp.f32 %v4035_v4 }
 0x14d   : > { %v3753_v25 = vrot.slane %v19301_v24, 4  ;;  %v1740_v56 = vmax.f32 %v1332_v37, 0.0  ;;  %v1741_v49 = vmax.f32 %v1335_v51, 0.0  ;;  %v3960_v33 = vrot.slane %v19303_v61, 4  ;;  %10721 = vmatmul.mubr.msk.bf16.gmra.mrb[124].mxu0 %vm19098_vm0, %v19304_v3 }
 0x14e   : > { %v1738_v12 = vmax.f32 %v1324_v54, 0.0  ;;  %v3748_v53 = vrot.slane %v3747_v35, 1  ;;  %v3882_v60 = vadd.f32 %v3881_v14, %v3880_v42  ;;  %v3826_v28 = vadd.f32 %v3825_v23, %v19299_v55  ;;  %v10634_v54 = vpop.f32.mrb[36].mxu0  ;;  %v19306_v23 = vld [vmem:[#allocation61_spill] sm:$0xff] }
 0x14f   : > { %v13786_v9 = vpack.c.bf16 %v1741_v49, %v1740_v56  ;;  %11859 = vrcp.f32 %v5868_v59  ;;  %v13788_v37 = vadd.f32 %v3820_v10, %v3819_v5  ;;  %v3955_v4 = vrot.slane %v3954_v31, 1  ;;  %v13790_v51 = vpop.permute.xlu0 %4592  ;;  %v1339_v14 = vpop.f32.mrb[37].mxu0 }
 0x150   : > { %4812 = vperm.xlu0 %11133, %v11842_v1   ;;  %6030 = vperm.xlu1 %11144, %v13727_v47   ;;  %v1739_v1 = vmax.f32 %v1327_v36, 0.0  ;;  %v11846_v47 = vpop.eup %11845  ;;  %19305 = vst [vmem:[#allocation38_spill] sm:$0xff] %v13790_v51  ;;  %11861 = vrcp.f32 %v5860_v2  ;;  %v3754_v42 = vadd.f32 %v3753_v25, %v19301_v24  ;;  %v5854_v5 = vmax.f32 %v13774_v52, 1.0  ;;  %v10635_v56 = vpop.f32.mrb[38].mxu0  ;;  %v19308_v52 = vld [vmem:[#allocation15_spill] sm:$0xff] }
 0x151   : > { %v13795_v36 = vpop.eup %11847  ;;  %v3961_v55 = vadd.f32 %v3960_v33, %v19303_v61  ;;  %v3888_v10 = vrot.slane %v19306_v23, 4  ;;  %v13805_v3 = vadd.f32 %v3748_v53, %v3747_v35  ;;  %v3883_v2 = vrot.slane %v3882_v60, 1  ;;  %v19309_v35 = vld [vmem:[#allocation16_spill] sm:$0xff] }
 0x152   : > { %10761 = vmatmul.mubr.bf16.gmra.mrb[20].mxu1 %v13651_v29  ;;  %v13793_v29 = vpack.c.bf16 %v1739_v1, %v1738_v12  ;;  %v11850_v59 = vpop.eup %11849  ;;  %v3827_v24 = vrot.slane %v3826_v28, 2  ;;  %v1351_v25 = vadd.f32 %v10635_v56, %v13519_v43  ;;  %v1342_v12 = vpop.f32.mrb[39].mxu0  ;;  %v4029_v33 = vmax.f32 %v13788_v37, 1.0 }
 0x153   : > { %10764 = vmatprep.mubr.bf16.mxu1 %v13679_v11  ;;  %v1348_v11 = vadd.f32 %v10634_v54, %v13519_v43  ;;  %v13803_v49 = vpop.eup %11851  ;;  %v13811_v54 = vadd.f32 -1.0, %v19308_v52  ;;  %v13814_v61 = vadd.f32 %v3955_v4, %v3954_v31  ;;  %v13818_v53 = vadd.f32 -1.0, %v19309_v35  ;;  %v13821_v52 = vpop.permute.xlu0 %4667 }
 0x154   : > { %5990 = vperm.xlu0 %11133, %v13737_v50   ;;  %6105 = vperm.xlu1 %11144, %v11844_v38   ;;  %v1340_v50 = vadd.f32 %v1339_v14, %v13519_v43  ;;  %v13807_v38 = vpop.permute.xlu1 %4627  ;;  %v11854_v1 = vpop.eup %11853  ;;  %v1343_v14 = vadd.f32 %v1342_v12, %v13519_v43  ;;  %v3755_v17 = vrot.slane %v3754_v42, 2  ;;  %v3962_v15 = vrot.slane %v3961_v55, 2  ;;  %19310 = vst [vmem:[#allocation82_spill] sm:$0xff] %v13821_v52 }
 0x155   : > { %19307 = vst [vmem:[#allocation9_spill] sm:$0xff] %v13807_v38  ;;  %v1744_v40 = vmax.f32 %v1348_v11, 0.0  ;;  %v1745_v38 = vmax.f32 %v1351_v25, 0.0  ;;  %v11856_v56 = vpop.eup %11855  ;;  %v3889_v51 = vadd.f32 %v3888_v10, %v19306_v23  ;;  %v13825_v12 = vadd.f32 %v3883_v2, %v3882_v60  ;;  %v10638_v10 = vpop.f32.mrb[40].mxu0 }
 0x156   : > { %v1742_v31 = vmax.f32 %v1340_v50, 0.0  ;;  %v1743_v4 = vmax.f32 %v1343_v14, 0.0  ;;  %v3828_v35 = vadd.f32 %v3827_v24, %v3826_v28  ;;  %v11858_v11 = vpop.eup %11857  ;;  %11863 = vrcp.f32 %v4029_v33 }
 0x157   : > { %v4044_v25 = vmax.f32 %v13814_v61, 1.0  ;;  %11865 = vrcp.f32 %v5854_v5  ;;  %v3756_v50 = vadd.f32 %v3755_v17, %v3754_v42  ;;  %v1364_v60 = vadd.f32 %v10638_v10, %v13519_v43 }
 0x158   : > { %6065 = vperm.xlu0 %11133, %v11846_v47   ;;  %4782 = vperm.xlu1 %11144, %v11850_v59   ;;  %v4021_v47 = vmax.f32 %v13805_v3, 1.0  ;;  %v13828_v59 = vpack.c.bf16 %v1745_v38, %v1744_v40  ;;  %v13831_v23 = vpack.c.bf16 %v1743_v4, %v1742_v31  ;;  %v13834_v14 = vpop.permute.xlu1 %4702  ;;  %v5869_v28 = vmax.f32 %v13818_v53, 1.0  ;;  %v19313_v4 = vld [vmem:[#allocation3_spill] sm:$0xff] }
 0x159   : > { %19311 = vst [vmem:[#allocation10_spill] sm:$0xff] %v13834_v14  ;;  %v11860_v40 = vpop.eup %11859  ;;  %v3963_v2 = vadd.f32 %v3962_v15, %v3961_v55  ;;  %v3890_v24 = vrot.slane %v3889_v51, 2  ;;  %v4036_v5 = vmax.f32 %v13825_v12, 1.0  ;;  %v3834_v10 = vrot.slane %v19313_v4, 4  ;;  %v13843_v14 = vpop.permute.xlu0 %4597  ;;  %v19315_v55 = vld [vmem:[#allocation18_spill] sm:$0xff] }
 0x15a   : > { %10765 = vmatmul.mubr.bf16.gmra.mrb[24].mxu1 %v13677_v44  ;;  %v5846_v44 = vmax.f32 %v13811_v54, 1.0  ;;  %v11862_v33 = vpop.eup %11861  ;;  %11867 = vrcp.f32 %v4021_v47  ;;  %v3829_v54 = vrot.slane %v3828_v35, 1  ;;  %19314 = vst [vmem:[#allocation40_spill] sm:$0xff] %v13843_v14  ;;  %v9952_v53 = vadd.f32 -1.0, %v19315_v55  ;;  %v19316_v14 = vld [vmem:[#allocation64_spill] sm:$0xff]  ;;  %v19320_v55 = vld [vmem:[#allocation81_spill] sm:$0xff] }
 0x15b   : > { %10768 = vmatprep.mubr.bf16.mxu1 %v13733_v26  ;;  %v1355_v26 = vpop.f32.mrb[41].mxu0  ;;  %11869 = vrcp.f32 %v4044_v25  ;;  %v1748_v47 = vmax.f32 %v1364_v60, 0.0  ;;  %v3964_v62 = vrot.slane %v3963_v2, 1  ;;  %v3835_v60 = vadd.f32 %v3834_v10, %v19313_v4 }
 0x15c   : > { %4742 = vperm.xlu0 %11133, %v11854_v1   ;;  %4857 = vperm.xlu1 %11144, %v11856_v56   ;;  %v1356_v38 = vadd.f32 %v1355_v26, %v13519_v43  ;;  %v10639_v1 = vpop.f32.mrb[42].mxu0  ;;  %v19312_v56 = vld [vmem:[#allocation17_spill] sm:$0xff]  ;;  %v3757_v26 = vrot.slane %v3756_v50, 1  ;;  %11871 = vrcp.f32 %v4036_v5  ;;  %v13849_v22 = vadd.f32 %v3829_v54, %v3828_v35  ;;  %v13852_v0 = vpop.permute.xlu1 %4632 }
 0x15d   : > { %v1367_v17 = vadd.f32 %v10639_v1, %v13519_v43  ;;  %v1358_v42 = vpop.f32.mrb[43].mxu0  ;;  %v9958_v31 = vadd.f32 -1.0, %v19312_v56  ;;  %v3891_v1 = vadd.f32 %v3890_v24, %v3889_v51  ;;  %19317 = vst [vmem:[#allocation41_spill] sm:$0xff] %v13852_v0  ;;  %11873 = vrcp.f32 %v5846_v44  ;;  %v13867_v4 = vpop.permute.xlu0 %4672 }
 0x15e   : > { %v1359_v15 = vadd.f32 %v1358_v42, %v13519_v43  ;;  %v1746_v56 = vmax.f32 %v1356_v38, 0.0  ;;  %v10642_v24 = vpop.f32.mrb[44].mxu0  ;;  %v5855_v35 = vmax.f32 %v9952_v53, 1.0  ;;  %v13862_v38 = vadd.f32 %v3757_v26, %v3756_v50  ;;  %19319 = vst [vmem:[#allocation44_spill] sm:$0xff] %v13867_v4 }
 0x15f   : > { %v1749_v52 = vmax.f32 %v1367_v17, 0.0  ;;  %v19318_v17 = vld [vmem:[#allocation77_spill] sm:$0xff]  ;;  %v1380_v5 = vadd.f32 %v10642_v24, %v13519_v43  ;;  %11875 = vrcp.f32 %v5869_v28  ;;  %v13865_v54 = vadd.f32 %v3964_v62, %v3963_v2 }
 0x160   : > { %4817 = vperm.xlu0 %11133, %v11858_v11   ;;  %6035 = vperm.xlu1 %11144, %v13795_v36   ;;  %v1747_v25 = vmax.f32 %v1359_v15, 0.0  ;;  %v3762_v11 = vrot.slane %v19316_v14, 4  ;;  %v5861_v36 = vmax.f32 %v9958_v31, 1.0  ;;  %v3969_v51 = vrot.slane %v19318_v17, 4 }
 0x161   : > { %v13855_v42 = vpack.c.bf16 %v1749_v52, %v1748_v47  ;;  %v11864_v52 = vpop.eup %11863  ;;  %v3892_v31 = vrot.slane %v3891_v1, 1  ;;  %v4030_v44 = vmax.f32 %v13849_v22, 1.0  ;;  %v3836_v28 = vrot.slane %v3835_v60, 2 }
 0x162   : > { %10769 = vmatmul.mubr.bf16.gmra.mrb[28].mxu1 %v13720_v13  ;;  %v13860_v13 = vpack.c.bf16 %v1747_v25, %v1746_v56  ;;  %v11866_v15 = vpop.eup %11865  ;;  %v3763_v50 = vadd.f32 %v3762_v11, %v19316_v14  ;;  %11877 = vrcp.f32 %v5861_v36  ;;  %v3970_v62 = vadd.f32 %v3969_v51, %v19318_v17  ;;  %v13877_v25 = vpop.permute.xlu1 %4707 }
 0x163   : > { %10772 = vmatprep.mubr.bf16.mxu1 %v13793_v29  ;;  %v1371_v29 = vpop.f32.mrb[45].mxu0  ;;  %11879 = vrcp.f32 %v5855_v35  ;;  %v4022_v56 = vmax.f32 %v13862_v38, 1.0  ;;  %19321 = vst [vmem:[#allocation11_spill] sm:$0xff] %v13877_v25  ;;  %v1752_v14 = vmax.f32 %v1380_v5, 0.0 }
 0x164   : > { %5995 = vperm.xlu0 %11133, %v13803_v49   ;;  %6110 = vperm.xlu1 %11144, %v11860_v40   ;;  %v1372_v49 = vadd.f32 %v1371_v29, %v13519_v43  ;;  %v10643_v10 = vpop.f32.mrb[46].mxu0  ;;  %v3897_v40 = vrot.slane %v19320_v55, 4  ;;  %v11868_v47 = vpop.eup %11867  ;;  %v4045_v29 = vmax.f32 %v13865_v54, 1.0  ;;  %11881 = vrcp.f32 %v4030_v44 }
 0x165   : > { %v1383_v53 = vadd.f32 %v10643_v10, %v13519_v43  ;;  %v1374_v26 = vpop.f32.mrb[47].mxu0  ;;  %v11870_v24 = vpop.eup %11869  ;;  %v13880_v10 = vadd.f32 %v3892_v31, %v3891_v1  ;;  %v3764_v17 = vrot.slane %v3763_v50, 2  ;;  %v3971_v5 = vrot.slane %v3970_v62, 2 }
 0x166   : > { %v1375_v2 = vadd.f32 %v1374_v26, %v13519_v43  ;;  %v1750_v36 = vmax.f32 %v1372_v49, 0.0  ;;  %v3898_v51 = vadd.f32 %v3897_v40, %v19320_v55  ;;  %v13888_v26 = vpop.permute.xlu0 %11296  ;;  %v11872_v31 = vpop.eup %11871  ;;  %v19323_v49 = vld [vmem:[#allocation19_spill] sm:$0xff]  ;;  %11883 = vrcp.f32 %v4022_v56 }
 0x167   : > { %v1753_v11 = vmax.f32 %v1383_v53, 0.0  ;;  %v3978_v53 = vrot.slane %v13451_v48, 4  ;;  %19322 = vst [vmem:[#allocation47_spill] sm:$0xff] %v13888_v26  ;;  %v9944_v44 = vadd.f32 -1.0, %v19323_v49  ;;  %11885 = vrcp.f32 %v4045_v29 }
 0x168   : > { %6070 = vperm.xlu0 %11133, %v11862_v33   ;;  %4787 = vperm.xlu1 %11144, %v11864_v52   ;;  %v1751_v33 = vmax.f32 %v1375_v2, 0.0  ;;  %v3837_v52 = vadd.f32 %v3836_v28, %v3835_v60  ;;  %v19324_v2 = vld [vmem:[#allocation20_spill] sm:$0xff]  ;;  %v4037_v60 = vmax.f32 %v13880_v10, 1.0 }
 0x169   : > { %v13885_v35 = vpack.c.bf16 %v1753_v11, %v1752_v14  ;;  %v9967_v25 = vadd.f32 -1.0, %v19324_v2  ;;  %v3765_v14 = vadd.f32 %v3764_v17, %v3763_v50  ;;  %v3899_v11 = vrot.slane %v3898_v51, 2 }
 0x16a   : > { %10773 = vmatmul.mubr.bf16.gmra.mrb[32].mxu1 %v13786_v9  ;;  %v13890_v1 = vpack.c.bf16 %v1751_v33, %v1750_v36  ;;  %v10646_v9 = vpop.f32.mrb[48].mxu0  ;;  %v3906_v36 = vrot.slane %v13457_v16, 4  ;;  %v13898_v33 = vpop.permute.xlu1 %4637  ;;  %v3838_v2 = vrot.slane %v3837_v52, 1  ;;  %v3979_v29 = vadd.f32 %v3978_v53, %v13451_v48 }
 0x16b   : > { %10776 = vmatprep.mubr.bf16.mxu1 %v13831_v23  ;;  %v1396_v23 = vadd.f32 %v10646_v9, %v13519_v43  ;;  %v1387_v55 = vpop.f32.mrb[49].mxu0  ;;  %19325 = vst [vmem:[#allocation12_spill] sm:$0xff] %v13898_v33  ;;  %v3972_v9 = vadd.f32 %v3971_v5, %v3970_v62  ;;  %v5870_v0 = vmax.f32 %v9967_v25, 1.0  ;;  %11887 = vrcp.f32 %v4037_v60  ;;  %v13904_v33 = vpop.permute.xlu0 %11306 }
 0x16c   : > { %4747 = vperm.xlu0 %11133, %v11868_v47   ;;  %4862 = vperm.xlu1 %11144, %v11870_v24   ;;  %v1388_v40 = vadd.f32 %v1387_v55, %v13519_v43  ;;  %v10647_v28 = vpop.f32.mrb[50].mxu0  ;;  %v11874_v47 = vpop.eup %11873  ;;  %v5847_v55 = vmax.f32 %v9944_v44, 1.0  ;;  %19327 = vst [vmem:[#allocation13_spill] sm:$0xff] %v13904_v33  ;;  %v3766_v48 = vrot.slane %v3765_v14, 1  ;;  %v3900_v53 = vadd.f32 %v3899_v11, %v3898_v51 }
 0x16d   : > { %v1399_v49 = vadd.f32 %v10647_v28, %v13519_v43  ;;  %v1390_v56 = vpop.f32.mrb[51].mxu0  ;;  %v11876_v24 = vpop.eup %11875  ;;  %v1756_v50 = vmax.f32 %v1396_v23, 0.0  ;;  %v13913_v25 = vadd.f32 %v3838_v2, %v3837_v52  ;;  %v3973_v6 = vrot.slane %v3972_v9, 1 }
 0x16e   : > { %v1391_v4 = vadd.f32 %v1390_v56, %v13519_v43  ;;  %v11878_v26 = vpop.eup %11877  ;;  %v1754_v28 = vmax.f32 %v1388_v40, 0.0  ;;  %v3980_v44 = vrot.slane %v3979_v29, 2  ;;  %11889 = vrcp.f32 %v5847_v55 }
 0x16f   : > { %v1757_v17 = vmax.f32 %v1399_v49, 0.0  ;;  %v13907_v5 = vpop.eup %11879  ;;  %11891 = vrcp.f32 %v5870_v0 }
 0x170   : > { %4822 = vperm.xlu0 %11133, %v11872_v31   ;;  %6040 = vperm.xlu1 %11144, %v11866_v15   ;;  %v1755_v62 = vmax.f32 %v1391_v4, 0.0  ;;  %v3907_v31 = vadd.f32 %v3906_v36, %v13457_v16  ;;  %v11882_v60 = vpop.eup %11881  ;;  %v13917_v4 = vpop.permute.xlu1 %4712  ;;  %v13921_v36 = vadd.f32 %v3766_v48, %v3765_v14 }
 0x171   : > { %v13911_v15 = vpack.c.bf16 %v1757_v17, %v1756_v50  ;;  %19328 = vst [vmem:[#allocation52_spill] sm:$0xff] %v13917_v4  ;;  %v11884_v11 = vpop.eup %11883  ;;  %v4031_v50 = vmax.f32 %v13913_v25, 1.0  ;;  %v3981_v17 = vadd.f32 %v3980_v44, %v3979_v29 }
 0x172   : > { %10777 = vmatmul.mubr.bf16.gmra.mrb[36].mxu1 %v13828_v59  ;;  %v13915_v23 = vpack.c.bf16 %v1755_v62, %v1754_v28  ;;  %v10650_v59 = vpop.f32.mrb[52].mxu0  ;;  %v3908_v49 = vrot.slane %v3907_v31, 2  ;;  %v11886_v55 = vpop.eup %11885  ;;  %v19330_v62 = vld [vmem:[#allocation22_spill] sm:$0xff] }
 0x173   : > { %10780 = vmatprep.mubr.bf16.mxu1 %v13860_v13  ;;  %v1412_v51 = vadd.f32 %v10650_v59, %v13519_v43  ;;  %v1403_v16 = vpop.f32.mrb[53].mxu0  ;;  %v5862_v13 = vmax.f32 %v9959_v18, 1.0  ;;  %v13927_v28 = vpop.permute.xlu0 %4677  ;;  %v9968_v48 = vadd.f32 -1.0, %v19330_v62 }
 0x174   : > { %6000 = vperm.xlu0 %11133, %v11874_v47   ;;  %6115 = vperm.xlu1 %11144, %v11876_v24   ;;  %v1404_v40 = vadd.f32 %v1403_v16, %v13519_v43  ;;  %v10651_v52 = vpop.f32.mrb[54].mxu0  ;;  %v3901_v47 = vrot.slane %v3900_v53, 1  ;;  %v13925_v24 = vadd.f32 %v3973_v6, %v3972_v9  ;;  %19329 = vst [vmem:[#allocation65_spill] sm:$0xff] %v13927_v28  ;;  %v13935_v6 = vpop.permute.xlu1 %11301 }
 0x175   : > { %v1415_v56 = vadd.f32 %v10651_v52, %v13519_v43  ;;  %v1406_v2 = vpop.f32.mrb[55].mxu0  ;;  %v1760_v0 = vmax.f32 %v1412_v51, 0.0  ;;  %11893 = vrcp.f32 %v5862_v13  ;;  %v4023_v52 = vmax.f32 %v13921_v36, 1.0  ;;  %19331 = vst [vmem:[#allocation50_spill] sm:$0xff] %v13935_v6  ;;  %v11888_v44 = vpop.eup %11887 }
 0x176   : > { %v1407_v18 = vadd.f32 %v1406_v2, %v13519_v43  ;;  %v1758_v59 = vmax.f32 %v1404_v40, 0.0  ;;  %v13933_v9 = vadd.f32 %v3901_v47, %v3900_v53  ;;  %v3909_v29 = vadd.f32 %v3908_v49, %v3907_v31  ;;  %v10654_v13 = vpop.f32.mrb[56].mxu0  ;;  %v19332_v31 = vld [vmem:[#allocation23_spill] sm:$0xff] }
 0x177   : > { %v1761_v14 = vmax.f32 %v1415_v56, 0.0  ;;  %11895 = vrcp.f32 %v4031_v50  ;;  %v3982_v51 = vrot.slane %v3981_v17, 1  ;;  %v1428_v53 = vadd.f32 %v10654_v13, %v13519_v43  ;;  %v1419_v40 = vpop.f32.mrb[57].mxu0  ;;  %v13945_v49 = vpop.permute.xlu0 %11316 }
 0x178   : > { %6075 = vperm.xlu0 %11133, %v11878_v26   ;;  %4792 = vperm.xlu1 %11144, %v11882_v60   ;;  %v1759_v16 = vmax.f32 %v1407_v18, 0.0  ;;  %v4046_v60 = vmax.f32 %v13925_v24, 1.0  ;;  %v9960_v47 = vadd.f32 -1.0, %v19332_v31  ;;  %19333 = vst [vmem:[#allocation14_spill] sm:$0xff] %v13945_v49  ;;  %v10655_v56 = vpop.f32.mrb[58].mxu0  ;;  %v11890_v2 = vpop.eup %11889  ;;  %11897 = vrcp.f32 %v4023_v52 }
 0x179   : > { %v13938_v26 = vpack.c.bf16 %v1761_v14, %v1760_v0  ;;  %v4038_v50 = vmax.f32 %v13933_v9, 1.0  ;;  %v3910_v18 = vrot.slane %v3909_v29, 1  ;;  %v1422_v0 = vpop.f32.mrb[59].mxu0  ;;  %v11892_v14 = vpop.eup %11891  ;;  %v13950_v62 = vadd.f32 %v3982_v51, %v3981_v17 }
 0x17a   : > { %10781 = vmatmul.mubr.bf16.gmra.mrb[40].mxu1 %v13855_v42  ;;  %v13941_v42 = vpack.c.bf16 %v1759_v16, %v1758_v59  ;;  %11899 = vrcp.f32 %v4046_v60  ;;  %v1423_v59 = vadd.f32 %v1422_v0, %v13519_v43  ;;  %v13953_v16 = vpop.permute.xlu1 %11311  ;;  %v1764_v13 = vmax.f32 %v1428_v53, 0.0  ;;  %v10658_v53 = vpop.f32.mrb[60].mxu0 }
 0x17b   : > { %10784 = vmatprep.mubr.bf16.mxu1 %v13890_v1  ;;  %v1420_v1 = vadd.f32 %v1419_v40, %v13519_v43  ;;  %19334 = vst [vmem:[#allocation51_spill] sm:$0xff] %v13953_v16  ;;  %11901 = vrcp.f32 %v4038_v50  ;;  %v13957_v4 = vadd.f32 %v3910_v18, %v3909_v29  ;;  %v13964_v51 = vpop.permute.xlu0 %11326  ;;  %v1444_v29 = vadd.f32 %v10658_v53, %v13519_v43  ;;  %v19337_v18 = vld [vmem:[#allocation70_spill] sm:$0xff] }
 0x17c   : > { %4752 = vperm.xlu0 %11133, %v11884_v11   ;;  %4867 = vperm.xlu1 %11144, %v11886_v55   ;;  %v1431_v11 = vadd.f32 %v10655_v56, %v13519_v43  ;;  %v5871_v55 = vmax.f32 %v9968_v48, 1.0  ;;  %v1763_v31 = vmax.f32 %v1423_v59, 0.0  ;;  %v5863_v56 = vmax.f32 %v9960_v47, 1.0  ;;  %19336 = vst [vmem:[#allocation57_spill] sm:$0xff] %v13964_v51  ;;  %v1435_v47 = vpop.f32.mrb[61].mxu0 }
 0x17d   : > { %v1762_v40 = vmax.f32 %v1420_v1, 0.0  ;;  %v10659_v50 = vpop.f32.mrb[62].mxu0  ;;  %v4039_v0 = vmax.f32 %v13957_v4, 1.0 }
 0x17e   : > { %v1765_v52 = vmax.f32 %v1431_v11, 0.0  ;;  %11903 = vrcp.f32 %v5871_v55  ;;  %v9969_v11 = vadd.f32 -1.0, %v19337_v18  ;;  %v13972_v55 = vpop.permute.xlu1 %4717  ;;  %v1438_v59 = vpop.f32.mrb[63].mxu0 }
 0x17f   : > { %v11894_v48 = vpop.eup %11893  ;;  %11905 = vrcp.f32 %v5863_v56  ;;  %19338 = vst [vmem:[#allocation79_spill] sm:$0xff] %v13972_v55 }
 0x180   : > { %4827 = vperm.xlu0 %11133, %v11888_v44   ;;  %6045 = vperm.xlu1 %11144, %v13907_v5   ;;  %v13960_v17 = vpack.c.bf16 %v1765_v52, %v1764_v13  ;;  %v19335_v44 = vld [vmem:[#allocation69_spill] sm:$0xff]  ;;  %v4047_v5 = vmax.f32 %v13950_v62, 1.0  ;;  %v19339_v52 = vld [vmem:[#allocation72_spill] sm:$0xff] }
 0x181   : > { %v9970_v60 = vadd.f32 -1.0, %v19335_v44  ;;  %v11896_v1 = vpop.eup %11895  ;;  %v1768_v44 = vmax.f32 %v1444_v29, 0.0  ;;  %v9979_v29 = vadd.f32 -1.0, %v13438_v41 }
 0x182   : > { %10785 = vmatmul.mubr.bf16.gmra.mrb[44].mxu1 %v13885_v35  ;;  %v13966_v35 = vpack.c.bf16 %v1763_v31, %v1762_v40  ;;  %11907 = vrcp.f32 %v4047_v5  ;;  %v1439_v40 = vadd.f32 %v1438_v59, %v13519_v43  ;;  %v11898_v31 = vpop.eup %11897 }
 0x183   : > { %10788 = vmatprep.mubr.bf16.mxu1 %v13915_v23  ;;  %v1436_v23 = vadd.f32 %v1435_v47, %v13519_v43  ;;  %v5873_v13 = vmax.f32 %v9970_v60, 1.0  ;;  %v13977_v47 = vpop.permute.xlu0 %11336  ;;  %v9977_v60 = vadd.f32 -1.0, %v13416_v8  ;;  %11909 = vrcp.f32 %v4039_v0 }
 0x184   : > { %6005 = vperm.xlu0 %11133, %v11890_v2   ;;  %6120 = vperm.xlu1 %11144, %v11892_v14   ;;  %v1447_v2 = vadd.f32 %v10659_v50, %v13519_v43  ;;  %v9978_v14 = vadd.f32 -1.0, %v19339_v52  ;;  %v11900_v53 = vpop.eup %11899  ;;  %19340 = vst [vmem:[#allocation61_spill] sm:$0xff] %v13977_v47  ;;  %v1767_v55 = vmax.f32 %v1439_v40, 0.0  ;;  %v5872_v50 = vmax.f32 %v9969_v11, 1.0 }
 0x185   : > { %v1766_v18 = vmax.f32 %v1436_v23, 0.0  ;;  %11911 = vrcp.f32 %v5873_v13  ;;  %v11902_v59 = vpop.eup %11901  ;;  %v5880_v13 = vmax.f32 %v9977_v60, 1.0  ;;  %v9971_v52 = vadd.f32 -1.0, %v13455_v20 }
 0x186   : > { %v1769_v56 = vmax.f32 %v1447_v2, 0.0  ;;  %v5881_v5 = vmax.f32 %v9978_v14, 1.0  ;;  %v10662_v2 = vpop.f32.mrb[64].mxu0  ;;  %11913 = vrcp.f32 %v5872_v50  ;;  %v5882_v14 = vmax.f32 %v9979_v29, 1.0 }
 0x187   : > { %v1460_v23 = vadd.f32 %v10662_v2, %v13519_v43  ;;  %v1451_v8 = vpop.f32.mrb[65].mxu0  ;;  %v9986_v40 = vadd.f32 -1.0, %v13459_v63  ;;  %v5874_v2 = vmax.f32 %v9971_v52, 1.0 }
 0x188   : > { %6080 = vperm.xlu0 %11133, %v11894_v48   ;;  %4797 = vperm.xlu1 %11144, %v11896_v1   ;;  %v13982_v48 = vpack.c.bf16 %v1769_v56, %v1768_v44  ;;  %v13985_v1 = vpack.c.bf16 %v1767_v55, %v1766_v18  ;;  %v11904_v11 = vpop.eup %11903  ;;  %v10663_v0 = vpop.f32.mrb[66].mxu0  ;;  %11915 = vrcp.f32 %v5881_v5  ;;  %v9985_v5 = vadd.f32 -1.0, %v13467_v27 }
 0x189   : > { %v1463_v41 = vadd.f32 %v10663_v0, %v13519_v43  ;;  %v1454_v55 = vpop.f32.mrb[67].mxu0  ;;  %v11906_v56 = vpop.eup %11905  ;;  %11917 = vrcp.f32 %v5880_v13 }
 0x18a   : > { %10789 = vmatmul.mubr.bf16.gmra.mrb[48].mxu1 %v13911_v15  ;;  %v13987_v15 = vpop.permute.xlu1 %11321  ;;  %v1455_v44 = vadd.f32 %v1454_v55, %v13519_v43  ;;  %11919 = vrcp.f32 %v5882_v14  ;;  %v9993_v55 = vadd.f32 -1.0, %v13484_v32 }
 0x18b   : > { %10792 = vmatprep.mubr.bf16.mxu1 %v13941_v42  ;;  %19341 = vst [vmem:[#allocation15_spill] sm:$0xff] %v13987_v15  ;;  %v1452_v42 = vadd.f32 %v1451_v8, %v13519_v43  ;;  %v1773_v18 = vmax.f32 %v1463_v41, 0.0  ;;  %11921 = vrcp.f32 %v5874_v2  ;;  %v5888_v41 = vmax.f32 %v9985_v5, 1.0 }
 0x18c   : > { %4757 = vperm.xlu0 %11133, %v11898_v31   ;;  %4872 = vperm.xlu1 %11144, %v11900_v53   ;;  %v13994_v31 = vpop.permute.xlu0 %11346  ;;  %v1772_v53 = vmax.f32 %v1460_v23, 0.0  ;;  %v11908_v50 = vpop.eup %11907  ;;  %v1771_v60 = vmax.f32 %v1455_v44, 0.0  ;;  %v9994_v23 = vadd.f32 -1.0, %v13477_v39  ;;  %v9980_v44 = vadd.f32 -1.0, %v13539_v57 }
 0x18d   : > { %19342 = vst [vmem:[#allocation16_spill] sm:$0xff] %v13994_v31  ;;  %v1770_v20 = vmax.f32 %v1452_v42, 0.0  ;;  %v5896_v5 = vmax.f32 %v9993_v55, 1.0  ;;  %v9987_v55 = vadd.f32 -1.0, %v13684_v21 }
 0x18e   : > { %v13999_v29 = vpop.permute.xlu1 %11331  ;;  %v14002_v63 = vpack.c.bf16 %v1773_v18, %v1772_v53 }
 0x18f   : > { %19343 = vst [vmem:[#allocation17_spill] sm:$0xff] %v13999_v29  ;;  %v14005_v8 = vpack.c.bf16 %v1771_v60, %v1770_v20 }
 0x190   : > { %4832 = vperm.xlu0 %11133, %v11902_v59   ;;  %6125 = vperm.xlu1 %11144, %v11904_v11   ;;  %v5889_v59 = vmax.f32 %v9986_v40, 1.0  ;;  %v11910_v11 = vpop.eup %11909  ;;  %v14008_v13 = vpop.permute.xlu0 %11356  ;;  %v5897_v40 = vmax.f32 %v9994_v23, 1.0  ;;  %v5883_v23 = vmax.f32 %v9980_v44, 1.0  ;;  %v9981_v44 = vadd.f32 -1.0, %v13722_v46 }
 0x191   : > { %v11912_v27 = vpop.eup %11911  ;;  %19344 = vst [vmem:[#allocation3_spill] sm:$0xff] %v14008_v13 }
 0x192   : > { %10793 = vmatmul.mubr.bf16.gmra.mrb[52].mxu1 %v13938_v26  ;;  %v10666_v26 = vpop.f32.mrb[68].mxu0  ;;  %11923 = vrcp.f32 %v5889_v59  ;;  %v11914_v53 = vpop.eup %11913  ;;  %v9972_v59 = vadd.f32 -1.0, %v13547_v34 }
 0x193   : > { %10796 = vmatprep.mubr.bf16.mxu1 %v13966_v35  ;;  %v1476_v42 = vadd.f32 %v10666_v26, %v13519_v43  ;;  %v1467_v0 = vpop.f32.mrb[69].mxu0  ;;  %v14015_v18 = vpop.permute.xlu1 %11341  ;;  %11925 = vrcp.f32 %v5888_v41  ;;  %v9995_v26 = vadd.f32 -1.0, %v13666_v19 }
 0x194   : > { %6085 = vperm.xlu0 %11133, %v11906_v56   ;;  %4877 = vperm.xlu1 %11144, %v11908_v50   ;;  %v1468_v35 = vadd.f32 %v1467_v0, %v13519_v43  ;;  %v10667_v52 = vpop.f32.mrb[70].mxu0  ;;  %19345 = vst [vmem:[#allocation18_spill] sm:$0xff] %v14015_v18  ;;  %v11916_v60 = vpop.eup %11915  ;;  %11927 = vrcp.f32 %v5897_v40  ;;  %v5875_v41 = vmax.f32 %v9972_v59, 1.0  ;;  %v9973_v59 = vadd.f32 -1.0, %v13735_v45 }
 0x195   : > { %v1479_v39 = vadd.f32 %v10667_v52, %v13519_v43  ;;  %v1470_v14 = vpop.f32.mrb[71].mxu0  ;;  %v1776_v50 = vmax.f32 %v1476_v42, 0.0  ;;  %v11918_v0 = vpop.eup %11917  ;;  %11929 = vrcp.f32 %v5896_v5  ;;  %v5898_v40 = vmax.f32 %v9995_v26, 1.0 }
 0x196   : > { %v1471_v56 = vadd.f32 %v1470_v14, %v13519_v43  ;;  %v1774_v32 = vmax.f32 %v1468_v35, 0.0  ;;  %v11920_v34 = vpop.eup %11919  ;;  %11931 = vrcp.f32 %v5883_v23  ;;  %v5890_v5 = vmax.f32 %v9987_v55, 1.0 }
 0x197   : > { %v1777_v20 = vmax.f32 %v1479_v39, 0.0  ;;  %v14030_v19 = vpop.permute.xlu1 %11351  ;;  %11933 = vrcp.f32 %v5875_v41  ;;  %v5884_v23 = vmax.f32 %v9981_v44, 1.0  ;;  %v9996_v26 = vadd.f32 -1.0, %v13742_v58 }
 0x198   : > { %4837 = vperm.xlu0 %11133, %v11910_v11   ;;  %6135 = vperm.xlu1 %11144, %v11912_v27   ;;  %v1775_v2 = vmax.f32 %v1471_v56, 0.0  ;;  %v14023_v11 = vpop.permute.xlu0 %11366  ;;  %19347 = vst [vmem:[#allocation77_spill] sm:$0xff] %v14030_v19  ;;  %11935 = vrcp.f32 %v5898_v40  ;;  %v9988_v41 = vadd.f32 -1.0, %v13752_v7 }
 0x199   : > { %v14020_v57 = vpack.c.bf16 %v1777_v20, %v1776_v50  ;;  %19346 = vst [vmem:[#allocation64_spill] sm:$0xff] %v14023_v11  ;;  %11937 = vrcp.f32 %v5890_v5 }
 0x19a   : > { %10797 = vmatmul.mubr.bf16.gmra.mrb[56].mxu1 %v13960_v17  ;;  %v14025_v42 = vpack.c.bf16 %v1775_v2, %v1774_v32  ;;  %v10670_v17 = vpop.f32.mrb[72].mxu0  ;;  %11939 = vrcp.f32 %v5884_v23  ;;  %v9997_v23 = vadd.f32 -1.0, %v13814_v61 }
 0x19b   : > { %10800 = vmatprep.mubr.bf16.mxu1 %v13985_v1  ;;  %v1492_v27 = vadd.f32 %v10670_v17, %v13519_v43  ;;  %v1483_v35 = vpop.f32.mrb[73].mxu0 }
 0x19c   : > { %6130 = vperm.xlu0 %11133, %v11914_v53   ;;  %6175 = vperm.xlu1 %11144, %v11916_v60   ;;  %v1484_v1 = vadd.f32 %v1483_v35, %v13519_v43  ;;  %v10671_v52 = vpop.f32.mrb[74].mxu0  ;;  %v11922_v53 = vpop.eup %11921 }
 0x19d   : > { %v1495_v39 = vadd.f32 %v10671_v52, %v13519_v43  ;;  %v1486_v14 = vpop.f32.mrb[75].mxu0  ;;  %v1780_v50 = vmax.f32 %v1492_v27, 0.0  ;;  %v11924_v60 = vpop.eup %11923  ;;  %v5876_v52 = vmax.f32 %v9973_v59, 1.0 }
 0x19e   : > { %v1487_v56 = vadd.f32 %v1486_v14, %v13519_v43  ;;  %v14035_v32 = vpop.permute.xlu0 %11376  ;;  %v1778_v21 = vmax.f32 %v1484_v1, 0.0  ;;  %v11926_v27 = vpop.eup %11925  ;;  %v9982_v14 = vadd.f32 -1.0, %v13788_v37 }
 0x19f   : > { %v1781_v20 = vmax.f32 %v1495_v39, 0.0  ;;  %19348 = vst [vmem:[#allocation81_spill] sm:$0xff] %v14035_v32  ;;  %v11928_v45 = vpop.eup %11927  ;;  %v5899_v39 = vmax.f32 %v9996_v26, 1.0  ;;  %11941 = vrcp.f32 %v5876_v52 }
 0x1a0   : > { %6170 = vperm.xlu0 %11133, %v11918_v0   ;;  %6180 = vperm.xlu1 %11144, %v11920_v34   ;;  %v1779_v2 = vmax.f32 %v1487_v56, 0.0  ;;  %v10674_v0 = vpop.f32.mrb[76].mxu0  ;;  %v11930_v56 = vpop.eup %11929  ;;  %v5885_v59 = vmax.f32 %v9982_v14, 1.0 }
 0x1a1   : > { %v14040_v46 = vpack.c.bf16 %v1781_v20, %v1780_v50  ;;  %v1508_v35 = vadd.f32 %v10674_v0, %v13519_v43  ;;  %v1499_v34 = vpop.f32.mrb[77].mxu0  ;;  %v11932_v20 = vpop.eup %11931  ;;  %11943 = vrcp.f32 %v5899_v39 }
 0x1a2   : > { %10801 = vmatmul.mubr.bf16.gmra.mrb[60].mxu1 %v13982_v48  ;;  %v14043_v17 = vpack.c.bf16 %v1779_v2, %v1778_v21  ;;  %v14045_v48 = vpop.permute.xlu1 %11361  ;;  %v10675_v1 = vpop.f32.mrb[78].mxu0  ;;  %v5891_v21 = vmax.f32 %v9988_v41, 1.0  ;;  %v9974_v2 = vadd.f32 -1.0, %v13805_v3  ;;  %v5900_v41 = vmax.f32 %v9997_v23, 1.0 }
 0x1a3   : > { %10804 = vmatprep.mubr.bf16.mxu1 %v14005_v8  ;;  %19349 = vst [vmem:[#allocation19_spill] sm:$0xff] %v14045_v48  ;;  %v1500_v8 = vadd.f32 %v1499_v34, %v13519_v43  ;;  %v1511_v58 = vadd.f32 %v10675_v1, %v13519_v43  ;;  %v1502_v55 = vpop.f32.mrb[79].mxu0  ;;  %v14052_v40 = vpop.permute.xlu0 %11386  ;;  %v9989_v1 = vadd.f32 -1.0, %v13825_v12 }
 0x1a4   : > { %6140 = vperm.xlu0 %11133, %v11922_v53   ;;  %6215 = vperm.xlu1 %11144, %v11924_v60   ;;  %19350 = vst [vmem:[#allocation20_spill] sm:$0xff] %v14052_v40  ;;  %v1503_v44 = vadd.f32 %v1502_v55, %v13519_v43  ;;  %v1784_v53 = vmax.f32 %v1508_v35, 0.0  ;;  %v11934_v0 = vpop.eup %11933  ;;  %11945 = vrcp.f32 %v5891_v21  ;;  %v9998_v21 = vadd.f32 -1.0, %v13865_v54 }
 0x1a5   : > { %v1785_v50 = vmax.f32 %v1511_v58, 0.0  ;;  %v1782_v7 = vmax.f32 %v1500_v8, 0.0  ;;  %v11936_v3 = vpop.eup %11935  ;;  %v5877_v8 = vmax.f32 %v9974_v2, 1.0  ;;  %11947 = vrcp.f32 %v5885_v59 }
 0x1a6   : > { %v1783_v60 = vmax.f32 %v1503_v44, 0.0  ;;  %v14057_v5 = vpop.permute.xlu1 %11371  ;;  %v9983_v58 = vadd.f32 -1.0, %v13849_v22  ;;  %v11938_v39 = vpop.eup %11937 }
 0x1a7   : > { %19351 = vst [vmem:[#allocation21_spill] sm:$0xff] %v14057_v5  ;;  %v14060_v37 = vpack.c.bf16 %v1785_v50, %v1784_v53  ;;  %v14066_v34 = vpop.permute.xlu0 %11396  ;;  %v11940_v53 = vpop.eup %11939  ;;  %11949 = vrcp.f32 %v5877_v8  ;;  %v5901_v8 = vmax.f32 %v9998_v21, 1.0 }
 0x1a8   : > { %6210 = vperm.xlu0 %11133, %v11926_v27   ;;  %6255 = vperm.xlu1 %11144, %v11928_v45   ;;  %v14063_v26 = vpack.c.bf16 %v1783_v60, %v1782_v7  ;;  %19352 = vst [vmem:[#allocation22_spill] sm:$0xff] %v14066_v34  ;;  %v9975_v7 = vadd.f32 -1.0, %v13862_v38  ;;  %11951 = vrcp.f32 %v5900_v41  ;;  %v5886_v60 = vmax.f32 %v9983_v58, 1.0 }
 0x1aa   : > { %10805 = vmatmul.mubr.bf16.gmra.mrb[64].mxu1 %v14002_v63  ;;  %v10678_v63 = vpop.f32.mrb[80].mxu0  ;;  %v14073_v14 = vpop.permute.xlu1 %11381 }
 0x1ab   : > { %10808 = vmatprep.mubr.bf16.mxu1 %v14025_v42  ;;  %v1524_v27 = vadd.f32 %v10678_v63, %v13519_v43  ;;  %v1515_v35 = vpop.f32.mrb[81].mxu0  ;;  %19353 = vst [vmem:[#allocation23_spill] sm:$0xff] %v14073_v14  ;;  %v14081_v2 = vpop.permute.xlu0 %11406 }
 0x1ac   : > { %6250 = vperm.xlu0 %11133, %v11930_v56   ;;  %6185 = vperm.xlu1 %11144, %v11932_v20   ;;  %v1516_v42 = vadd.f32 %v1515_v35, %v13519_v43  ;;  %v10679_v45 = vpop.f32.mrb[82].mxu0  ;;  %v5892_v20 = vmax.f32 %v9989_v1, 1.0  ;;  %19354 = vst [vmem:[#allocation69_spill] sm:$0xff] %v14081_v2  ;;  %v5878_v35 = vmax.f32 %v9975_v7, 1.0  ;;  %v9984_v1 = vadd.f32 -1.0, %v13913_v25 }
 0x1ad   : > { %v1527_v61 = vadd.f32 %v10679_v45, %v13519_v43  ;;  %v1518_v52 = vpop.f32.mrb[83].mxu0  ;;  %v1788_v44 = vmax.f32 %v1524_v27, 0.0 }
 0x1ae   : > { %v1519_v55 = vadd.f32 %v1518_v52, %v13519_v43  ;;  %v1786_v12 = vmax.f32 %v1516_v42, 0.0  ;;  %v10682_v23 = vpop.f32.mrb[84].mxu0  ;;  %11953 = vrcp.f32 %v5892_v20  ;;  %v14086_v42 = vpop.permute.xlu1 %11391 }
 0x1af   : > { %v1789_v56 = vmax.f32 %v1527_v61, 0.0  ;;  %v1540_v63 = vadd.f32 %v10682_v23, %v13519_v43  ;;  %19355 = vst [vmem:[#allocation70_spill] sm:$0xff] %v14086_v42  ;;  %11955 = vrcp.f32 %v5886_v60  ;;  %v9991_v23 = vadd.f32 -1.0, %v13933_v9 }
 0x1b0   : > { %6145 = vperm.xlu0 %11133, %v11934_v0   ;;  %6260 = vperm.xlu1 %11144, %v11936_v3   ;;  %v1787_v50 = vmax.f32 %v1519_v55, 0.0  ;;  %v1531_v0 = vpop.f32.mrb[85].mxu0  ;;  %v9990_v3 = vadd.f32 -1.0, %v13880_v10  ;;  %11957 = vrcp.f32 %v5878_v35 }
 0x1b1   : > { %v14078_v22 = vpack.c.bf16 %v1789_v56, %v1788_v44  ;;  %v1532_v38 = vadd.f32 %v1531_v0, %v13519_v43  ;;  %v1792_v41 = vmax.f32 %v1540_v63, 0.0  ;;  %11959 = vrcp.f32 %v5901_v8 }
 0x1b2   : > { %10809 = vmatmul.mubr.bf16.gmra.mrb[68].mxu1 %v14020_v57  ;;  %v1874_v59 = vpack.c.bf16 %v1787_v50, %v1786_v12  ;;  %v11942_v57 = vpop.eup %11941  ;;  %v5893_v56 = vmax.f32 %v9990_v3, 1.0  ;;  %v5887_v12 = vmax.f32 %v9984_v1, 1.0  ;;  %v9999_v50 = vadd.f32 -1.0, %v13925_v24  ;;  %v14099_v60 = vpop.permute.xlu1 %11401 }
 0x1b3   : > { %10812 = vmatprep.mubr.bf16.mxu1 %v14043_v17  ;;  %v11944_v27 = vpop.eup %11943  ;;  %v10683_v17 = vpop.f32.mrb[86].mxu0  ;;  %v1790_v10 = vmax.f32 %v1532_v38, 0.0  ;;  %19357 = vst [vmem:[#allocation90_spill] sm:$0xff] %v14099_v60  ;;  %v5894_v0 = vmax.f32 %v9991_v23, 1.0 }
 0x1b4   : > { %6220 = vperm.xlu0 %11133, %v11938_v39   ;;  %6190 = vperm.xlu1 %11144, %v11940_v53   ;;  %v1543_v54 = vadd.f32 %v10683_v17, %v13519_v43  ;;  %v1534_v45 = vpop.f32.mrb[87].mxu0  ;;  %v11946_v52 = vpop.eup %11945  ;;  %v9976_v53 = vadd.f32 -1.0, %v13921_v36  ;;  %11961 = vrcp.f32 %v5893_v56  ;;  %v5902_v36 = vmax.f32 %v9999_v50, 1.0 }
 0x1b5   : > { %v1535_v61 = vadd.f32 %v1534_v45, %v13519_v43  ;;  %v11948_v55 = vpop.eup %11947  ;;  %v14091_v39 = vpop.permute.xlu0 %11416  ;;  %11963 = vrcp.f32 %v5887_v12 }
 0x1b6   : > { %v1793_v58 = vmax.f32 %v1543_v54, 0.0  ;;  %19356 = vst [vmem:[#allocation72_spill] sm:$0xff] %v14091_v39  ;;  %v11950_v7 = vpop.eup %11949  ;;  %v5879_v21 = vmax.f32 %v9976_v53, 1.0  ;;  %v14107_v38 = vpop.permute.xlu1 %11411 }
 0x1b7   : > { %v1791_v44 = vmax.f32 %v1535_v61, 0.0  ;;  %19359 = vst [vmem:[#allocation92_spill] sm:$0xff] %v14107_v38  ;;  %v10686_v3 = vpop.f32.mrb[88].mxu0 }
 0x1b8   : > { %6150 = vperm.xlu0 %11133, %v11942_v57   ;;  %6265 = vperm.xlu1 %11144, %v11944_v27   ;;  %v14096_v25 = vpack.c.bf16 %v1793_v58, %v1792_v41  ;;  %11965 = vrcp.f32 %v5879_v21  ;;  %v9992_v27 = vadd.f32 -1.0, %v13957_v4  ;;  %v1547_v45 = vpop.f32.mrb[89].mxu0 }
 0x1b9   : > { %v1876_v20 = vpack.c.bf16 %v1791_v44, %v1790_v10  ;;  %v14103_v57 = vpop.permute.xlu0 %11426  ;;  %11967 = vrcp.f32 %v5902_v36  ;;  %v1548_v4 = vadd.f32 %v1547_v45, %v13519_v43  ;;  %v10687_v8 = vpop.f32.mrb[90].mxu0 }
 0x1ba   : > { %10813 = vmatmul.mubr.bf16.gmra.mrb[72].mxu1 %v14040_v46  ;;  %v11952_v46 = vpop.eup %11951  ;;  %19358 = vst [vmem:[#allocation91_spill] sm:$0xff] %v14103_v57  ;;  %11969 = vrcp.f32 %v5894_v0  ;;  %v5895_v54 = vmax.f32 %v9992_v27, 1.0  ;;  %v14113_v1 = vpop.permute.xlu1 %11421  ;;  %v1559_v61 = vadd.f32 %v10687_v8, %v13519_v43 }
 0x1bb   : > { %10816 = vmatprep.mubr.bf16.mxu1 %v14063_v26  ;;  %v10000_v26 = vadd.f32 -1.0, %v13950_v62  ;;  %v11954_v63 = vpop.eup %11953  ;;  %19361 = vst [vmem:[#allocation94_spill] sm:$0xff] %v14113_v1  ;;  %v1794_v56 = vmax.f32 %v1548_v4, 0.0 }
 0x1bc   : > { %6225 = vperm.xlu0 %11133, %v11946_v52   ;;  %6195 = vperm.xlu1 %11144, %v11948_v55   ;;  %v11956_v24 = vpop.eup %11955  ;;  %v1550_v52 = vpop.f32.mrb[91].mxu0  ;;  %v1797_v10 = vmax.f32 %v1559_v61, 0.0 }
 0x1bd   : > { %v5903_v9 = vmax.f32 %v10000_v26, 1.0  ;;  %v11958_v17 = vpop.eup %11957  ;;  %v14109_v35 = vpop.permute.xlu0 %11436  ;;  %v1551_v58 = vadd.f32 %v1550_v52, %v13519_v43  ;;  %v19368_v52 = vld [vmem:[#allocation27_spill] sm:$0xff] }
 0x1be   : > { %v11960_v62 = vpop.eup %11959  ;;  %19360 = vst [vmem:[#allocation93_spill] sm:$0xff] %v14109_v35  ;;  %v14120_v21 = vpop.permute.xlu1 %11431 }
 0x1bf   : > { %11971 = vrcp.f32 %v5903_v9  ;;  %v1795_v53 = vmax.f32 %v1551_v58, 0.0  ;;  %19363 = vst [vmem:[#allocation96_spill] sm:$0xff] %v14120_v21 }
 0x1c0   : > { %6155 = vperm.xlu0 %11133, %v11950_v7   ;;  %6270 = vperm.xlu1 %11144, %v11952_v46   ;;  %11973 = vrcp.f32 %v5895_v54 }
 0x1c1   : > { %v14118_v44 = vpop.permute.xlu0 %11446  ;;  %v1878_v46 = vpack.c.bf16 %v1795_v53, %v1794_v56 }
 0x1c2   : > { %10817 = vmatmul.mubr.bf16.gmra.mrb[76].mxu1 %v14060_v37  ;;  %v1556_v37 = vadd.f32 %v10686_v3, %v13519_v43  ;;  %19362 = vst [vmem:[#allocation95_spill] sm:$0xff] %v14118_v44  ;;  %v14125_v26 = vpop.permute.xlu1 %11441 }
 0x1c3   : > { %10820 = vmatprep.mubr.bf16.mxu1 %v1874_v59  ;;  %v11962_v59 = vpop.eup %11961  ;;  %19365 = vst [vmem:[#allocation98_spill] sm:$0xff] %v14125_v26 }
 0x1c4   : > { %6230 = vperm.xlu0 %11133, %v11954_v63   ;;  %6200 = vperm.xlu1 %11144, %v11956_v24   ;;  %v11964_v41 = vpop.eup %11963  ;;  %v1796_v55 = vmax.f32 %v1556_v37, 0.0  ;;  %v10690_v24 = vpop.f32.mrb[92].mxu0 }
 0x1c5   : > { %v11966_v12 = vpop.eup %11965  ;;  %v14122_v36 = vpop.permute.xlu0 %5970  ;;  %v1572_v0 = vadd.f32 %v10690_v24, %v13519_v43  ;;  %v19389_v24 = vld [vmem:[#allocation46_spill] sm:$0xff] }
 0x1c6   : > { %v1879_v50 = vpack.c.bf16 %v1797_v10, %v1796_v55  ;;  %v11968_v7 = vpop.eup %11967  ;;  %19364 = vst [vmem:[#allocation97_spill] sm:$0xff] %v14122_v36  ;;  %v1563_v27 = vpop.f32.mrb[93].mxu0  ;;  %v19369_v55 = vld [vmem:[#allocation24_spill] sm:$0xff]  ;;  %v19470_v35 = vunpack.i.h.bf16 %v19389_v24 }
 0x1c7   : > { %v1564_v9 = vadd.f32 %v1563_v27, %v13519_v43  ;;  %v1800_v37 = vmax.f32 %v1572_v0, 0.0  ;;  %v19374_v27 = vld [vmem:[#allocation26_spill] sm:$0xff] }
 0x1c8   : > { %6160 = vperm.xlu0 %11133, %v11958_v17   ;;  %6275 = vperm.xlu1 %11144, %v11960_v62   ;;  %v10691_v17 = vpop.f32.mrb[94].mxu0  ;;  %v11542_v0 = vld [vmem:[%s18725_s7 + $0x80] sm:$0xff]  }
 0x1c9   : > { %v14127_v63 = vpop.permute.xlu0 %6010  ;;  %v1566_v3 = vpop.f32.mrb[95].mxu0  ;;  %v1798_v4 = vmax.f32 %v1564_v9, 0.0  ;;  %v19380_v9 = vld [vmem:[#allocation32_spill] sm:$0xff]  ;;  %10868 = vmatprep.subr.bf16.mxu0 %v11542_v0 }
 0x1ca   : > { %10821 = vmatmul.mubr.bf16.gmra.mrb[80].mxu1 %v14078_v22  ;;  %v11970_v22 = vpop.eup %11969  ;;  %19366 = vst [vmem:[#allocation99_spill] sm:$0xff] %v14127_v63  ;;  %v1567_v54 = vadd.f32 %v1566_v3, %v13519_v43  ;;  %10869 = vmatpush3.bf16.msra.mxu0 %v11542_v0 }
 0x1cb   : > { %10824 = vmatprep.mubr.bf16.mxu1 %v1876_v20  ;;  %v11972_v23 = vpop.eup %11971 }
 0x1cc   : > { %6235 = vperm.xlu0 %11133, %v11962_v59   ;;  %6205 = vperm.xlu1 %11144, %v11964_v41   ;;  %v11974_v20 = vpop.eup %11973  ;;  %v1799_v8 = vmax.f32 %v1567_v54, 0.0  ;;  %v19398_v41 = vld [vmem:[#allocation62_spill] sm:$0xff] }
 0x1cd   : > { %v14131_v62 = vpop.permute.xlu0 %4722  ;;  %v19466_v26 = vunpack.i.l.bf16 %v19398_v41 }
 0x1ce   : > { %19367 = vst [vmem:[#allocation100_spill] sm:$0xff] %v14131_v62  ;;  %v1880_v61 = vpack.c.bf16 %v1799_v8, %v1798_v4  ;;  %v10694_v8 = vpop.f32.mrb[96].mxu0  ;;  %v12164_v4 = vld [vmem:[%s18726_s8] sm:$0xff] }
 0x1cf   : > { %v1588_v54 = vadd.f32 %v10694_v8, %v13519_v43 }
 0x1d0   : > { %6165 = vperm.xlu0 %11133, %v11966_v12   ;;  %6280 = vperm.xlu1 %11144, %v11968_v7   ;;  %v19371_v12 = vld [vmem:[#allocation29_spill] sm:$0xff] }
 0x1d1   : > { %v14138_v56 = vpop.permute.xlu0 %4762  ;;  %v19403_v7 = vld [vmem:[#allocation5_spill] sm:$0xff] }
 0x1d2   : > { %10825 = vmatmul.mubr.bf16.gmra.mrb[84].mxu1 %v14096_v25  ;;  %v1575_v25 = vadd.f32 %v10691_v17, %v13519_v43  ;;  %19370 = vst [vmem:[#allocation27_spill] sm:$0xff] %v14138_v56 }
 0x1d3   : > { %10828 = vmatprep.mubr.bf16.mxu1 %v1878_v46  ;;  %v19372_v46 = vld [vmem:[#allocation25_spill] sm:$0xff] }
 0x1d4   : > { %6240 = vperm.xlu0 %11133, %v11970_v22   ;;  %6285 = vperm.xlu1 %11144, %v11972_v23   ;;  %v1801_v45 = vmax.f32 %v1575_v25, 0.0  ;;  %v19385_v22 = vld [vmem:[#allocation39_spill] sm:$0xff] }
 0x1d5   : > { %v14164_v53 = vpop.permute.xlu0 %5980  ;;  %v19480_v2 = vunpack.i.h.bf16 %v19385_v22 }
 0x1d6   : > { %v1881_v59 = vpack.c.bf16 %v1801_v45, %v1800_v37  ;;  %19383 = vst [vmem:[#allocation24_spill] sm:$0xff] %v14164_v53  ;;  %v1579_v45 = vpop.f32.mrb[97].mxu0  ;;  %v19393_v37 = vld [vmem:[#allocation54_spill] sm:$0xff] }
 0x1d7   : > { %v10695_v56 = vpop.f32.mrb[98].mxu0 }
 0x1d8   : > { %6245 = vperm.xlu0 %11133, %v11974_v20   ;;  %v1591_v8 = vadd.f32 %v10695_v56, %v13519_v43  ;;  %v1582_v3 = vpop.f32.mrb[99].mxu0 }
 0x1d9   : > { %v14189_v25 = vpop.permute.xlu0 %6050  ;;  %v10698_v28 = vpop.f32.mrb[100].mxu0 }
 0x1da   : > { %10829 = vmatmul.mubr.bf16.gmra.mrb[88].mxu1 %v1879_v50  ;;  %v1580_v50 = vadd.f32 %v1579_v45, %v13519_v43  ;;  %19394 = vst [vmem:[#allocation29_spill] sm:$0xff] %v14189_v25  ;;  %v1583_v45 = vadd.f32 %v1582_v3, %v13519_v43  ;;  %v1804_v25 = vmax.f32 %v1588_v54, 0.0  ;;  %v1805_v10 = vmax.f32 %v1591_v8, 0.0  ;;  %v1595_v17 = vpop.f32.mrb[101].mxu0 }
 0x1db   : > { %10832 = vmatprep.mubr.bf16.mxu1 %v1880_v61  ;;  %v1604_v3 = vadd.f32 %v10698_v28, %v13519_v43 }
 0x1dc   : > { %v1802_v62 = vmax.f32 %v1580_v50, 0.0  ;;  %v1803_v61 = vmax.f32 %v1583_v45, 0.0  ;;  %v1883_v53 = vpack.c.bf16 %v1805_v10, %v1804_v25 }
 0x1dd   : > { %v14211_v20 = vpop.permute.xlu0 %6090  ;;  %v1808_v10 = vmax.f32 %v1604_v3, 0.0 }
 0x1de   : > { %v1882_v56 = vpack.c.bf16 %v1803_v61, %v1802_v62  ;;  %19402 = vst [vmem:[#allocation25_spill] sm:$0xff] %v14211_v20  ;;  %v1596_v62 = vadd.f32 %v1595_v17, %v13519_v43  ;;  %v10699_v61 = vpop.f32.mrb[102].mxu0 }
 0x1df   : > { %v1607_v28 = vadd.f32 %v10699_v61, %v13519_v43  ;;  %v1598_v30 = vpop.f32.mrb[103].mxu0  ;;  %v19405_v61 = vsub.s32 1, %v19403_v7 }
 0x1e0   : > { %v1599_v17 = vadd.f32 %v1598_v30, %v13519_v43  ;;  %v1806_v0 = vmax.f32 %v1596_v62, 0.0  ;;  %v10702_v7 = vpop.f32.mrb[104].mxu0 }
 0x1e1   : > { %v1809_v63 = vmax.f32 %v1607_v28, 0.0  ;;  %v14233_v54 = vrot.slane %v12164_v4, %v19405_v61  ;;  %v14240_v28 = vpop.permute.xlu0 %4732  ;;  %v1611_v30 = vpop.f32.mrb[105].mxu0 }
 0x1e2   : > { %10833 = vmatmul.mubr.bf16.gmra.mrb[92].mxu1 %v1881_v59  ;;  %v1807_v23 = vmax.f32 %v1599_v17, 0.0  ;;  %19406 = vst [vmem:[#allocation26_spill] sm:$0xff] %v14240_v28  ;;  %v1612_v61 = vadd.f32 %v1611_v30, %v13519_v43 }
 0x1e3   : > { %10836 = vmatprep.mubr.bf16.mxu1 %v1882_v56  ;;  %v1885_v33 = vpack.c.bf16 %v1809_v63, %v1808_v10  ;;  %v1620_v56 = vadd.f32 %v10702_v7, %v13519_v43 }
 0x1e5   : > { %v1812_v47 = vmax.f32 %v1620_v56, 0.0  ;;  %v14275_v30 = vpop.permute.xlu0 %4802 }
 0x1e6   : > { %19407 = vst [vmem:[#allocation32_spill] sm:$0xff] %v14275_v30 }
 0x1ea   : > { %10837 = vmatmul.mubr.bf16.gmra.mrb[96].mxu1 %v1883_v53  ;;  %v1884_v53 = vpack.c.bf16 %v1807_v23, %v1806_v0  ;;  %v10703_v23 = vpop.f32.mrb[106].mxu0 }
 0x1eb   : > { %v1614_v4 = vpop.f32.mrb[107].mxu0 }
 0x1ec   : > { %10840 = vmatprep.mubr.bf16.mxu1 %v1884_v53  ;;  %v1615_v53 = vadd.f32 %v1614_v4, %v13519_v43  ;;  %v19409_v4 = vunpack.i.l.bf16 %v19372_v46 }
 0x1ee   : > { %v1811_v51 = vmax.f32 %v1615_v53, 0.0  ;;  %v10706_v53 = vpop.f32.mrb[108].mxu0 }
 0x1ef   : > { %v1627_v29 = vpop.f32.mrb[109].mxu0 }
 0x1f0   : > { %v10707_v17 = vpop.f32.mrb[110].mxu0 }
 0x1f2   : > { %10841 = vmatmul.mubr.bf16.gmra.mrb[100].mxu1 %v1885_v33  ;;  %v19412_v33 = vunpack.i.l.bf16 %v19369_v55 }
 0x1fd   : > { %v10742_v25 = vpop.f32.mrb[0].mxu1 }
 0x1fe   : > { %v14249_v3 = vadd.f32 %v10742_v25, %v14233_v54  ;;  %v2000_v63 = vpop.f32.mrb[1].mxu1  ;;  %v1623_v25 = vadd.f32 %v10703_v23, %v13519_v43  ;;  %v1810_v23 = vmax.f32 %v1612_v61, 0.0 }
 0x1ff   : > { %v14255_v0 = vadd.f32 %v2000_v63, %v14233_v54  ;;  %v10743_v63 = vpop.f32.mrb[2].mxu1 }
 0x200   : > { %v1813_v18 = vmax.f32 %v1623_v25, 0.0  ;;  %v14267_v7 = vadd.f32 %v10743_v63, %v14233_v54  ;;  %v2003_v62 = vpop.f32.mrb[3].mxu1  ;;  %v1886_v61 = vpack.c.bf16 %v1811_v51, %v1810_v23  ;;  %v19408_v16 = vmax.f32 %v14249_v3, 0.0 }
 0x201   : > { %v14271_v10 = vadd.f32 %v2003_v62, %v14233_v54  ;;  %v1636_v62 = vadd.f32 %v10706_v53, %v13519_v43  ;;  %v1628_v23 = vadd.f32 %v1627_v29, %v13519_v43  ;;  %v19411_v53 = vmax.f32 %v14255_v0, 0.0 }
 0x202   : > { %v1887_v56 = vpack.c.bf16 %v1813_v18, %v1812_v47  ;;  %v18880_v25 = vmax.f32 %v14267_v7, 0.0  ;;  %v3281_v30 = vmul.f32 %v19409_v4, %v19408_v16  ;;  %v19410_v47 = vunpack.i.h.bf16 %v19372_v46  ;;  %10844 = vmatprep.mubr.bf16.mxu1 %v1886_v61  ;;  %v1630_v61 = vpop.f32.mrb[111].mxu0 }
 0x203   : > { %v3279_v13 = vmul.f32 %v19412_v33, %v19411_v53  ;;  %v19413_v16 = vmax.f32 %v14271_v10, 0.0  ;;  %v19414_v4 = vunpack.i.h.bf16 %v19369_v55  ;;  %v1639_v29 = vadd.f32 %v10707_v17, %v13519_v43 }
 0x204   : > { %v3282_v18 = vmul.f32 %v19410_v47, %v18880_v25  ;;  %10845 = vmatmul.mubr.bf16.gmra.mrb[104].mxu1 %v1887_v56  ;;  %v1816_v19 = vmax.f32 %v1636_v62, 0.0  ;;  %v1631_v33 = vadd.f32 %v1630_v61, %v13519_v43 }
 0x205   : > { %v10746_v48 = vpop.f32.mrb[4].mxu1  ;;  %v3280_v5 = vmul.f32 %v19414_v4, %v19413_v16  ;;  %v1814_v16 = vmax.f32 %v1628_v23, 0.0  ;;  %v1817_v4 = vmax.f32 %v1639_v29, 0.0  ;;  %v10710_v29 = vpop.f32.mrb[112].mxu0 }
 0x206   : > { %v14291_v63 = vadd.f32 %v10746_v48, %v14233_v54  ;;  %v2016_v51 = vpop.f32.mrb[5].mxu1  ;;  %v4119_v15 = vadd.f32 %v3282_v18, %v3281_v30  ;;  %v1815_v25 = vmax.f32 %v1631_v33, 0.0  ;;  %v1652_v17 = vadd.f32 %v10710_v29, %v13519_v43  ;;  %v1643_v50 = vpop.f32.mrb[113].mxu0 }
 0x207   : > { %v14303_v47 = vadd.f32 %v2016_v51, %v14233_v54  ;;  %v4112_v53 = vadd.f32 %v3280_v5, %v3279_v13  ;;  %v10747_v49 = vpop.f32.mrb[6].mxu1  ;;  %v14318_v13 = vpop.permute.xlu0 %4842  ;;  %v1889_v5 = vpack.c.bf16 %v1817_v4, %v1816_v19  ;;  %v19420_v29 = vunpack.i.l.bf16 %v19374_v27 }
 0x208   : > { %v4120_v51 = vrot.slane %v4119_v15, 4  ;;  %v14311_v31 = vadd.f32 %v10747_v49, %v14233_v54  ;;  %v2019_v48 = vpop.f32.mrb[7].mxu1  ;;  %19415 = vst [vmem:[#allocation39_spill] sm:$0xff] %v14318_v13  ;;  %v1888_v49 = vpack.c.bf16 %v1815_v25, %v1814_v16  ;;  %v19416_v56 = vmax.f32 %v14291_v63, 0.0  ;;  %v10711_v16 = vpop.f32.mrb[114].mxu0 }
 0x209   : > { %v4113_v11 = vrot.slane %v4112_v53, 4  ;;  %v14315_v30 = vadd.f32 %v2019_v48, %v14233_v54  ;;  %v19417_v13 = vunpack.i.l.bf16 %v19380_v9  ;;  %v1646_v6 = vpop.f32.mrb[115].mxu0 }
 0x20a   : > { %v4121_v62 = vadd.f32 %v4120_v51, %v4119_v15  ;;  %v18894_v18 = vmax.f32 %v14311_v31, 0.0  ;;  %v19418_v15 = vunpack.i.h.bf16 %v19380_v9  ;;  %10848 = vmatprep.mubr.bf16.mxu1 %v1888_v49  ;;  %v19419_v51 = vmax.f32 %v14303_v47, 0.0 }
 0x20b   : > { %v4114_v61 = vadd.f32 %v4113_v11, %v4112_v53  ;;  %v18901_v33 = vmax.f32 %v14315_v30, 0.0  ;;  %v3285_v19 = vmul.f32 %v19417_v13, %v19416_v56  ;;  %v1644_v11 = vadd.f32 %v1643_v50, %v13519_v43 }
 0x20c   : > { %v4122_v48 = vrot.slane %v4121_v62, 2  ;;  %v3286_v4 = vmul.f32 %v19418_v15, %v18894_v18  ;;  %v3283_v23 = vmul.f32 %v19420_v29, %v19419_v51  ;;  %v19421_v56 = vunpack.i.h.bf16 %v19374_v27  ;;  %10849 = vmatmul.mubr.bf16.gmra.mrb[108].mxu1 %v1889_v5 }
 0x20d   : > { %v10750_v28 = vpop.f32.mrb[8].mxu1  ;;  %v4115_v53 = vrot.slane %v4114_v61, 2  ;;  %v1655_v18 = vadd.f32 %v10711_v16, %v13519_v43  ;;  %v1647_v8 = vadd.f32 %v1646_v6, %v13519_v43  ;;  %v1820_v29 = vmax.f32 %v1652_v17, 0.0 }
 0x20e   : > { %v14332_v25 = vpop.f32.mrb[9].mxu1  ;;  %v3284_v13 = vmul.f32 %v19421_v56, %v18901_v33  ;;  %v4123_v15 = vadd.f32 %v4122_v48, %v4121_v62  ;;  %v4133_v50 = vadd.f32 %v3286_v4, %v3285_v19  ;;  %v1818_v14 = vmax.f32 %v1644_v11, 0.0  ;;  %v14350_v19 = vpop.permute.xlu1 %11451  ;;  %v19424_v11 = vld [vmem:[#allocation87_spill] sm:$0xff] }
 0x20f   : > { %v4116_v20 = vadd.f32 %v4115_v53, %v4114_v61  ;;  %v10751_v51 = vpop.f32.mrb[10].mxu1  ;;  %v1821_v58 = vmax.f32 %v1655_v18, 0.0  ;;  %v1819_v48 = vmax.f32 %v1647_v8, 0.0  ;;  %19422 = vst [vmem:[#allocation46_spill] sm:$0xff] %v14350_v19  ;;  %v14352_v4 = vpop.permute.xlu0 %5985 }
 0x210   : > { %v4126_v59 = vadd.f32 %v3284_v13, %v3283_v23  ;;  %v4124_v45 = vrot.slane %v4123_v15, 1  ;;  %v4134_v36 = vrot.slane %v4133_v50, 4  ;;  %v14347_v56 = vpop.f32.mrb[11].mxu1  ;;  %19423 = vst [vmem:[#allocation54_spill] sm:$0xff] %v14352_v4  ;;  %v10714_v13 = vpop.f32.mrb[116].mxu0 }
 0x211   : > { %v4117_v62 = vrot.slane %v4116_v20, 1  ;;  %v1891_v6 = vpack.c.bf16 %v1821_v58, %v1820_v29  ;;  %v1890_v18 = vpack.c.bf16 %v1819_v48, %v1818_v14  ;;  %v1668_v5 = vadd.f32 %v10714_v13, %v13519_v43  ;;  %v1659_v42 = vpop.f32.mrb[117].mxu0 }
 0x212   : > { %v4127_v16 = vrot.slane %v4126_v59, 4  ;;  %v4125_v61 = vadd.f32 %v4124_v45, %v4123_v15  ;;  %v4135_v23 = vadd.f32 %v4134_v36, %v4133_v50  ;;  %v19425_v45 = vld [vmem:[#allocation83_spill] sm:$0xff]  ;;  %v14363_v36 = vadd.f32 %v1659_v42, %v13519_v43 }
 0x213   : > { %v4118_v53 = vadd.f32 %v4117_v62, %v4116_v20  ;;  %v10715_v20 = vpop.f32.mrb[118].mxu0  ;;  %10852 = vmatprep.mubr.bf16.mxu1 %v1890_v18  ;;  %v14366_v14 = vadd.f32 %v10750_v28, %v14233_v54  ;;  %v19426_v15 = vmax.f32 %v14249_v3, 0.0  ;;  %v19427_v29 = vmax.f32 %v14267_v7, 0.0 }
 0x214   : > { %v4128_v49 = vadd.f32 %v4127_v16, %v4126_v59  ;;  %v4881_v8 = vmul.f32 %v19424_v11, %v4125_v61  ;;  %v4136_v32 = vrot.slane %v4135_v23, 2  ;;  %v14369_v59 = vadd.f32 %v10751_v51, %v14233_v54  ;;  %v1662_v61 = vpop.f32.mrb[119].mxu0  ;;  %10853 = vmatmul.mubr.bf16.gmra.mrb[112].mxu1 %v1891_v6 }
 0x215   : > { %v14355_v33 = vpop.f32.mrb[12].mxu1  ;;  %v4880_v58 = vmul.f32 %v19425_v45, %v4118_v53  ;;  %v19428_v42 = vmax.f32 %v14255_v0, 0.0  ;;  %v19429_v18 = vmax.f32 %v14271_v10, 0.0  ;;  %v19430_v3 = vunpack.i.l.bf16 %v19372_v46 }
 0x216   : > { %v14359_v44 = vpop.f32.mrb[13].mxu1  ;;  %v4946_v50 = vsub.f32 %v19426_v15, %v4881_v8  ;;  %v4947_v62 = vsub.f32 %v19427_v29, %v4881_v8  ;;  %v6873_v48 = vpack.c.bf16 %v4881_v8, %v4881_v8  ;;  %v4129_v16 = vrot.slane %v4128_v49, 2 }
 0x217   : > { %v4944_v53 = vsub.f32 %v19428_v42, %v4880_v58  ;;  %v4945_v28 = vsub.f32 %v19429_v18, %v4880_v58  ;;  %v6872_v13 = vpack.c.bf16 %v4880_v58, %v4880_v58  ;;  %v4137_v11 = vadd.f32 %v4136_v32, %v4135_v23  ;;  %v14379_v51 = vpop.f32.mrb[14].mxu1  ;;  %v14391_v23 = vpop.permute.xlu1 %5975 }
 0x218   : > { %v5074_v45 = vmul.f32 %v19430_v3, %v4946_v50  ;;  %v19431_v7 = vunpack.i.h.bf16 %v19372_v46  ;;  %v7411_v8 = vunpack.c.l.b16 %v6873_v48  ;;  %v1824_v29 = vmax.f32 %v1668_v5, 0.0  ;;  %v14385_v17 = vpop.f32.mrb[15].mxu1  ;;  %v14393_v18 = vpop.permute.xlu0 %6060 }
 0x219   : > { %v19432_v0 = vunpack.i.l.bf16 %v19369_v55  ;;  %v19433_v10 = vunpack.i.h.bf16 %v19369_v55  ;;  %v7410_v58 = vunpack.c.l.b16 %v6872_v13  ;;  %v4138_v32 = vrot.slane %v4137_v11, 1  ;;  %19434 = vst [vmem:[#allocation62_spill] sm:$0xff] %v14393_v18 }
 0x21a   : > { %v5075_v15 = vmul.f32 %v19431_v7, %v4947_v62  ;;  %v5202_v50 = vmul.f32 %v5074_v45, %v5074_v45  ;;  %v4130_v46 = vadd.f32 %v4129_v16, %v4128_v49  ;;  %v1671_v62 = vadd.f32 %v10715_v20, %v13519_v43  ;;  %v19436_v16 = vld [vmem:[#allocation58_spill] sm:$0xff] }
 0x21b   : > { %v5072_v6 = vmul.f32 %v19432_v0, %v4944_v53  ;;  %v5073_v42 = vmul.f32 %v19433_v10, %v4945_v28  ;;  %v14397_v7 = vsel %vm7162_vm2, %v7411_v8, %v7410_v58  ;;  %v4139_v53 = vadd.f32 %v4138_v32, %v4137_v11  ;;  %v10718_v0 = vpop.f32.mrb[120].mxu0 }
 0x21c   : > { %v5203_v3 = vmul.f32 %v5075_v15, %v5075_v15  ;;  %19435 = vst [vmem:[#allocation87_spill] sm:$0xff] %v14397_v7  ;;  %v4131_v13 = vrot.slane %v4130_v46, 1  ;;  %v1825_v10 = vmax.f32 %v1671_v62, 0.0  ;;  %v1663_v4 = vadd.f32 %v1662_v61, %v13519_v43  ;;  %v1675_v18 = vpop.f32.mrb[121].mxu0 }
 0x21d   : > { %v5200_v5 = vmul.f32 %v5072_v6, %v5072_v6  ;;  %v5201_v48 = vmul.f32 %v5073_v42, %v5073_v42  ;;  %v14399_v55 = vpop.f32.mrb[16].mxu1  ;;  %v14406_v15 = vmul.f32 %v19436_v16, %v4139_v53  ;;  %v14410_v11 = vadd.f32 %v14332_v25, %v14233_v54  ;;  %v10719_v8 = vpop.f32.mrb[122].mxu0 }
 0x21e   : > { %v5335_v28 = vadd.f32 %v5203_v3, %v5202_v50  ;;  %v14402_v45 = vpop.f32.mrb[17].mxu1  ;;  %v1822_v6 = vmax.f32 %v14363_v36, 0.0  ;;  %v4132_v42 = vadd.f32 %v4131_v13, %v4130_v46  ;;  %v1893_v58 = vpack.c.bf16 %v1825_v10, %v1824_v29  ;;  %v1678_v61 = vpop.f32.mrb[123].mxu0  ;;  %v19440_v46 = vld [vmem:[#allocation6_spill] sm:$0xff] }
 0x21f   : > { %v5328_v20 = vadd.f32 %v5201_v48, %v5200_v5  ;;  %v1823_v32 = vmax.f32 %v1663_v4, 0.0  ;;  %v19437_v50 = vmax.f32 %v14291_v63, 0.0  ;;  %v19438_v62 = vmax.f32 %v14311_v31, 0.0  ;;  %v14421_v53 = vpop.f32.mrb[18].mxu1  ;;  %v14425_v4 = vpop.permute.xlu0 %4737 }
 0x220   : > { %19439 = vst [vmem:[#allocation83_spill] sm:$0xff] %v14425_v4  ;;  %v14428_v13 = vmul.f32 %v19440_v46, %v4132_v42  ;;  %v14430_v10 = vpop.f32.mrb[19].mxu1  ;;  %v14433_v16 = vpop.permute.xlu1 %6015  ;;  %v19444_v36 = vunpack.i.h.bf16 %v19380_v9  ;;  %v19445_v29 = vmax.f32 %v14303_v47, 0.0  ;;  %v14448_v46 = vadd.f32 %v14347_v56, %v14233_v54 }
 0x221   : > { %v4950_v3 = vsub.f32 %v19437_v50, %v14406_v15  ;;  %v4951_v5 = vsub.f32 %v19438_v62, %v14406_v15  ;;  %v1892_v63 = vpack.c.bf16 %v1823_v32, %v1822_v6  ;;  %19442 = vst [vmem:[#allocation6_spill] sm:$0xff] %v14433_v16  ;;  %v5336_v50 = vrot.slane %v5335_v28, 4 }
 0x222   : > { %19441 = vst [vmem:[#allocation58_spill] sm:$0xff] %v14428_v13  ;;  %v19443_v62 = vunpack.i.l.bf16 %v19380_v9  ;;  %v4948_v48 = vsub.f32 %v19445_v29, %v14428_v13  ;;  %v19446_v6 = vmax.f32 %v14315_v30, 0.0  ;;  %v19447_v9 = vmax.f32 %v14366_v14, 0.0 }
 0x223   : > { %v5079_v25 = vmul.f32 %v19444_v36, %v4951_v5  ;;  %10856 = vmatprep.mubr.bf16.mxu1 %v1892_v63  ;;  %v19448_v5 = vunpack.i.l.bf16 %v19389_v24  ;;  %v19449_v47 = vmax.f32 %v14369_v59, 0.0  ;;  %v19450_v29 = vunpack.i.h.bf16 %v19389_v24  ;;  %v14476_v56 = vpop.permute.xlu0 %4812 }
 0x224   : > { %v5078_v49 = vmul.f32 %v19443_v62, %v4950_v3  ;;  %v4949_v42 = vsub.f32 %v19446_v6, %v14428_v13  ;;  %10857 = vmatmul.mubr.bf16.gmra.mrb[116].mxu1 %v1893_v58  ;;  %v14458_v62 = vpop.f32.mrb[124].mxu0  ;;  %v5329_v63 = vrot.slane %v5328_v20, 4  ;;  %v19452_v32 = vunpack.i.h.bf16 %v19374_v27  ;;  %19453 = vst [vmem:[#allocation101_spill] sm:$0xff] %v14476_v56 }
 0x225   : > { %v5207_v3 = vmul.f32 %v5079_v25, %v5079_v25  ;;  %v3289_v36 = vmul.f32 %v19448_v5, %v19447_v9  ;;  %v3290_v30 = vmul.f32 %v19450_v29, %v19449_v47  ;;  %v14460_v6 = vpop.f32.mrb[20].mxu1  ;;  %v14467_v9 = vpop.f32.mrb[125].mxu0  ;;  %v5337_v58 = vadd.f32 %v5336_v50, %v5335_v28 }
 0x226   : > { %v5206_v31 = vmul.f32 %v5078_v49, %v5078_v49  ;;  %v19451_v49 = vunpack.i.l.bf16 %v19374_v27  ;;  %v5077_v7 = vmul.f32 %v19452_v32, %v4949_v42  ;;  %v14469_v5 = vpop.f32.mrb[21].mxu1  ;;  %v14474_v4 = vpop.f32.mrb[126].mxu0  ;;  %v18917_v27 = vmax.f32 %v14448_v46, 0.0 }
 0x227   : > { %v4147_v60 = vadd.f32 %v3290_v30, %v3289_v36  ;;  %v14480_v42 = vpop.f32.mrb[127].mxu0  ;;  %v19455_v28 = vmax.f32 %v14410_v11, 0.0  ;;  %v1676_v36 = vadd.f32 %v1675_v18, %v13519_v43  ;;  %v14490_v30 = vpop.f32.mrb[22].mxu1  ;;  %v1687_v32 = vadd.f32 %v10719_v8, %v13519_v43 }
 0x228   : > { %v5076_v25 = vmul.f32 %v19451_v49, %v4948_v48  ;;  %v14472_v29 = vadd.f32 %v5207_v3, %v5206_v31  ;;  %v5205_v40 = vmul.f32 %v5077_v7, %v5077_v7  ;;  %v1684_v48 = vadd.f32 %v10718_v0, %v13519_v43  ;;  %v14483_v49 = vpop.permute.xlu1 %4727  ;;  %v14499_v56 = vpop.f32.mrb[23].mxu1 }
 0x229   : > { %19454 = vst [vmem:[#allocation102_spill] sm:$0xff] %v14483_v49  ;;  %v19456_v31 = vunpack.i.l.bf16 %v19385_v22  ;;  %v4148_v3 = vrot.slane %v4147_v60, 4  ;;  %v5330_v7 = vadd.f32 %v5329_v63, %v5328_v20  ;;  %19458 = vst [vmem:[#allocation103_spill] sm:$0xff] %v14499_v56  ;;  %v1679_v18 = vadd.f32 %v1678_v61, %v13519_v43  ;;  %v14508_v56 = vpop.permute.xlu0 %5990 }
 0x22a   : > { %v5204_v34 = vmul.f32 %v5076_v25, %v5076_v25  ;;  %v19457_v25 = vunpack.i.h.bf16 %v19385_v22  ;;  %v1828_v20 = vmax.f32 %v1684_v48, 0.0  ;;  %v1826_v13 = vmax.f32 %v1676_v36, 0.0 }
 0x22b   : > { %v3287_v50 = vmul.f32 %v19456_v31, %v19455_v28  ;;  %v5338_v28 = vrot.slane %v5337_v58, 2  ;;  %v4149_v31 = vadd.f32 %v4148_v3, %v4147_v60  ;;  %v5331_v38 = vrot.slane %v5330_v7, 2 }
 0x22c   : > { %v14492_v0 = vadd.f32 %v5205_v40, %v5204_v34  ;;  %v3288_v47 = vmul.f32 %v19457_v25, %v18917_v27  ;;  %v1829_v34 = vmax.f32 %v1687_v32, 0.0  ;;  %v1827_v25 = vmax.f32 %v1679_v18, 0.0 }
 0x22d   : > { %v4150_v16 = vrot.slane %v4149_v31, 2  ;;  %v14505_v27 = vpop.f32.mrb[24].mxu1  ;;  %v5339_v32 = vadd.f32 %v5338_v28, %v5337_v58  ;;  %v14521_v1 = vadd.f32 %v14355_v33, %v14233_v54  ;;  %v14535_v18 = vadd.f32 %v14379_v51, %v14233_v54 }
 0x22e   : > { %v4140_v40 = vadd.f32 %v3288_v47, %v3287_v50  ;;  %v1895_v3 = vpack.c.bf16 %v1829_v34, %v1828_v20  ;;  %v14510_v61 = vpop.f32.mrb[25].mxu1  ;;  %v14513_v47 = vpop.permute.xlu1 %4767  ;;  %v1894_v63 = vpack.c.bf16 %v1827_v25, %v1826_v13  ;;  %v19464_v48 = vmax.f32 %v14369_v59, 0.0 }
 0x22f   : > { %19459 = vst [vmem:[#allocation104_spill] sm:$0xff] %v14513_v47  ;;  %v4151_v50 = vadd.f32 %v4150_v16, %v4149_v31  ;;  %v14515_v36 = vpop.f32.mrb[26].mxu1  ;;  %v14530_v31 = vadd.f32 %v5331_v38, %v5330_v7  ;;  %v5340_v25 = vrot.slane %v5339_v32, 1  ;;  %v14538_v34 = vpop.permute.xlu0 %6065  ;;  %v14543_v38 = vadd.f32 %v14359_v44, %v14233_v54 }
 0x230   : > { %v4141_v60 = vrot.slane %v4140_v40, 4  ;;  %v14523_v20 = vpop.f32.mrb[27].mxu1  ;;  %10860 = vmatprep.mubr.bf16.mxu1 %v1894_v63  ;;  %19460 = vst [vmem:[#allocation105_spill] sm:$0xff] %v14538_v34  ;;  %v14559_v44 = vadd.f32 %v14385_v17, %v14233_v54  ;;  %v19465_v17 = vmax.f32 %v14521_v1, 0.0 }
 0x231   : > { %v4152_v13 = vrot.slane %v4151_v50, 1  ;;  %10861 = vmatmul.mubr.bf16.gmra.mrb[120].mxu1 %v1895_v3  ;;  %v14563_v16 = vadd.f32 %v5340_v25, %v5339_v32 }
 0x232   : > { %v4142_v49 = vadd.f32 %v4141_v60, %v4140_v40  ;;  %v14546_v3 = vpop.permute.xlu1 %6020  ;;  %v3293_v32 = vmul.f32 %v19466_v26, %v19465_v17  ;;  %v19472_v17 = vld [vmem:[#allocation73_spill] sm:$0xff] }
 0x233   : > { %v4153_v60 = vadd.f32 %v4152_v13, %v4151_v50  ;;  %19461 = vst [vmem:[#allocation106_spill] sm:$0xff] %v14546_v3  ;;  %v5350_v50 = vrot.slane %v14472_v29, 4  ;;  %v19462_v13 = vld [vmem:[#allocation71_spill] sm:$0xff]  ;;  %v14592_v26 = vpop.permute.xlu0 %4742 }
 0x234   : > { %v4143_v40 = vrot.slane %v4142_v49, 2  ;;  %19471 = vst [vmem:[#allocation71_spill] sm:$0xff] %v14592_v26 }
 0x235   : > { %v14550_v51 = vmul.f32 %v19462_v13, %v4153_v60  ;;  %v14553_v33 = vpop.f32.mrb[28].mxu1  ;;  %v19463_v60 = vmax.f32 %v14366_v14, 0.0  ;;  %v19467_v14 = vmax.f32 %v14535_v18, 0.0 }
 0x236   : > { %v4144_v63 = vadd.f32 %v4143_v40, %v4142_v49  ;;  %v14561_v7 = vpop.f32.mrb[29].mxu1  ;;  %v1700_v49 = vadd.f32 %v14458_v62, %v13519_v43  ;;  %v5343_v62 = vrot.slane %v14492_v0, 4 }
 0x237   : > { %v4954_v13 = vsub.f32 %v19463_v60, %v14550_v51  ;;  %v4955_v28 = vsub.f32 %v19464_v48, %v14550_v51  ;;  %v14573_v40 = vpop.f32.mrb[30].mxu1  ;;  %v19468_v60 = vunpack.i.h.bf16 %v19398_v41  ;;  %v5351_v48 = vadd.f32 %v5350_v50, %v14472_v29  ;;  %v14600_v29 = vpop.permute.xlu1 %6055 }
 0x238   : > { %v4145_v8 = vrot.slane %v4144_v63, 1  ;;  %v14584_v59 = vpop.f32.mrb[31].mxu1  ;;  %19473 = vst [vmem:[#allocation73_spill] sm:$0xff] %v14600_v29 }
 0x239   : > { %v3294_v19 = vmul.f32 %v19468_v60, %v19467_v14  ;;  %v5083_v39 = vmul.f32 %v19470_v35, %v4955_v28  ;;  %v1692_v14 = vadd.f32 %v14467_v9, %v13519_v43  ;;  %v18934_v60 = vmax.f32 %v14559_v44, 0.0 }
 0x23a   : > { %v4146_v58 = vadd.f32 %v4145_v8, %v4144_v63  ;;  %v19469_v8 = vunpack.i.l.bf16 %v19389_v24  ;;  %v1695_v35 = vadd.f32 %v14480_v42, %v13519_v43  ;;  %v11543_v24 = vld [vmem:[%s18725_s7 + $0x88] sm:$0xff]   ;;  %v19478_v42 = vunpack.i.h.bf16 %v19393_v37 }
 0x23b   : > { %v4161_v21 = vadd.f32 %v3294_v19, %v3293_v32  ;;  %v5211_v47 = vmul.f32 %v5083_v39, %v5083_v39  ;;  %v19474_v19 = vmax.f32 %v14410_v11, 0.0  ;;  %v19476_v39 = vmax.f32 %v14543_v38, 0.0  ;;  %10870 = vmatprep.subr.bf16.mxu0 %v11543_v24 }
 0x23c   : > { %v5082_v63 = vmul.f32 %v19469_v8, %v4954_v13  ;;  %v14595_v25 = vmul.f32 %v19472_v17, %v4146_v58  ;;  %v1703_v13 = vadd.f32 %v14474_v4, %v13519_v43  ;;  %v19475_v58 = vmax.f32 %v14448_v46, 0.0  ;;  %10871 = vmatpush3.bf16.msra.mxu0 %v11543_v24 }
 0x23d   : > { %v19477_v32 = vunpack.i.l.bf16 %v19393_v37  ;;  %v1832_v8 = vmax.f32 %v1700_v49, 0.0  ;;  %v4162_v43 = vrot.slane %v4161_v21, 4  ;;  %v3292_v17 = vmul.f32 %v19478_v42, %v18934_v60 }
 0x23e   : > { %v5210_v50 = vmul.f32 %v5082_v63, %v5082_v63  ;;  %v4952_v9 = vsub.f32 %v19474_v19, %v14595_v25  ;;  %v4953_v28 = vsub.f32 %v19475_v58, %v14595_v25  ;;  %v1833_v11 = vmax.f32 %v1703_v13, 0.0  ;;  %v14625_v19 = vpop.f32.mrb[32].mxu1  ;;  %v14635_v13 = vpop.permute.xlu0 %4817 }
 0x23f   : > { %v3291_v4 = vmul.f32 %v19477_v32, %v19476_v39  ;;  %v19479_v46 = vunpack.i.l.bf16 %v19385_v22  ;;  %v1830_v39 = vmax.f32 %v1692_v14, 0.0  ;;  %v1831_v49 = vmax.f32 %v1695_v35, 0.0  ;;  %19481 = vst [vmem:[#allocation107_spill] sm:$0xff] %v14635_v13  ;;  %v14643_v14 = vpop.permute.xlu1 %6095 }
 0x240   : > { %v14619_v63 = vadd.f32 %v5211_v47, %v5210_v50  ;;  %v5081_v57 = vmul.f32 %v19480_v2, %v4953_v28  ;;  %v14631_v47 = vpop.f32.mrb[33].mxu1  ;;  %v5352_v50 = vrot.slane %v5351_v48, 2  ;;  %v4163_v32 = vadd.f32 %v4162_v43, %v4161_v21  ;;  %19482 = vst [vmem:[#allocation108_spill] sm:$0xff] %v14643_v14 }
 0x241   : > { %v5080_v58 = vmul.f32 %v19479_v46, %v4952_v9  ;;  %v4154_v26 = vadd.f32 %v3292_v17, %v3291_v4  ;;  %v1897_v34 = vpack.c.bf16 %v1833_v11, %v1832_v8  ;;  %v14633_v42 = vpop.f32.mrb[34].mxu1  ;;  %v1896_v3 = vpack.c.bf16 %v1831_v49, %v1830_v39 }
 0x242   : > { %v5209_v29 = vmul.f32 %v5081_v57, %v5081_v57  ;;  %v14639_v22 = vadd.f32 %v14399_v55, %v14233_v54  ;;  %v14641_v2 = vpop.f32.mrb[35].mxu1  ;;  %v5344_v35 = vadd.f32 %v5343_v62, %v14492_v0  ;;  %v4164_v21 = vrot.slane %v4163_v32, 2 }
 0x243   : > { %v5208_v60 = vmul.f32 %v5080_v58, %v5080_v58  ;;  %v4155_v24 = vrot.slane %v4154_v26, 4  ;;  %v14648_v9 = vadd.f32 %v14402_v45, %v14233_v54  ;;  %v14655_v55 = vadd.f32 %v14421_v53, %v14233_v54  ;;  %10864 = vmatprep.mubr.bf16.mxu1 %v1896_v3 }
 0x244   : > { %v18935_v57 = vmax.f32 %v14639_v22, 0.0  ;;  %v14659_v4 = vadd.f32 %v14430_v10, %v14233_v54  ;;  %v19483_v0 = vrot.slane %v14530_v31, 1  ;;  %v4165_v8 = vadd.f32 %v4164_v21, %v4163_v32  ;;  %10865 = vmatmul.mubr.bf16.gmra.mrb[124].mxu1 %v1897_v34  ;;  %v19494_v21 = vld [vmem:[#allocation40_spill] sm:$0xff]  ;;  %v19519_v32 = vld [vmem:[#allocation58_spill] sm:$0xff] }
 0x245   : > { %v14650_v28 = vadd.f32 %v5209_v29, %v5208_v60  ;;  %v4156_v45 = vadd.f32 %v4155_v24, %v4154_v26  ;;  %v18936_v60 = vmax.f32 %v14648_v9, 0.0  ;;  %v5353_v29 = vadd.f32 %v5352_v50, %v5351_v48  ;;  %v14673_v26 = vpop.permute.xlu0 %5995  ;;  %v14694_v24 = vpop.permute.xlu1 %4772 }
 0x246   : > { %v5334_v62 = vadd.f32 %v19483_v0, %v14530_v31  ;;  %v6875_v43 = vpack.c.bf16 %v14406_v15, %v14406_v15  ;;  %v18937_v53 = vmax.f32 %v14655_v55, 0.0  ;;  %v18938_v17 = vmax.f32 %v14659_v4, 0.0  ;;  %v14671_v31 = vpop.f32.mrb[36].mxu1  ;;  %19491 = vst [vmem:[#allocation111_spill] sm:$0xff] %v14694_v24  ;;  %v19492_v0 = vld [vmem:[#allocation97_spill] sm:$0xff] }
 0x247   : > { %v6289_v10 = vmul.f32 %v14391_v23, %v14563_v16  ;;  %v5345_v3 = vrot.slane %v5344_v35, 2  ;;  %v4166_v11 = vrot.slane %v4165_v8, 1  ;;  %v4157_v46 = vrot.slane %v4156_v45, 2  ;;  %19484 = vst [vmem:[#allocation109_spill] sm:$0xff] %v14671_v31  ;;  %v14691_v50 = vpop.f32.mrb[37].mxu1 }
 0x248   : > { %v19485_v34 = vunpack.i.l.bf16 %v19371_v12  ;;  %v19486_v15 = vunpack.i.l.bf16 %v19368_v52  ;;  %v19487_v23 = vunpack.i.h.bf16 %v19371_v12  ;;  %v19488_v39 = vunpack.i.h.bf16 %v19368_v52  ;;  %19489 = vst [vmem:[#allocation110_spill] sm:$0xff] %v14691_v50 }
 0x24a   : > { %v3297_v48 = vmul.f32 %v19485_v34, %v18935_v57  ;;  %v3295_v58 = vmul.f32 %v19486_v15, %v18936_v60  ;;  %v3298_v16 = vmul.f32 %v19487_v23, %v18937_v53  ;;  %v3296_v49 = vmul.f32 %v19488_v39, %v18938_v17  ;;  %v14697_v60 = vpop.f32.mrb[38].mxu1 }
 0x24b   : > { %v6288_v34 = vmul.f32 %v19492_v0, %v5334_v62  ;;  %v4167_v57 = vadd.f32 %v4166_v11, %v4165_v8  ;;  %v4158_v15 = vadd.f32 %v4157_v46, %v4156_v45  ;;  %v5354_v23 = vrot.slane %v5353_v29, 1  ;;  %v14700_v31 = vpop.f32.mrb[39].mxu1 }
 0x24c   : > { %v4175_v53 = vadd.f32 %v3298_v16, %v3297_v48  ;;  %v4168_v14 = vadd.f32 %v3296_v49, %v3295_v58  ;;  %v14702_v39 = vunpack.c.l.b16 %v6875_v43  ;;  %v14704_v17 = vadd.f32 %v5345_v3, %v5344_v35  ;;  %v14723_v58 = vpop.permute.xlu0 %6070 }
 0x24d   : > { %v14707_v50 = vmul.f32 %v19494_v21, %v4167_v57  ;;  %v4159_v24 = vrot.slane %v4158_v15, 1  ;;  %v14709_v62 = vadd.f32 1e-31, %v6289_v10  ;;  %v14713_v11 = vadd.f32 %v14460_v6, %v14233_v54  ;;  %19500 = vst [vmem:[#allocation114_spill] sm:$0xff] %v14723_v58  ;;  %v14726_v6 = vpop.permute.xlu1 %4807  ;;  %v19531_v58 = vld [vmem:[#allocation31_spill] sm:$0xff] }
 0x24e   : > { %19493 = vst [vmem:[#allocation97_spill] sm:$0xff] %v14702_v39  ;;  %v4176_v8 = vrot.slane %v4175_v53, 4  ;;  %v4169_v45 = vrot.slane %v4168_v14, 4  ;;  %v14715_v46 = vadd.f32 1e-31, %v6288_v34  ;;  %v19498_v43 = vmax.f32 %v14521_v1, 0.0 }
 0x24f   : > { %19495 = vst [vmem:[#allocation40_spill] sm:$0xff] %v14707_v50  ;;  %19496 = vst [vmem:[#allocation112_spill] sm:$0xff] %v14709_v62  ;;  %v19499_v35 = vmax.f32 %v14535_v18, 0.0  ;;  %v4160_v3 = vadd.f32 %v4159_v24, %v4158_v15  ;;  %v5355_v10 = vadd.f32 %v5354_v23, %v5353_v29  ;;  %v5364_v16 = vrot.slane %v14619_v63, 4  ;;  %v19504_v18 = vld [vmem:[#allocation38_spill] sm:$0xff]  ;;  %v14736_v24 = vpop.f32.mrb[40].mxu1 }
 0x250   : > { %19497 = vst [vmem:[#allocation113_spill] sm:$0xff] %v14715_v46  ;;  %v4958_v48 = vsub.f32 %v19498_v43, %v14707_v50  ;;  %v4177_v49 = vadd.f32 %v4176_v8, %v4175_v53  ;;  %v4170_v21 = vadd.f32 %v4169_v45, %v4168_v14  ;;  %19501 = vst [vmem:[#allocation115_spill] sm:$0xff] %v14726_v6  ;;  %v5347_v0 = vrot.slane %v14704_v17, 1  ;;  %v14743_v23 = vpop.f32.mrb[41].mxu1 }
 0x251   : > { %v4959_v57 = vsub.f32 %v19499_v35, %v14707_v50  ;;  %v19502_v34 = vunpack.i.l.bf16 %v19398_v41  ;;  %v19503_v43 = vunpack.i.h.bf16 %v19398_v41  ;;  %v14734_v35 = vmul.f32 %v19504_v18, %v4160_v3 }
 0x252   : > { %v4178_v29 = vrot.slane %v4177_v49, 2  ;;  %v4171_v15 = vrot.slane %v4170_v21, 2  ;;  %v14741_v14 = vadd.f32 %v14490_v30, %v14233_v54  ;;  %v19506_v41 = vmax.f32 %v14543_v38, 0.0 }
 0x253   : > { %v5086_v1 = vmul.f32 %v19502_v34, %v4958_v48  ;;  %v5087_v13 = vmul.f32 %v19503_v43, %v4959_v57  ;;  %19505 = vst [vmem:[#allocation38_spill] sm:$0xff] %v14734_v35  ;;  %v19507_v57 = vmax.f32 %v14559_v44, 0.0  ;;  %v14751_v34 = vpop.f32.mrb[42].mxu1  ;;  %v14754_v43 = vadd.f32 %v5364_v16, %v14619_v63  ;;  %v14769_v63 = vpop.permute.xlu0 %4747 }
 0x254   : > { %v4956_v48 = vsub.f32 %v19506_v41, %v14734_v35  ;;  %19508 = vst [vmem:[#allocation116_spill] sm:$0xff] %v14751_v34  ;;  %v4179_v18 = vadd.f32 %v4178_v29, %v4177_v49  ;;  %v4172_v30 = vadd.f32 %v4171_v15, %v4170_v21  ;;  %v14758_v53 = vadd.f32 %v14469_v5, %v14233_v54  ;;  %v19513_v5 = vld [vmem:[#allocation103_spill] sm:$0xff]  ;;  %v14776_v15 = vpop.permute.xlu1 %4847 }
 0x255   : > { %v5214_v8 = vmul.f32 %v5086_v1, %v5086_v1  ;;  %v5215_v45 = vmul.f32 %v5087_v13, %v5087_v13  ;;  %v4957_v3 = vsub.f32 %v19507_v57, %v14734_v35  ;;  %v14760_v13 = vpop.f32.mrb[43].mxu1  ;;  %v19510_v38 = vunpack.i.l.bf16 %v19393_v37  ;;  %19512 = vst [vmem:[#allocation118_spill] sm:$0xff] %v14769_v63  ;;  %19514 = vst [vmem:[#allocation103_spill] sm:$0xff] %v14776_v15 }
 0x256   : > { %19509 = vst [vmem:[#allocation117_spill] sm:$0xff] %v14760_v13  ;;  %v19511_v44 = vunpack.i.h.bf16 %v19393_v37  ;;  %v18941_v39 = vmax.f32 %v14741_v14, 0.0  ;;  %v5357_v16 = vrot.slane %v14650_v28, 4  ;;  %v4180_v49 = vrot.slane %v4179_v18, 1  ;;  %v19516_v37 = vld [vmem:[#allocation42_spill] sm:$0xff]  ;;  %v19522_v13 = vld [vmem:[#allocation85_spill] sm:$0xff] }
 0x257   : > { %v14762_v1 = vadd.f32 %v5215_v45, %v5214_v8  ;;  %v5084_v41 = vmul.f32 %v19510_v38, %v4956_v48  ;;  %v4173_v21 = vrot.slane %v4172_v30, 1  ;;  %v14774_v29 = vadd.f32 %v19513_v5, %v14233_v54 }
 0x258   : > { %v5085_v57 = vmul.f32 %v19511_v44, %v4957_v3  ;;  %v19515_v48 = vmax.f32 %v14713_v11, 0.0  ;;  %v19517_v3 = vunpack.i.l.bf16 %v19516_v37  ;;  %v19518_v44 = vunpack.i.h.bf16 %v19516_v37 }
 0x259   : > { %v5212_v8 = vmul.f32 %v5084_v41, %v5084_v41  ;;  %11975 = vrsqrt.f32 %v14709_v62  ;;  %v4181_v6 = vadd.f32 %v4180_v49, %v4179_v18  ;;  %v4174_v63 = vadd.f32 %v4173_v21, %v4172_v30 }
 0x25a   : > { %v5213_v45 = vmul.f32 %v5085_v57, %v5085_v57  ;;  %v3301_v38 = vmul.f32 %v19517_v3, %v19515_v48  ;;  %v3302_v50 = vmul.f32 %v19518_v44, %v18941_v39  ;;  %v18946_v41 = vmax.f32 %v14758_v53, 0.0  ;;  %v14793_v48 = vpop.f32.mrb[44].mxu1  ;;  %v19520_v3 = vld [vmem:[#allocation54_spill] sm:$0xff]  ;;  %v19521_v39 = vld [vmem:[#allocation88_spill] sm:$0xff] }
 0x25b   : > { %11977 = vrsqrt.f32 %v14715_v46  ;;  %v6291_v44 = vmul.f32 %v19520_v3, %v5355_v10  ;;  %v4889_v62 = vmul.f32 %v19521_v39, %v4181_v6  ;;  %v4888_v34 = vmul.f32 %v19522_v13, %v4174_v63  ;;  %v14799_v5 = vpop.f32.mrb[45].mxu1 }
 0x25c   : > { %v14789_v15 = vadd.f32 %v5213_v45, %v5212_v8  ;;  %v4189_v57 = vadd.f32 %v3302_v50, %v3301_v38  ;;  %19523 = vst [vmem:[#allocation42_spill] sm:$0xff] %v14799_v5  ;;  %v5348_v18 = vadd.f32 %v5347_v0, %v14704_v17  ;;  %v5366_v30 = vrot.slane %v14754_v43, 2  ;;  %v14804_v21 = vpop.f32.mrb[46].mxu1  ;;  %v14806_v8 = vpop.permute.xlu0 %4822 }
 0x25d   : > { %v5358_v50 = vadd.f32 %v5357_v16, %v14650_v28  ;;  %19524 = vst [vmem:[#allocation58_spill] sm:$0xff] %v14804_v21  ;;  %19525 = vst [vmem:[#allocation54_spill] sm:$0xff] %v14806_v8  ;;  %v19526_v45 = vmax.f32 %v14639_v22, 0.0  ;;  %v19527_v39 = vmax.f32 %v14655_v55, 0.0  ;;  %v6881_v13 = vpack.c.bf16 %v4889_v62, %v4889_v62  ;;  %v14814_v17 = vpop.f32.mrb[47].mxu1  ;;  %v14816_v0 = vpop.permute.xlu1 %6025 }
 0x25e   : > { %v4190_v49 = vrot.slane %v4189_v57, 4  ;;  %v19528_v63 = vmax.f32 %v14648_v9, 0.0  ;;  %19529 = vst [vmem:[#allocation88_spill] sm:$0xff] %v14814_v17  ;;  %v19530_v28 = vmax.f32 %v14659_v4, 0.0  ;;  %v6880_v3 = vpack.c.bf16 %v4888_v34, %v4888_v34 }
 0x25f   : > { %v4962_v10 = vsub.f32 %v19526_v45, %v4889_v62  ;;  %v4963_v6 = vsub.f32 %v19527_v39, %v4889_v62  ;;  %v19532_v22 = vunpack.i.l.bf16 %v19531_v58  ;;  %v19533_v55 = vmax.f32 %v14774_v29, 0.0 }
 0x260   : > { %v4960_v38 = vsub.f32 %v19528_v63, %v4888_v34  ;;  %v4961_v16 = vsub.f32 %v19530_v28, %v4888_v34  ;;  %v19534_v62 = vunpack.i.h.bf16 %v19531_v58  ;;  %v19535_v9 = vunpack.i.l.bf16 %v19371_v12 }
 0x261   : > { %v3299_v45 = vmul.f32 %v19532_v22, %v18946_v41  ;;  %v19536_v8 = vunpack.i.h.bf16 %v19371_v12  ;;  %v7419_v17 = vunpack.c.l.b16 %v6881_v13  ;;  %v19537_v4 = vunpack.i.l.bf16 %v19368_v52 }
 0x262   : > { %v3300_v39 = vmul.f32 %v19534_v62, %v19533_v55  ;;  %v5090_v63 = vmul.f32 %v19535_v9, %v4962_v10  ;;  %v5378_v28 = vrot.slane %v14762_v1, 4  ;;  %v19538_v21 = vunpack.i.h.bf16 %v19368_v52 }
 0x263   : > { %v5091_v46 = vmul.f32 %v19536_v8, %v4963_v6  ;;  %v5088_v34 = vmul.f32 %v19537_v4, %v4960_v38  ;;  %v7418_v41 = vunpack.c.l.b16 %v6880_v3  ;;  %v14839_v5 = vadd.f32 %v14505_v27, %v14233_v54  ;;  %v19540_v8 = vld [vmem:[#allocation24_spill] sm:$0xff]  ;;  %v14847_v4 = vpop.f32.mrb[48].mxu1  ;;  %v14849_v52 = vpop.eup %11975 }
 0x264   : > { %v5089_v22 = vmul.f32 %v19538_v21, %v4961_v16  ;;  %v5218_v55 = vmul.f32 %v5090_v63, %v5090_v63  ;;  %v4191_v9 = vadd.f32 %v4190_v49, %v4189_v57  ;;  %v14841_v12 = vadd.f32 1e-31, %v6291_v44  ;;  %19542 = vst [vmem:[#allocation24_spill] sm:$0xff] %v14849_v52  ;;  %v14851_v21 = vpop.permute.xlu0 %6000  ;;  %v14855_v57 = vpop.f32.mrb[49].mxu1 }
 0x265   : > { %v5219_v62 = vmul.f32 %v5091_v46, %v5091_v46  ;;  %v5216_v10 = vmul.f32 %v5088_v34, %v5088_v34  ;;  %v6290_v6 = vmul.f32 %v19540_v8, %v5348_v18  ;;  %v14845_v38 = vsel %vm7162_vm2, %v7419_v17, %v7418_v41  ;;  %v14857_v44 = vpop.permute.xlu1 %6100  ;;  %v14867_v63 = vpop.f32.mrb[50].mxu1 }
 0x266   : > { %19539 = vst [vmem:[#allocation85_spill] sm:$0xff] %v14841_v12  ;;  %v5217_v13 = vmul.f32 %v5089_v22, %v5089_v22  ;;  %19541 = vst [vmem:[#allocation31_spill] sm:$0xff] %v14845_v38  ;;  %v5359_v27 = vrot.slane %v5358_v50, 2  ;;  %v4192_v46 = vrot.slane %v4191_v9, 2  ;;  %v4182_v3 = vadd.f32 %v3300_v39, %v3299_v45  ;;  %v14869_v34 = vpop.eup %11977 }
 0x267   : > { %v14853_v16 = vadd.f32 %v5219_v62, %v5218_v55  ;;  %19543 = vst [vmem:[#allocation119_spill] sm:$0xff] %v14857_v44  ;;  %v5367_v18 = vadd.f32 %v5366_v30, %v14754_v43  ;;  %v5379_v41 = vadd.f32 %v5378_v28, %v14762_v1  ;;  %v14865_v17 = vadd.f32 %v14510_v61, %v14233_v54  ;;  %v14876_v43 = vpop.f32.mrb[51].mxu1 }
 0x268   : > { %v14861_v49 = vadd.f32 %v5217_v13, %v5216_v10  ;;  %19544 = vst [vmem:[#allocation120_spill] sm:$0xff] %v14869_v34  ;;  %v4193_v22 = vadd.f32 %v4192_v46, %v4191_v9  ;;  %v4183_v45 = vrot.slane %v4182_v3, 4  ;;  %v14874_v55 = vadd.f32 %v14515_v36, %v14233_v54  ;;  %v14912_v52 = vpop.f32.mrb[52].mxu1 }
 0x269   : > { %11979 = vrsqrt.f32 %v14841_v12  ;;  %v14879_v1 = vadd.f32 1e-31, %v6290_v6  ;;  %v6877_v61 = vpack.c.bf16 %v14550_v51, %v14550_v51  ;;  %v6876_v30 = vpack.c.bf16 %v14595_v25, %v14595_v25  ;;  %v14891_v6 = vpop.permute.xlu0 %6075  ;;  %v19548_v25 = vld [vmem:[#allocation56_spill] sm:$0xff]  ;;  %v14901_v12 = vpop.permute.xlu1 %4777  ;;  %19555 = vst [vmem:[#allocation125_spill] sm:$0xff] %v14912_v52 }
 0x26a   : > { %v5360_v28 = vadd.f32 %v5359_v27, %v5358_v50  ;;  %v4194_v62 = vrot.slane %v4193_v22, 1  ;;  %v4184_v10 = vadd.f32 %v4183_v45, %v4182_v3  ;;  %v18949_v9 = vmax.f32 %v14874_v55, 0.0  ;;  %19546 = vst [vmem:[#allocation122_spill] sm:$0xff] %v14891_v6  ;;  %19551 = vst [vmem:[#allocation56_spill] sm:$0xff] %v14901_v12  ;;  %v14917_v12 = vpop.f32.mrb[53].mxu1 }
 0x26b   : > { %19545 = vst [vmem:[#allocation121_spill] sm:$0xff] %v14879_v1  ;;  %v5368_v8 = vrot.slane %v5367_v18, 1  ;;  %v5380_v36 = vrot.slane %v5379_v41, 2  ;;  %v14889_v46 = vadd.f32 %v14523_v20, %v14233_v54  ;;  %v19547_v38 = vmax.f32 %v14839_v5, 0.0 }
 0x26c   : > { %v4195_v39 = vadd.f32 %v4194_v62, %v4193_v22  ;;  %v4185_v51 = vrot.slane %v4184_v10, 2  ;;  %v19549_v50 = vunpack.i.l.bf16 %v19548_v25  ;;  %v19550_v3 = vunpack.i.h.bf16 %v19548_v25 }
 0x26d   : > { %11981 = vrsqrt.f32 %v14879_v1  ;;  %v19552_v20 = vpack.c.bf16 %v19519_v32, %v19519_v32  ;;  %v14909_v22 = vunpack.c.l.b16 %v6877_v61  ;;  %v18952_v62 = vmax.f32 %v14889_v46, 0.0  ;;  %v19560_v61 = vld [vmem:[#allocation48_spill] sm:$0xff] }
 0x26e   : > { %v3305_v27 = vmul.f32 %v19549_v50, %v19547_v38  ;;  %v3306_v45 = vmul.f32 %v19550_v3, %v18949_v9  ;;  %v5361_v38 = vrot.slane %v5360_v28, 1  ;;  %v19556_v50 = vld [vmem:[#allocation75_spill] sm:$0xff]  ;;  %v4186_v3 = vadd.f32 %v4185_v51, %v4184_v10 }
 0x26f   : > { %v14907_v13 = vunpack.c.l.b16 %v19552_v20  ;;  %19554 = vst [vmem:[#allocation124_spill] sm:$0xff] %v14909_v22  ;;  %v14915_v34 = vmul.f32 %v19556_v50, %v4195_v39  ;;  %19557 = vst [vmem:[#allocation75_spill] sm:$0xff] %v14917_v12  ;;  %v14919_v1 = vunpack.c.l.b16 %v6876_v30  ;;  %v5371_v32 = vrot.slane %v14789_v15, 4  ;;  %v14930_v39 = vpop.f32.mrb[54].mxu1 }
 0x270   : > { %v4203_v9 = vadd.f32 %v3306_v45, %v3305_v27  ;;  %v19559_v20 = vmax.f32 %v14865_v17, 0.0  ;;  %v19561_v22 = vunpack.i.l.bf16 %v19560_v61  ;;  %v19562_v44 = vunpack.i.h.bf16 %v19560_v61  ;;  %19563 = vst [vmem:[#allocation48_spill] sm:$0xff] %v14930_v39 }
 0x271   : > { %19553 = vst [vmem:[#allocation123_spill] sm:$0xff] %v14907_v13  ;;  %19558 = vst [vmem:[#allocation126_spill] sm:$0xff] %v14919_v1  ;;  %v5369_v10 = vadd.f32 %v5368_v8, %v5367_v18  ;;  %v5381_v51 = vadd.f32 %v5380_v36, %v5379_v41  ;;  %v19564_v30 = vmax.f32 %v14713_v11, 0.0  ;;  %v19565_v45 = vmax.f32 %v14741_v14, 0.0  ;;  %v14938_v1 = vpop.f32.mrb[55].mxu1 }
 0x272   : > { %v3303_v13 = vmul.f32 %v19561_v22, %v19559_v20  ;;  %v3304_v6 = vmul.f32 %v19562_v44, %v18952_v62  ;;  %19566 = vst [vmem:[#allocation127_spill] sm:$0xff] %v14938_v1  ;;  %v5392_v22 = vrot.slane %v14853_v16, 4  ;;  %v4187_v20 = vrot.slane %v4186_v3, 1  ;;  %v14941_v44 = vpop.permute.xlu0 %4752 }
 0x273   : > { %v4966_v27 = vsub.f32 %v19564_v30, %v14915_v34  ;;  %v4967_v50 = vsub.f32 %v19565_v45, %v14915_v34  ;;  %v4204_v12 = vrot.slane %v4203_v9, 4  ;;  %19567 = vst [vmem:[#allocation128_spill] sm:$0xff] %v14941_v44  ;;  %v5362_v62 = vadd.f32 %v5361_v38, %v5360_v28  ;;  %v14948_v14 = vpop.eup %11979  ;;  %v14950_v30 = vpop.permute.xlu1 %4852 }
 0x274   : > { %v4196_v52 = vadd.f32 %v3304_v6, %v3303_v13  ;;  %v5385_v18 = vrot.slane %v14861_v49, 4  ;;  %v19568_v41 = vunpack.i.l.bf16 %v19516_v37  ;;  %v19569_v8 = vunpack.i.h.bf16 %v19516_v37  ;;  %19570 = vst [vmem:[#allocation129_spill] sm:$0xff] %v14948_v14  ;;  %19571 = vst [vmem:[#allocation130_spill] sm:$0xff] %v14950_v30  ;;  %v19572_v37 = vld [vmem:[#allocation55_spill] sm:$0xff]  ;;  %v14961_v30 = vpop.f32.mrb[56].mxu1 }
 0x275   : > { %v5372_v45 = vadd.f32 %v5371_v32, %v14789_v15  ;;  %v4188_v1 = vadd.f32 %v4187_v20, %v4186_v3  ;;  %v4205_v39 = vadd.f32 %v4204_v12, %v4203_v9  ;;  %v5382_v6 = vrot.slane %v5381_v51, 1 }
 0x276   : > { %v5094_v11 = vmul.f32 %v19568_v41, %v4966_v27  ;;  %v5095_v36 = vmul.f32 %v19569_v8, %v4967_v50  ;;  %v4197_v13 = vrot.slane %v4196_v52, 4  ;;  %v14955_v38 = vadd.f32 %v14553_v33, %v14233_v54  ;;  %v14971_v33 = vpop.f32.mrb[57].mxu1 }
 0x277   : > { %v5393_v27 = vadd.f32 %v5392_v22, %v14853_v16  ;;  %v14959_v50 = vmul.f32 %v19572_v37, %v4188_v1  ;;  %v4206_v41 = vrot.slane %v4205_v39, 2  ;;  %v6293_v15 = vmul.f32 %v14673_v26, %v5369_v10  ;;  %19573 = vst [vmem:[#allocation55_spill] sm:$0xff] %v14971_v33  ;;  %v14973_v16 = vpop.eup %11981  ;;  %v14988_v22 = vpop.permute.xlu0 %4827 }
 0x278   : > { %v5222_v44 = vmul.f32 %v5094_v11, %v5094_v11  ;;  %v5223_v28 = vmul.f32 %v5095_v36, %v5095_v36  ;;  %v4198_v8 = vadd.f32 %v4197_v13, %v4196_v52  ;;  %v5386_v12 = vadd.f32 %v5385_v18, %v14861_v49  ;;  %19574 = vst [vmem:[#allocation131_spill] sm:$0xff] %v14973_v16  ;;  %v19587_v16 = vld [vmem:[#allocation9_spill] sm:$0xff] }
 0x279   : > { %v14969_v3 = vadd.f32 %v14573_v40, %v14233_v54  ;;  %v6292_v1 = vmul.f32 %v14508_v56, %v5362_v62  ;;  %v19575_v52 = vmax.f32 %v14758_v53, 0.0  ;;  %v19576_v26 = vmax.f32 %v14774_v29, 0.0  ;;  %v14986_v40 = vpop.f32.mrb[58].mxu1  ;;  %19578 = vst [vmem:[#allocation133_spill] sm:$0xff] %v14988_v22  ;;  %v14993_v53 = vpop.permute.xlu1 %6030 }
 0x27a   : > { %v14965_v9 = vadd.f32 %v5223_v28, %v5222_v44  ;;  %v14984_v10 = vadd.f32 %v14561_v7, %v14233_v54  ;;  %19577 = vst [vmem:[#allocation132_spill] sm:$0xff] %v14986_v40  ;;  %v5373_v20 = vrot.slane %v5372_v45, 2  ;;  %v4207_v44 = vadd.f32 %v4206_v41, %v4205_v39  ;;  %v14991_v62 = vpop.f32.mrb[59].mxu1 }
 0x27b   : > { %v4964_v32 = vsub.f32 %v19575_v52, %v14959_v50  ;;  %v4965_v49 = vsub.f32 %v19576_v26, %v14959_v50  ;;  %v4199_v18 = vrot.slane %v4198_v8, 2  ;;  %19579 = vst [vmem:[#allocation134_spill] sm:$0xff] %v14991_v62  ;;  %v5383_v11 = vadd.f32 %v5382_v6, %v5381_v51  ;;  %v15018_v56 = vpop.f32.mrb[60].mxu1 }
 0x27c   : > { %v5394_v29 = vrot.slane %v5393_v27, 2  ;;  %v19580_v36 = vunpack.i.l.bf16 %v19531_v58  ;;  %v19581_v7 = vunpack.i.h.bf16 %v19531_v58  ;;  %v5387_v37 = vrot.slane %v5386_v12, 2  ;;  %v15023_v40 = vpop.f32.mrb[61].mxu1 }
 0x27d   : > { %v4208_v52 = vrot.slane %v4207_v44, 1  ;;  %v4200_v26 = vadd.f32 %v4199_v18, %v4198_v8  ;;  %v18954_v39 = vmax.f32 %v14969_v3, 0.0  ;;  %v15003_v14 = vadd.f32 %v14584_v59, %v14233_v54  ;;  %v15025_v33 = vpop.permute.xlu1 %6105 }
 0x27e   : > { %v5092_v13 = vmul.f32 %v19580_v36, %v4964_v32  ;;  %v5093_v28 = vmul.f32 %v19581_v7, %v4965_v49  ;;  %v19582_v32 = vmax.f32 %v14955_v38, 0.0  ;;  %v19583_v36 = vld [vmem:[#allocation80_spill] sm:$0xff]  ;;  %v5374_v7 = vadd.f32 %v5373_v20, %v5372_v45 }
 0x27f   : > { %v4209_v51 = vadd.f32 %v4208_v52, %v4207_v44  ;;  %v4201_v6 = vrot.slane %v4200_v26, 1  ;;  %v19584_v58 = vunpack.i.l.bf16 %v19583_v36  ;;  %v19585_v8 = vunpack.i.h.bf16 %v19583_v36  ;;  %v6006_v44 = vpop.permute.xlu0 %6005 }
 0x280   : > { %v5220_v41 = vmul.f32 %v5092_v13, %v5092_v13  ;;  %v5221_v22 = vmul.f32 %v5093_v28, %v5093_v28  ;;  %v15013_v13 = vadd.f32 1e-31, %v6292_v1  ;;  %v18953_v59 = vmax.f32 %v15003_v14, 0.0 }
 0x281   : > { %v3309_v49 = vmul.f32 %v19584_v58, %v19582_v32  ;;  %v3310_v18 = vmul.f32 %v19585_v8, %v18954_v39  ;;  %v5395_v52 = vadd.f32 %v5394_v29, %v5393_v27  ;;  %v15021_v62 = vmul.f32 %v19587_v16, %v4209_v51  ;;  %v15035_v16 = vpop.f32.mrb[62].mxu1 }
 0x282   : > { %19586 = vst [vmem:[#allocation80_spill] sm:$0xff] %v15013_v13  ;;  %v15015_v28 = vadd.f32 %v5221_v22, %v5220_v41  ;;  %v4202_v32 = vadd.f32 %v4201_v6, %v4200_v26  ;;  %v6295_v1 = vmul.f32 %v6006_v44, %v5383_v11  ;;  %v5388_v8 = vadd.f32 %v5387_v37, %v5386_v12  ;;  %v19589_v22 = vld [vmem:[#allocation63_spill] sm:$0xff]  ;;  %v19595_v44 = vld [vmem:[#allocation33_spill] sm:$0xff] }
 0x283   : > { %v4217_v58 = vadd.f32 %v3310_v18, %v3309_v49  ;;  %v19588_v45 = vmax.f32 %v14984_v10, 0.0  ;;  %v19590_v20 = vunpack.i.l.bf16 %v19589_v22  ;;  %v19591_v27 = vunpack.i.h.bf16 %v19589_v22  ;;  %v15047_v49 = vpop.f32.mrb[63].mxu1 }
 0x284   : > { %v15037_v26 = vadd.f32 1e-31, %v6293_v15  ;;  %v19593_v12 = vmax.f32 %v14839_v5, 0.0  ;;  %v19594_v37 = vmax.f32 %v14874_v55, 0.0  ;;  %v5375_v18 = vrot.slane %v5374_v7, 1 }
 0x285   : > { %v3307_v41 = vmul.f32 %v19590_v20, %v19588_v45  ;;  %v3308_v29 = vmul.f32 %v19591_v27, %v18953_v59  ;;  %v15050_v45 = vmul.f32 %v19595_v44, %v4202_v32  ;;  %v4218_v20 = vrot.slane %v4217_v58, 4 }
 0x286   : > { %19592 = vst [vmem:[#allocation9_spill] sm:$0xff] %v15037_v26  ;;  %v4970_v11 = vsub.f32 %v19593_v12, %v15021_v62  ;;  %v4971_v6 = vsub.f32 %v19594_v37, %v15021_v62  ;;  %11983 = vrsqrt.f32 %v15013_v13  ;;  %v5396_v27 = vrot.slane %v5395_v52, 1  ;;  %v19628_v26 = vld [vmem:[#allocation109_spill] sm:$0xff] }
 0x287   : > { %v4210_v15 = vadd.f32 %v3308_v29, %v3307_v41  ;;  %v19596_v51 = vunpack.i.l.bf16 %v19548_v25  ;;  %v19597_v5 = vunpack.i.h.bf16 %v19548_v25  ;;  %v15057_v39 = vadd.f32 1e-31, %v6295_v1  ;;  %v15069_v25 = vpop.permute.xlu1 %4782 }
 0x288   : > { %v5389_v55 = vrot.slane %v5388_v8, 1  ;;  %v19599_v37 = vmax.f32 %v14865_v17, 0.0  ;;  %v19600_v32 = vmax.f32 %v14889_v46, 0.0  ;;  %v4219_v13 = vadd.f32 %v4218_v20, %v4217_v58  ;;  %19601 = vst [vmem:[#allocation33_spill] sm:$0xff] %v15069_v25 }
 0x289   : > { %v5098_v59 = vmul.f32 %v19596_v51, %v4970_v11  ;;  %v5099_v12 = vmul.f32 %v19597_v5, %v4971_v6  ;;  %19598 = vst [vmem:[#allocation63_spill] sm:$0xff] %v15057_v39  ;;  %v15067_v51 = vadd.f32 %v14625_v19, %v14233_v54  ;;  %v5376_v1 = vadd.f32 %v5375_v18, %v5374_v7 }
 0x28a   : > { %v4968_v35 = vsub.f32 %v19599_v37, %v15050_v45  ;;  %v4969_v41 = vsub.f32 %v19600_v32, %v15050_v45  ;;  %v19602_v11 = vunpack.i.l.bf16 %v19560_v61  ;;  %v19603_v17 = vunpack.i.h.bf16 %v19560_v61 }
 0x28b   : > { %v5226_v29 = vmul.f32 %v5098_v59, %v5098_v59  ;;  %v5227_v44 = vmul.f32 %v5099_v12, %v5099_v12  ;;  %v15077_v46 = vadd.f32 %v14631_v47, %v14233_v54  ;;  %v5397_v59 = vadd.f32 %v5396_v27, %v5395_v52  ;;  %v11544_v27 = vld [vmem:[%s18725_s7 + $0x90] sm:$0xff]   ;;  %v19608_v47 = vld [vmem:[#allocation34_spill] sm:$0xff] }
 0x28c   : > { %v5096_v6 = vmul.f32 %v19602_v11, %v4968_v35  ;;  %v5097_v5 = vmul.f32 %v19603_v17, %v4969_v41  ;;  %v4220_v58 = vrot.slane %v4219_v13, 2  ;;  %v4211_v20 = vrot.slane %v4210_v15, 4  ;;  %v19605_v17 = vld [vmem:[#allocation6_spill] sm:$0xff]  ;;  %10872 = vmatprep.subr.bf16.mxu0 %v11544_v27 }
 0x28d   : > { %v15079_v12 = vadd.f32 %v5227_v44, %v5226_v29  ;;  %v5390_v19 = vadd.f32 %v5389_v55, %v5388_v8  ;;  %v5406_v37 = vrot.slane %v14965_v9, 4  ;;  %v5399_v18 = vrot.slane %v15015_v28, 4  ;;  %10873 = vmatpush3.bf16.msra.mxu0 %v11544_v27 }
 0x28e   : > { %v5224_v32 = vmul.f32 %v5096_v6, %v5096_v6  ;;  %v5225_v7 = vmul.f32 %v5097_v5, %v5097_v5  ;;  %v4221_v35 = vadd.f32 %v4220_v58, %v4219_v13  ;;  %v4212_v11 = vadd.f32 %v4211_v20, %v4210_v15  ;;  %v15098_v13 = vpop.f32.mrb[64].mxu1 }
 0x28f   : > { %v18960_v61 = vmax.f32 %v15067_v51, 0.0  ;;  %v15089_v52 = vadd.f32 %v14633_v42, %v14233_v54  ;;  %v15093_v8 = vadd.f32 %v14641_v2, %v14233_v54  ;;  %v6294_v15 = vmul.f32 %v14851_v21, %v5376_v1  ;;  %v15103_v6 = vpop.f32.mrb[65].mxu1  ;;  %v15105_v42 = vpop.permute.xlu1 %4857  ;;  %v19607_v21 = vld [vmem:[#allocation99_spill] sm:$0xff] }
 0x290   : > { %v15084_v41 = vadd.f32 %v5225_v7, %v5224_v32  ;;  %v6883_v55 = vpack.c.bf16 %v14915_v34, %v14915_v34  ;;  %v4222_v29 = vrot.slane %v4221_v35, 1  ;;  %v4213_v44 = vrot.slane %v4212_v11, 2  ;;  %19604 = vst [vmem:[#allocation135_spill] sm:$0xff] %v15105_v42  ;;  %v15111_v32 = vpop.eup %11983 }
 0x291   : > { %v6297_v2 = vmul.f32 %v19605_v17, %v5397_v59  ;;  %v5407_v5 = vadd.f32 %v5406_v37, %v14965_v9  ;;  %v18961_v58 = vmax.f32 %v15089_v52, 0.0  ;;  %19606 = vst [vmem:[#allocation6_spill] sm:$0xff] %v15111_v32  ;;  %v6296_v1 = vmul.f32 %v19607_v21, %v5390_v19  ;;  %v19611_v37 = vld [vmem:[#allocation28_spill] sm:$0xff] }
 0x292   : > { %v4223_v34 = vadd.f32 %v4222_v29, %v4221_v35  ;;  %v4214_v7 = vadd.f32 %v4213_v44, %v4212_v11  ;;  %v19609_v25 = vunpack.i.l.bf16 %v19608_v47  ;;  %v5400_v59 = vadd.f32 %v5399_v18, %v15015_v28  ;;  %v19618_v28 = vld [vmem:[#allocation12_spill] sm:$0xff] }
 0x293   : > { %v19610_v9 = vmax.f32 %v15077_v46, 0.0  ;;  %v19612_v17 = vunpack.i.l.bf16 %v19611_v37  ;;  %v19613_v39 = vunpack.i.h.bf16 %v19608_v47  ;;  %v19614_v35 = vmax.f32 %v15093_v8, 0.0 }
 0x294   : > { %v3313_v42 = vmul.f32 %v19609_v25, %v18960_v61  ;;  %v19615_v11 = vunpack.i.h.bf16 %v19611_v37  ;;  %v15131_v44 = vadd.f32 1e-31, %v6294_v15  ;;  %v15133_v25 = vunpack.c.l.b16 %v6883_v55 }
 0x295   : > { %v3311_v20 = vmul.f32 %v19612_v17, %v19610_v9  ;;  %v3314_v19 = vmul.f32 %v19613_v39, %v18961_v58  ;;  %v15136_v18 = vmul.f32 %v19618_v28, %v4223_v34  ;;  %v4215_v27 = vrot.slane %v4214_v7, 1 }
 0x296   : > { %v3312_v29 = vmul.f32 %v19615_v11, %v19614_v35  ;;  %19616 = vst [vmem:[#allocation99_spill] sm:$0xff] %v15131_v44  ;;  %19617 = vst [vmem:[#allocation34_spill] sm:$0xff] %v15133_v25  ;;  %v15138_v21 = vadd.f32 1e-31, %v6297_v2  ;;  %v5408_v9 = vrot.slane %v5407_v5, 2  ;;  %v19621_v39 = vmax.f32 %v14955_v38, 0.0  ;;  %v15148_v11 = vpop.permute.xlu1 %6035 }
 0x297   : > { %19619 = vst [vmem:[#allocation28_spill] sm:$0xff] %v15136_v18  ;;  %v4231_v17 = vadd.f32 %v3314_v19, %v3313_v42  ;;  %v15140_v32 = vadd.f32 1e-31, %v6296_v1  ;;  %v19622_v15 = vmax.f32 %v14969_v3, 0.0  ;;  %v4216_v35 = vadd.f32 %v4215_v27, %v4214_v7 }
 0x298   : > { %19620 = vst [vmem:[#allocation12_spill] sm:$0xff] %v15138_v21  ;;  %v4224_v61 = vadd.f32 %v3312_v29, %v3311_v20  ;;  %v4974_v58 = vsub.f32 %v19621_v39, %v15136_v18  ;;  %v5401_v34 = vrot.slane %v5400_v59, 2  ;;  %v6882_v2 = vpack.c.bf16 %v14959_v50, %v14959_v50  ;;  %v19625_v39 = vld [vmem:[#allocation41_spill] sm:$0xff] }
 0x299   : > { %v4975_v55 = vsub.f32 %v19622_v15, %v15136_v18  ;;  %v4232_v28 = vrot.slane %v4231_v17, 4  ;;  %v5420_v20 = vrot.slane %v15079_v12, 4  ;;  %v19623_v1 = vunpack.i.l.bf16 %v19583_v36 }
 0x29a   : > { %v4225_v42 = vrot.slane %v4224_v61, 4  ;;  %v19624_v38 = vunpack.i.h.bf16 %v19583_v36  ;;  %v15158_v3 = vmul.f32 %v19625_v39, %v4216_v35  ;;  %11985 = vrsqrt.f32 %v15138_v21 }
 0x29b   : > { %v5102_v19 = vmul.f32 %v19623_v1, %v4974_v58  ;;  %v5409_v7 = vadd.f32 %v5408_v9, %v5407_v5  ;;  %v4233_v27 = vadd.f32 %v4232_v28, %v4231_v17  ;;  %v19627_v18 = vmax.f32 %v14984_v10, 0.0  ;;  %v15177_v28 = vpop.permute.xlu1 %6110 }
 0x29c   : > { %v5103_v29 = vmul.f32 %v19624_v38, %v4975_v55  ;;  %19626 = vst [vmem:[#allocation41_spill] sm:$0xff] %v15158_v3  ;;  %v4226_v15 = vadd.f32 %v4225_v42, %v4224_v61  ;;  %v15166_v58 = vadd.f32 %v19628_v26, %v14233_v54  ;;  %11987 = vrsqrt.f32 %v15140_v32  ;;  %19631 = vst [vmem:[#allocation109_spill] sm:$0xff] %v15177_v28 }
 0x29d   : > { %v5230_v25 = vmul.f32 %v5102_v19, %v5102_v19  ;;  %v4972_v44 = vsub.f32 %v19627_v18, %v15158_v3  ;;  %v5402_v36 = vadd.f32 %v5401_v34, %v5400_v59  ;;  %v19629_v55 = vmax.f32 %v15003_v14, 0.0 }
 0x29e   : > { %v5231_v50 = vmul.f32 %v5103_v29, %v5103_v29  ;;  %v4234_v5 = vrot.slane %v4233_v27, 2  ;;  %v5421_v61 = vadd.f32 %v5420_v20, %v15079_v12  ;;  %v19630_v17 = vunpack.i.l.bf16 %v19589_v22 }
 0x29f   : > { %v4973_v35 = vsub.f32 %v19629_v55, %v15158_v3  ;;  %v4227_v18 = vrot.slane %v4226_v15, 2  ;;  %v5410_v26 = vrot.slane %v5409_v7, 1  ;;  %v5413_v42 = vrot.slane %v15084_v41, 4 }
 0x2a0   : > { %v15173_v9 = vadd.f32 %v5231_v50, %v5230_v25  ;;  %v5100_v10 = vmul.f32 %v19630_v17, %v4972_v44  ;;  %v19632_v59 = vunpack.i.h.bf16 %v19589_v22  ;;  %v4235_v1 = vadd.f32 %v4234_v5, %v4233_v27 }
 0x2a1   : > { %v4228_v19 = vadd.f32 %v4227_v18, %v4226_v15  ;;  %v18965_v38 = vmax.f32 %v15166_v58, 0.0  ;;  %v15185_v12 = vadd.f32 %v14697_v60, %v14233_v54  ;;  %v6885_v44 = vpack.c.bf16 %v15021_v62, %v15021_v62 }
 0x2a2   : > { %v5101_v34 = vmul.f32 %v19632_v59, %v4973_v35  ;;  %v5228_v14 = vmul.f32 %v5100_v10, %v5100_v10  ;;  %v4236_v20 = vrot.slane %v4235_v1, 1  ;;  %v15191_v29 = vadd.f32 %v14700_v31, %v14233_v54  ;;  %v19634_v35 = vld [vmem:[#allocation110_spill] sm:$0xff]  ;;  %v19635_v31 = vld [vmem:[#allocation43_spill] sm:$0xff] }
 0x2a3   : > { %v5403_v22 = vrot.slane %v5402_v36, 1  ;;  %v5422_v39 = vrot.slane %v5421_v61, 2  ;;  %v4229_v27 = vrot.slane %v4228_v19, 1  ;;  %v18966_v15 = vmax.f32 %v15185_v12, 0.0 }
 0x2a4   : > { %v5229_v25 = vmul.f32 %v5101_v34, %v5101_v34  ;;  %v15194_v50 = vunpack.c.l.b16 %v6882_v2  ;;  %v4237_v60 = vadd.f32 %v4236_v20, %v4235_v1  ;;  %v15200_v5 = vadd.f32 %v19634_v35, %v14233_v54  ;;  %v15211_v34 = vpop.eup %11985  ;;  %v15213_v1 = vpop.permute.xlu1 %4787  ;;  %v19641_v20 = vld [vmem:[#allocation66_spill] sm:$0xff]  ;;  %v19642_v35 = vld [vmem:[#allocation7_spill] sm:$0xff] }
 0x2a5   : > { %v5414_v62 = vadd.f32 %v5413_v42, %v15084_v41  ;;  %v4230_v17 = vadd.f32 %v4229_v27, %v4228_v19  ;;  %v19636_v10 = vunpack.i.l.bf16 %v19635_v31  ;;  %v19637_v2 = vunpack.i.h.bf16 %v19635_v31  ;;  %19638 = vst [vmem:[#allocation110_spill] sm:$0xff] %v15211_v34  ;;  %19639 = vst [vmem:[#allocation43_spill] sm:$0xff] %v15213_v1 }
 0x2a6   : > { %19633 = vst [vmem:[#allocation136_spill] sm:$0xff] %v15194_v50  ;;  %v15196_v55 = vadd.f32 %v5229_v25, %v5228_v14  ;;  %v5411_v14 = vadd.f32 %v5410_v26, %v5409_v7  ;;  %v15215_v25 = vunpack.c.l.b16 %v6885_v44  ;;  %v4897_v41 = vmul.f32 %v19641_v20, %v4237_v60  ;;  %v15220_v50 = vpop.eup %11987 }
 0x2a7   : > { %v3317_v18 = vmul.f32 %v19636_v10, %v18965_v38  ;;  %v3318_v59 = vmul.f32 %v19637_v2, %v18966_v15  ;;  %v18967_v42 = vmax.f32 %v15191_v29, 0.0  ;;  %v5404_v19 = vadd.f32 %v5403_v22, %v5402_v36  ;;  %19643 = vst [vmem:[#allocation66_spill] sm:$0xff] %v15220_v50 }
 0x2a8   : > { %19640 = vst [vmem:[#allocation137_spill] sm:$0xff] %v15215_v25  ;;  %v5423_v27 = vadd.f32 %v5422_v39, %v5421_v61  ;;  %v4896_v10 = vmul.f32 %v19642_v35, %v4230_v17  ;;  %v19644_v2 = vmax.f32 %v15067_v51, 0.0  ;;  %v19645_v28 = vmax.f32 %v15089_v52, 0.0  ;;  %v19650_v52 = vld [vmem:[#allocation36_spill] sm:$0xff] }
 0x2a9   : > { %v4245_v38 = vadd.f32 %v3318_v59, %v3317_v18  ;;  %v6889_v7 = vpack.c.bf16 %v4897_v41, %v4897_v41  ;;  %v18968_v26 = vmax.f32 %v15200_v5, 0.0  ;;  %v5415_v44 = vrot.slane %v5414_v62, 2 }
 0x2aa   : > { %v4978_v15 = vsub.f32 %v19644_v2, %v4897_v41  ;;  %v4979_v1 = vsub.f32 %v19645_v28, %v4897_v41  ;;  %v19646_v60 = vmax.f32 %v15077_v46, 0.0  ;;  %v19647_v36 = vmax.f32 %v15093_v8, 0.0 }
 0x2ab   : > { %v6888_v22 = vpack.c.bf16 %v4896_v10, %v4896_v10  ;;  %v19648_v39 = vunpack.i.l.bf16 %v19608_v47  ;;  %v19649_v51 = vunpack.i.h.bf16 %v19608_v47  ;;  %v7427_v59 = vunpack.c.l.b16 %v6889_v7 }
 0x2ac   : > { %v4976_v20 = vsub.f32 %v19646_v60, %v4896_v10  ;;  %v4977_v61 = vsub.f32 %v19647_v36, %v4896_v10  ;;  %v19651_v28 = vunpack.i.h.bf16 %v19650_v52  ;;  %v19652_v35 = vunpack.i.l.bf16 %v19611_v37 }
 0x2ad   : > { %v5106_v17 = vmul.f32 %v19648_v39, %v4978_v15  ;;  %v5107_v18 = vmul.f32 %v19649_v51, %v4979_v1  ;;  %v19653_v2 = vunpack.i.h.bf16 %v19611_v37  ;;  %v7426_v60 = vunpack.c.l.b16 %v6888_v22  ;;  %v15247_v15 = vpop.permute.xlu1 %4862 }
 0x2ae   : > { %v3316_v41 = vmul.f32 %v19651_v28, %v18967_v42  ;;  %v5104_v46 = vmul.f32 %v19652_v35, %v4976_v20  ;;  %v15245_v10 = vadd.f32 %v14736_v24, %v14233_v54  ;;  %19654 = vst [vmem:[#allocation7_spill] sm:$0xff] %v15247_v15  ;;  %v19655_v7 = vunpack.i.l.bf16 %v19650_v52 }
 0x2af   : > { %v5105_v8 = vmul.f32 %v19653_v2, %v4977_v61  ;;  %v5234_v47 = vmul.f32 %v5106_v17, %v5106_v17  ;;  %v5235_v1 = vmul.f32 %v5107_v18, %v5107_v18  ;;  %v4246_v39 = vrot.slane %v4245_v38, 4 }
 0x2b0   : > { %v3315_v36 = vmul.f32 %v19655_v7, %v18968_v26  ;;  %v5232_v51 = vmul.f32 %v5104_v46, %v5104_v46  ;;  %v15254_v37 = vsel %vm7162_vm2, %v7427_v59, %v7426_v60  ;;  %v15258_v61 = vadd.f32 %v14743_v23, %v14233_v54  ;;  %v19656_v46 = vld [vmem:[#allocation116_spill] sm:$0xff]  ;;  %v19657_v59 = vld [vmem:[#allocation106_spill] sm:$0xff] }
 0x2b1   : > { %v5233_v20 = vmul.f32 %v5105_v8, %v5105_v8  ;;  %v5434_v24 = vrot.slane %v15173_v9, 4  ;;  %v5447_v22 = vadd.f32 %v5235_v1, %v5234_v47  ;;  %v4247_v17 = vadd.f32 %v4246_v39, %v4245_v38  ;;  %v15278_v1 = vpop.permute.xlu1 %6040 }
 0x2b2   : > { %v4238_v18 = vadd.f32 %v3316_v41, %v3315_v36  ;;  %v6299_v28 = vmul.f32 %v14816_v0, %v5411_v14  ;;  %v18969_v2 = vmax.f32 %v15245_v10, 0.0  ;;  %v15267_v8 = vadd.f32 %v19656_v46, %v14233_v54  ;;  %v19658_v14 = vld [vmem:[#allocation117_spill] sm:$0xff] }
 0x2b3   : > { %v15262_v35 = vadd.f32 %v5233_v20, %v5232_v51  ;;  %v6298_v60 = vmul.f32 %v19657_v59, %v5404_v19  ;;  %v5424_v7 = vrot.slane %v5423_v27, 1  ;;  %v4248_v23 = vrot.slane %v4247_v17, 2 }
 0x2b4   : > { %v4239_v42 = vrot.slane %v4238_v18, 4  ;;  %v6884_v47 = vpack.c.bf16 %v15050_v45, %v15050_v45  ;;  %v18970_v0 = vmax.f32 %v15267_v8, 0.0  ;;  %v15276_v41 = vadd.f32 %v19658_v14, %v14233_v54  ;;  %v19660_v45 = vld [vmem:[#allocation60_spill] sm:$0xff] }
 0x2b5   : > { %v5416_v36 = vadd.f32 %v5415_v44, %v5414_v62  ;;  %v5435_v39 = vadd.f32 %v5434_v24, %v15173_v9  ;;  %v4249_v19 = vadd.f32 %v4248_v23, %v4247_v17  ;;  %v15281_v20 = vadd.f32 1e-31, %v6299_v28  ;;  %v19664_v17 = vld [vmem:[#allocation49_spill] sm:$0xff]  ;;  %v15304_v21 = vpop.permute.xlu1 %6115 }
 0x2b6   : > { %v4240_v51 = vadd.f32 %v4239_v42, %v4238_v18  ;;  %v19661_v46 = vunpack.i.l.bf16 %v19660_v45  ;;  %v19662_v26 = vunpack.i.h.bf16 %v19660_v45  ;;  %v18973_v38 = vmax.f32 %v15276_v41, 0.0 }
 0x2b7   : > { %19659 = vst [vmem:[#allocation36_spill] sm:$0xff] %v15281_v20  ;;  %v15292_v25 = vadd.f32 1e-31, %v6298_v60  ;;  %v5425_v62 = vadd.f32 %v5424_v7, %v5423_v27  ;;  %v4250_v9 = vrot.slane %v4249_v19, 1  ;;  %v5448_v42 = vrot.slane %v5447_v22, 4 }
 0x2b8   : > { %v3321_v59 = vmul.f32 %v19661_v46, %v18969_v2  ;;  %v3322_v14 = vmul.f32 %v19662_v26, %v18970_v0  ;;  %v4241_v44 = vrot.slane %v4240_v51, 2  ;;  %v19663_v24 = vmax.f32 %v15258_v61, 0.0 }
 0x2b9   : > { %v19665_v18 = vunpack.i.l.bf16 %v19664_v17  ;;  %v19666_v46 = vunpack.i.h.bf16 %v19664_v17  ;;  %v5417_v26 = vrot.slane %v5416_v36, 1  ;;  %v5436_v0 = vrot.slane %v5435_v39, 2 }
 0x2ba   : > { %v4259_v23 = vadd.f32 %v3322_v14, %v3321_v59  ;;  %v4251_v15 = vadd.f32 %v4250_v9, %v4249_v19  ;;  %v4242_v60 = vadd.f32 %v4241_v44, %v4240_v51  ;;  %11989 = vrsqrt.f32 %v15281_v20  ;;  %v19668_v14 = vld [vmem:[#allocation76_spill] sm:$0xff] }
 0x2bb   : > { %v3319_v28 = vmul.f32 %v19665_v18, %v19663_v24  ;;  %v3320_v2 = vmul.f32 %v19666_v46, %v18973_v38  ;;  %v5427_v27 = vrot.slane %v15196_v55, 4  ;;  %11991 = vrsqrt.f32 %v15292_v25 }
 0x2bc   : > { %v4260_v7 = vrot.slane %v4259_v23, 4  ;;  %v15307_v59 = vunpack.c.l.b16 %v6884_v47  ;;  %v4899_v24 = vmul.f32 %v19668_v14, %v4251_v15  ;;  %v4243_v18 = vrot.slane %v4242_v60, 1 }
 0x2bd   : > { %v4252_v34 = vadd.f32 %v3320_v2, %v3319_v28  ;;  %v15311_v46 = vmul.f32 %v15148_v11, %v5425_v62  ;;  %v5449_v19 = vadd.f32 %v5448_v42, %v5447_v22  ;;  %v5418_v44 = vadd.f32 %v5417_v26, %v5416_v36  ;;  %v15336_v26 = vpop.permute.xlu1 %4792 }
 0x2be   : > { %19667 = vst [vmem:[#allocation116_spill] sm:$0xff] %v15307_v59  ;;  %v4261_v51 = vadd.f32 %v4260_v7, %v4259_v23  ;;  %v5437_v38 = vadd.f32 %v5436_v0, %v5435_v39  ;;  %v19669_v20 = vmax.f32 %v15166_v58, 0.0  ;;  %v19670_v28 = vmax.f32 %v15185_v12, 0.0  ;;  %v19673_v39 = vld [vmem:[#allocation59_spill] sm:$0xff]  ;;  %19676 = vst [vmem:[#allocation106_spill] sm:$0xff] %v15336_v26 }
 0x2bf   : > { %v4253_v9 = vrot.slane %v4252_v34, 4  ;;  %v5428_v47 = vadd.f32 %v5427_v27, %v15196_v55  ;;  %v4244_v59 = vadd.f32 %v4243_v18, %v4242_v60  ;;  %v5441_v11 = vrot.slane %v15262_v35, 4 }
 0x2c0   : > { %v4982_v2 = vsub.f32 %v19669_v20, %v4899_v24  ;;  %v4983_v50 = vsub.f32 %v19670_v28, %v4899_v24  ;;  %v4262_v15 = vrot.slane %v4261_v51, 2  ;;  %v19671_v22 = vunpack.i.l.bf16 %v19635_v31  ;;  %v19674_v20 = vld [vmem:[#allocation42_spill] sm:$0xff] }
 0x2c1   : > { %v4254_v14 = vadd.f32 %v4253_v9, %v4252_v34  ;;  %v19672_v36 = vunpack.i.h.bf16 %v19635_v31  ;;  %v15325_v58 = vadd.f32 %v14793_v48, %v14233_v54  ;;  %v5450_v12 = vrot.slane %v5449_v19, 2  ;;  %v19675_v34 = vld [vmem:[#allocation58_spill] sm:$0xff] }
 0x2c2   : > { %v5110_v62 = vmul.f32 %v19671_v22, %v4982_v2  ;;  %v4898_v55 = vmul.f32 %v19673_v39, %v4244_v59  ;;  %v15330_v42 = vadd.f32 %v19674_v20, %v14233_v54  ;;  %v15334_v23 = vadd.f32 %v19675_v34, %v14233_v54 }
 0x2c3   : > { %v5111_v0 = vmul.f32 %v19672_v36, %v4983_v50  ;;  %v6891_v60 = vpack.c.bf16 %v4899_v24, %v4899_v24  ;;  %v4263_v27 = vadd.f32 %v4262_v15, %v4261_v51  ;;  %v19677_v48 = vmax.f32 %v15200_v5, 0.0 }
 0x2c4   : > { %v5238_v31 = vmul.f32 %v5110_v62, %v5110_v62  ;;  %v19678_v18 = vmax.f32 %v15191_v29, 0.0  ;;  %v6890_v9 = vpack.c.bf16 %v4898_v55, %v4898_v55  ;;  %v4255_v2 = vrot.slane %v4254_v14, 2  ;;  %v15345_v20 = vpop.eup %11989 }
 0x2c5   : > { %v5239_v50 = vmul.f32 %v5111_v0, %v5111_v0  ;;  %v4980_v7 = vsub.f32 %v19677_v48, %v4898_v55  ;;  %v5438_v28 = vrot.slane %v5437_v38, 1  ;;  %v5429_v22 = vrot.slane %v5428_v47, 2  ;;  %19679 = vst [vmem:[#allocation117_spill] sm:$0xff] %v15345_v20  ;;  %v15351_v29 = vpop.eup %11991 }
 0x2c6   : > { %v4981_v59 = vsub.f32 %v19678_v18, %v4898_v55  ;;  %v5451_v62 = vadd.f32 %v5450_v12, %v5449_v19  ;;  %v5442_v24 = vadd.f32 %v5441_v11, %v15262_v35  ;;  %v19680_v51 = vunpack.i.l.bf16 %v19650_v52  ;;  %19681 = vst [vmem:[#allocation60_spill] sm:$0xff] %v15351_v29  ;;  %v19683_v19 = vld [vmem:[#allocation88_spill] sm:$0xff]  ;;  %v15360_v11 = vpop.permute.xlu1 %4867 }
 0x2c7   : > { %v15342_v36 = vadd.f32 %v5239_v50, %v5238_v31  ;;  %v7429_v0 = vunpack.c.l.b16 %v6891_v60  ;;  %v19682_v55 = vunpack.i.h.bf16 %v19650_v52  ;;  %v7428_v31 = vunpack.c.l.b16 %v6890_v9  ;;  %19684 = vst [vmem:[#allocation49_spill] sm:$0xff] %v15360_v11 }
 0x2c8   : > { %v5108_v5 = vmul.f32 %v19680_v51, %v4980_v7  ;;  %v4264_v50 = vrot.slane %v4263_v27, 1  ;;  %v4256_v18 = vadd.f32 %v4255_v2, %v4254_v14  ;;  %v18976_v39 = vmax.f32 %v15334_v23, 0.0 }
 0x2c9   : > { %v5109_v34 = vmul.f32 %v19682_v55, %v4981_v59  ;;  %v15358_v35 = vadd.f32 %v19683_v19, %v14233_v54  ;;  %v7489_v7 = vsel %vm7164_vm3, %v7428_v31, %v15254_v37  ;;  %v19685_v52 = vmax.f32 %v15325_v58, 0.0  ;;  %v19686_v59 = vld [vmem:[#allocation78_spill] sm:$0xff] }
 0x2ca   : > { %v5236_v48 = vmul.f32 %v5108_v5, %v5108_v5  ;;  %v4265_v60 = vadd.f32 %v4264_v50, %v4263_v27  ;;  %v19687_v9 = vunpack.i.l.bf16 %v19686_v59  ;;  %v4257_v5 = vrot.slane %v4256_v18, 1  ;;  %v19689_v27 = vld [vmem:[#allocation82_spill] sm:$0xff] }
 0x2cb   : > { %v5237_v12 = vmul.f32 %v5109_v34, %v5109_v34  ;;  %v7490_v14 = vsel %vm7166_vm4, %v7429_v0, %v7489_v7  ;;  %v19688_v2 = vunpack.i.h.bf16 %v19686_v59  ;;  %v18977_v19 = vmax.f32 %v15358_v35, 0.0 }
 0x2cc   : > { %v3325_v51 = vmul.f32 %v19687_v9, %v19685_v52  ;;  %v6300_v34 = vmul.f32 %v14993_v53, %v5418_v44  ;;  %v5439_v15 = vadd.f32 %v5438_v28, %v5437_v38  ;;  %v15376_v31 = vmul.f32 %v19689_v27, %v4265_v60  ;;  %v19691_v9 = vld [vmem:[#allocation4_spill] sm:$0xff] }
 0x2cd   : > { %v3326_v55 = vmul.f32 %v19688_v2, %v18976_v39  ;;  %v5454_v37 = vadd.f32 %v5237_v12, %v5236_v48  ;;  %v4258_v50 = vadd.f32 %v4257_v5, %v4256_v18  ;;  %v19690_v52 = vmax.f32 %v15330_v42, 0.0 }
 0x2ce   : > { %v19692_v11 = vunpack.i.l.bf16 %v19691_v9  ;;  %v19693_v2 = vunpack.i.h.bf16 %v19691_v9  ;;  %v5430_v26 = vadd.f32 %v5429_v22, %v5428_v47  ;;  %v5443_v20 = vrot.slane %v5442_v24, 2 }
 0x2cf   : > { %v4273_v7 = vadd.f32 %v3326_v55, %v3325_v51  ;;  %v19694_v53 = vmax.f32 %v15245_v10, 0.0  ;;  %v19695_v44 = vmax.f32 %v15267_v8, 0.0  ;;  %v5452_v18 = vrot.slane %v5451_v62, 1  ;;  %v6046_v51 = vpop.permute.xlu1 %6045 }
 0x2d0   : > { %v3323_v0 = vmul.f32 %v19692_v11, %v19690_v52  ;;  %v3324_v39 = vmul.f32 %v19693_v2, %v18977_v19  ;;  %v19696_v11 = vld [vmem:[#allocation35_spill] sm:$0xff]  ;;  %v5455_v5 = vrot.slane %v5454_v37, 4  ;;  %v19697_v47 = vunpack.i.l.bf16 %v19660_v45 }
 0x2d1   : > { %v4986_v38 = vsub.f32 %v19694_v53, %v15376_v31  ;;  %v4987_v28 = vsub.f32 %v19695_v44, %v15376_v31  ;;  %v4900_v12 = vmul.f32 %v19696_v11, %v4258_v50  ;;  %v19698_v10 = vunpack.i.h.bf16 %v19660_v45 }
 0x2d2   : > { %v4266_v60 = vadd.f32 %v3324_v39, %v3323_v0  ;;  %v4274_v27 = vrot.slane %v4273_v7, 4  ;;  %v15399_v52 = vadd.f32 1e-31, %v6300_v34  ;;  %v6303_v8 = vmul.f32 %v6046_v51, %v5439_v15 }
 0x2d3   : > { %v5114_v22 = vmul.f32 %v19697_v47, %v4986_v38  ;;  %v5115_v55 = vmul.f32 %v19698_v10, %v4987_v28  ;;  %v19700_v2 = vmax.f32 %v15258_v61, 0.0  ;;  %v19701_v44 = vmax.f32 %v15276_v41, 0.0 }
 0x2d4   : > { %19699 = vst [vmem:[#allocation76_spill] sm:$0xff] %v15399_v52  ;;  %v5431_v50 = vrot.slane %v5430_v26, 1  ;;  %v5444_v39 = vadd.f32 %v5443_v20, %v5442_v24  ;;  %v5462_v0 = vrot.slane %v15342_v36, 4  ;;  %v19702_v38 = vunpack.i.l.bf16 %v19664_v17 }
 0x2d5   : > { %v4984_v53 = vsub.f32 %v19700_v2, %v4900_v12  ;;  %v4985_v48 = vsub.f32 %v19701_v44, %v4900_v12  ;;  %v5242_v11 = vmul.f32 %v5114_v22, %v5114_v22  ;;  %v5243_v19 = vmul.f32 %v5115_v55, %v5115_v55 }
 0x2d6   : > { %v19703_v28 = vunpack.i.h.bf16 %v19664_v17  ;;  %v6892_v47 = vpack.c.bf16 %v4900_v12, %v4900_v12  ;;  %v5453_v15 = vadd.f32 %v5452_v18, %v5451_v62  ;;  %v5456_v51 = vadd.f32 %v5455_v5, %v5454_v37  ;;  %v19706_v37 = vld [vmem:[#allocation73_spill] sm:$0xff]  ;;  %v15431_v12 = vpop.f32.mrb[66].mxu1 }
 0x2d7   : > { %v5112_v45 = vmul.f32 %v19702_v38, %v4984_v53  ;;  %v4275_v61 = vadd.f32 %v4274_v27, %v4273_v7  ;;  %v4267_v10 = vrot.slane %v4266_v60, 4  ;;  %v5475_v2 = vadd.f32 %v5243_v19, %v5242_v11  ;;  %19708 = vst [vmem:[#allocation88_spill] sm:$0xff] %v15431_v12 }
 0x2d8   : > { %v5113_v34 = vmul.f32 %v19703_v28, %v4985_v48  ;;  %v7430_v3 = vunpack.c.l.b16 %v6892_v47  ;;  %v5445_v20 = vrot.slane %v5444_v39, 1  ;;  %v5463_v24 = vadd.f32 %v5462_v0, %v15342_v36 }
 0x2d9   : > { %v5240_v41 = vmul.f32 %v5112_v45, %v5112_v45  ;;  %v4276_v22 = vrot.slane %v4275_v61, 2  ;;  %v4268_v55 = vadd.f32 %v4267_v10, %v4266_v60  ;;  %v15418_v17 = vadd.f32 %v14847_v4, %v14233_v54 }
 0x2da   : > { %v5241_v44 = vmul.f32 %v5113_v34, %v5113_v34  ;;  %v15414_v53 = vsel %vm7168_vm5, %v7430_v3, %v7490_v14  ;;  %v15422_v62 = vadd.f32 %v14855_v57, %v14233_v54  ;;  %v15425_v19 = vadd.f32 1e-31, %v15311_v46  ;;  %v19710_v34 = vld [vmem:[#allocation29_spill] sm:$0xff] }
 0x2db   : > { %19704 = vst [vmem:[#allocation59_spill] sm:$0xff] %v15414_v53  ;;  %v6305_v36 = vmul.f32 %v19706_v37, %v5453_v15  ;;  %v4277_v7 = vadd.f32 %v4276_v22, %v4275_v61  ;;  %v4269_v48 = vrot.slane %v4268_v55, 2  ;;  %11993 = vrsqrt.f32 %v15399_v52  ;;  %v19711_v15 = vld [vmem:[#allocation65_spill] sm:$0xff]  ;;  %v19715_v22 = vld [vmem:[#allocation30_spill] sm:$0xff] }
 0x2dc   : > { %v15411_v29 = vadd.f32 %v5241_v44, %v5240_v41  ;;  %19705 = vst [vmem:[#allocation42_spill] sm:$0xff] %v15425_v19  ;;  %v15429_v18 = vadd.f32 1e-31, %v6303_v8  ;;  %v5432_v3 = vadd.f32 %v5431_v50, %v5430_v26  ;;  %v5457_v14 = vrot.slane %v5456_v51, 2  ;;  %v19762_v53 = vld [vmem:[#allocation122_spill] sm:$0xff] }
 0x2dd   : > { %v5446_v4 = vadd.f32 %v5445_v20, %v5444_v39  ;;  %v4278_v60 = vrot.slane %v4277_v7, 1  ;;  %v4270_v5 = vadd.f32 %v4269_v48, %v4268_v55  ;;  %v15435_v57 = vadd.f32 %v14867_v63, %v14233_v54 }
 0x2de   : > { %19707 = vst [vmem:[#allocation58_spill] sm:$0xff] %v15429_v18  ;;  %v5464_v46 = vrot.slane %v5463_v24, 2  ;;  %v2561_v27 = vmax.f32 %v15418_v17, 0.0  ;;  %v18983_v0 = vmax.f32 %v15422_v62, 0.0  ;;  %v15441_v8 = vadd.f32 %v14876_v43, %v14233_v54  ;;  %v19712_v43 = vld [vmem:[#allocation37_spill] sm:$0xff] }
 0x2df   : > { %v15443_v26 = vadd.f32 1e-31, %v6305_v36  ;;  %v4279_v50 = vadd.f32 %v4278_v60, %v4277_v7  ;;  %v4271_v11 = vrot.slane %v4270_v5, 1  ;;  %v18984_v39 = vmax.f32 %v15435_v57, 0.0 }
 0x2e0   : > { %v6302_v38 = vmul.f32 %v15278_v1, %v5432_v3  ;;  %v5458_v45 = vadd.f32 %v5457_v14, %v5456_v51  ;;  %v5476_v63 = vrot.slane %v5475_v2, 4  ;;  %v18980_v28 = vmax.f32 %v15441_v8, 0.0 }
 0x2e1   : > { %19709 = vst [vmem:[#allocation78_spill] sm:$0xff] %v15443_v26  ;;  %v6304_v47 = vmul.f32 %v19710_v34, %v5446_v4  ;;  %v15450_v61 = vmul.f32 %v19711_v15, %v4279_v50  ;;  %v4272_v10 = vadd.f32 %v4271_v11, %v4270_v5  ;;  %v19713_v41 = vunpack.i.h.bf16 %v19712_v43  ;;  %v19720_v4 = vld [vmem:[#allocation44_spill] sm:$0xff] }
 0x2e2   : > { %v5465_v20 = vadd.f32 %v5464_v46, %v5463_v24  ;;  %v19714_v1 = vunpack.i.l.bf16 %v19712_v43  ;;  %v19716_v55 = vunpack.i.l.bf16 %v19715_v22  ;;  %v19717_v36 = vunpack.i.h.bf16 %v19715_v22 }
 0x2e3   : > { %v3330_v44 = vmul.f32 %v19713_v41, %v18984_v39  ;;  %11995 = vrsqrt.f32 %v15443_v26  ;;  %v19718_v24 = vmax.f32 %v15325_v58, 0.0  ;;  %v19719_v3 = vmax.f32 %v15334_v23, 0.0  ;;  %v19746_v39 = vld [vmem:[#allocation67_spill] sm:$0xff] }
 0x2e4   : > { %v3329_v51 = vmul.f32 %v19714_v1, %v2561_v27  ;;  %v3327_v37 = vmul.f32 %v19716_v55, %v18983_v0  ;;  %v3328_v7 = vmul.f32 %v19717_v36, %v18980_v28  ;;  %v15476_v60 = vmul.f32 %v19720_v4, %v4272_v10 }
 0x2e5   : > { %v4990_v48 = vsub.f32 %v19718_v24, %v15450_v61  ;;  %v4991_v14 = vsub.f32 %v19719_v3, %v15450_v61  ;;  %v5459_v5 = vrot.slane %v5458_v45, 1  ;;  %v5477_v46 = vadd.f32 %v5476_v63, %v5475_v2  ;;  %v15487_v36 = vpop.eup %11993 }
 0x2e6   : > { %v4287_v50 = vadd.f32 %v3330_v44, %v3329_v51  ;;  %v4280_v11 = vadd.f32 %v3328_v7, %v3327_v37  ;;  %v15478_v34 = vadd.f32 1e-31, %v6302_v38  ;;  %v19722_v15 = vunpack.i.l.bf16 %v19686_v59  ;;  %19725 = vst [vmem:[#allocation4_spill] sm:$0xff] %v15487_v36 }
 0x2e7   : > { %v19723_v1 = vunpack.i.h.bf16 %v19686_v59  ;;  %v19724_v55 = vmax.f32 %v15330_v42, 0.0  ;;  %v15489_v10 = vadd.f32 1e-31, %v6304_v47  ;;  %v5466_v24 = vrot.slane %v5465_v20, 1  ;;  %v19730_v47 = vld [vmem:[#allocation125_spill] sm:$0xff] }
 0x2e8   : > { %19721 = vst [vmem:[#allocation82_spill] sm:$0xff] %v15478_v34  ;;  %v5118_v41 = vmul.f32 %v19722_v15, %v4990_v48  ;;  %v5469_v2 = vrot.slane %v15411_v29, 4  ;;  %v19727_v38 = vmax.f32 %v15358_v35, 0.0  ;;  %v19728_v59 = vunpack.i.l.bf16 %v19691_v9 }
 0x2e9   : > { %v5119_v58 = vmul.f32 %v19723_v1, %v4991_v14  ;;  %v4988_v23 = vsub.f32 %v19724_v55, %v15476_v60  ;;  %19726 = vst [vmem:[#allocation35_spill] sm:$0xff] %v15489_v10  ;;  %v4288_v7 = vrot.slane %v4287_v50, 4  ;;  %v5460_v48 = vadd.f32 %v5459_v5, %v5458_v45 }
 0x2ea   : > { %v4989_v63 = vsub.f32 %v19727_v38, %v15476_v60  ;;  %v5246_v44 = vmul.f32 %v5118_v41, %v5118_v41  ;;  %v5478_v42 = vrot.slane %v5477_v46, 2  ;;  %v19729_v3 = vunpack.i.h.bf16 %v19691_v9  ;;  %v19731_v38 = vld [vmem:[#allocation75_spill] sm:$0xff] }
 0x2eb   : > { %v5247_v51 = vmul.f32 %v5119_v58, %v5119_v58  ;;  %v5116_v37 = vmul.f32 %v19728_v59, %v4988_v23  ;;  %v15501_v4 = vadd.f32 %v19730_v47, %v14233_v54  ;;  %v4289_v35 = vadd.f32 %v4288_v7, %v4287_v50  ;;  %v19732_v59 = vld [vmem:[#allocation62_spill] sm:$0xff] }
 0x2ec   : > { %v5117_v14 = vmul.f32 %v19729_v3, %v4989_v63  ;;  %v4281_v55 = vrot.slane %v4280_v11, 4  ;;  %11997 = vrsqrt.f32 %v15489_v10  ;;  %v5470_v58 = vadd.f32 %v5469_v2, %v15411_v29 }
 0x2ed   : > { %v15503_v15 = vadd.f32 %v5247_v51, %v5246_v44  ;;  %v5244_v1 = vmul.f32 %v5116_v37, %v5116_v37  ;;  %v5467_v5 = vadd.f32 %v5466_v24, %v5465_v20  ;;  %v4290_v23 = vrot.slane %v4289_v35, 2  ;;  %v19733_v37 = vld [vmem:[#allocation48_spill] sm:$0xff]  ;;  %v11996_v3 = vpop.eup %11995 }
 0x2ee   : > { %v5245_v45 = vmul.f32 %v5117_v14, %v5117_v14  ;;  %v4282_v9 = vadd.f32 %v4281_v55, %v4280_v11  ;;  %v15510_v63 = vadd.f32 %v19731_v38, %v14233_v54  ;;  %v6306_v44 = vmul.f32 %v19732_v59, %v5460_v48  ;;  %v19734_v48 = vld [vmem:[#allocation127_spill] sm:$0xff]  ;;  %v19735_v55 = vld [vmem:[#allocation105_spill] sm:$0xff] }
 0x2ef   : > { %v18981_v50 = vmax.f32 %v15501_v4, 0.0  ;;  %v15518_v7 = vadd.f32 %v19733_v37, %v14233_v54  ;;  %v5479_v20 = vadd.f32 %v5478_v42, %v5477_v46  ;;  %v4291_v24 = vadd.f32 %v4290_v23, %v4289_v35  ;;  %v19737_v46 = vld [vmem:[#allocation53_spill] sm:$0xff] }
 0x2f0   : > { %v15513_v51 = vadd.f32 %v5245_v45, %v5244_v1  ;;  %v4283_v11 = vrot.slane %v4282_v9, 2  ;;  %v5471_v2 = vrot.slane %v5470_v58, 2  ;;  %v18986_v14 = vmax.f32 %v15510_v63, 0.0 }
 0x2f1   : > { %v18982_v47 = vmax.f32 %v15518_v7, 0.0  ;;  %v15525_v1 = vadd.f32 %v19734_v48, %v14233_v54  ;;  %v6307_v45 = vmul.f32 %v19735_v55, %v5467_v5  ;;  %v6893_v38 = vpack.c.bf16 %v15376_v31, %v15376_v31 }
 0x2f2   : > { %v4292_v59 = vrot.slane %v4291_v24, 1  ;;  %v4284_v37 = vadd.f32 %v4283_v11, %v4282_v9  ;;  %v15530_v41 = vadd.f32 1e-31, %v6306_v44  ;;  %v19738_v42 = vunpack.i.l.bf16 %v19737_v46  ;;  %v19741_v11 = vld [vmem:[#allocation45_spill] sm:$0xff] }
 0x2f3   : > { %v19739_v23 = vunpack.i.h.bf16 %v19737_v46  ;;  %v18985_v29 = vmax.f32 %v15525_v1, 0.0  ;;  %v15542_v5 = vmul.f32 %v11996_v3, %v15443_v26  ;;  %v5480_v31 = vrot.slane %v5479_v20, 1 }
 0x2f4   : > { %19736 = vst [vmem:[#allocation73_spill] sm:$0xff] %v15530_v41  ;;  %v3333_v35 = vmul.f32 %v19738_v42, %v18981_v50  ;;  %v4293_v55 = vadd.f32 %v4292_v59, %v4291_v24  ;;  %v4285_v9 = vrot.slane %v4284_v37, 1  ;;  %v15544_v44 = vadd.f32 %v5471_v2, %v5470_v58 }
 0x2f5   : > { %v3334_v48 = vmul.f32 %v19739_v23, %v18982_v47  ;;  %19740 = vst [vmem:[#allocation29_spill] sm:$0xff] %v15542_v5  ;;  %v19742_v28 = vunpack.i.l.bf16 %v19741_v11  ;;  %v19743_v23 = vunpack.i.h.bf16 %v19741_v11  ;;  %v15554_v0 = vadd.f32 1e-31, %v6307_v45 }
 0x2f6   : > { %v15556_v3 = vunpack.c.l.b16 %v6893_v38  ;;  %v4905_v24 = vmul.f32 %v19746_v39, %v4293_v55  ;;  %v4286_v59 = vadd.f32 %v4285_v9, %v4284_v37  ;;  %v15559_v58 = vpop.eup %11997  ;;  %11999 = vrsqrt.f32 %v15530_v41  ;;  %v19748_v55 = vld [vmem:[#allocation89_spill] sm:$0xff] }
 0x2f7   : > { %v3331_v42 = vmul.f32 %v19742_v28, %v18986_v14  ;;  %v4301_v50 = vadd.f32 %v3334_v48, %v3333_v35  ;;  %v3332_v47 = vmul.f32 %v19743_v23, %v18985_v29  ;;  %19744 = vst [vmem:[#allocation65_spill] sm:$0xff] %v15554_v0  ;;  %v5481_v48 = vadd.f32 %v5480_v31, %v5479_v20 }
 0x2f8   : > { %19745 = vst [vmem:[#allocation37_spill] sm:$0xff] %v15556_v3  ;;  %v4994_v23 = vsub.f32 %v2561_v27, %v4905_v24  ;;  %v19747_v45 = vmax.f32 %v15435_v57, 0.0  ;;  %v6897_v29 = vpack.c.bf16 %v4905_v24, %v4905_v24  ;;  %v5490_v37 = vrot.slane %v15503_v15, 4 }
 0x2f9   : > { %v4302_v2 = vrot.slane %v4301_v50, 4  ;;  %v4294_v35 = vadd.f32 %v3332_v47, %v3331_v42  ;;  %v4904_v9 = vmul.f32 %v19748_v55, %v4286_v59  ;;  %v19749_v3 = vunpack.i.l.bf16 %v19712_v43 }
 0x2fa   : > { %v4995_v38 = vsub.f32 %v19747_v45, %v4905_v24  ;;  %v19750_v47 = vunpack.i.h.bf16 %v19712_v43  ;;  %v15577_v17 = vadd.f32 %v14961_v30, %v14233_v54  ;;  %v7435_v57 = vunpack.c.l.b16 %v6897_v29 }
 0x2fb   : > { %v4303_v14 = vadd.f32 %v4302_v2, %v4301_v50  ;;  %v5122_v28 = vmul.f32 %v19749_v3, %v4994_v23  ;;  %v4295_v31 = vrot.slane %v4294_v35, 4  ;;  %v19751_v27 = vmax.f32 %v15422_v62, 0.0  ;;  %v19753_v3 = vld [vmem:[#allocation55_spill] sm:$0xff]  ;;  %v19756_v62 = vld [vmem:[#allocation132_spill] sm:$0xff] }
 0x2fc   : > { %v5123_v20 = vmul.f32 %v19750_v47, %v4995_v38  ;;  %v19752_v24 = vmax.f32 %v15441_v8, 0.0  ;;  %v6896_v59 = vpack.c.bf16 %v4904_v9, %v4904_v9  ;;  %v15585_v43 = vadd.f32 %v19753_v3, %v14233_v54 }
 0x2fd   : > { %v4992_v42 = vsub.f32 %v19751_v27, %v4904_v9  ;;  %v5250_v50 = vmul.f32 %v5122_v28, %v5122_v28  ;;  %v4304_v55 = vrot.slane %v4303_v14, 2  ;;  %v19754_v23 = vunpack.i.l.bf16 %v19715_v22 }
 0x2fe   : > { %v4993_v45 = vsub.f32 %v19752_v24, %v4904_v9  ;;  %v5251_v2 = vmul.f32 %v5123_v20, %v5123_v20  ;;  %v19755_v30 = vunpack.i.h.bf16 %v19715_v22  ;;  %v7434_v47 = vunpack.c.l.b16 %v6896_v59 }
 0x2ff   : > { %v5120_v38 = vmul.f32 %v19754_v23, %v4992_v42  ;;  %v15593_v27 = vadd.f32 %v19756_v62, %v14233_v54  ;;  %v5483_v8 = vrot.slane %v15513_v51, 4  ;;  %v4305_v9 = vadd.f32 %v4304_v55, %v4303_v14 }
 0x300   : > { %v5121_v29 = vmul.f32 %v19755_v30, %v4993_v45  ;;  %v5503_v28 = vadd.f32 %v5251_v2, %v5250_v50  ;;  %v4296_v20 = vadd.f32 %v4295_v31, %v4294_v35  ;;  %v15597_v3 = vsel %vm7162_vm2, %v7435_v57, %v7434_v47  ;;  %v15601_v30 = vpop.eup %11999  ;;  %v19757_v35 = vld [vmem:[#allocation134_spill] sm:$0xff]  ;;  %v15609_v57 = vpop.f32.mrb[67].mxu1 }
 0x301   : > { %v5248_v24 = vmul.f32 %v5120_v38, %v5120_v38  ;;  %v18989_v42 = vmax.f32 %v15577_v17, 0.0  ;;  %v5491_v22 = vadd.f32 %v5490_v37, %v15503_v15  ;;  %v4306_v59 = vrot.slane %v4305_v9, 1  ;;  %19758 = vst [vmem:[#allocation30_spill] sm:$0xff] %v15609_v57  ;;  %v19759_v38 = vld [vmem:[#allocation74_spill] sm:$0xff]  ;;  %v15633_v57 = vpop.f32.mrb[68].mxu1 }
 0x302   : > { %v5249_v39 = vmul.f32 %v5121_v29, %v5121_v29  ;;  %v5504_v45 = vrot.slane %v5503_v28, 4  ;;  %v4297_v23 = vrot.slane %v4296_v20, 2  ;;  %v18990_v14 = vmax.f32 %v15593_v27, 0.0  ;;  %19768 = vst [vmem:[#allocation44_spill] sm:$0xff] %v15633_v57 }
 0x303   : > { %v15607_v31 = vadd.f32 %v19757_v35, %v14233_v54  ;;  %v5484_v50 = vadd.f32 %v5483_v8, %v15513_v51  ;;  %v4307_v15 = vadd.f32 %v4306_v59, %v4305_v9  ;;  %v19761_v47 = vunpack.i.h.bf16 %v19759_v38  ;;  %v19763_v51 = vld [vmem:[#allocation8_spill] sm:$0xff]  ;;  %v15623_v9 = vpop.permute.xlu0 %6080  ;;  %v19765_v59 = vld [vmem:[#allocation2_spill] sm:$0xff] }
 0x304   : > { %v5496_v62 = vadd.f32 %v5249_v39, %v5248_v24  ;;  %v5505_v2 = vadd.f32 %v5504_v45, %v5503_v28  ;;  %v4298_v37 = vadd.f32 %v4297_v23, %v4296_v20  ;;  %v19760_v39 = vunpack.i.l.bf16 %v19759_v38 }
 0x305   : > { %v3338_v24 = vmul.f32 %v19761_v47, %v18990_v14  ;;  %v18991_v35 = vmax.f32 %v15607_v31, 0.0  ;;  %v6309_v5 = vmul.f32 %v19762_v53, %v5481_v48  ;;  %v5492_v26 = vrot.slane %v5491_v22, 2  ;;  %v11545_v53 = vld [vmem:[%s18725_s7 + $0x98] sm:$0xff]  }
 0x306   : > { %v5497_v55 = vrot.slane %v5496_v62, 4  ;;  %v3337_v29 = vmul.f32 %v19760_v39, %v18989_v42  ;;  %v4907_v8 = vmul.f32 %v19763_v51, %v4307_v15  ;;  %v4299_v28 = vrot.slane %v4298_v37, 1  ;;  %10874 = vmatprep.subr.bf16.mxu0 %v11545_v53 }
 0x307   : > { %v19764_v45 = vmax.f32 %v15585_v43, 0.0  ;;  %v19766_v23 = vunpack.i.l.bf16 %v19765_v59  ;;  %v19767_v47 = vunpack.i.h.bf16 %v19765_v59  ;;  %v5485_v48 = vrot.slane %v5484_v50, 2  ;;  %10875 = vmatpush3.bf16.msra.mxu0 %v11545_v53  ;;  %v15658_v52 = vpop.permute.xlu0 %4757 }
 0x308   : > { %v5498_v20 = vadd.f32 %v5497_v55, %v5496_v62  ;;  %v4315_v42 = vadd.f32 %v3338_v24, %v3337_v29  ;;  %v5506_v15 = vrot.slane %v5505_v2, 2  ;;  %v19769_v62 = vmax.f32 %v15501_v4, 0.0  ;;  %v15642_v29 = vpop.f32.mrb[69].mxu1 }
 0x309   : > { %v3335_v39 = vmul.f32 %v19766_v23, %v19764_v45  ;;  %v3336_v14 = vmul.f32 %v19767_v47, %v18991_v35  ;;  %v19770_v51 = vmax.f32 %v15518_v7, 0.0  ;;  %19771 = vst [vmem:[#allocation125_spill] sm:$0xff] %v15642_v29  ;;  %v4300_v23 = vadd.f32 %v4299_v28, %v4298_v37  ;;  %v15644_v35 = vpop.f32.mrb[70].mxu1  ;;  %v19776_v28 = vld [vmem:[#allocation68_spill] sm:$0xff] }
 0x30a   : > { %v4998_v55 = vsub.f32 %v19769_v62, %v4907_v8  ;;  %v5499_v24 = vrot.slane %v5498_v20, 2  ;;  %v4316_v12 = vrot.slane %v4315_v42, 4  ;;  %19772 = vst [vmem:[#allocation75_spill] sm:$0xff] %v15644_v35  ;;  %v19773_v57 = vrot.slane %v15544_v44, 1  ;;  %v15655_v37 = vpop.f32.mrb[71].mxu1 }
 0x30b   : > { %v4999_v45 = vsub.f32 %v19770_v51, %v4907_v8  ;;  %v4308_v47 = vadd.f32 %v3336_v14, %v3335_v39  ;;  %v19774_v62 = vunpack.i.l.bf16 %v19737_v46  ;;  %v19775_v51 = vunpack.i.h.bf16 %v19737_v46 }
 0x30c   : > { %v5474_v18 = vadd.f32 %v19773_v57, %v15544_v44  ;;  %v5493_v14 = vadd.f32 %v5492_v26, %v5491_v22  ;;  %v4906_v39 = vmul.f32 %v19776_v28, %v4300_v23  ;;  %v4317_v35 = vadd.f32 %v4316_v12, %v4315_v42 }
 0x30d   : > { %v5126_v7 = vmul.f32 %v19774_v62, %v4998_v55  ;;  %v5127_v29 = vmul.f32 %v19775_v51, %v4999_v45  ;;  %v4309_v34 = vrot.slane %v4308_v47, 4  ;;  %v5486_v19 = vadd.f32 %v5485_v48, %v5484_v50  ;;  %v15664_v51 = vpop.f32.mrb[72].mxu1 }
 0x30e   : > { %v5507_v36 = vadd.f32 %v5506_v15, %v5505_v2  ;;  %v5500_v4 = vadd.f32 %v5499_v24, %v5498_v20  ;;  %v19777_v55 = vmax.f32 %v15510_v63, 0.0  ;;  %v19778_v46 = vmax.f32 %v15525_v1, 0.0  ;;  %v15666_v50 = vpop.f32.mrb[73].mxu1 }
 0x30f   : > { %v5254_v44 = vmul.f32 %v5126_v7, %v5126_v7  ;;  %v5255_v57 = vmul.f32 %v5127_v29, %v5127_v29  ;;  %v6898_v45 = vpack.c.bf16 %v4906_v39, %v4906_v39  ;;  %v6899_v22 = vpack.c.bf16 %v4907_v8, %v4907_v8  ;;  %v15676_v29 = vpop.f32.mrb[74].mxu1 }
 0x310   : > { %v4996_v62 = vsub.f32 %v19777_v55, %v4906_v39  ;;  %v4997_v53 = vsub.f32 %v19778_v46, %v4906_v39  ;;  %v4318_v12 = vrot.slane %v4317_v35, 2  ;;  %v4310_v42 = vadd.f32 %v4309_v34, %v4308_v47  ;;  %v15678_v34 = vpop.f32.mrb[75].mxu1 }
 0x311   : > { %v5517_v26 = vadd.f32 %v5255_v57, %v5254_v44  ;;  %v19779_v2 = vunpack.i.l.bf16 %v19741_v11  ;;  %v19780_v20 = vunpack.i.h.bf16 %v19741_v11  ;;  %v7436_v63 = vunpack.c.l.b16 %v6898_v45 }
 0x312   : > { %v15674_v1 = vadd.f32 %v15018_v56, %v14233_v54  ;;  %v5508_v24 = vrot.slane %v5507_v36, 1  ;;  %v4319_v8 = vadd.f32 %v4318_v12, %v4317_v35  ;;  %v4311_v7 = vrot.slane %v4310_v42, 2  ;;  %v19783_v12 = vld [vmem:[#allocation114_spill] sm:$0xff] }
 0x313   : > { %v5124_v48 = vmul.f32 %v19779_v2, %v4996_v62  ;;  %v5125_v15 = vmul.f32 %v19780_v20, %v4997_v53  ;;  %v5518_v23 = vrot.slane %v5517_v26, 4  ;;  %v5501_v47 = vrot.slane %v5500_v4, 1  ;;  %v15684_v62 = vpop.permute.xlu0 %4832 }
 0x314   : > { %v7496_v11 = vsel %vm7164_vm3, %v7436_v63, %v15597_v3  ;;  %v15682_v44 = vadd.f32 1e-31, %v6309_v5  ;;  %v5494_v57 = vrot.slane %v5493_v14, 1  ;;  %v7437_v56 = vunpack.c.l.b16 %v6899_v22  ;;  %19782 = vst [vmem:[#allocation48_spill] sm:$0xff] %v15684_v62 }
 0x315   : > { %v5252_v28 = vmul.f32 %v5124_v48, %v5124_v48  ;;  %v5253_v39 = vmul.f32 %v5125_v15, %v5125_v15  ;;  %v5519_v55 = vadd.f32 %v5518_v23, %v5517_v26  ;;  %v5487_v46 = vrot.slane %v5486_v19, 1 }
 0x316   : > { %19781 = vst [vmem:[#allocation62_spill] sm:$0xff] %v15682_v44  ;;  %v4320_v45 = vrot.slane %v4319_v8, 1  ;;  %v4312_v35 = vadd.f32 %v4311_v7, %v4310_v42  ;;  %v15687_v2 = vmul.f32 %v19783_v12, %v5474_v18  ;;  %v5509_v20 = vadd.f32 %v5508_v24, %v5507_v36 }
 0x317   : > { %v5510_v53 = vadd.f32 %v5253_v39, %v5252_v28  ;;  %v7497_v48 = vsel %vm7166_vm4, %v7437_v56, %v7496_v11  ;;  %v15692_v3 = vadd.f32 %v15035_v16, %v14233_v54  ;;  %v5502_v5 = vadd.f32 %v5501_v47, %v5500_v4  ;;  %v19784_v4 = vld [vmem:[#allocation108_spill] sm:$0xff]  ;;  %v19785_v47 = vld [vmem:[#allocation11_spill] sm:$0xff]  ;;  %v6086_v56 = vpop.permute.xlu0 %6085 }
 0x318   : > { %v5520_v15 = vrot.slane %v5519_v55, 2  ;;  %v18998_v22 = vmax.f32 %v15674_v1, 0.0  ;;  %v5495_v63 = vadd.f32 %v5494_v57, %v5493_v14  ;;  %v4321_v23 = vadd.f32 %v4320_v45, %v4319_v8  ;;  %v19786_v8 = vld [vmem:[#allocation86_spill] sm:$0xff]  ;;  %v15712_v57 = vpop.f32.mrb[76].mxu1 }
 0x319   : > { %v5511_v26 = vrot.slane %v5510_v53, 4  ;;  %v4313_v28 = vrot.slane %v4312_v35, 1  ;;  %v18997_v42 = vmax.f32 %v15692_v3, 0.0  ;;  %v5488_v7 = vadd.f32 %v5487_v46, %v5486_v19 }
 0x31a   : > { %v15698_v36 = vadd.f32 %v15023_v40, %v14233_v54  ;;  %v15702_v16 = vadd.f32 %v15047_v49, %v14233_v54  ;;  %v6313_v24 = vmul.f32 %v19784_v4, %v5509_v20  ;;  %v15706_v39 = vmul.f32 %v19785_v47, %v4321_v23  ;;  %v19788_v40 = vld [vmem:[#allocation25_spill] sm:$0xff]  ;;  %v15719_v20 = vpop.f32.mrb[77].mxu1 }
 0x31b   : > { %v5512_v18 = vadd.f32 %v5511_v26, %v5510_v53  ;;  %v4314_v14 = vadd.f32 %v4313_v28, %v4312_v35  ;;  %v19787_v11 = vunpack.i.h.bf16 %v19786_v8  ;;  %v6312_v46 = vmul.f32 %v19788_v40, %v5502_v5 }
 0x31c   : > { %v5521_v53 = vadd.f32 %v5520_v15, %v5519_v55  ;;  %v19789_v49 = vunpack.i.l.bf16 %v19786_v8  ;;  %v6311_v35 = vmul.f32 %v6086_v56, %v5495_v63  ;;  %v19790_v26 = vmax.f32 %v15577_v17, 0.0  ;;  %v15728_v55 = vpop.f32.mrb[78].mxu1 }
 0x31d   : > { %v3342_v19 = vmul.f32 %v19787_v11, %v18997_v42  ;;  %v5513_v45 = vrot.slane %v5512_v18, 2  ;;  %v19791_v28 = vmax.f32 %v15593_v27, 0.0  ;;  %v6310_v15 = vmul.f32 %v15623_v9, %v5488_v7  ;;  %v19792_v11 = vld [vmem:[#allocation10_spill] sm:$0xff] }
 0x31e   : > { %v3341_v12 = vmul.f32 %v19789_v49, %v18998_v22  ;;  %v5002_v23 = vsub.f32 %v19790_v26, %v15706_v39  ;;  %v4908_v40 = vmul.f32 %v19792_v11, %v4314_v14  ;;  %v15732_v42 = vadd.f32 1e-31, %v6313_v24 }
 0x31f   : > { %v5003_v4 = vsub.f32 %v19791_v28, %v15706_v39  ;;  %v5514_v47 = vadd.f32 %v5513_v45, %v5512_v18  ;;  %v19794_v63 = vunpack.i.l.bf16 %v19759_v38  ;;  %v19795_v56 = vunpack.i.h.bf16 %v19759_v38 }
 0x320   : > { %v4329_v49 = vadd.f32 %v3342_v19, %v3341_v12  ;;  %19793 = vst [vmem:[#allocation127_spill] sm:$0xff] %v15732_v42  ;;  %v18999_v27 = vmax.f32 %v15698_v36, 0.0  ;;  %v15739_v28 = vadd.f32 1e-31, %v6312_v46  ;;  %v5522_v22 = vrot.slane %v5521_v53, 1  ;;  %v19800_v12 = vld [vmem:[#allocation84_spill] sm:$0xff] }
 0x321   : > { %v5130_v17 = vmul.f32 %v19794_v63, %v5002_v23  ;;  %v5131_v26 = vmul.f32 %v19795_v56, %v5003_v4  ;;  %v19797_v5 = vmax.f32 %v15585_v43, 0.0  ;;  %v19798_v7 = vmax.f32 %v15607_v31, 0.0 }
 0x322   : > { %19796 = vst [vmem:[#allocation105_spill] sm:$0xff] %v15739_v28  ;;  %v6900_v19 = vpack.c.bf16 %v4908_v40, %v4908_v40  ;;  %v19799_v45 = vmax.f32 %v15702_v16, 0.0  ;;  %v19801_v23 = vunpack.i.h.bf16 %v19800_v12  ;;  %v5515_v4 = vrot.slane %v5514_v47, 1 }
 0x323   : > { %v5000_v9 = vsub.f32 %v19797_v5, %v4908_v40  ;;  %v5001_v18 = vsub.f32 %v19798_v7, %v4908_v40  ;;  %v5258_v14 = vmul.f32 %v5130_v17, %v5130_v17  ;;  %v5259_v24 = vmul.f32 %v5131_v26, %v5131_v26 }
 0x324   : > { %v3340_v38 = vmul.f32 %v19801_v23, %v19799_v45  ;;  %v19802_v11 = vunpack.i.l.bf16 %v19765_v59  ;;  %v19803_v63 = vunpack.i.h.bf16 %v19765_v59  ;;  %v4330_v43 = vrot.slane %v4329_v49, 4 }
 0x325   : > { %12001 = vrsqrt.f32 %v15732_v42  ;;  %v5531_v31 = vadd.f32 %v5259_v24, %v5258_v14  ;;  %v7438_v5 = vunpack.c.l.b16 %v6900_v19  ;;  %v19804_v40 = vunpack.i.l.bf16 %v19800_v12 }
 0x326   : > { %v5128_v46 = vmul.f32 %v19802_v11, %v5000_v9  ;;  %v5129_v56 = vmul.f32 %v19803_v63, %v5001_v18  ;;  %12003 = vrsqrt.f32 %v15739_v28  ;;  %v4331_v45 = vadd.f32 %v4330_v43, %v4329_v49 }
 0x327   : > { %v3339_v17 = vmul.f32 %v19804_v40, %v18999_v27  ;;  %v5523_v23 = vadd.f32 %v5522_v22, %v5521_v53  ;;  %v5532_v9 = vrot.slane %v5531_v31, 4  ;;  %v15760_v59 = vsel %vm7168_vm5, %v7438_v5, %v7497_v48 }
 0x328   : > { %v5256_v26 = vmul.f32 %v5128_v46, %v5128_v46  ;;  %v5257_v7 = vmul.f32 %v5129_v56, %v5129_v56  ;;  %19805 = vst [vmem:[#allocation53_spill] sm:$0xff] %v15760_v59  ;;  %v15763_v11 = vadd.f32 1e-31, %v15687_v2  ;;  %v5516_v14 = vadd.f32 %v5515_v4, %v5514_v47 }
 0x329   : > { %v4322_v18 = vadd.f32 %v3340_v38, %v3339_v17  ;;  %v4332_v19 = vrot.slane %v4331_v45, 2  ;;  %v15767_v63 = vmul.f32 %v15559_v58, %v15489_v10  ;;  %12005 = vrsqrt.f32 %v15554_v0 }
 0x32a   : > { %19806 = vst [vmem:[#allocation45_spill] sm:$0xff] %v15763_v11  ;;  %v5524_v24 = vadd.f32 %v5257_v7, %v5256_v26  ;;  %v5533_v46 = vadd.f32 %v5532_v9, %v5531_v31  ;;  %12007 = vrsqrt.f32 %v15682_v44  ;;  %v15771_v22 = vadd.f32 1e-31, %v6311_v35  ;;  %v19814_v35 = vld [vmem:[#allocation119_spill] sm:$0xff]  ;;  %v15806_v9 = vpop.f32.mrb[79].mxu1 }
 0x32b   : > { %19807 = vst [vmem:[#allocation67_spill] sm:$0xff] %v15767_v63  ;;  %v4323_v49 = vrot.slane %v4322_v18, 4  ;;  %v19809_v48 = vpack.c.bf16 %v15450_v61, %v15450_v61  ;;  %v4333_v53 = vadd.f32 %v4332_v19, %v4331_v45  ;;  %v15778_v47 = vadd.f32 1e-31, %v6310_v15  ;;  %v19818_v19 = vld [vmem:[#allocation79_spill] sm:$0xff] }
 0x32c   : > { %19808 = vst [vmem:[#allocation89_spill] sm:$0xff] %v15771_v22  ;;  %v6315_v38 = vmul.f32 %v15025_v33, %v5523_v23  ;;  %v5525_v58 = vrot.slane %v5524_v24, 4  ;;  %12009 = vrsqrt.f32 %v15763_v11  ;;  %v19812_v56 = vpack.c.bf16 %v15476_v60, %v15476_v60 }
 0x32d   : > { %v15776_v2 = vunpack.c.l.b16 %v19809_v48  ;;  %19811 = vst [vmem:[#allocation132_spill] sm:$0xff] %v15778_v47  ;;  %v4324_v4 = vadd.f32 %v4323_v49, %v4322_v18  ;;  %v6314_v31 = vmul.f32 %v19814_v35, %v5516_v14  ;;  %v4334_v5 = vrot.slane %v4333_v53, 1 }
 0x32e   : > { %v15785_v43 = vunpack.c.l.b16 %v19812_v56  ;;  %v5534_v61 = vrot.slane %v5533_v46, 2  ;;  %v15790_v15 = vadd.f32 %v15098_v13, %v14233_v54  ;;  %v15794_v33 = vadd.f32 %v15103_v6, %v14233_v54 }
 0x32f   : > { %19810 = vst [vmem:[#allocation55_spill] sm:$0xff] %v15776_v2  ;;  %v4325_v40 = vrot.slane %v4324_v4, 2  ;;  %v15798_v17 = vmul.f32 %v15601_v30, %v15530_v41  ;;  %12011 = vrsqrt.f32 %v15771_v22  ;;  %v6901_v60 = vpack.c.bf16 %v15706_v39, %v15706_v39  ;;  %v12002_v7 = vpop.eup %12001  ;;  %v19837_v2 = vld [vmem:[#allocation131_spill] sm:$0xff] }
 0x330   : > { %19813 = vst [vmem:[#allocation134_spill] sm:$0xff] %v15785_v43  ;;  %v4335_v26 = vadd.f32 %v4334_v5, %v4333_v53  ;;  %12013 = vrsqrt.f32 %v15778_v47  ;;  %v15804_v45 = vadd.f32 1e-31, %v6315_v38  ;;  %v5526_v13 = vadd.f32 %v5525_v58, %v5524_v24  ;;  %v12004_v6 = vpop.eup %12003  ;;  %v19850_v47 = vld [vmem:[#allocation99_spill] sm:$0xff] }
 0x331   : > { %19815 = vst [vmem:[#allocation74_spill] sm:$0xff] %v15798_v17  ;;  %v4326_v23 = vadd.f32 %v4325_v40, %v4324_v4  ;;  %v15810_v14 = vadd.f32 1e-31, %v6314_v31  ;;  %v5535_v39 = vadd.f32 %v5534_v61, %v5533_v46  ;;  %v19000_v53 = vmax.f32 %v15790_v15, 0.0 }
 0x332   : > { %19816 = vst [vmem:[#allocation122_spill] sm:$0xff] %v15804_v45  ;;  %v15813_v49 = vmul.f32 %v19818_v19, %v4335_v26  ;;  %v15818_v24 = vmul.f32 %v12002_v7, %v15732_v42  ;;  %v15820_v58 = vunpack.c.l.b16 %v6901_v60  ;;  %v19821_v4 = vmax.f32 %v15674_v1, 0.0  ;;  %v19828_v19 = vld [vmem:[#allocation113_spill] sm:$0xff] }
 0x333   : > { %19817 = vst [vmem:[#allocation8_spill] sm:$0xff] %v15810_v14  ;;  %v4327_v48 = vrot.slane %v4326_v23, 1  ;;  %v19822_v35 = vmax.f32 %v15692_v3, 0.0  ;;  %v15828_v5 = vpop.eup %12005  ;;  %v15831_v46 = vmul.f32 %v12004_v6, %v15739_v28  ;;  %12015 = vrsqrt.f32 %v15804_v45  ;;  %v19830_v6 = vld [vmem:[#allocation52_spill] sm:$0xff] }
 0x334   : > { %19819 = vst [vmem:[#allocation2_spill] sm:$0xff] %v15818_v24  ;;  %19820 = vst [vmem:[#allocation68_spill] sm:$0xff] %v15820_v58  ;;  %v5006_v56 = vsub.f32 %v19821_v4, %v15813_v49  ;;  %v5527_v61 = vrot.slane %v5526_v13, 2  ;;  %v15834_v26 = vpop.eup %12007  ;;  %12017 = vrsqrt.f32 %v15810_v14  ;;  %v19826_v1 = vunpack.i.l.bf16 %v19786_v8  ;;  %v19829_v4 = vld [vmem:[#allocation120_spill] sm:$0xff] }
 0x335   : > { %v5007_v31 = vsub.f32 %v19822_v35, %v15813_v49  ;;  %19823 = vst [vmem:[#allocation114_spill] sm:$0xff] %v15828_v5  ;;  %19824 = vst [vmem:[#allocation108_spill] sm:$0xff] %v15831_v46  ;;  %v4328_v40 = vadd.f32 %v4327_v48, %v4326_v23  ;;  %v19827_v7 = vunpack.i.h.bf16 %v19786_v8  ;;  %v6417_v35 = vmul.f32 %v19829_v4, %v19828_v19  ;;  %v19831_v23 = vld [vmem:[#allocation50_spill] sm:$0xff]  ;;  %v19836_v4 = vld [vmem:[#allocation121_spill] sm:$0xff] }
 0x336   : > { %19825 = vst [vmem:[#allocation11_spill] sm:$0xff] %v15834_v26  ;;  %v5134_v60 = vmul.f32 %v19826_v1, %v5006_v56  ;;  %v5536_v18 = vrot.slane %v5535_v39, 1  ;;  %v19832_v48 = vunpack.i.l.bf16 %v19831_v23  ;;  %vm6418_vm6 = vcmp.eq.f32.partialorder %v19828_v19, inf  ;;  %v15853_v27 = vpop.eup %12009  ;;  %v19835_v1 = vld [vmem:[#allocation24_spill] sm:$0xff] }
 0x337   : > { %v5135_v3 = vmul.f32 %v19827_v7, %v5007_v31  ;;  %v15844_v30 = vmul.f32 %v19830_v6, %v4328_v40  ;;  %19833 = vst [vmem:[#allocation86_spill] sm:$0xff] %v15853_v27  ;;  %v19834_v31 = vld [vmem:[#allocation112_spill] sm:$0xff]  ;;  %v6431_v58 = vmul.f32 %v19837_v2, %v19836_v4  ;;  %v15859_v40 = vpop.f32.mrb[80].mxu1  ;;  %v5528_v6 = vadd.f32 %v5527_v61, %v5526_v13 }
 0x338   : > { %v15850_v38 = vmul.f32 %v19832_v48, %v19000_v53  ;;  %v5262_v56 = vmul.f32 %v5134_v60, %v5134_v60  ;;  %v6424_v7 = vmul.f32 %v19835_v1, %v19834_v31  ;;  %v19838_v59 = vmax.f32 %v15698_v36, 0.0  ;;  %v15868_v60 = vpop.f32.mrb[81].mxu1  ;;  %v19866_v28 = vld [vmem:[#allocation4_spill] sm:$0xff] }
 0x339   : > { %v5263_v8 = vmul.f32 %v5135_v3, %v5135_v3  ;;  %v19839_v53 = vmax.f32 %v15702_v16, 0.0  ;;  %vm6420_vm7 = vcmp.eq.f32.partialorder %v19828_v19, 0.0  ;;  %v15870_v3 = vpop.eup %12011  ;;  %v6419_v2 = vsel %vm6418_vm6, %v19828_v19, %v6417_v35  ;;  %v15875_v13 = vpop.f32.mrb[82].mxu1 }
 0x33a   : > { %v5004_v48 = vsub.f32 %v19838_v59, %v15844_v30  ;;  %19840 = vst [vmem:[#allocation25_spill] sm:$0xff] %v15870_v3  ;;  %v6421_v62 = vand.u32 2147483648, %v19828_v19  ;;  %vm6425_vm8 = vcmp.eq.f32.partialorder %v19834_v31, inf  ;;  %v15877_v36 = vpop.eup %12013  ;;  %v5537_v59 = vadd.f32 %v5536_v18, %v5535_v39 }
 0x33b   : > { %v5005_v43 = vsub.f32 %v19839_v53, %v15844_v30  ;;  %v5545_v1 = vadd.f32 %v5263_v8, %v5262_v56  ;;  %19841 = vst [vmem:[#allocation10_spill] sm:$0xff] %v15877_v36  ;;  %v19842_v16 = vunpack.i.l.bf16 %v19800_v12  ;;  %v19843_v61 = vunpack.i.h.bf16 %v19800_v12 }
 0x33c   : > { %vm6432_vm9 = vcmp.eq.f32.partialorder %v19836_v4, inf  ;;  %v6426_v56 = vsel %vm6425_vm8, %v19834_v31, %v6424_v7  ;;  %vm6427_vm10 = vcmp.eq.f32.partialorder %v19834_v31, 0.0  ;;  %v6428_v35 = vand.u32 2147483648, %v19834_v31 }
 0x33d   : > { %v5132_v53 = vmul.f32 %v19842_v16, %v5004_v48  ;;  %v5133_v45 = vmul.f32 %v19843_v61, %v5005_v43  ;;  %v6433_v8 = vsel %vm6432_vm9, %v19836_v4, %v6431_v58  ;;  %v5529_v24 = vrot.slane %v5528_v6, 1  ;;  %v19844_v43 = vld [vmem:[#allocation85_spill] sm:$0xff]  ;;  %v15894_v7 = vpop.eup %12015  ;;  %v19848_v58 = vld [vmem:[#allocation80_spill] sm:$0xff] }
 0x33e   : > { %v6435_v18 = vand.u32 2147483648, %v19836_v4  ;;  %v5546_v39 = vrot.slane %v5545_v1, 4  ;;  %v6903_v12 = vpack.c.bf16 %v15813_v49, %v15813_v49  ;;  %v19845_v48 = vld [vmem:[#allocation129_spill] sm:$0xff]  ;;  %19847 = vst [vmem:[#allocation84_spill] sm:$0xff] %v15894_v7  ;;  %v6317_v22 = vmul.f32 %v15304_v21, %v5537_v59  ;;  %v12018_v26 = vpop.eup %12017  ;;  %v19852_v49 = vld [vmem:[#allocation47_spill] sm:$0xff] }
 0x33f   : > { %v5260_v46 = vmul.f32 %v5132_v53, %v5132_v53  ;;  %v5261_v3 = vmul.f32 %v5133_v45, %v5133_v45  ;;  %v6438_v16 = vmul.f32 %v19845_v48, %v19844_v43  ;;  %v19846_v61 = vld [vmem:[#allocation9_spill] sm:$0xff]  ;;  %v19849_v53 = vld [vmem:[#allocation6_spill] sm:$0xff]  ;;  %v19851_v44 = vmax.f32 %v15794_v33, 0.0 }
 0x340   : > { %12019 = vrsqrt.f32 %v19846_v61  ;;  %v6445_v45 = vmul.f32 %v19849_v53, %v19848_v58  ;;  %v19853_v42 = vunpack.i.l.bf16 %v19852_v49  ;;  %v15910_v48 = vsel %vm6420_vm7, %v6421_v62, %v6419_v2  ;;  %v11546_v62 = vld [vmem:[%s18725_s7 + $0xa0] sm:$0xff]  }
 0x341   : > { %v15897_v36 = vadd.f32 %v5261_v3, %v5260_v46  ;;  %12021 = vrsqrt.f32 %v19850_v47  ;;  %v15914_v21 = vsel %vm6427_vm10, %v6428_v35, %v6426_v56  ;;  %vm6434_vm11 = vcmp.eq.f32.partialorder %v19836_v4, 0.0  ;;  %v15917_v46 = vpop.f32.mrb[83].mxu1  ;;  %10876 = vmatprep.subr.bf16.mxu0 %v11546_v62 }
 0x342   : > { %v15906_v27 = vmul.f32 %v19853_v42, %v19851_v44  ;;  %v15919_v3 = vadd.f32 %v5529_v24, %v5528_v6  ;;  %v15921_v59 = vsel %vm6434_vm11, %v6435_v18, %v6433_v8  ;;  %vm6439_vm12 = vcmp.eq.f32.partialorder %v19844_v43, inf  ;;  %v19854_v44 = vld [vmem:[#allocation63_spill] sm:$0xff]  ;;  %v15925_v42 = vpop.f32.mrb[84].mxu1  ;;  %v19859_v18 = vld [vmem:[#allocation66_spill] sm:$0xff]  ;;  %10877 = vmatpush3.bf16.msra.mxu0 %v11546_v62 }
 0x343   : > { %12023 = vrsqrt.f32 %v19854_v44  ;;  %v15930_v19 = vadd.f32 %v5546_v39, %v5545_v1  ;;  %v15932_v31 = vunpack.c.l.b16 %v6903_v12  ;;  %v6440_v4 = vsel %vm6439_vm12, %v19844_v43, %v6438_v16  ;;  %v15936_v24 = vpop.f32.mrb[85].mxu1  ;;  %v19860_v12 = vld [vmem:[#allocation12_spill] sm:$0xff]  ;;  %v19861_v16 = vld [vmem:[#allocation110_spill] sm:$0xff] }
 0x344   : > { %vm6446_vm13 = vcmp.eq.f32.partialorder %v19848_v58, inf  ;;  %v15939_v6 = vmul.f32 %v12018_v26, %v15810_v14  ;;  %v15941_v2 = vadd.f32 1e-31, %v6317_v22  ;;  %v6442_v56 = vand.u32 2147483648, %v19844_v43  ;;  %v15945_v1 = vpop.f32.mrb[86].mxu1 }
 0x345   : > { %19855 = vst [vmem:[#allocation119_spill] sm:$0xff] %v15932_v31  ;;  %v6447_v35 = vsel %vm6446_vm13, %v19848_v58, %v6445_v45  ;;  %19858 = vst [vmem:[#allocation120_spill] sm:$0xff] %v15945_v1  ;;  %vm6441_vm14 = vcmp.eq.f32.partialorder %v19844_v43, 0.0  ;;  %v6449_v8 = vand.u32 2147483648, %v19848_v58  ;;  %v6473_v39 = vmul.f32 %v19859_v18, %v15140_v32 }
 0x346   : > { %19856 = vst [vmem:[#allocation79_spill] sm:$0xff] %v15939_v6  ;;  %19857 = vst [vmem:[#allocation113_spill] sm:$0xff] %v15941_v2  ;;  %v6480_v26 = vmul.f32 %v19861_v16, %v19860_v12  ;;  %v15953_v22 = vsel %vm6441_vm14, %v6442_v56, %v6440_v4  ;;  %vm6448_vm15 = vcmp.eq.f32.partialorder %v19848_v58, 0.0  ;;  %vm6453_vm1 = vcmp.eq.f32.partialorder %v19846_v61, inf }
 0x347   : > { %v6456_v53 = vand.u32 2147483648, %v19846_v61  ;;  %v15960_v31 = vsel %vm6448_vm15, %v6449_v8, %v6447_v35  ;;  %vm6460_vm6 = vcmp.eq.f32.partialorder %v19850_v47, inf  ;;  %vm6455_vm7 = vcmp.eq.f32.partialorder %v19846_v61, 0.0  ;;  %v19862_v35 = vld [vmem:[#allocation60_spill] sm:$0xff] }
 0x348   : > { %vm6462_vm8 = vcmp.eq.f32.partialorder %v19850_v47, 0.0  ;;  %v6463_v62 = vand.u32 2147483648, %v19850_v47  ;;  %vm6467_vm9 = vcmp.eq.f32.partialorder %v19854_v44, inf  ;;  %vm6474_vm10 = vcmp.eq.f32.partialorder %v15140_v32, inf }
 0x349   : > { %vm6481_vm11 = vcmp.eq.f32.partialorder %v19860_v12, inf  ;;  %vm6469_vm12 = vcmp.eq.f32.partialorder %v19854_v44, 0.0  ;;  %v6475_v4 = vsel %vm6474_vm10, %v15140_v32, %v6473_v39  ;;  %v6487_v8 = vmul.f32 %v19862_v35, %v15292_v25  ;;  %v19863_v39 = vld [vmem:[#allocation36_spill] sm:$0xff] }
 0x34a   : > { %v12020_v58 = vpop.eup %12019  ;;  %v6482_v56 = vsel %vm6481_vm11, %v19860_v12, %v6480_v26  ;;  %v6470_v45 = vand.u32 2147483648, %v19854_v44  ;;  %v6477_v43 = vand.u32 2147483648, %v15140_v32  ;;  %v6484_v7 = vand.u32 2147483648, %v19860_v12  ;;  %v19864_v26 = vld [vmem:[#allocation117_spill] sm:$0xff] }
 0x34b   : > { %v12022_v18 = vpop.eup %12021  ;;  %v6452_v16 = vmul.f32 %v12020_v58, %v19846_v61  ;;  %vm6476_vm13 = vcmp.eq.f32.partialorder %v15140_v32, 0.0  ;;  %vm6483_vm14 = vcmp.eq.f32.partialorder %v19860_v12, 0.0  ;;  %v6494_v14 = vmul.f32 %v19864_v26, %v19863_v39  ;;  %v19865_v58 = vld [vmem:[#allocation76_spill] sm:$0xff]  ;;  %v15994_v12 = vpop.f32.mrb[87].mxu1 }
 0x34c   : > { %v6459_v6 = vmul.f32 %v12022_v18, %v19850_v47  ;;  %v15983_v35 = vsel %vm6476_vm13, %v6477_v43, %v6475_v4  ;;  %v15985_v17 = vsel %vm6483_vm14, %v6484_v7, %v6482_v56  ;;  %vm6488_vm15 = vcmp.eq.f32.partialorder %v15292_v25, inf  ;;  %19867 = vst [vmem:[#allocation52_spill] sm:$0xff] %v15994_v12  ;;  %v19868_v4 = vld [vmem:[#allocation42_spill] sm:$0xff] }
 0x34d   : > { %v12024_v11 = vpop.eup %12023  ;;  %v6501_v41 = vmul.f32 %v19866_v28, %v19865_v58  ;;  %v6489_v18 = vsel %vm6488_vm15, %v15292_v25, %v6487_v8  ;;  %vm6490_vm10 = vcmp.eq.f32.partialorder %v15292_v25, 0.0  ;;  %v6491_v32 = vand.u32 2147483648, %v15292_v25 }
 0x34e   : > { %v6466_v5 = vmul.f32 %v12024_v11, %v19854_v44  ;;  %v6454_v7 = vsel %vm6453_vm1, %v19846_v61, %v6452_v16  ;;  %v6461_v43 = vsel %vm6460_vm6, %v19850_v47, %v6459_v6  ;;  %vm6495_vm11 = vcmp.eq.f32.partialorder %v19863_v39, inf }
 0x34f   : > { %vm6502_vm13 = vcmp.eq.f32.partialorder %v19865_v58, inf  ;;  %v6496_v25 = vsel %vm6495_vm11, %v19863_v39, %v6494_v14  ;;  %12025 = vrsqrt.f32 %v19868_v4  ;;  %v6492_v56 = vsel %vm6490_vm10, %v6491_v32, %v6489_v18  ;;  %v19869_v14 = vld [vmem:[#allocation82_spill] sm:$0xff] }
 0x350   : > { %v6468_v28 = vsel %vm6467_vm9, %v19854_v44, %v6466_v5  ;;  %v6503_v11 = vsel %vm6502_vm13, %v19865_v58, %v6501_v41  ;;  %vm6497_vm1 = vcmp.eq.f32.partialorder %v19863_v39, 0.0  ;;  %v6498_v8 = vand.u32 2147483648, %v19863_v39  ;;  %v16022_v39 = vpop.f32.mrb[88].mxu1 }
 0x351   : > { %v6505_v6 = vand.u32 2147483648, %v19865_v58  ;;  %v6457_v16 = vsel %vm6455_vm7, %v6456_v53, %v6454_v7  ;;  %v6464_v26 = vsel %vm6462_vm8, %v6463_v62, %v6461_v43  ;;  %vm6504_vm6 = vcmp.eq.f32.partialorder %v19865_v58, 0.0  ;;  %19870 = vst [vmem:[#allocation50_spill] sm:$0xff] %v16022_v39  ;;  %v19871_v53 = vld [vmem:[#allocation58_spill] sm:$0xff]  ;;  %v16030_v58 = vpop.f32.mrb[89].mxu1 }
 0x352   : > { %12027 = vrsqrt.f32 %v19869_v14  ;;  %v6471_v41 = vsel %vm6469_vm12, %v6470_v45, %v6468_v28  ;;  %v6499_v5 = vsel %vm6497_vm1, %v6498_v8, %v6496_v25  ;;  %v6512_v32 = vand.u32 2147483648, %v19868_v4  ;;  %19872 = vst [vmem:[#allocation112_spill] sm:$0xff] %v16030_v58  ;;  %v16041_v28 = vpop.f32.mrb[90].mxu1 }
 0x353   : > { %v6506_v18 = vsel %vm6504_vm6, %v6505_v6, %v6503_v11  ;;  %vm6509_vm9 = vcmp.eq.f32.partialorder %v19868_v4, inf  ;;  %v6519_v61 = vand.u32 2147483648, %v19869_v14  ;;  %12029 = vrsqrt.f32 %v19871_v53  ;;  %19873 = vst [vmem:[#allocation24_spill] sm:$0xff] %v16041_v28 }
 0x354   : > { %v6953_v62 = vpack.c.bf16 %v15910_v48, %v15910_v48  ;;  %vm6511_vm7 = vcmp.eq.f32.partialorder %v19868_v4, 0.0  ;;  %v6954_v44 = vpack.c.bf16 %v15914_v21, %v15914_v21  ;;  %v6955_v45 = vpack.c.bf16 %v15921_v59, %v15921_v59 }
 0x355   : > { %v6956_v7 = vpack.c.bf16 %v15953_v22, %v15953_v22  ;;  %v6957_v43 = vpack.c.bf16 %v15960_v31, %v15960_v31  ;;  %vm6516_vm8 = vcmp.eq.f32.partialorder %v19869_v14, inf  ;;  %v6958_v48 = vpack.c.bf16 %v6457_v16, %v6457_v16 }
 0x356   : > { %v6959_v25 = vpack.c.bf16 %v6464_v26, %v6464_v26  ;;  %v6960_v11 = vpack.c.bf16 %v6471_v41, %v6471_v41  ;;  %v6961_v8 = vpack.c.bf16 %v15983_v35, %v15983_v35  ;;  %vm6518_vm12 = vcmp.eq.f32.partialorder %v19869_v14, 0.0 }
 0x357   : > { %v6962_v21 = vpack.c.bf16 %v15985_v17, %v15985_v17  ;;  %v6963_v59 = vpack.c.bf16 %v6492_v56, %v6492_v56  ;;  %v6964_v22 = vpack.c.bf16 %v6499_v5, %v6499_v5  ;;  %v6965_v6 = vpack.c.bf16 %v6506_v18, %v6506_v18 }
 0x358   : > { %vm6523_vm14 = vcmp.eq.f32.partialorder %v19871_v53, inf  ;;  %v7098_v31 = vunpack.c.l.b16 %v6953_v62  ;;  %v7099_v47 = vunpack.c.l.b16 %v6954_v44  ;;  %v7100_v0 = vunpack.c.l.b16 %v6955_v45 }
 0x359   : > { %v7101_v63 = vunpack.c.l.b16 %v6956_v7  ;;  %vm6525_vm15 = vcmp.eq.f32.partialorder %v19871_v53, 0.0  ;;  %v7102_v16 = vunpack.c.l.b16 %v6957_v43  ;;  %v7103_v26 = vunpack.c.l.b16 %v6958_v48  ;;  %v12026_v10 = vpop.eup %12025 }
 0x35a   : > { %v7104_v41 = vunpack.c.l.b16 %v6959_v25  ;;  %v7105_v35 = vunpack.c.l.b16 %v6960_v11  ;;  %v7106_v58 = vunpack.c.l.b16 %v6961_v8  ;;  %v7107_v28 = vunpack.c.l.b16 %v6962_v21  ;;  %v16069_v8 = vpop.f32.mrb[91].mxu1 }
 0x35b   : > { %v7108_v39 = vunpack.c.l.b16 %v6963_v59  ;;  %v7109_v17 = vunpack.c.l.b16 %v6964_v22  ;;  %v6508_v56 = vmul.f32 %v12026_v10, %v19868_v4  ;;  %v7110_v5 = vunpack.c.l.b16 %v6965_v6  ;;  %19875 = vst [vmem:[#allocation121_spill] sm:$0xff] %v16069_v8 }
 0x35c   : > { %v7163_v18 = vsel %vm7162_vm2, %v7099_v47, %v7098_v31  ;;  %vm19111_vm10 = vcmask 1045509   ;;  %v12028_v62 = vpop.eup %12027  ;;  %vm19104_vm11 = vcmask 1046534   ;;  %vm19101_vm13 = vcmask 1047559   ;;  %v11547_v31 = vld [vmem:[%s18725_s7 + $0xa8] sm:$0xff]  }
 0x35d   : > { %v7165_v44 = vsel %vm7164_vm3, %v7100_v0, %v7163_v18  ;;  %v7176_v45 = vsel %vm7162_vm2, %v7107_v28, %v7106_v58  ;;  %v6510_v7 = vsel %vm6509_vm9, %v19868_v4, %v6508_v56  ;;  %v6515_v43 = vmul.f32 %v12028_v62, %v19869_v14  ;;  %v12030_v25 = vpop.eup %12029  ;;  %v19874_v58 = vld [vmem:[#allocation88_spill] sm:$0xff]  ;;  %v19878_v18 = vld [vmem:[#allocation30_spill] sm:$0xff]  ;;  %10878 = vmatprep.subr.bf16.mxu0 %v11547_v31 }
 0x35e   : > { %v7167_v48 = vsel %vm7166_vm4, %v7101_v63, %v7165_v44  ;;  %v7177_v10 = vsel %vm7164_vm3, %v7108_v39, %v7176_v45  ;;  %v6513_v47 = vsel %vm6511_vm7, %v6512_v32, %v6510_v7  ;;  %v16067_v28 = vadd.f32 %v19874_v58, %v14233_v54  ;;  %v19879_v44 = vld [vmem:[#allocation44_spill] sm:$0xff]  ;;  %10879 = vmatpush3.bf16.msra.mxu0 %v11547_v31 }
 0x35f   : > { %v7169_v0 = vsel %vm7168_vm5, %v7102_v16, %v7167_v48  ;;  %v7178_v11 = vsel %vm7166_vm4, %v7109_v17, %v7177_v10  ;;  %v6517_v63 = vsel %vm6516_vm8, %v19869_v14, %v6515_v43  ;;  %v6522_v39 = vmul.f32 %v12030_v25, %v19871_v53  ;;  %v11548_v58 = vld [vmem:[%s18725_s7 + $0xb0] sm:$0xff]  }
 0x360   : > { %v6966_v21 = vpack.c.bf16 %v6513_v47, %v6513_v47  ;;  %v7171_v4 = vsel %vm19111_vm10, %v7103_v26, %v7169_v0  ;;  %v6520_v32 = vsel %vm6518_vm12, %v6519_v61, %v6517_v63  ;;  %v7179_v22 = vsel %vm7168_vm5, %v7110_v5, %v7178_v11  ;;  %v19881_v0 = vld [vmem:[#allocation75_spill] sm:$0xff]  ;;  %v19884_v31 = vld [vmem:[#allocation16_spill] sm:$0xff]  ;;  %10880 = vmatprep.subr.bf16.mxu0 %v11548_v58 }
 0x361   : > { %v7173_v59 = vsel %vm19104_vm11, %v7104_v41, %v7171_v4  ;;  %v19029_v6 = vmax.f32 %v16067_v28, 0.0  ;;  %v6524_v16 = vsel %vm6523_vm14, %v19871_v53, %v6522_v39  ;;  %v6967_v17 = vpack.c.bf16 %v6520_v32, %v6520_v32  ;;  %v16125_v4 = vpop.f32.mrb[92].mxu1 }
 0x362   : > { %v7111_v56 = vunpack.c.l.b16 %v6966_v21  ;;  %v7175_v26 = vsel %vm19101_vm13, %v7105_v35, %v7173_v59  ;;  %v19876_v14 = vand.u32 2147483648, %v19871_v53  ;;  %v19877_v41 = vunpack.i.h.bf16 %v19831_v23  ;;  %v19880_v53 = vld [vmem:[#allocation125_spill] sm:$0xff]  ;;  %19882 = vst [vmem:[#allocation131_spill] sm:$0xff] %v16125_v4  ;;  %10881 = vmatpush3.bf16.msra.mxu0 %v11548_v58 }
 0x363   : > { %v16098_v62 = vadd.f32 %v19878_v18, %v14233_v54  ;;  %v16102_v45 = vadd.f32 %v19879_v44, %v14233_v54  ;;  %v7112_v7 = vunpack.c.l.b16 %v6967_v17  ;;  %v16107_v48 = vadd.f32 %v19880_v53, %v14233_v54 }
 0x364   : > { %v6527_v61 = vsel %vm6525_vm15, %v19876_v14, %v6524_v16  ;;  %v3346_v5 = vmul.f32 %v19877_v41, %v19029_v6  ;;  %v7180_v43 = vsel %vm19111_vm10, %v7111_v56, %v7179_v22  ;;  %v16114_v11 = vadd.f32 %v19881_v0, %v14233_v54  ;;  %v16136_v14 = vpop.f32.mrb[93].mxu1 }
 0x365   : > { %v6968_v35 = vpack.c.bf16 %v6527_v61, %v6527_v61  ;;  %v19027_v25 = vmax.f32 %v16098_v62, 0.0  ;;  %v19026_v47 = vmax.f32 %v16102_v45, 0.0  ;;  %v7181_v39 = vsel %vm19104_vm11, %v7112_v7, %v7180_v43  ;;  %19886 = vst [vmem:[#allocation85_spill] sm:$0xff] %v16136_v14  ;;  %v19887_v61 = vld [vmem:[#allocation14_spill] sm:$0xff] }
 0x366   : > { %v4343_v10 = vadd.f32 %v3346_v5, %v15850_v38  ;;  %v19024_v21 = vmax.f32 %v16107_v48, 0.0  ;;  %v16123_v38 = vadd.f32 %v15655_v37, %v14233_v54  ;;  %v19883_v59 = vunpack.i.h.bf16 %v19852_v49 }
 0x367   : > { %v7113_v63 = vunpack.c.l.b16 %v6968_v35  ;;  %v19885_v16 = vunpack.i.l.bf16 %v19884_v31  ;;  %v19025_v56 = vmax.f32 %v16114_v11, 0.0  ;;  %v19888_v41 = vunpack.i.l.bf16 %v19887_v61  ;;  %v16148_v35 = vpop.f32.mrb[94].mxu1 }
 0x368   : > { %v4344_v32 = vrot.slane %v4343_v10, 4  ;;  %v3344_v22 = vmul.f32 %v19883_v59, %v19027_v25  ;;  %v19023_v18 = vmax.f32 %v16123_v38, 0.0  ;;  %v16146_v44 = vadd.f32 %v15664_v51, %v14233_v54  ;;  %19889 = vst [vmem:[#allocation129_spill] sm:$0xff] %v16148_v35  ;;  %v11549_v59 = vld [vmem:[%s18725_s7 + $0xb8] sm:$0xff]   ;;  %v16214_v35 = vpop.permute.xlu0 %4837 }
 0x369   : > { %v3349_v17 = vmul.f32 %v19885_v16, %v19026_v47  ;;  %v7182_v37 = vsel %vm19101_vm13, %v7113_v63, %v7181_v39  ;;  %v3347_v5 = vmul.f32 %v19888_v41, %v19024_v21  ;;  %v19890_v0 = vunpack.i.h.bf16 %v19884_v31  ;;  %v16155_v39 = vpop.f32.mrb[95].mxu1  ;;  %10882 = vmatprep.subr.bf16.mxu0 %v11549_v59  ;;  %19904 = vst [vmem:[#allocation99_spill] sm:$0xff] %v16214_v35 }
 0x36a   : > { %v7225_v7 = vpack.c.b16 %v7182_v37, %v7175_v26  ;;  %v4345_v43 = vadd.f32 %v4344_v32, %v4343_v10  ;;  %v4336_v53 = vadd.f32 %v3344_v22, %v15906_v27  ;;  %19891 = vst [vmem:[#allocation9_spill] sm:$0xff] %v16155_v39  ;;  %v19892_v51 = vunpack.i.h.bf16 %v19887_v61  ;;  %10883 = vmatpush3.bf16.msra.mxu0 %v11549_v59 }
 0x36b   : > { %v3350_v63 = vmul.f32 %v19890_v0, %v19025_v56  ;;  %v19028_v26 = vmax.f32 %v16146_v44, 0.0  ;;  %v16167_v27 = vadd.f32 %v15666_v50, %v14233_v54  ;;  %v16171_v10 = vadd.f32 %v15676_v29, %v14233_v54 }
 0x36c   : > { %v3348_v58 = vmul.f32 %v19892_v51, %v19023_v18  ;;  %10884 = vmatprep.mubr.bf16.mxu0 %v7225_v7  ;;  %v4346_v32 = vrot.slane %v4345_v43, 2  ;;  %v4337_v22 = vrot.slane %v4336_v53, 4  ;;  %v16175_v37 = vadd.f32 %v15678_v34, %v14233_v54  ;;  %v19894_v34 = vld [vmem:[#allocation20_spill] sm:$0xff] }
 0x36d   : > { %v4357_v16 = vadd.f32 %v3350_v63, %v3349_v17  ;;  %v19893_v41 = vrot.slane %v15897_v36, 4  ;;  %v19030_v50 = vmax.f32 %v16167_v27, 0.0  ;;  %v19031_v18 = vmax.f32 %v16171_v10, 0.0 }
 0x36e   : > { %v4350_v51 = vadd.f32 %v3348_v58, %v3347_v5  ;;  %v4347_v29 = vadd.f32 %v4346_v32, %v4345_v43  ;;  %v4338_v7 = vadd.f32 %v4337_v22, %v4336_v53  ;;  %v19032_v17 = vmax.f32 %v16175_v37, 0.0  ;;  %v16195_v53 = vpop.f32.mrb[96].mxu1  ;;  %v16197_v32 = vpop.permute.xlu1 %6120 }
 0x36f   : > { %v5540_v0 = vadd.f32 %v19893_v41, %v15897_v36  ;;  %v4358_v21 = vrot.slane %v4357_v16, 4  ;;  %v19895_v56 = vunpack.i.l.bf16 %v19894_v34  ;;  %v19896_v36 = vld [vmem:[#allocation64_spill] sm:$0xff]  ;;  %v19898_v59 = vunpack.i.h.bf16 %v19894_v34  ;;  %19899 = vst [vmem:[#allocation80_spill] sm:$0xff] %v16195_v53  ;;  %v16203_v6 = vpop.f32.mrb[97].mxu1 }
 0x370   : > { %v4351_v63 = vrot.slane %v4350_v51, 4  ;;  %v19897_v5 = vunpack.i.l.bf16 %v19896_v36  ;;  %v4348_v22 = vrot.slane %v4347_v29, 1  ;;  %v4339_v41 = vrot.slane %v4338_v7, 2  ;;  %19901 = vst [vmem:[#allocation6_spill] sm:$0xff] %v16203_v6 }
 0x371   : > { %v3353_v47 = vmul.f32 %v19895_v56, %v19028_v26  ;;  %v3354_v43 = vmul.f32 %v19898_v59, %v19031_v18  ;;  %v4359_v25 = vadd.f32 %v4358_v21, %v4357_v16  ;;  %v19900_v56 = vunpack.i.h.bf16 %v19896_v36 }
 0x372   : > { %v3351_v58 = vmul.f32 %v19897_v5, %v19030_v50  ;;  %v19902_v5 = vld [vmem:[#allocation109_spill] sm:$0xff]  ;;  %v19903_v59 = vrot.slane %v15930_v19, 2  ;;  %v4352_v53 = vadd.f32 %v4351_v63, %v4350_v51  ;;  %v4349_v21 = vadd.f32 %v4348_v22, %v4347_v29 }
 0x373   : > { %v3352_v26 = vmul.f32 %v19900_v56, %v19032_v17  ;;  %v16207_v50 = vmul.f32 %v19902_v5, %v15919_v3  ;;  %v4371_v39 = vadd.f32 %v3354_v43, %v3353_v47  ;;  %v4340_v16 = vadd.f32 %v4339_v41, %v4338_v7  ;;  %v19905_v3 = vld [vmem:[#allocation102_spill] sm:$0xff]  ;;  %v16221_v7 = vpop.permute.xlu1 %4797 }
 0x374   : > { %v16212_v18 = vadd.f32 %v19903_v59, %v15930_v19  ;;  %v4360_v14 = vrot.slane %v4359_v25, 2  ;;  %12031 = vrsqrt.f32 %v15941_v2  ;;  %v5541_v56 = vrot.slane %v5540_v0, 2  ;;  %19906 = vst [vmem:[#allocation47_spill] sm:$0xff] %v16221_v7  ;;  %v19914_v7 = vld [vmem:[#allocation83_spill] sm:$0xff] }
 0x375   : > { %v4364_v4 = vadd.f32 %v3352_v26, %v3351_v58  ;;  %v4353_v17 = vrot.slane %v4352_v53, 2  ;;  %v4372_v6 = vrot.slane %v4371_v39, 4  ;;  %v4913_v5 = vmul.f32 %v19905_v3, %v4349_v21  ;;  %v16227_v3 = vpop.permute.xlu0 %6130 }
 0x376   : > { %v4341_v8 = vrot.slane %v4340_v16, 1  ;;  %v4361_v12 = vadd.f32 %v4360_v14, %v4359_v25  ;;  %v5550_v19 = vrot.slane %v16212_v18, 1  ;;  %v19907_v26 = vmax.f32 %v15790_v15, 0.0  ;;  %v19911_v15 = vld [vmem:[#allocation100_spill] sm:$0xff] }
 0x377   : > { %v4365_v1 = vrot.slane %v4364_v4, 4  ;;  %v4354_v51 = vadd.f32 %v4353_v17, %v4352_v53  ;;  %v4373_v29 = vadd.f32 %v4372_v6, %v4371_v39  ;;  %v19908_v58 = vmax.f32 %v16067_v28, 0.0 }
 0x378   : > { %v5010_v63 = vsub.f32 %v19907_v26, %v4913_v5  ;;  %v6905_v22 = vpack.c.bf16 %v4913_v5, %v4913_v5  ;;  %v4342_v41 = vadd.f32 %v4341_v8, %v4340_v16  ;;  %v4362_v59 = vrot.slane %v4361_v12, 1 }
 0x379   : > { %v5011_v43 = vsub.f32 %v19908_v58, %v4913_v5  ;;  %v4355_v25 = vrot.slane %v4354_v51, 1  ;;  %v4374_v14 = vrot.slane %v4373_v29, 2  ;;  %v4366_v21 = vadd.f32 %v4365_v1, %v4364_v4 }
 0x37a   : > { %v5542_v35 = vadd.f32 %v5541_v56, %v5540_v0  ;;  %v19909_v17 = vunpack.i.l.bf16 %v19831_v23  ;;  %v19910_v39 = vunpack.i.h.bf16 %v19831_v23  ;;  %v4912_v26 = vmul.f32 %v19911_v15, %v4342_v41  ;;  %v19915_v23 = vld [vmem:[#allocation26_spill] sm:$0xff] }
 0x37b   : > { %v7443_v47 = vunpack.c.l.b16 %v6905_v22  ;;  %v4363_v28 = vadd.f32 %v4362_v59, %v4361_v12  ;;  %v4356_v58 = vadd.f32 %v4355_v25, %v4354_v51  ;;  %v4375_v5 = vadd.f32 %v4374_v14, %v4373_v29  ;;  %v16244_v22 = vpop.permute.xlu1 %4872 }
 0x37c   : > { %v5138_v6 = vmul.f32 %v19909_v17, %v5010_v63  ;;  %v5139_v53 = vmul.f32 %v19910_v39, %v5011_v43  ;;  %v19912_v2 = vmax.f32 %v15794_v33, 0.0  ;;  %v19913_v4 = vmax.f32 %v16098_v62, 0.0  ;;  %19916 = vst [vmem:[#allocation63_spill] sm:$0xff] %v16244_v22 }
 0x37d   : > { %v6904_v56 = vpack.c.bf16 %v4912_v26, %v4912_v26  ;;  %v16239_v63 = vmul.f32 %v19914_v7, %v4363_v28  ;;  %v16242_v43 = vmul.f32 %v19915_v23, %v4356_v58  ;;  %v4367_v41 = vrot.slane %v4366_v21, 2 }
 0x37e   : > { %v5266_v8 = vmul.f32 %v5138_v6, %v5138_v6  ;;  %v5267_v16 = vmul.f32 %v5139_v53, %v5139_v53  ;;  %v5008_v1 = vsub.f32 %v19912_v2, %v4912_v26  ;;  %v5009_v0 = vsub.f32 %v19913_v4, %v4912_v26  ;;  %v16250_v62 = vpop.eup %12031  ;;  %v16258_v53 = vpop.permute.xlu0 %6170 }
 0x37f   : > { %v5543_v12 = vrot.slane %v5542_v35, 1  ;;  %v19917_v29 = vunpack.i.l.bf16 %v19852_v49  ;;  %v19918_v33 = vunpack.i.h.bf16 %v19852_v49  ;;  %v7442_v25 = vunpack.c.l.b16 %v6904_v56 }
 0x380   : > { %v5559_v51 = vadd.f32 %v5267_v16, %v5266_v8  ;;  %v19919_v7 = vmax.f32 %v16102_v45, 0.0  ;;  %v19920_v17 = vmax.f32 %v16114_v11, 0.0  ;;  %v4376_v39 = vrot.slane %v4375_v5, 1 }
 0x381   : > { %v5136_v59 = vmul.f32 %v19917_v29, %v5008_v1  ;;  %v5137_v2 = vmul.f32 %v19918_v33, %v5009_v0  ;;  %v19921_v49 = vmax.f32 %v16107_v48, 0.0  ;;  %v16264_v8 = vsel %vm7162_vm2, %v7443_v47, %v7442_v25 }
 0x382   : > { %v5014_v14 = vsub.f32 %v19919_v7, %v16239_v63  ;;  %v5015_v6 = vsub.f32 %v19920_v17, %v16239_v63  ;;  %v5560_v15 = vrot.slane %v5559_v51, 4  ;;  %19922 = vst [vmem:[#allocation66_spill] sm:$0xff] %v16264_v8  ;;  %v19923_v45 = vunpack.i.l.bf16 %v19884_v31  ;;  %v6126_v7 = vpop.permute.xlu1 %6125 }
 0x383   : > { %v5264_v26 = vmul.f32 %v5136_v59, %v5136_v59  ;;  %v5265_v28 = vmul.f32 %v5137_v2, %v5137_v2  ;;  %v5012_v58 = vsub.f32 %v19921_v49, %v16242_v43  ;;  %v19924_v1 = vunpack.i.h.bf16 %v19884_v31 }
 0x384   : > { %v5142_v16 = vmul.f32 %v19923_v45, %v5014_v14  ;;  %v4368_v4 = vadd.f32 %v4367_v41, %v4366_v21  ;;  %v5561_v0 = vadd.f32 %v5560_v15, %v5559_v51  ;;  %v19925_v23 = vmax.f32 %v16123_v38, 0.0 }
 0x385   : > { %v5143_v11 = vmul.f32 %v19924_v1, %v5015_v6  ;;  %v5552_v56 = vadd.f32 %v5265_v28, %v5264_v26  ;;  %v19926_v59 = vunpack.i.l.bf16 %v19887_v61  ;;  %v5551_v33 = vadd.f32 %v5550_v19, %v16212_v18  ;;  %v19928_v6 = vld [vmem:[#allocation118_spill] sm:$0xff]  ;;  %v16285_v18 = vpop.permute.xlu0 %6140 }
 0x386   : > { %v5013_v29 = vsub.f32 %v19925_v23, %v16242_v43  ;;  %v5270_v47 = vmul.f32 %v5142_v16, %v5142_v16  ;;  %v4377_v25 = vadd.f32 %v4376_v39, %v4375_v5  ;;  %v5562_v14 = vrot.slane %v5561_v0, 2 }
 0x387   : > { %v5140_v48 = vmul.f32 %v19926_v59, %v5012_v58  ;;  %v5271_v2 = vmul.f32 %v5143_v11, %v5143_v11  ;;  %v5553_v17 = vrot.slane %v5552_v56, 4  ;;  %v19927_v31 = vunpack.i.h.bf16 %v19887_v61  ;;  %v16305_v59 = vpop.permute.xlu1 %4877 }
 0x388   : > { %v16279_v15 = vmul.f32 %v19928_v6, %v4377_v25  ;;  %v4369_v38 = vrot.slane %v4368_v4, 1  ;;  %v16283_v26 = vadd.f32 %v15728_v55, %v14233_v54  ;;  %v5544_v19 = vadd.f32 %v5543_v12, %v5542_v35  ;;  %19933 = vst [vmem:[#allocation12_spill] sm:$0xff] %v16305_v59 }
 0x389   : > { %v5141_v21 = vmul.f32 %v19927_v31, %v5013_v29  ;;  %v5268_v41 = vmul.f32 %v5140_v48, %v5140_v48  ;;  %v5573_v51 = vadd.f32 %v5271_v2, %v5270_v47  ;;  %v5563_v5 = vadd.f32 %v5562_v14, %v5561_v0  ;;  %v19934_v47 = vld [vmem:[#allocation71_spill] sm:$0xff]  ;;  %v16310_v2 = vpop.f32.mrb[98].mxu1 }
 0x38a   : > { %v16289_v28 = vadd.f32 %v15712_v57, %v14233_v54  ;;  %v5554_v61 = vadd.f32 %v5553_v17, %v5552_v56  ;;  %v19929_v58 = vmax.f32 %v16146_v44, 0.0  ;;  %v19930_v16 = vmax.f32 %v16171_v10, 0.0  ;;  %v16312_v17 = vpop.permute.xlu0 %6210 }
 0x38b   : > { %v5269_v39 = vmul.f32 %v5141_v21, %v5141_v21  ;;  %v5574_v49 = vrot.slane %v5573_v51, 4  ;;  %v16298_v1 = vadd.f32 1e-31, %v16207_v50  ;;  %v6319_v35 = vmul.f32 %v6126_v7, %v5551_v33  ;;  %19935 = vst [vmem:[#allocation110_spill] sm:$0xff] %v16312_v17 }
 0x38c   : > { %v5018_v45 = vsub.f32 %v19929_v58, %v16279_v15  ;;  %v5019_v55 = vsub.f32 %v19930_v16, %v16279_v15  ;;  %v4370_v11 = vadd.f32 %v4369_v38, %v4368_v4  ;;  %v5564_v0 = vrot.slane %v5563_v5, 1 }
 0x38d   : > { %v5566_v12 = vadd.f32 %v5269_v39, %v5268_v41  ;;  %v19931_v57 = vunpack.i.l.bf16 %v19894_v34  ;;  %v19932_v56 = vunpack.i.h.bf16 %v19894_v34  ;;  %v19040_v44 = vmax.f32 %v16283_v26, 0.0 }
 0x38e   : > { %v6318_v10 = vmul.f32 %v16197_v32, %v5544_v19  ;;  %v5575_v48 = vadd.f32 %v5574_v49, %v5573_v51  ;;  %v4916_v50 = vmul.f32 %v19934_v47, %v4370_v11  ;;  %v19042_v33 = vmax.f32 %v16289_v28, 0.0  ;;  %v19940_v49 = vld [vmem:[#allocation91_spill] sm:$0xff]  ;;  %v16350_v47 = vpop.permute.xlu0 %6250 }
 0x38f   : > { %v5146_v23 = vmul.f32 %v19931_v57, %v5018_v45  ;;  %v5147_v29 = vmul.f32 %v19932_v56, %v5019_v55  ;;  %v5555_v4 = vrot.slane %v5554_v61, 2  ;;  %v5567_v25 = vrot.slane %v5566_v12, 4  ;;  %v6136_v57 = vpop.permute.xlu1 %6135  ;;  %19945 = vst [vmem:[#allocation36_spill] sm:$0xff] %v16350_v47 }
 0x390   : > { %v16314_v34 = vadd.f32 1e-31, %v6319_v35  ;;  %v19936_v31 = vpack.c.bf16 %v15844_v30, %v15844_v30  ;;  %v19938_v32 = vmax.f32 %v16167_v27, 0.0  ;;  %v16325_v51 = vadd.f32 %v15719_v20, %v14233_v54 }
 0x391   : > { %v5274_v7 = vmul.f32 %v5146_v23, %v5146_v23  ;;  %v5275_v14 = vmul.f32 %v5147_v29, %v5147_v29  ;;  %v5565_v6 = vadd.f32 %v5564_v0, %v5563_v5  ;;  %v19939_v19 = vmax.f32 %v16175_v37, 0.0 }
 0x392   : > { %v16319_v21 = vunpack.c.l.b16 %v19936_v31  ;;  %v5016_v41 = vsub.f32 %v19938_v32, %v4916_v50  ;;  %v19941_v58 = vunpack.i.h.bf16 %v19940_v49  ;;  %12033 = vrsqrt.f32 %v16298_v1 }
 0x393   : > { %v5587_v38 = vadd.f32 %v5275_v14, %v5274_v7  ;;  %v5017_v39 = vsub.f32 %v19939_v19, %v4916_v50  ;;  %v16334_v30 = vadd.f32 1e-31, %v6318_v10  ;;  %v5576_v27 = vrot.slane %v5575_v48, 2 }
 0x394   : > { %19937 = vst [vmem:[#allocation60_spill] sm:$0xff] %v16319_v21  ;;  %v3358_v45 = vmul.f32 %v19941_v58, %v19040_v44  ;;  %v19942_v16 = vunpack.i.l.bf16 %v19896_v36  ;;  %v5556_v20 = vadd.f32 %v5555_v4, %v5554_v61  ;;  %v5568_v35 = vadd.f32 %v5567_v25, %v5566_v12 }
 0x395   : > { %v19943_v5 = vunpack.i.h.bf16 %v19896_v36  ;;  %v19944_v37 = vunpack.i.l.bf16 %v19940_v49  ;;  %12035 = vrsqrt.f32 %v16314_v34  ;;  %v6907_v23 = vpack.c.bf16 %v16239_v63, %v16239_v63 }
 0x396   : > { %v5144_v55 = vmul.f32 %v19942_v16, %v5016_v41  ;;  %v19038_v29 = vmax.f32 %v16325_v51, 0.0  ;;  %v6321_v10 = vmul.f32 %v6136_v57, %v5565_v6  ;;  %v6906_v61 = vpack.c.bf16 %v16242_v43, %v16242_v43  ;;  %v19946_v41 = vld [vmem:[#allocation69_spill] sm:$0xff] }
 0x397   : > { %v5145_v11 = vmul.f32 %v19943_v5, %v5017_v39  ;;  %v3357_v0 = vmul.f32 %v19944_v37, %v19042_v33  ;;  %12037 = vrsqrt.f32 %v16334_v30  ;;  %v5577_v4 = vadd.f32 %v5576_v27, %v5575_v48 }
 0x398   : > { %v5272_v56 = vmul.f32 %v5144_v55, %v5144_v55  ;;  %v6909_v25 = vpack.c.bf16 %v16279_v15, %v16279_v15  ;;  %v16357_v63 = vadd.f32 %v15806_v9, %v14233_v54  ;;  %v5557_v7 = vrot.slane %v5556_v20, 1 }
 0x399   : > { %v5273_v36 = vmul.f32 %v5145_v11, %v5145_v11  ;;  %v4385_v12 = vadd.f32 %v3358_v45, %v3357_v0  ;;  %v5569_v14 = vrot.slane %v5568_v35, 2  ;;  %v6908_v43 = vpack.c.bf16 %v4916_v50, %v4916_v50 }
 0x39a   : > { %v19947_v6 = vunpack.i.l.bf16 %v19946_v41  ;;  %v19037_v48 = vmax.f32 %v16357_v63, 0.0  ;;  %v16368_v15 = vadd.f32 %v15859_v40, %v14233_v54  ;;  %v16370_v39 = vadd.f32 1e-31, %v6321_v10 }
 0x39b   : > { %v16359_v31 = vadd.f32 %v5273_v36, %v5272_v56  ;;  %v4386_v32 = vrot.slane %v4385_v12, 4  ;;  %v16372_v9 = vunpack.c.l.b16 %v6907_v23  ;;  %v16374_v58 = vunpack.c.l.b16 %v6906_v61  ;;  %v6146_v23 = vpop.permute.xlu0 %6145 }
 0x39c   : > { %v3355_v19 = vmul.f32 %v19947_v6, %v19038_v29  ;;  %19948 = vst [vmem:[#allocation117_spill] sm:$0xff] %v16370_v39  ;;  %v5578_v27 = vrot.slane %v5577_v4, 1  ;;  %v5588_v50 = vrot.slane %v5587_v38, 4  ;;  %v19951_v16 = vunpack.i.h.bf16 %v19946_v41  ;;  %v16386_v57 = vpop.eup %12033 }
 0x39d   : > { %19949 = vst [vmem:[#allocation76_spill] sm:$0xff] %v16372_v9  ;;  %19950 = vst [vmem:[#allocation4_spill] sm:$0xff] %v16374_v58  ;;  %v4387_v45 = vadd.f32 %v4386_v32, %v4385_v12  ;;  %v16382_v5 = vadd.f32 %v15868_v60, %v14233_v54  ;;  %v5558_v40 = vadd.f32 %v5557_v7, %v5556_v20  ;;  %v16384_v37 = vunpack.c.l.b16 %v6909_v25 }
 0x39e   : > { %v3356_v55 = vmul.f32 %v19951_v16, %v19037_v48  ;;  %v5570_v11 = vadd.f32 %v5569_v14, %v5568_v35  ;;  %v16388_v56 = vunpack.c.l.b16 %v6908_v43  ;;  %v19035_v61 = vmax.f32 %v16368_v15, 0.0 }
 0x39f   : > { %19952 = vst [vmem:[#allocation42_spill] sm:$0xff] %v16384_v37  ;;  %v4388_v0 = vrot.slane %v4387_v45, 2  ;;  %v16393_v36 = vadd.f32 %v15875_v13, %v14233_v54  ;;  %12039 = vrsqrt.f32 %v16370_v39  ;;  %v19039_v20 = vmax.f32 %v16382_v5, 0.0  ;;  %v16401_v12 = vpop.eup %12035 }
 0x3a0   : > { %19953 = vst [vmem:[#allocation82_spill] sm:$0xff] %v16388_v56  ;;  %v4378_v10 = vadd.f32 %v3356_v55, %v3355_v19  ;;  %v16399_v35 = vadd.f32 %v15917_v46, %v14233_v54  ;;  %v5579_v25 = vadd.f32 %v5578_v27, %v5577_v4  ;;  %v5589_v7 = vadd.f32 %v5588_v50, %v5587_v38  ;;  %v19954_v46 = vld [vmem:[#allocation51_spill] sm:$0xff]  ;;  %v19957_v50 = vld [vmem:[#allocation13_spill] sm:$0xff] }
 0x3a1   : > { %v4389_v60 = vadd.f32 %v4388_v0, %v4387_v45  ;;  %v19036_v32 = vmax.f32 %v16393_v36, 0.0  ;;  %v16405_v43 = vmul.f32 %v16227_v3, %v5558_v40  ;;  %v5571_v13 = vrot.slane %v5570_v11, 1  ;;  %v16408_v45 = vpop.eup %12037 }
 0x3a2   : > { %v4379_v14 = vrot.slane %v4378_v10, 4  ;;  %v19041_v19 = vmax.f32 %v16399_v35, 0.0  ;;  %v19955_v55 = vunpack.i.l.bf16 %v19954_v46  ;;  %v19956_v38 = vunpack.i.h.bf16 %v19954_v46 }
 0x3a3   : > { %v4390_v6 = vrot.slane %v4389_v60, 1  ;;  %v16420_v3 = vadd.f32 %v15925_v42, %v14233_v54  ;;  %v19958_v40 = vunpack.i.l.bf16 %v19957_v50  ;;  %v5590_v42 = vrot.slane %v5589_v7, 2 }
 0x3a4   : > { %v4380_v16 = vadd.f32 %v4379_v14, %v4378_v10  ;;  %v3361_v0 = vmul.f32 %v19955_v55, %v19035_v61  ;;  %v3362_v4 = vmul.f32 %v19956_v38, %v19036_v32  ;;  %v19959_v14 = vunpack.i.h.bf16 %v19957_v50  ;;  %v16434_v38 = vpop.permute.xlu0 %6220 }
 0x3a5   : > { %v4391_v27 = vadd.f32 %v4390_v6, %v4389_v60  ;;  %v3359_v10 = vmul.f32 %v19958_v40, %v19039_v20  ;;  %v16432_v61 = vadd.f32 %v15936_v24, %v14233_v54  ;;  %19960 = vst [vmem:[#allocation58_spill] sm:$0xff] %v16434_v38  ;;  %v6323_v32 = vmul.f32 %v6146_v23, %v5579_v25  ;;  %v19962_v20 = vld [vmem:[#allocation120_spill] sm:$0xff] }
 0x3a6   : > { %v3360_v55 = vmul.f32 %v19959_v14, %v19041_v19  ;;  %v4381_v48 = vrot.slane %v4380_v16, 2  ;;  %v4399_v60 = vadd.f32 %v3362_v4, %v3361_v0  ;;  %v19043_v40 = vmax.f32 %v16420_v3, 0.0 }
 0x3a7   : > { %v16437_v6 = vmul.f32 %v15658_v52, %v4391_v27  ;;  %v16442_v44 = vadd.f32 %v19962_v20, %v14233_v54  ;;  %v5572_v14 = vadd.f32 %v5571_v13, %v5570_v11  ;;  %v5581_v24 = vrot.slane %v16359_v31, 4  ;;  %v19965_v11 = vld [vmem:[#allocation52_spill] sm:$0xff]  ;;  %v19969_v27 = vld [vmem:[#allocation77_spill] sm:$0xff] }
 0x3a8   : > { %v4392_v29 = vadd.f32 %v3360_v55, %v3359_v10  ;;  %v4382_v19 = vadd.f32 %v4381_v48, %v4380_v16  ;;  %v4400_v33 = vrot.slane %v4399_v60, 4  ;;  %v19963_v23 = vmax.f32 %v16289_v28, 0.0 }
 0x3a9   : > { %19961 = vst [vmem:[#allocation88_spill] sm:$0xff] %v16437_v6  ;;  %v19964_v52 = vmax.f32 %v16283_v26, 0.0  ;;  %v16455_v13 = vadd.f32 %v19965_v11, %v14233_v54  ;;  %v16457_v48 = vpop.eup %12039  ;;  %v19967_v28 = vunpack.i.l.bf16 %v19940_v49  ;;  %v19970_v37 = vunpack.i.l.bf16 %v19969_v27 }
 0x3aa   : > { %v5022_v25 = vsub.f32 %v19963_v23, %v16437_v6  ;;  %v4393_v4 = vrot.slane %v4392_v29, 4  ;;  %v4383_v10 = vrot.slane %v4382_v19, 1  ;;  %v4401_v55 = vadd.f32 %v4400_v33, %v4399_v60  ;;  %19966 = vst [vmem:[#allocation30_spill] sm:$0xff] %v16457_v48  ;;  %v16467_v60 = vpop.permute.xlu0 %6150  ;;  %v19988_v48 = vld [vmem:[#allocation27_spill] sm:$0xff] }
 0x3ab   : > { %v5023_v0 = vsub.f32 %v19964_v52, %v16437_v6  ;;  %v19968_v23 = vunpack.i.h.bf16 %v19940_v49  ;;  %v3365_v33 = vmul.f32 %v19970_v37, %v19043_v40  ;;  %v19971_v11 = vmax.f32 %v16442_v44, 0.0 }
 0x3ac   : > { %v5150_v16 = vmul.f32 %v19967_v28, %v5022_v25  ;;  %v4394_v52 = vadd.f32 %v4393_v4, %v4392_v29  ;;  %v4384_v20 = vadd.f32 %v4383_v10, %v4382_v19  ;;  %v4402_v56 = vrot.slane %v4401_v55, 2  ;;  %v19973_v28 = vld [vmem:[#allocation128_spill] sm:$0xff]  ;;  %v19975_v19 = vld [vmem:[#allocation15_spill] sm:$0xff] }
 0x3ad   : > { %v5151_v26 = vmul.f32 %v19968_v23, %v5023_v0  ;;  %v19972_v9 = vunpack.i.h.bf16 %v19969_v27  ;;  %v19045_v25 = vmax.f32 %v16455_v13, 0.0  ;;  %v5582_v49 = vadd.f32 %v5581_v24, %v16359_v31 }
 0x3ae   : > { %v5278_v0 = vmul.f32 %v5150_v16, %v5150_v16  ;;  %v4395_v4 = vrot.slane %v4394_v52, 2  ;;  %v16476_v23 = vmul.f32 %v19973_v28, %v4384_v20  ;;  %v4403_v37 = vadd.f32 %v4402_v56, %v4401_v55 }
 0x3af   : > { %v3366_v58 = vmul.f32 %v19972_v9, %v19971_v11  ;;  %v5279_v29 = vmul.f32 %v5151_v26, %v5151_v26  ;;  %v19976_v10 = vunpack.i.h.bf16 %v19975_v19  ;;  %v16482_v6 = vadd.f32 %v5590_v42, %v5589_v7 }
 0x3b0   : > { %19974 = vst [vmem:[#allocation44_spill] sm:$0xff] %v16476_v23  ;;  %v4396_v11 = vadd.f32 %v4395_v4, %v4394_v52  ;;  %v19977_v21 = vmax.f32 %v16432_v61, 0.0  ;;  %v19978_v31 = vunpack.i.l.bf16 %v19975_v19  ;;  %v6322_v16 = vmul.f32 %v16285_v18, %v5572_v14 }
 0x3b1   : > { %v4413_v40 = vadd.f32 %v3366_v58, %v3365_v33  ;;  %v3364_v8 = vmul.f32 %v19976_v10, %v19045_v25  ;;  %v5601_v9 = vadd.f32 %v5279_v29, %v5278_v0  ;;  %v19979_v56 = vmax.f32 %v16325_v51, 0.0  ;;  %v16495_v0 = vpop.permute.xlu0 %6225 }
 0x3b2   : > { %v3363_v24 = vmul.f32 %v19978_v31, %v19977_v21  ;;  %v19980_v55 = vmax.f32 %v16357_v63, 0.0  ;;  %v4404_v26 = vrot.slane %v4403_v37, 1  ;;  %v5583_v7 = vrot.slane %v5582_v49, 2  ;;  %19981 = vst [vmem:[#allocation125_spill] sm:$0xff] %v16495_v0 }
 0x3b3   : > { %v5020_v58 = vsub.f32 %v19979_v56, %v16476_v23  ;;  %v4397_v42 = vrot.slane %v4396_v11, 1  ;;  %v4414_v33 = vrot.slane %v4413_v40, 4  ;;  %v16498_v29 = vadd.f32 1e-31, %v16405_v43 }
 0x3b4   : > { %v5021_v20 = vsub.f32 %v19980_v55, %v16476_v23  ;;  %v4406_v52 = vadd.f32 %v3364_v8, %v3363_v24  ;;  %v19983_v18 = vunpack.i.l.bf16 %v19946_v41  ;;  %v19984_v51 = vunpack.i.h.bf16 %v19946_v41  ;;  %v19986_v24 = vld [vmem:[#allocation104_spill] sm:$0xff] }
 0x3b5   : > { %19982 = vst [vmem:[#allocation75_spill] sm:$0xff] %v16498_v29  ;;  %v4405_v4 = vadd.f32 %v4404_v26, %v4403_v37  ;;  %v16504_v28 = vadd.f32 1e-31, %v6323_v32  ;;  %v5592_v63 = vrot.slane %v16482_v6, 1  ;;  %v4398_v10 = vadd.f32 %v4397_v42, %v4396_v11 }
 0x3b6   : > { %v5148_v21 = vmul.f32 %v19983_v18, %v5020_v58  ;;  %v5149_v14 = vmul.f32 %v19984_v51, %v5021_v20  ;;  %v4415_v31 = vadd.f32 %v4414_v33, %v4413_v40  ;;  %v4407_v25 = vrot.slane %v4406_v52, 4 }
 0x3b7   : > { %19985 = vst [vmem:[#allocation16_spill] sm:$0xff] %v16504_v28  ;;  %v4921_v55 = vmul.f32 %v19986_v24, %v4405_v4  ;;  %v16508_v43 = vadd.f32 1e-31, %v6322_v16  ;;  %v5584_v22 = vadd.f32 %v5583_v7, %v5582_v49  ;;  %v4920_v58 = vmul.f32 %v19988_v48, %v4398_v10  ;;  %v6156_v49 = vpop.permute.xlu0 %6155 }
 0x3b8   : > { %v5276_v56 = vmul.f32 %v5148_v21, %v5148_v21  ;;  %v5277_v8 = vmul.f32 %v5149_v14, %v5149_v14  ;;  %v4416_v18 = vrot.slane %v4415_v31, 2  ;;  %v19989_v37 = vmax.f32 %v16368_v15, 0.0 }
 0x3b9   : > { %19987 = vst [vmem:[#allocation14_spill] sm:$0xff] %v16508_v43  ;;  %v19990_v20 = vmax.f32 %v16393_v36, 0.0  ;;  %v6913_v11 = vpack.c.bf16 %v4921_v55, %v4921_v55  ;;  %v5602_v40 = vrot.slane %v5601_v9, 4  ;;  %v19991_v42 = vmax.f32 %v16382_v5, 0.0  ;;  %v16523_v36 = vpop.f32.mrb[99].mxu1 }
 0x3ba   : > { %v5594_v41 = vadd.f32 %v5277_v8, %v5276_v56  ;;  %v5026_v32 = vsub.f32 %v19989_v37, %v4921_v55  ;;  %v19992_v21 = vmax.f32 %v16399_v35, 0.0  ;;  %v6912_v51 = vpack.c.bf16 %v4920_v58, %v4920_v58  ;;  %v16533_v37 = vpop.f32.mrb[100].mxu1 }
 0x3bb   : > { %v5027_v26 = vsub.f32 %v19990_v20, %v4921_v55  ;;  %v5024_v33 = vsub.f32 %v19991_v42, %v4920_v58  ;;  %v19993_v48 = vunpack.i.l.bf16 %v19954_v46  ;;  %v19994_v14 = vunpack.i.h.bf16 %v19954_v46  ;;  %v19997_v55 = vld [vmem:[#allocation50_spill] sm:$0xff] }
 0x3bc   : > { %v5025_v16 = vsub.f32 %v19992_v21, %v4920_v58  ;;  %v7451_v4 = vunpack.c.l.b16 %v6913_v11  ;;  %v4408_v10 = vadd.f32 %v4407_v25, %v4406_v52  ;;  %v19995_v56 = vunpack.i.l.bf16 %v19957_v50  ;;  %v16535_v25 = vpop.f32.mrb[101].mxu1 }
 0x3bd   : > { %v5154_v7 = vmul.f32 %v19993_v48, %v5026_v32  ;;  %v5155_v15 = vmul.f32 %v19994_v14, %v5027_v26  ;;  %v19996_v5 = vunpack.i.h.bf16 %v19957_v50  ;;  %v7450_v35 = vunpack.c.l.b16 %v6912_v51  ;;  %v16540_v50 = vpop.f32.mrb[102].mxu1 }
 0x3be   : > { %v5152_v8 = vmul.f32 %v19995_v56, %v5024_v33  ;;  %v16531_v58 = vadd.f32 %v19997_v55, %v14233_v54  ;;  %v5585_v32 = vrot.slane %v5584_v22, 1  ;;  %v4417_v26 = vadd.f32 %v4416_v18, %v4415_v31  ;;  %v19999_v31 = vld [vmem:[#allocation24_spill] sm:$0xff] }
 0x3bf   : > { %v5153_v24 = vmul.f32 %v19996_v5, %v5025_v16  ;;  %v5282_v46 = vmul.f32 %v5154_v7, %v5154_v7  ;;  %v5283_v20 = vmul.f32 %v5155_v15, %v5155_v15  ;;  %v5603_v52 = vadd.f32 %v5602_v40, %v5601_v9  ;;  %v16548_v9 = vpop.permute.xlu0 %6230 }
 0x3c0   : > { %v5280_v11 = vmul.f32 %v5152_v8, %v5152_v8  ;;  %v16538_v33 = vsel %vm7162_vm2, %v7451_v4, %v7450_v35  ;;  %v5595_v21 = vrot.slane %v5594_v41, 4  ;;  %v4418_v51 = vrot.slane %v4417_v26, 1  ;;  %20000 = vst [vmem:[#allocation64_spill] sm:$0xff] %v16548_v9  ;;  %v16553_v35 = vpop.f32.mrb[103].mxu1  ;;  %v20032_v9 = vld [vmem:[#allocation85_spill] sm:$0xff] }
 0x3c1   : > { %v5281_v42 = vmul.f32 %v5153_v24, %v5153_v24  ;;  %19998 = vst [vmem:[#allocation20_spill] sm:$0xff] %v16538_v33  ;;  %v5615_v16 = vadd.f32 %v5283_v20, %v5282_v46  ;;  %v4409_v48 = vrot.slane %v4408_v10, 2  ;;  %12041 = vrsqrt.f32 %v16498_v29  ;;  %v20001_v46 = vld [vmem:[#allocation56_spill] sm:$0xff] }
 0x3c2   : > { %v19046_v7 = vmax.f32 %v16531_v58, 0.0  ;;  %v16546_v18 = vadd.f32 %v19999_v31, %v14233_v54  ;;  %v5593_v40 = vadd.f32 %v5592_v63, %v16482_v6  ;;  %v4419_v4 = vadd.f32 %v4418_v51, %v4417_v26  ;;  %v20002_v63 = vld [vmem:[#allocation70_spill] sm:$0xff] }
 0x3c3   : > { %v5608_v14 = vadd.f32 %v5281_v42, %v5280_v11  ;;  %v5616_v15 = vrot.slane %v5615_v16, 4  ;;  %v4410_v56 = vadd.f32 %v4409_v48, %v4408_v10  ;;  %12043 = vrsqrt.f32 %v16504_v28  ;;  %v16559_v42 = vpop.f32.mrb[104].mxu1 }
 0x3c4   : > { %v5586_v8 = vadd.f32 %v5585_v32, %v5584_v22  ;;  %v5604_v5 = vrot.slane %v5603_v52, 2  ;;  %v19051_v24 = vmax.f32 %v16546_v18, 0.0  ;;  %12045 = vrsqrt.f32 %v16508_v43  ;;  %v20004_v32 = vld [vmem:[#allocation112_spill] sm:$0xff]  ;;  %v16573_v51 = vpop.f32.mrb[105].mxu1 }
 0x3c5   : > { %v5596_v55 = vadd.f32 %v5595_v21, %v5594_v41  ;;  %v16557_v20 = vmul.f32 %v20001_v46, %v4419_v4  ;;  %v4411_v11 = vrot.slane %v4410_v56, 1  ;;  %v5609_v6 = vrot.slane %v5608_v14, 4  ;;  %v16581_v33 = vpop.f32.mrb[106].mxu1 }
 0x3c6   : > { %v20003_v10 = vunpack.i.l.bf16 %v20002_v63  ;;  %v16567_v26 = vadd.f32 %v20004_v32, %v14233_v54  ;;  %v20005_v41 = vunpack.i.h.bf16 %v20002_v63  ;;  %v6325_v48 = vmul.f32 %v6156_v49, %v5593_v40  ;;  %20008 = vst [vmem:[#allocation109_spill] sm:$0xff] %v16581_v33  ;;  %v16583_v32 = vpop.permute.xlu1 %6175  ;;  %v16586_v39 = vpop.f32.mrb[107].mxu1 }
 0x3c7   : > { %v5617_v31 = vadd.f32 %v5616_v15, %v5615_v16  ;;  %v20006_v4 = vmax.f32 %v16420_v3, 0.0  ;;  %v6324_v28 = vmul.f32 %v16467_v60, %v5586_v8  ;;  %v5605_v43 = vadd.f32 %v5604_v5, %v5603_v52  ;;  %20009 = vst [vmem:[#allocation102_spill] sm:$0xff] %v16586_v39  ;;  %v16588_v49 = vpop.permute.xlu0 %6160  ;;  %v20013_v60 = vld [vmem:[#allocation111_spill] sm:$0xff] }
 0x3c8   : > { %v3369_v22 = vmul.f32 %v20003_v10, %v19046_v7  ;;  %v3370_v21 = vmul.f32 %v20005_v41, %v19051_v24  ;;  %v20007_v10 = vmax.f32 %v16442_v44, 0.0  ;;  %v4412_v41 = vadd.f32 %v4411_v11, %v4410_v56 }
 0x3c9   : > { %v5030_v46 = vsub.f32 %v20006_v4, %v16557_v20  ;;  %v5597_v16 = vrot.slane %v5596_v55, 2  ;;  %v20010_v3 = vunpack.i.l.bf16 %v19969_v27  ;;  %v20011_v44 = vunpack.i.h.bf16 %v19969_v27  ;;  %v20012_v4 = vld [vmem:[#allocation121_spill] sm:$0xff] }
 0x3ca   : > { %v5031_v7 = vsub.f32 %v20007_v10, %v16557_v20  ;;  %v4427_v24 = vadd.f32 %v3370_v21, %v3369_v22  ;;  %v16596_v10 = vadd.f32 %v20012_v4, %v14233_v54  ;;  %v5610_v59 = vadd.f32 %v5609_v6, %v5608_v14 }
 0x3cb   : > { %v5158_v40 = vmul.f32 %v20010_v3, %v5030_v46  ;;  %v16599_v52 = vmul.f32 %v20013_v60, %v4412_v41  ;;  %v16602_v5 = vadd.f32 1e-31, %v6325_v48  ;;  %v5618_v11 = vrot.slane %v5617_v31, 2  ;;  %v16604_v46 = vpop.eup %12041 }
 0x3cc   : > { %v5159_v15 = vmul.f32 %v20011_v44, %v5031_v7  ;;  %v4428_v8 = vrot.slane %v4427_v24, 4  ;;  %20015 = vst [vmem:[#allocation83_spill] sm:$0xff] %v16604_v46  ;;  %v16606_v27 = vadd.f32 1e-31, %v6324_v28  ;;  %v5606_v7 = vrot.slane %v5605_v43, 1 }
 0x3cd   : > { %20014 = vst [vmem:[#allocation100_spill] sm:$0xff] %v16602_v5  ;;  %v5286_v22 = vmul.f32 %v5158_v40, %v5158_v40  ;;  %v20017_v3 = vmax.f32 %v16432_v61, 0.0  ;;  %v20018_v6 = vmax.f32 %v16455_v13, 0.0  ;;  %v5598_v44 = vadd.f32 %v5597_v16, %v5596_v55  ;;  %v16615_v40 = vpop.eup %12043  ;;  %v20023_v13 = vld [vmem:[#allocation21_spill] sm:$0xff] }
 0x3ce   : > { %v5287_v21 = vmul.f32 %v5159_v15, %v5159_v15  ;;  %20016 = vst [vmem:[#allocation26_spill] sm:$0xff] %v16606_v27  ;;  %v4429_v48 = vadd.f32 %v4428_v8, %v4427_v24  ;;  %v19057_v60 = vmax.f32 %v16596_v10, 0.0  ;;  %20019 = vst [vmem:[#allocation118_spill] sm:$0xff] %v16615_v40  ;;  %v16617_v15 = vpop.permute.xlu1 %6180  ;;  %v5611_v28 = vrot.slane %v5610_v59, 2  ;;  %v16627_v16 = vpop.eup %12045 }
 0x3cf   : > { %v5028_v14 = vsub.f32 %v20017_v3, %v16599_v52  ;;  %v5029_v41 = vsub.f32 %v20018_v6, %v16599_v52  ;;  %v20020_v56 = vunpack.i.l.bf16 %v19975_v19  ;;  %v20021_v61 = vunpack.i.h.bf16 %v19975_v19  ;;  %20025 = vst [vmem:[#allocation71_spill] sm:$0xff] %v16627_v16  ;;  %v16629_v24 = vpop.permute.xlu0 %6235 }
 0x3d0   : > { %v5629_v4 = vadd.f32 %v5287_v21, %v5286_v22  ;;  %v20022_v46 = vmax.f32 %v16567_v26, 0.0  ;;  %v20024_v6 = vunpack.i.l.bf16 %v20023_v13  ;;  %20026 = vst [vmem:[#allocation91_spill] sm:$0xff] %v16629_v24  ;;  %v5619_v8 = vadd.f32 %v5618_v11, %v5617_v31 }
 0x3d1   : > { %v5156_v5 = vmul.f32 %v20020_v56, %v5028_v14  ;;  %v5157_v3 = vmul.f32 %v20021_v61, %v5029_v41  ;;  %v4430_v21 = vrot.slane %v4429_v48, 2  ;;  %v20027_v40 = vunpack.i.h.bf16 %v20023_v13  ;;  %v16635_v14 = vpop.f32.mrb[108].mxu1 }
 0x3d2   : > { %v3367_v55 = vmul.f32 %v20024_v6, %v20022_v46  ;;  %v5630_v22 = vrot.slane %v5629_v4, 4  ;;  %20028 = vst [vmem:[#allocation69_spill] sm:$0xff] %v16635_v14  ;;  %12047 = vrsqrt.f32 %v16606_v27  ;;  %v20029_v46 = vld [vmem:[#allocation131_spill] sm:$0xff]  ;;  %v16642_v6 = vpop.f32.mrb[109].mxu1  ;;  %v5607_v31 = vadd.f32 %v5606_v7, %v5605_v43  ;;  %v20033_v7 = vld [vmem:[#allocation129_spill] sm:$0xff] }
 0x3d3   : > { %v3368_v56 = vmul.f32 %v20027_v40, %v19057_v60  ;;  %v5284_v19 = vmul.f32 %v5156_v5, %v5156_v5  ;;  %v5285_v41 = vmul.f32 %v5157_v3, %v5157_v3  ;;  %v16640_v61 = vadd.f32 %v20029_v46, %v14233_v54  ;;  %20030 = vst [vmem:[#allocation51_spill] sm:$0xff] %v16642_v6  ;;  %v16644_v24 = vpop.f32.mrb[110].mxu1  ;;  %v20036_v6 = vld [vmem:[#allocation43_spill] sm:$0xff] }
 0x3d4   : > { %v5631_v11 = vadd.f32 %v5630_v22, %v5629_v4  ;;  %v4431_v16 = vadd.f32 %v4430_v21, %v4429_v48  ;;  %20031 = vst [vmem:[#allocation13_spill] sm:$0xff] %v16644_v24  ;;  %v5599_v47 = vrot.slane %v5598_v44, 1  ;;  %v5612_v40 = vadd.f32 %v5611_v28, %v5610_v59  ;;  %v16656_v48 = vpop.permute.xlu1 %6215  ;;  %v6166_v59 = vpop.permute.xlu0 %6165  ;;  %v20035_v22 = vld [vmem:[#allocation9_spill] sm:$0xff] }
 0x3d5   : > { %v4420_v29 = vadd.f32 %v3368_v56, %v3367_v55  ;;  %v5622_v60 = vadd.f32 %v5285_v41, %v5284_v19  ;;  %v16648_v27 = vadd.f32 %v20032_v9, %v14233_v54  ;;  %v5620_v5 = vrot.slane %v5619_v8, 1  ;;  %20034 = vst [vmem:[#allocation120_spill] sm:$0xff] %v16656_v48 }
 0x3d6   : > { %v5632_v3 = vrot.slane %v5631_v11, 2  ;;  %v4432_v38 = vrot.slane %v4431_v16, 1  ;;  %v16654_v4 = vadd.f32 %v20033_v7, %v14233_v54  ;;  %v16660_v21 = vadd.f32 %v20035_v22, %v14233_v54 }
 0x3d7   : > { %v4421_v46 = vrot.slane %v4420_v29, 4  ;;  %v5623_v0 = vrot.slane %v5622_v60, 4  ;;  %v6327_v56 = vmul.f32 %v6166_v59, %v5607_v31  ;;  %v5600_v19 = vadd.f32 %v5599_v47, %v5598_v44 }
 0x3d8   : > { %v5633_v28 = vadd.f32 %v5632_v3, %v5631_v11  ;;  %v4433_v55 = vadd.f32 %v4432_v38, %v4431_v16  ;;  %v19060_v17 = vmax.f32 %v16654_v4, 0.0  ;;  %v5613_v43 = vrot.slane %v5612_v40, 1 }
 0x3d9   : > { %v4422_v9 = vadd.f32 %v4421_v46, %v4420_v29  ;;  %v5624_v41 = vadd.f32 %v5623_v0, %v5622_v60  ;;  %v5621_v24 = vadd.f32 %v5620_v5, %v5619_v8  ;;  %v20037_v38 = vmax.f32 %v16640_v61, 0.0  ;;  %v20038_v29 = vld [vmem:[#allocation96_spill] sm:$0xff] }
 0x3da   : > { %v16664_v14 = vmul.f32 %v20036_v6, %v4433_v55  ;;  %v20039_v16 = vunpack.i.l.bf16 %v20038_v29  ;;  %v20040_v47 = vunpack.i.h.bf16 %v20038_v29  ;;  %v5634_v44 = vrot.slane %v5633_v28, 1  ;;  %v20044_v46 = vld [vmem:[#allocation92_spill] sm:$0xff] }
 0x3db   : > { %v4423_v7 = vrot.slane %v4422_v9, 2  ;;  %v5625_v11 = vrot.slane %v5624_v41, 2  ;;  %v20041_v60 = vmax.f32 %v16531_v58, 0.0  ;;  %v20042_v31 = vmax.f32 %v16546_v18, 0.0 }
 0x3dc   : > { %v3373_v3 = vmul.f32 %v20039_v16, %v20037_v38  ;;  %v3374_v0 = vmul.f32 %v20040_v47, %v19060_v17  ;;  %v20043_v5 = vmax.f32 %v16648_v27, 0.0  ;;  %v20045_v59 = vunpack.i.l.bf16 %v20044_v46  ;;  %v16685_v22 = vpop.eup %12047 }
 0x3dd   : > { %v5034_v6 = vsub.f32 %v20041_v60, %v16664_v14  ;;  %v5035_v8 = vsub.f32 %v20042_v31, %v16664_v14  ;;  %20046 = vst [vmem:[#allocation52_spill] sm:$0xff] %v16685_v22  ;;  %v5626_v38 = vadd.f32 %v5625_v11, %v5624_v41  ;;  %v4424_v16 = vadd.f32 %v4423_v7, %v4422_v9  ;;  %v16691_v60 = vpop.permute.xlu1 %6255 }
 0x3de   : > { %v3371_v55 = vmul.f32 %v20045_v59, %v20043_v5  ;;  %v4441_v48 = vadd.f32 %v3374_v0, %v3373_v3  ;;  %v20047_v47 = vmax.f32 %v16660_v21, 0.0  ;;  %v20048_v17 = vunpack.i.h.bf16 %v20044_v46  ;;  %20049 = vst [vmem:[#allocation77_spill] sm:$0xff] %v16691_v60 }
 0x3df   : > { %v5614_v39 = vadd.f32 %v5613_v43, %v5612_v40  ;;  %v6915_v18 = vpack.c.bf16 %v16557_v20, %v16557_v20  ;;  %v20050_v31 = vunpack.i.l.bf16 %v20002_v63  ;;  %v20051_v5 = vunpack.i.h.bf16 %v20002_v63 }
 0x3e0   : > { %v3372_v58 = vmul.f32 %v20048_v17, %v20047_v47  ;;  %v6326_v9 = vmul.f32 %v16588_v49, %v5600_v19  ;;  %v4425_v41 = vrot.slane %v4424_v16, 1  ;;  %v4442_v7 = vrot.slane %v4441_v48, 4  ;;  %v20053_v19 = vld [vmem:[#allocation35_spill] sm:$0xff] }
 0x3e1   : > { %v5162_v33 = vmul.f32 %v20050_v31, %v5034_v6  ;;  %v5163_v59 = vmul.f32 %v20051_v5, %v5035_v8  ;;  %v6329_v3 = vmul.f32 %v16583_v32, %v5621_v24  ;;  %v5627_v17 = vrot.slane %v5626_v38, 1  ;;  %v20055_v32 = vld [vmem:[#allocation33_spill] sm:$0xff]  ;;  %v20060_v5 = vld [vmem:[#allocation80_spill] sm:$0xff] }
 0x3e2   : > { %v4434_v11 = vadd.f32 %v3372_v58, %v3371_v55  ;;  %v5635_v40 = vadd.f32 %v5634_v44, %v5633_v28  ;;  %v4426_v43 = vadd.f32 %v4425_v41, %v4424_v16  ;;  %v4443_v22 = vadd.f32 %v4442_v7, %v4441_v48  ;;  %v6186_v44 = vpop.permute.xlu1 %6185  ;;  %v20061_v41 = vld [vmem:[#allocation78_spill] sm:$0xff] }
 0x3e3   : > { %v5290_v0 = vmul.f32 %v5162_v33, %v5162_v33  ;;  %v5291_v47 = vmul.f32 %v5163_v59, %v5163_v59  ;;  %v16701_v60 = vadd.f32 1e-31, %v6327_v56  ;;  %v6328_v6 = vmul.f32 %v16258_v53, %v5614_v39 }
 0x3e4   : > { %v4435_v20 = vrot.slane %v4434_v11, 4  ;;  %vm6530_vm1 = vcmp.eq.f32.partialorder %v20053_v19, inf  ;;  %v16707_v8 = vunpack.c.l.b16 %v6915_v18  ;;  %v16710_v24 = vmul.f32 %v20055_v32, %v4426_v43 }
 0x3e5   : > { %20052 = vst [vmem:[#allocation128_spill] sm:$0xff] %v16701_v60  ;;  %v5643_v49 = vadd.f32 %v5291_v47, %v5290_v0  ;;  %v4444_v33 = vrot.slane %v4443_v22, 2  ;;  %v16712_v48 = vadd.f32 1e-31, %v6326_v9  ;;  %v16714_v56 = vadd.f32 1e-31, %v6329_v3 }
 0x3e6   : > { %20054 = vst [vmem:[#allocation15_spill] sm:$0xff] %v16707_v8  ;;  %v4436_v28 = vadd.f32 %v4435_v20, %v4434_v11  ;;  %v5628_v55 = vadd.f32 %v5627_v17, %v5626_v38  ;;  %v6914_v16 = vpack.c.bf16 %v16599_v52, %v16599_v52  ;;  %v6331_v53 = vmul.f32 %v6186_v44, %v5635_v40  ;;  %v16728_v9 = vpop.f32.mrb[111].mxu1  ;;  %v20063_v11 = vld [vmem:[#allocation6_spill] sm:$0xff] }
 0x3e7   : > { %20056 = vst [vmem:[#allocation104_spill] sm:$0xff] %v16712_v48  ;;  %20057 = vst [vmem:[#allocation27_spill] sm:$0xff] %v16714_v56  ;;  %v20058_v39 = vmax.f32 %v16567_v26, 0.0  ;;  %v20059_v18 = vmax.f32 %v16596_v10, 0.0  ;;  %v16726_v59 = vadd.f32 %v20060_v5, %v14233_v54  ;;  %vm6537_vm6 = vcmp.eq.f32.partialorder %v20061_v41, inf }
 0x3e8   : > { %v16731_v38 = vadd.f32 1e-31, %v6328_v6  ;;  %v4445_v52 = vadd.f32 %v4444_v33, %v4443_v22  ;;  %v4437_v7 = vrot.slane %v4436_v28, 2  ;;  %v16735_v26 = vadd.f32 %v20063_v11, %v14233_v54  ;;  %v16745_v6 = vpop.f32.mrb[112].mxu1 }
 0x3e9   : > { %v5032_v58 = vsub.f32 %v20058_v39, %v16710_v24  ;;  %v5033_v31 = vsub.f32 %v20059_v18, %v16710_v24  ;;  %v5644_v3 = vrot.slane %v5643_v49, 4  ;;  %v6917_v10 = vpack.c.bf16 %v16664_v14, %v16664_v14  ;;  %v16750_v39 = vpop.f32.mrb[113].mxu1 }
 0x3ea   : > { %20062 = vst [vmem:[#allocation50_spill] sm:$0xff] %v16731_v38  ;;  %v20064_v17 = vunpack.i.l.bf16 %v20023_v13  ;;  %v20065_v47 = vunpack.i.h.bf16 %v20023_v13  ;;  %12049 = vrsqrt.f32 %v16714_v56  ;;  %v6330_v43 = vmul.f32 %v16617_v15, %v5628_v55  ;;  %v20117_v56 = vld [vmem:[#allocation79_spill] sm:$0xff] }
 0x3eb   : > { %v4446_v22 = vrot.slane %v4445_v52, 1  ;;  %v4438_v20 = vadd.f32 %v4437_v7, %v4436_v28  ;;  %v16747_v32 = vadd.f32 1e-31, %v6331_v53  ;;  %v19062_v14 = vmax.f32 %v16726_v59, 0.0  ;;  %v20070_v7 = vld [vmem:[#allocation47_spill] sm:$0xff] }
 0x3ec   : > { %v5160_v0 = vmul.f32 %v20064_v17, %v5032_v58  ;;  %v5161_v40 = vmul.f32 %v20065_v47, %v5033_v31  ;;  %12051 = vrsqrt.f32 %v16731_v38  ;;  %v16753_v13 = vunpack.c.l.b16 %v6914_v16  ;;  %v16755_v31 = vpop.f32.mrb[114].mxu1 }
 0x3ed   : > { %20066 = vst [vmem:[#allocation24_spill] sm:$0xff] %v16747_v32  ;;  %v4447_v58 = vadd.f32 %v4446_v22, %v4445_v52  ;;  %v4439_v18 = vrot.slane %v4438_v20, 1  ;;  %v5645_v15 = vadd.f32 %v5644_v3, %v5643_v49  ;;  %v16757_v28 = vunpack.c.l.b16 %v6917_v10  ;;  %v20073_v3 = vld [vmem:[#allocation17_spill] sm:$0xff] }
 0x3ee   : > { %v5288_v33 = vmul.f32 %v5160_v0, %v5160_v0  ;;  %v5289_v44 = vmul.f32 %v5161_v40, %v5161_v40  ;;  %20067 = vst [vmem:[#allocation56_spill] sm:$0xff] %v16753_v13  ;;  %v19061_v53 = vmax.f32 %v16735_v26, 0.0  ;;  %v16760_v5 = vadd.f32 1e-31, %v6330_v43  ;;  %v20072_v0 = vld [vmem:[#allocation67_spill] sm:$0xff] }
 0x3ef   : > { %20068 = vst [vmem:[#allocation70_spill] sm:$0xff] %v16757_v28  ;;  %v16763_v11 = vmul.f32 %v20070_v7, %v4447_v58  ;;  %v4440_v17 = vadd.f32 %v4439_v18, %v4438_v20  ;;  %v6531_v16 = vsel %vm6530_vm1, %v20053_v19, %v20072_v0  ;;  %12053 = vrsqrt.f32 %v16747_v32  ;;  %v20079_v58 = vld [vmem:[#allocation57_spill] sm:$0xff]  ;;  %v20089_v28 = vld [vmem:[#allocation114_spill] sm:$0xff] }
 0x3f0   : > { %v5636_v55 = vadd.f32 %v5289_v44, %v5288_v33  ;;  %20069 = vst [vmem:[#allocation112_spill] sm:$0xff] %v16760_v5  ;;  %v6916_v49 = vpack.c.bf16 %v16710_v24, %v16710_v24  ;;  %v20074_v10 = vunpack.i.l.bf16 %v20073_v3  ;;  %v20075_v40 = vmax.f32 %v16640_v61, 0.0  ;;  %v20077_v33 = vld [vmem:[#allocation106_spill] sm:$0xff] }
 0x3f1   : > { %20071 = vst [vmem:[#allocation121_spill] sm:$0xff] %v16763_v11  ;;  %v20076_v22 = vmax.f32 %v16654_v4, 0.0  ;;  %v16785_v44 = vmul.f32 %v20077_v33, %v4440_v17  ;;  %vm6532_vm9 = vcmp.eq.f32.partialorder %v20053_v19, 0.0  ;;  %v5646_v24 = vrot.slane %v5645_v15, 2  ;;  %v16802_v17 = vpop.f32.mrb[115].mxu1  ;;  %v20105_v32 = vld [vmem:[#allocation10_spill] sm:$0xff] }
 0x3f2   : > { %v5637_v52 = vrot.slane %v5636_v55, 4  ;;  %v16776_v47 = vmul.f32 %v20074_v10, %v19062_v14  ;;  %v5038_v43 = vsub.f32 %v20075_v40, %v16763_v11  ;;  %v20080_v18 = vunpack.i.l.bf16 %v20079_v58  ;;  %v20082_v10 = vld [vmem:[#allocation29_spill] sm:$0xff] }
 0x3f3   : > { %v5039_v20 = vsub.f32 %v20076_v22, %v16763_v11  ;;  %20078 = vst [vmem:[#allocation111_spill] sm:$0xff] %v16785_v44  ;;  %v20081_v0 = vand.u32 2147483648, %v20053_v19  ;;  %v6538_v4 = vsel %vm6537_vm6, %v20061_v41, %v20082_v10  ;;  %12055 = vrsqrt.f32 %v16760_v5  ;;  %v20088_v14 = vld [vmem:[#allocation65_spill] sm:$0xff] }
 0x3f4   : > { %v16792_v7 = vmul.f32 %v20080_v18, %v19061_v53  ;;  %v20083_v40 = vunpack.i.l.bf16 %v20038_v29  ;;  %v20084_v33 = vunpack.i.h.bf16 %v20038_v29  ;;  %v20085_v19 = vmax.f32 %v16648_v27, 0.0  ;;  %v16819_v13 = vpop.eup %12049 }
 0x3f5   : > { %v16796_v61 = vsel %vm6532_vm9, %v20081_v0, %v6531_v16  ;;  %v5638_v0 = vadd.f32 %v5637_v52, %v5636_v55  ;;  %v16812_v63 = vunpack.c.l.b16 %v6916_v49  ;;  %v20087_v10 = vmax.f32 %v16660_v21, 0.0  ;;  %20090 = vst [vmem:[#allocation131_spill] sm:$0xff] %v16819_v13 }
 0x3f6   : > { %v5166_v22 = vmul.f32 %v20083_v40, %v5038_v43  ;;  %v5167_v18 = vmul.f32 %v20084_v33, %v5039_v20  ;;  %v5036_v16 = vsub.f32 %v20085_v19, %v16785_v44  ;;  %v6550_v8 = vmul.f32 %v20089_v28, %v20088_v14  ;;  %v20094_v33 = vld [vmem:[#allocation73_spill] sm:$0xff]  ;;  %v16833_v28 = vpop.eup %12051 }
 0x3f7   : > { %20086 = vst [vmem:[#allocation21_spill] sm:$0xff] %v16812_v63  ;;  %v5037_v53 = vsub.f32 %v20087_v10, %v16785_v44  ;;  %v20091_v29 = vunpack.i.l.bf16 %v20044_v46  ;;  %vm6539_vm7 = vcmp.eq.f32.partialorder %v20061_v41, 0.0  ;;  %v16824_v27 = vadd.f32 %v5646_v24, %v5645_v15  ;;  %20095 = vst [vmem:[#allocation85_spill] sm:$0xff] %v16833_v28  ;;  %v16839_v15 = vpop.f32.mrb[116].mxu1  ;;  %v20098_v24 = vld [vmem:[#allocation45_spill] sm:$0xff]  ;;  %v20102_v63 = vld [vmem:[#allocation11_spill] sm:$0xff] }
 0x3f8   : > { %v5294_v43 = vmul.f32 %v5166_v22, %v5166_v22  ;;  %v5295_v40 = vmul.f32 %v5167_v18, %v5167_v18  ;;  %v20092_v55 = vunpack.i.h.bf16 %v20044_v46  ;;  %v20093_v21 = vand.u32 2147483648, %v20061_v41  ;;  %v20096_v22 = vld [vmem:[#allocation105_spill] sm:$0xff] }
 0x3f9   : > { %v5164_v20 = vmul.f32 %v20091_v29, %v5036_v16  ;;  %vm6544_vm8 = vcmp.eq.f32.partialorder %v20094_v33, inf  ;;  %vm6586_vm12 = vcmp.eq.f32.partialorder %v20096_v22, inf  ;;  %v20097_v16 = vld [vmem:[#allocation74_spill] sm:$0xff]  ;;  %vm6551_vm14 = vcmp.eq.f32.partialorder %v20088_v14, inf }
 0x3fa   : > { %v5165_v52 = vmul.f32 %v20092_v55, %v5037_v53  ;;  %v16830_v49 = vsel %vm6539_vm7, %v20093_v21, %v6538_v4  ;;  %v5657_v18 = vadd.f32 %v5295_v40, %v5294_v43  ;;  %v6545_v10 = vsel %vm6544_vm8, %v20094_v33, %v20097_v16  ;;  %v20099_v4 = vld [vmem:[#allocation86_spill] sm:$0xff]  ;;  %v16844_v55 = vpop.f32.mrb[117].mxu1  ;;  %v20100_v21 = vld [vmem:[#allocation127_spill] sm:$0xff] }
 0x3fb   : > { %v5292_v19 = vmul.f32 %v5164_v20, %v5164_v20  ;;  %v5639_v46 = vrot.slane %v5638_v0, 2  ;;  %v6552_v41 = vsel %vm6551_vm14, %v20088_v14, %v6550_v8  ;;  %v6557_v29 = vmul.f32 %v20099_v4, %v20098_v24  ;;  %v20101_v16 = vld [vmem:[#allocation62_spill] sm:$0xff]  ;;  %v16851_v11 = vpop.f32.mrb[118].mxu1  ;;  %v20104_v4 = vld [vmem:[#allocation132_spill] sm:$0xff] }
 0x3fc   : > { %v5293_v53 = vmul.f32 %v5165_v52, %v5165_v52  ;;  %vm6593_vm15 = vcmp.eq.f32.partialorder %v20100_v21, inf  ;;  %v5658_v43 = vrot.slane %v5657_v18, 4  ;;  %v6547_v40 = vand.u32 2147483648, %v20094_v33  ;;  %v16853_v52 = vpop.eup %12053  ;;  %v16859_v13 = vpop.f32.mrb[119].mxu1 }
 0x3fd   : > { %v6554_v20 = vand.u32 2147483648, %v20088_v14  ;;  %v6564_v23 = vmul.f32 %v20102_v63, %v20101_v16  ;;  %20103 = vst [vmem:[#allocation129_spill] sm:$0xff] %v16853_v52  ;;  %vm6546_vm1 = vcmp.eq.f32.partialorder %v20094_v33, 0.0  ;;  %vm6553_vm6 = vcmp.eq.f32.partialorder %v20088_v14, 0.0  ;;  %v20106_v14 = vld [vmem:[#allocation89_spill] sm:$0xff] }
 0x3fe   : > { %v5650_v8 = vadd.f32 %v5293_v53, %v5292_v19  ;;  %v6571_v5 = vmul.f32 %v20105_v32, %v20104_v4  ;;  %v16862_v28 = vsel %vm6546_vm1, %v6547_v40, %v6545_v10  ;;  %vm6558_vm9 = vcmp.eq.f32.partialorder %v20098_v24, inf  ;;  %v20107_v33 = vld [vmem:[#allocation25_spill] sm:$0xff]  ;;  %v16873_v32 = vpop.eup %12055 }
 0x3ff   : > { %v16864_v38 = vsel %vm6553_vm6, %v6554_v20, %v6552_v41  ;;  %v16867_v63 = vadd.f32 %v5639_v46, %v5638_v0  ;;  %v6559_v19 = vsel %vm6558_vm9, %v20098_v24, %v6557_v29  ;;  %vm6565_vm7 = vcmp.eq.f32.partialorder %v20101_v16, inf  ;;  %20108 = vst [vmem:[#allocation9_spill] sm:$0xff] %v16873_v32  ;;  %v20110_v20 = vld [vmem:[#allocation108_spill] sm:$0xff] }
 0x400   : > { %v6578_v53 = vmul.f32 %v20107_v33, %v20106_v14  ;;  %v16875_v52 = vadd.f32 %v5658_v43, %v5657_v18  ;;  %v6561_v10 = vand.u32 2147483648, %v20098_v24  ;;  %v6566_v41 = vsel %vm6565_vm7, %v20101_v16, %v6564_v23  ;;  %v16888_v43 = vpop.f32.mrb[120].mxu1  ;;  %v20119_v32 = vld [vmem:[#allocation84_spill] sm:$0xff] }
 0x401   : > { %vm6572_vm8 = vcmp.eq.f32.partialorder %v20104_v4, inf  ;;  %v5651_v40 = vrot.slane %v5650_v8, 4  ;;  %vm6560_vm14 = vcmp.eq.f32.partialorder %v20098_v24, 0.0  ;;  %v6568_v0 = vand.u32 2147483648, %v20101_v16  ;;  %20109 = vst [vmem:[#allocation43_spill] sm:$0xff] %v16888_v43  ;;  %v16986_v43 = vpop.permute.xlu1 %6260 }
 0x402   : > { %v6573_v46 = vsel %vm6572_vm8, %v20104_v4, %v6571_v5  ;;  %v16883_v29 = vsel %vm6560_vm14, %v6561_v10, %v6559_v19  ;;  %vm6567_vm1 = vcmp.eq.f32.partialorder %v20101_v16, 0.0  ;;  %v6575_v18 = vand.u32 2147483648, %v20104_v4  ;;  %v16898_v19 = vpop.f32.mrb[121].mxu1  ;;  %20126 = vst [vmem:[#allocation47_spill] sm:$0xff] %v16986_v43 }
 0x403   : > { %vm6579_vm6 = vcmp.eq.f32.partialorder %v20106_v14, inf  ;;  %v16890_v23 = vsel %vm6567_vm1, %v6568_v0, %v6566_v41  ;;  %vm6574_vm9 = vcmp.eq.f32.partialorder %v20104_v4, 0.0  ;;  %v6587_v5 = vsel %vm6586_vm12, %v20096_v22, %v20110_v20  ;;  %20111 = vst [vmem:[#allocation96_spill] sm:$0xff] %v16898_v19  ;;  %v16905_v41 = vpop.f32.mrb[122].mxu1  ;;  %v20114_v20 = vld [vmem:[#allocation8_spill] sm:$0xff] }
 0x404   : > { %v6580_v24 = vsel %vm6579_vm6, %v20106_v14, %v6578_v53  ;;  %v16901_v33 = vsel %vm6574_vm9, %v6575_v18, %v6573_v46  ;;  %vm6581_vm7 = vcmp.eq.f32.partialorder %v20106_v14, 0.0  ;;  %v6582_v10 = vand.u32 2147483648, %v20106_v14  ;;  %20112 = vst [vmem:[#allocation92_spill] sm:$0xff] %v16905_v41  ;;  %v20113_v53 = vld [vmem:[#allocation2_spill] sm:$0xff]  ;;  %v16915_v16 = vpop.f32.mrb[123].mxu1 }
 0x405   : > { %v16907_v4 = vadd.f32 %v5651_v40, %v5650_v8  ;;  %vm6588_vm8 = vcmp.eq.f32.partialorder %v20096_v22, 0.0  ;;  %v6594_v0 = vsel %vm6593_vm15, %v20100_v21, %v20113_v53  ;;  %vm6600_vm12 = vcmp.eq.f32.partialorder %v20114_v20, inf  ;;  %20115 = vst [vmem:[#allocation35_spill] sm:$0xff] %v16915_v16  ;;  %v20118_v40 = vld [vmem:[#allocation122_spill] sm:$0xff]  ;;  %v16944_v16 = vpop.f32.mrb[124].mxu1 }
 0x406   : > { %v16917_v46 = vsel %vm6581_vm7, %v6582_v10, %v6580_v24  ;;  %v20116_v18 = vand.u32 2147483648, %v20096_v22  ;;  %v6601_v8 = vsel %vm6600_vm12, %v20114_v20, %v20117_v56  ;;  %v6606_v60 = vmul.f32 %v20119_v32, %v20118_v40  ;;  %20122 = vst [vmem:[#allocation33_spill] sm:$0xff] %v16944_v16 }
 0x407   : > { %vm6595_vm14 = vcmp.eq.f32.partialorder %v20100_v21, 0.0  ;;  %v6603_v53 = vand.u32 2147483648, %v20114_v20  ;;  %vm6607_vm15 = vcmp.eq.f32.partialorder %v20118_v40, inf  ;;  %v6613_v24 = vmul.f32 %v16386_v57, %v16298_v1 }
 0x408   : > { %v16921_v14 = vsel %vm6588_vm8, %v20116_v18, %v6587_v5  ;;  %vm6602_vm1 = vcmp.eq.f32.partialorder %v20114_v20, 0.0  ;;  %v6608_v22 = vsel %vm6607_vm15, %v20118_v40, %v6606_v60  ;;  %v6610_v5 = vand.u32 2147483648, %v20118_v40  ;;  %v20121_v20 = vld [vmem:[#allocation113_spill] sm:$0xff] }
 0x409   : > { %vm6614_vm6 = vcmp.eq.f32.partialorder %v16298_v1, inf  ;;  %v20120_v56 = vand.u32 2147483648, %v20100_v21  ;;  %v6604_v10 = vsel %vm6602_vm1, %v6603_v53, %v6601_v8  ;;  %vm6609_vm9 = vcmp.eq.f32.partialorder %v20118_v40, 0.0  ;;  %v16951_v8 = vpop.f32.mrb[125].mxu1 }
 0x40a   : > { %v6615_v18 = vsel %vm6614_vm6, %v16298_v1, %v6613_v24  ;;  %v6611_v48 = vsel %vm6609_vm9, %v6610_v5, %v6608_v22  ;;  %vm6616_vm7 = vcmp.eq.f32.partialorder %v16298_v1, 0.0  ;;  %v6617_v57 = vand.u32 2147483648, %v16298_v1  ;;  %20123 = vst [vmem:[#allocation80_spill] sm:$0xff] %v16951_v8  ;;  %v16956_v1 = vpop.f32.mrb[126].mxu1 }
 0x40b   : > { %v6597_v32 = vsel %vm6595_vm14, %v20120_v56, %v6594_v0  ;;  %v6620_v60 = vmul.f32 %v16250_v62, %v20121_v20  ;;  %vm6621_vm8 = vcmp.eq.f32.partialorder %v20121_v20, inf  ;;  %vm6623_vm12 = vcmp.eq.f32.partialorder %v20121_v20, 0.0  ;;  %20124 = vst [vmem:[#allocation78_spill] sm:$0xff] %v16956_v1 }
 0x40c   : > { %v6624_v21 = vand.u32 2147483648, %v20121_v20  ;;  %v6627_v0 = vmul.f32 %v16408_v45, %v16334_v30  ;;  %v6618_v40 = vsel %vm6616_vm7, %v6617_v57, %v6615_v18  ;;  %vm6628_vm14 = vcmp.eq.f32.partialorder %v16334_v30, inf  ;;  %v16962_v45 = vpop.f32.mrb[127].mxu1 }
 0x40d   : > { %v6622_v53 = vsel %vm6621_vm8, %v20121_v20, %v6620_v60  ;;  %v6631_v62 = vand.u32 2147483648, %v16334_v30  ;;  %vm6630_vm15 = vcmp.eq.f32.partialorder %v16334_v30, 0.0  ;;  %v6634_v5 = vmul.f32 %v16401_v12, %v16314_v34  ;;  %20125 = vst [vmem:[#allocation6_spill] sm:$0xff] %v16962_v45 }
 0x40e   : > { %v6625_v24 = vsel %vm6623_vm12, %v6624_v21, %v6622_v53  ;;  %v6629_v22 = vsel %vm6628_vm14, %v16334_v30, %v6627_v0  ;;  %vm6635_vm1 = vcmp.eq.f32.partialorder %v16314_v34, inf  ;;  %vm6637_vm6 = vcmp.eq.f32.partialorder %v16314_v34, 0.0 }
 0x40f   : > { %v6632_v56 = vsel %vm6630_vm15, %v6631_v62, %v6629_v22  ;;  %v6638_v18 = vand.u32 2147483648, %v16314_v34  ;;  %v6636_v57 = vsel %vm6635_vm1, %v16314_v34, %v6634_v5  ;;  %v6969_v20 = vpack.c.bf16 %v16796_v61, %v16796_v61 }
 0x410   : > { %v6970_v30 = vpack.c.bf16 %v16830_v49, %v16830_v49  ;;  %v6971_v12 = vpack.c.bf16 %v16862_v28, %v16862_v28  ;;  %v6972_v21 = vpack.c.bf16 %v16864_v38, %v16864_v38  ;;  %v6973_v0 = vpack.c.bf16 %v16883_v29, %v16883_v29 }
 0x411   : > { %v6639_v60 = vsel %vm6637_vm6, %v6638_v18, %v6636_v57  ;;  %v6974_v53 = vpack.c.bf16 %v16890_v23, %v16890_v23  ;;  %v6975_v34 = vpack.c.bf16 %v16901_v33, %v16901_v33  ;;  %v6976_v61 = vpack.c.bf16 %v16917_v46, %v16917_v46 }
 0x412   : > { %v6977_v49 = vpack.c.bf16 %v16921_v14, %v16921_v14  ;;  %v6978_v28 = vpack.c.bf16 %v6597_v32, %v6597_v32  ;;  %v6979_v62 = vpack.c.bf16 %v6604_v10, %v6604_v10  ;;  %v6980_v22 = vpack.c.bf16 %v6611_v48, %v6611_v48 }
 0x413   : > { %v6981_v5 = vpack.c.bf16 %v6618_v40, %v6618_v40  ;;  %v6982_v38 = vpack.c.bf16 %v6625_v24, %v6625_v24  ;;  %v6983_v18 = vpack.c.bf16 %v6632_v56, %v6632_v56  ;;  %v6984_v57 = vpack.c.bf16 %v6639_v60, %v6639_v60 }
 0x414   : > { %v7114_v29 = vunpack.c.l.b16 %v6969_v20  ;;  %v7115_v45 = vunpack.c.l.b16 %v6970_v30  ;;  %v7116_v8 = vunpack.c.l.b16 %v6971_v12  ;;  %v7117_v23 = vunpack.c.l.b16 %v6972_v21 }
 0x415   : > { %v7118_v1 = vunpack.c.l.b16 %v6973_v0  ;;  %v7119_v16 = vunpack.c.l.b16 %v6974_v53  ;;  %v7120_v33 = vunpack.c.l.b16 %v6975_v34  ;;  %v7121_v19 = vunpack.c.l.b16 %v6976_v61 }
 0x416   : > { %v7122_v41 = vunpack.c.l.b16 %v6977_v49  ;;  %v7123_v46 = vunpack.c.l.b16 %v6978_v28  ;;  %v7124_v14 = vunpack.c.l.b16 %v6979_v62  ;;  %v7125_v32 = vunpack.c.l.b16 %v6980_v22  ;;  %v17018_v62 = vpop.permute.xlu1 %6190 }
 0x417   : > { %v7126_v10 = vunpack.c.l.b16 %v6981_v5  ;;  %v7127_v48 = vunpack.c.l.b16 %v6982_v38  ;;  %v7128_v40 = vunpack.c.l.b16 %v6983_v18  ;;  %v7129_v24 = vunpack.c.l.b16 %v6984_v57 }
 0x418   : > { %v7183_v56 = vsel %vm7162_vm2, %v7115_v45, %v7114_v29  ;;  %v7190_v20 = vsel %vm7162_vm2, %v7123_v46, %v7122_v41  ;;  %v16994_v60 = vadd.f32 %v16310_v2, %v14233_v54  ;;  %v16998_v21 = vadd.f32 %v16523_v36, %v14233_v54  ;;  %v20129_v29 = vld [vmem:[#allocation81_spill] sm:$0xff]  ;;  %v20131_v46 = vld [vmem:[#allocation3_spill] sm:$0xff] }
 0x419   : > { %v7184_v30 = vsel %vm7164_vm3, %v7116_v8, %v7183_v56  ;;  %v7191_v12 = vsel %vm7164_vm3, %v7124_v14, %v7190_v20  ;;  %v17004_v45 = vadd.f32 %v16533_v37, %v14233_v54  ;;  %v17008_v41 = vadd.f32 %v16535_v25, %v14233_v54 }
 0x41a   : > { %v7185_v0 = vsel %vm7166_vm4, %v7117_v23, %v7184_v30  ;;  %v7192_v53 = vsel %vm7166_vm4, %v7125_v32, %v7191_v12  ;;  %v19085_v34 = vmax.f32 %v16994_v60, 0.0  ;;  %v19084_v36 = vmax.f32 %v16998_v21, 0.0 }
 0x41b   : > { %v7186_v8 = vsel %vm7168_vm5, %v7118_v1, %v7185_v0  ;;  %v7193_v2 = vsel %vm7168_vm5, %v7126_v10, %v7192_v53  ;;  %v19082_v28 = vmax.f32 %v17004_v45, 0.0  ;;  %v19079_v37 = vmax.f32 %v17008_v41, 0.0 }
 0x41c   : > { %v7187_v61 = vsel %vm19111_vm10, %v7119_v16, %v7186_v8  ;;  %v7194_v49 = vsel %vm19111_vm10, %v7127_v48, %v7193_v2  ;;  %v20127_v22 = vunpack.i.h.bf16 %v20073_v3  ;;  %v20128_v16 = vunpack.i.h.bf16 %v20079_v58  ;;  %v17071_v2 = vpop.permute.xlu1 %6265 }
 0x41d   : > { %v7188_v25 = vsel %vm19104_vm11, %v7120_v33, %v7187_v61  ;;  %v7195_v1 = vsel %vm19104_vm11, %v7128_v40, %v7194_v49  ;;  %v20130_v23 = vunpack.i.l.bf16 %v20129_v29  ;;  %v20132_v14 = vunpack.i.l.bf16 %v20131_v46  ;;  %20135 = vst [vmem:[#allocation67_spill] sm:$0xff] %v17071_v2  ;;  %v20146_v2 = vld [vmem:[#allocation115_spill] sm:$0xff] }
 0x41e   : > { %v3378_v5 = vmul.f32 %v20127_v22, %v19085_v34  ;;  %v3376_v38 = vmul.f32 %v20128_v16, %v19084_v36  ;;  %v7189_v18 = vsel %vm19101_vm13, %v7121_v19, %v7188_v25  ;;  %v7196_v57 = vsel %vm19101_vm13, %v7129_v24, %v7195_v1 }
 0x41f   : > { %v3381_v33 = vmul.f32 %v20130_v23, %v19082_v28  ;;  %v3379_v32 = vmul.f32 %v20132_v14, %v19079_v37  ;;  %v7226_v10 = vpack.c.b16 %v7196_v57, %v7189_v18  ;;  %v17044_v19 = vadd.f32 %v16540_v50, %v14233_v54  ;;  %v20140_v23 = vld [vmem:[#allocation22_spill] sm:$0xff] }
 0x420   : > { %v4455_v48 = vadd.f32 %v3378_v5, %v16776_v47  ;;  %v4448_v40 = vadd.f32 %v3376_v38, %v16792_v7  ;;  %v17048_v24 = vadd.f32 %v16553_v35, %v14233_v54  ;;  %v17052_v56 = vadd.f32 %v16559_v42, %v14233_v54  ;;  %v20133_v47 = vld [vmem:[#allocation109_spill] sm:$0xff]  ;;  %v20134_v35 = vld [vmem:[#allocation102_spill] sm:$0xff]  ;;  %v20138_v38 = vld [vmem:[#allocation72_spill] sm:$0xff] }
 0x421   : > { %v17056_v20 = vadd.f32 %v16573_v51, %v14233_v54  ;;  %v17060_v30 = vadd.f32 %v20133_v47, %v14233_v54  ;;  %10885 = vmatmul.mubr.bf16.vlgmr.msra.gmra.mrb[128].mxu0 %v7226_v10  ;;  %v19080_v12 = vmax.f32 %v17044_v19, 0.0  ;;  %v17065_v0 = vadd.f32 %v20134_v35, %v14233_v54 }
 0x422   : > { %v4456_v7 = vrot.slane %v4455_v48, 4  ;;  %v4449_v50 = vrot.slane %v4448_v40, 4  ;;  %v19078_v42 = vmax.f32 %v17048_v24, 0.0  ;;  %v19076_v53 = vmax.f32 %v17052_v56, 0.0 }
 0x423   : > { %v19077_v51 = vmax.f32 %v17056_v20, 0.0  ;;  %v19081_v8 = vmax.f32 %v17060_v30, 0.0  ;;  %v20136_v25 = vunpack.i.h.bf16 %v20129_v29  ;;  %v19083_v22 = vmax.f32 %v17065_v0, 0.0 }
 0x424   : > { %v4457_v61 = vadd.f32 %v4456_v7, %v4455_v48  ;;  %v4450_v49 = vadd.f32 %v4449_v50, %v4448_v40  ;;  %v20137_v5 = vunpack.i.h.bf16 %v20131_v46  ;;  %v20139_v18 = vunpack.i.l.bf16 %v20138_v38 }
 0x425   : > { %v3382_v1 = vmul.f32 %v20136_v25, %v19080_v12  ;;  %v20141_v14 = vunpack.i.l.bf16 %v20140_v23  ;;  %v20142_v48 = vunpack.i.h.bf16 %v20138_v38  ;;  %v20143_v35 = vunpack.i.h.bf16 %v20140_v23 }
 0x426   : > { %v3380_v16 = vmul.f32 %v20137_v5, %v19078_v42  ;;  %v3385_v57 = vmul.f32 %v20139_v18, %v19076_v53  ;;  %v4458_v47 = vrot.slane %v4457_v61, 2  ;;  %v4451_v7 = vrot.slane %v4450_v49, 2 }
 0x427   : > { %v3383_v10 = vmul.f32 %v20141_v14, %v19077_v51  ;;  %v3386_v40 = vmul.f32 %v20142_v48, %v19081_v8  ;;  %v4469_v50 = vadd.f32 %v3382_v1, %v3381_v33  ;;  %v3384_v25 = vmul.f32 %v20143_v35, %v19083_v22  ;;  %v6196_v22 = vpop.permute.xlu1 %6195 }
 0x428   : > { %v20144_v5 = vrot.slane %v16824_v27, 1  ;;  %v5653_v53 = vrot.slane %v16907_v4, 2  ;;  %v4462_v14 = vadd.f32 %v3380_v16, %v3379_v32  ;;  %v4459_v42 = vadd.f32 %v4458_v47, %v4457_v61 }
 0x429   : > { %v4483_v51 = vadd.f32 %v3386_v40, %v3385_v57  ;;  %v4452_v37 = vadd.f32 %v4451_v7, %v4450_v49  ;;  %v4470_v12 = vrot.slane %v4469_v50, 4  ;;  %v4476_v48 = vadd.f32 %v3384_v25, %v3383_v10 }
 0x42a   : > { %v5649_v18 = vadd.f32 %v20144_v5, %v16824_v27  ;;  %v5641_v8 = vrot.slane %v16867_v63, 1  ;;  %v20145_v33 = vrot.slane %v16875_v52, 2  ;;  %v4463_v28 = vrot.slane %v4462_v14, 4 }
 0x42b   : > { %v4484_v35 = vrot.slane %v4483_v51, 4  ;;  %v4460_v36 = vrot.slane %v4459_v42, 1  ;;  %v4453_v34 = vrot.slane %v4452_v37, 1  ;;  %v4471_v27 = vadd.f32 %v4470_v12, %v4469_v50  ;;  %v20147_v50 = vld [vmem:[#allocation32_spill] sm:$0xff] }
 0x42c   : > { %v5661_v1 = vadd.f32 %v20145_v33, %v16875_v52  ;;  %v4477_v5 = vrot.slane %v4476_v48, 4  ;;  %v6333_v43 = vmul.f32 %v6196_v22, %v5649_v18  ;;  %v5654_v32 = vadd.f32 %v5653_v53, %v16907_v4 }
 0x42d   : > { %v4464_v61 = vadd.f32 %v4463_v28, %v4462_v14  ;;  %v4485_v49 = vadd.f32 %v4484_v35, %v4483_v51  ;;  %v4461_v16 = vadd.f32 %v4460_v36, %v4459_v42  ;;  %v4454_v57 = vadd.f32 %v4453_v34, %v4452_v37 }
 0x42e   : > { %v4472_v10 = vrot.slane %v4471_v27, 2  ;;  %v4478_v40 = vadd.f32 %v4477_v5, %v4476_v48  ;;  %v5642_v47 = vadd.f32 %v5641_v8, %v16867_v63  ;;  %v5662_v33 = vrot.slane %v5661_v1, 1 }
 0x42f   : > { %v4465_v7 = vrot.slane %v4464_v61, 2  ;;  %v4486_v25 = vrot.slane %v4485_v49, 2  ;;  %v4929_v12 = vmul.f32 %v20146_v2, %v4461_v16  ;;  %v4928_v22 = vmul.f32 %v20147_v50, %v4454_v57  ;;  %v17120_v16 = vpop.permute.xlu1 %6270 }
 0x430   : > { %v4473_v18 = vadd.f32 %v4472_v10, %v4471_v27  ;;  %v5655_v4 = vrot.slane %v5654_v32, 1  ;;  %v4479_v36 = vrot.slane %v4478_v40, 2  ;;  %v20148_v34 = vmax.f32 %v16726_v59, 0.0 }
 0x431   : > { %v4466_v28 = vadd.f32 %v4465_v7, %v4464_v61  ;;  %v4487_v53 = vadd.f32 %v4486_v25, %v4485_v49  ;;  %v20149_v63 = vmax.f32 %v16994_v60, 0.0  ;;  %v6921_v51 = vpack.c.bf16 %v4929_v12, %v4929_v12 }
 0x432   : > { %v5042_v37 = vsub.f32 %v20148_v34, %v4929_v12  ;;  %v20150_v8 = vmax.f32 %v16735_v26, 0.0  ;;  %v20151_v48 = vmax.f32 %v16998_v21, 0.0  ;;  %v6920_v35 = vpack.c.bf16 %v4928_v22, %v4928_v22 }
 0x433   : > { %v5043_v42 = vsub.f32 %v20149_v63, %v4929_v12  ;;  %v4474_v5 = vrot.slane %v4473_v18, 1  ;;  %v4467_v27 = vrot.slane %v4466_v28, 1  ;;  %v20152_v61 = vunpack.i.l.bf16 %v20073_v3 }
 0x434   : > { %v5040_v14 = vsub.f32 %v20150_v8, %v4928_v22  ;;  %v5041_v2 = vsub.f32 %v20151_v48, %v4928_v22  ;;  %v20153_v59 = vunpack.i.h.bf16 %v20073_v3  ;;  %v7459_v60 = vunpack.c.l.b16 %v6921_v51  ;;  %v20157_v3 = vld [vmem:[#allocation107_spill] sm:$0xff]  ;;  %v20158_v51 = vld [vmem:[#allocation101_spill] sm:$0xff] }
 0x435   : > { %v5170_v49 = vmul.f32 %v20152_v61, %v5042_v37  ;;  %v20154_v10 = vunpack.i.l.bf16 %v20079_v58  ;;  %v20155_v26 = vunpack.i.h.bf16 %v20079_v58  ;;  %v7458_v21 = vunpack.c.l.b16 %v6920_v35 }
 0x436   : > { %v5171_v57 = vmul.f32 %v20153_v59, %v5043_v42  ;;  %v4475_v12 = vadd.f32 %v4474_v5, %v4473_v18  ;;  %v4468_v50 = vadd.f32 %v4467_v27, %v4466_v28  ;;  %v4488_v8 = vrot.slane %v4487_v53, 1 }
 0x437   : > { %v5168_v7 = vmul.f32 %v20154_v10, %v5040_v14  ;;  %v5169_v25 = vmul.f32 %v20155_v26, %v5041_v2  ;;  %v5298_v22 = vmul.f32 %v5170_v49, %v5170_v49  ;;  %v17131_v37 = vsel %vm7162_vm2, %v7459_v60, %v7458_v21 }
 0x438   : > { %v5299_v34 = vmul.f32 %v5171_v57, %v5171_v57  ;;  %20156 = vst [vmem:[#allocation17_spill] sm:$0xff] %v17131_v37  ;;  %v17134_v42 = vmul.f32 %v20157_v3, %v4475_v12  ;;  %v17137_v61 = vmul.f32 %v20158_v51, %v4468_v50  ;;  %v17139_v14 = vadd.f32 1e-31, %v6333_v43  ;;  %v6201_v57 = vpop.permute.xlu1 %6200 }
 0x439   : > { %v5296_v63 = vmul.f32 %v5168_v7, %v5168_v7  ;;  %v5297_v48 = vmul.f32 %v5169_v25, %v5169_v25  ;;  %v6332_v58 = vmul.f32 %v17018_v62, %v5642_v47  ;;  %v5663_v18 = vadd.f32 %v5662_v33, %v5661_v1 }
 0x43a   : > { %v5671_v28 = vadd.f32 %v5299_v34, %v5298_v22  ;;  %v20159_v35 = vmax.f32 %v17004_v45, 0.0  ;;  %v20160_v27 = vmax.f32 %v17044_v19, 0.0  ;;  %v4489_v59 = vadd.f32 %v4488_v8, %v4487_v53  ;;  %v20167_v22 = vld [vmem:[#allocation13_spill] sm:$0xff] }
 0x43b   : > { %v5664_v2 = vadd.f32 %v5297_v48, %v5296_v63  ;;  %v20161_v43 = vmax.f32 %v17008_v41, 0.0  ;;  %v20162_v62 = vmax.f32 %v17048_v24, 0.0  ;;  %v4480_v47 = vadd.f32 %v4479_v36, %v4478_v40  ;;  %v20168_v36 = vld [vmem:[#allocation133_spill] sm:$0xff] }
 0x43c   : > { %v5046_v5 = vsub.f32 %v20159_v35, %v17134_v42  ;;  %v5047_v49 = vsub.f32 %v20160_v27, %v17134_v42  ;;  %v5672_v60 = vrot.slane %v5671_v28, 4  ;;  %v5656_v33 = vadd.f32 %v5655_v4, %v5654_v32  ;;  %v17179_v27 = vpop.permute.xlu1 %6275 }
 0x43d   : > { %v5044_v10 = vsub.f32 %v20161_v43, %v17137_v61  ;;  %v5045_v1 = vsub.f32 %v20162_v62, %v17137_v61  ;;  %v5665_v7 = vrot.slane %v5664_v2, 4  ;;  %v20163_v45 = vunpack.i.l.bf16 %v20129_v29 }
 0x43e   : > { %v20164_v19 = vunpack.i.h.bf16 %v20129_v29  ;;  %v5673_v53 = vadd.f32 %v5672_v60, %v5671_v28  ;;  %v20165_v21 = vunpack.i.l.bf16 %v20131_v46  ;;  %v20166_v41 = vunpack.i.h.bf16 %v20131_v46  ;;  %v20172_v60 = vld [vmem:[#allocation51_spill] sm:$0xff] }
 0x43f   : > { %v5174_v26 = vmul.f32 %v20163_v45, %v5046_v5  ;;  %v17164_v24 = vadd.f32 %v20167_v22, %v14233_v54  ;;  %v5666_v40 = vadd.f32 %v5665_v7, %v5664_v2  ;;  %v17167_v34 = vmul.f32 %v20168_v36, %v4489_v59  ;;  %v20171_v2 = vld [vmem:[#allocation69_spill] sm:$0xff] }
 0x440   : > { %v5175_v25 = vmul.f32 %v20164_v19, %v5047_v49  ;;  %v5172_v12 = vmul.f32 %v20165_v21, %v5044_v10  ;;  %v5173_v50 = vmul.f32 %v20166_v41, %v5045_v1  ;;  %v5674_v63 = vrot.slane %v5673_v53, 2 }
 0x441   : > { %v5302_v32 = vmul.f32 %v5174_v26, %v5174_v26  ;;  %v4481_v48 = vrot.slane %v4480_v47, 1  ;;  %v20169_v51 = vmax.f32 %v17052_v56, 0.0  ;;  %v20170_v28 = vmax.f32 %v17060_v30, 0.0 }
 0x442   : > { %v5303_v4 = vmul.f32 %v5175_v25, %v5175_v25  ;;  %v5300_v29 = vmul.f32 %v5172_v12, %v5172_v12  ;;  %v5301_v8 = vmul.f32 %v5173_v50, %v5173_v50  ;;  %v17177_v5 = vadd.f32 %v20171_v2, %v14233_v54  ;;  %v20175_v25 = vld [vmem:[#allocation54_spill] sm:$0xff] }
 0x443   : > { %v5050_v46 = vsub.f32 %v20169_v51, %v17167_v34  ;;  %v5051_v35 = vsub.f32 %v20170_v28, %v17167_v34  ;;  %v4482_v59 = vadd.f32 %v4481_v48, %v4480_v47  ;;  %v17183_v43 = vadd.f32 %v20172_v60, %v14233_v54  ;;  %v20178_v48 = vld [vmem:[#allocation95_spill] sm:$0xff] }
 0x444   : > { %v5685_v3 = vadd.f32 %v5303_v4, %v5302_v32  ;;  %v5678_v49 = vadd.f32 %v5301_v8, %v5300_v29  ;;  %v2622_v10 = vmax.f32 %v17164_v24, 0.0  ;;  %v5667_v56 = vrot.slane %v5666_v40, 2 }
 0x445   : > { %v20173_v1 = vunpack.i.l.bf16 %v20138_v38  ;;  %v20174_v7 = vunpack.i.h.bf16 %v20138_v38  ;;  %v5675_v26 = vadd.f32 %v5674_v63, %v5673_v53  ;;  %v17191_v21 = vmul.f32 %v20175_v25, %v4482_v59 }
 0x446   : > { %v5686_v62 = vrot.slane %v5685_v3, 4  ;;  %v5679_v19 = vrot.slane %v5678_v49, 4  ;;  %v17195_v47 = vadd.f32 %v16728_v9, %v14233_v54  ;;  %v2621_v22 = vmax.f32 %v17177_v5, 0.0 }
 0x447   : > { %v5178_v30 = vmul.f32 %v20173_v1, %v5050_v46  ;;  %v5179_v45 = vmul.f32 %v20174_v7, %v5051_v35  ;;  %v20176_v4 = vmax.f32 %v17056_v20, 0.0  ;;  %v20177_v53 = vmax.f32 %v17065_v0, 0.0  ;;  %v6206_v46 = vpop.permute.xlu1 %6205  ;;  %v11550_v1 = vld [vmem:[%s18725_s7 + $0x40] sm:$0xff]  }
 0x448   : > { %v5687_v12 = vadd.f32 %v5686_v62, %v5685_v3  ;;  %v5680_v32 = vadd.f32 %v5679_v19, %v5678_v49  ;;  %v2619_v63 = vmax.f32 %v17183_v43, 0.0  ;;  %v5668_v29 = vadd.f32 %v5667_v56, %v5666_v40  ;;  %10892 = vmatprep.subr.bf16.mxu0 %v11550_v1 }
 0x449   : > { %v5306_v41 = vmul.f32 %v5178_v30, %v5178_v30  ;;  %v5307_v50 = vmul.f32 %v5179_v45, %v5179_v45  ;;  %v5048_v38 = vsub.f32 %v20176_v4, %v17191_v21  ;;  %v5049_v36 = vsub.f32 %v20177_v53, %v17191_v21  ;;  %10893 = vmatpush3.bf16.msra.mxu0 %v11550_v1 }
 0x44a   : > { %v5688_v8 = vrot.slane %v5687_v12, 2  ;;  %v20179_v3 = vunpack.i.h.bf16 %v20178_v48  ;;  %v5676_v28 = vrot.slane %v5675_v26, 1  ;;  %v20180_v35 = vunpack.i.l.bf16 %v20140_v23 }
 0x44b   : > { %v5699_v9 = vadd.f32 %v5307_v50, %v5306_v41  ;;  %v20181_v2 = vunpack.i.h.bf16 %v20140_v23  ;;  %v2620_v0 = vmax.f32 %v17195_v47, 0.0  ;;  %v17214_v59 = vadd.f32 1e-31, %v6332_v58  ;;  %v11551_v23 = vld [vmem:[%s18725_s7 + $0x48] sm:$0xff]   ;;  %v20183_v58 = vld [vmem:[#allocation93_spill] sm:$0xff] }
 0x44c   : > { %v3390_v51 = vmul.f32 %v20179_v3, %v2622_v10  ;;  %v5176_v20 = vmul.f32 %v20180_v35, %v5048_v38  ;;  %v6335_v40 = vmul.f32 %v6206_v46, %v5663_v18  ;;  %v5681_v60 = vrot.slane %v5680_v32, 2  ;;  %10894 = vmatprep.subr.bf16.mxu0 %v11551_v23 }
 0x44d   : > { %v5177_v49 = vmul.f32 %v20181_v2, %v5049_v36  ;;  %v20182_v56 = vunpack.i.l.bf16 %v20178_v48  ;;  %v6334_v30 = vmul.f32 %v6201_v57, %v5656_v33  ;;  %v20184_v18 = vunpack.i.l.bf16 %v20183_v58  ;;  %10895 = vmatpush3.bf16.msra.mxu0 %v11551_v23 }
 0x44e   : > { %v5304_v7 = vmul.f32 %v5176_v20, %v5176_v20  ;;  %v5669_v25 = vrot.slane %v5668_v29, 1  ;;  %v5689_v41 = vadd.f32 %v5688_v8, %v5687_v12  ;;  %v5700_v50 = vrot.slane %v5699_v9, 4 }
 0x44f   : > { %v3389_v62 = vmul.f32 %v20182_v56, %v2621_v22  ;;  %v5305_v45 = vmul.f32 %v5177_v49, %v5177_v49  ;;  %v3387_v19 = vmul.f32 %v20184_v18, %v2619_v63  ;;  %v5677_v38 = vadd.f32 %v5676_v28, %v5675_v26  ;;  %v11552_v26 = vld [vmem:[%s18725_s7 + $0x50] sm:$0xff]  }
 0x450   : > { %v6923_v53 = vpack.c.bf16 %v17134_v42, %v17134_v42  ;;  %v20185_v57 = vunpack.i.h.bf16 %v20183_v58  ;;  %12057 = vrsqrt.f32 %v17214_v59  ;;  %v5682_v3 = vadd.f32 %v5681_v60, %v5680_v32  ;;  %v20186_v49 = vld [vmem:[#allocation120_spill] sm:$0xff]  ;;  %10896 = vmatprep.subr.bf16.mxu0 %v11552_v26 }
 0x451   : > { %v4497_v4 = vadd.f32 %v3390_v51, %v3389_v62  ;;  %v5692_v36 = vadd.f32 %v5305_v45, %v5304_v7  ;;  %v6922_v12 = vpack.c.bf16 %v17137_v61, %v17137_v61  ;;  %v17242_v42 = vadd.f32 1e-31, %v6335_v40  ;;  %v20190_v45 = vld [vmem:[#allocation110_spill] sm:$0xff]  ;;  %10897 = vmatpush3.bf16.msra.mxu0 %v11552_v26 }
 0x452   : > { %v3388_v33 = vmul.f32 %v20185_v57, %v2620_v0  ;;  %v17244_v51 = vadd.f32 1e-31, %v6334_v30  ;;  %v6925_v46 = vpack.c.bf16 %v17167_v34, %v17167_v34  ;;  %v5670_v35 = vadd.f32 %v5669_v25, %v5668_v29  ;;  %v11553_v29 = vld [vmem:[%s18725_s7 + $0x58] sm:$0xff]  }
 0x453   : > { %v4498_v8 = vrot.slane %v4497_v4, 4  ;;  %v5690_v20 = vrot.slane %v5689_v41, 1  ;;  %v5701_v32 = vadd.f32 %v5700_v50, %v5699_v9  ;;  %v6337_v61 = vmul.f32 %v20186_v49, %v5677_v38  ;;  %10898 = vmatprep.subr.bf16.mxu0 %v11553_v29 }
 0x454   : > { %v4490_v28 = vadd.f32 %v3388_v33, %v3387_v19  ;;  %v17249_v60 = vunpack.c.l.b16 %v6923_v53  ;;  %v17253_v62 = vadd.f32 %v16745_v6, %v14233_v54  ;;  %v5683_v40 = vrot.slane %v5682_v3, 1 }
 0x455   : > { %v4499_v2 = vadd.f32 %v4498_v8, %v4497_v4  ;;  %v17255_v1 = vunpack.c.l.b16 %v6922_v12  ;;  %v17259_v34 = vadd.f32 %v16750_v39, %v14233_v54  ;;  %v17264_v9 = vunpack.c.l.b16 %v6925_v46  ;;  %v11554_v8 = vld [vmem:[%s18725_s7 + $0x60] sm:$0xff]   ;;  %10899 = vmatpush3.bf16.msra.mxu0 %v11553_v29 }
 0x456   : > { %20187 = vst [vmem:[#allocation106_spill] sm:$0xff] %v17249_v60  ;;  %v4491_v56 = vrot.slane %v4490_v28, 4  ;;  %v5693_v7 = vrot.slane %v5692_v36, 4  ;;  %v6924_v6 = vpack.c.bf16 %v17191_v21, %v17191_v21  ;;  %v17269_v18 = vmul.f32 %v20190_v45, %v5670_v35  ;;  %v20191_v35 = vld [vmem:[#allocation125_spill] sm:$0xff]  ;;  %10900 = vmatprep.subr.bf16.mxu0 %v11554_v8 }
 0x457   : > { %20188 = vst [vmem:[#allocation57_spill] sm:$0xff] %v17255_v1  ;;  %v4500_v30 = vrot.slane %v4499_v2, 2  ;;  %20189 = vst [vmem:[#allocation29_spill] sm:$0xff] %v17264_v9  ;;  %v5691_v19 = vadd.f32 %v5690_v20, %v5689_v41  ;;  %v5702_v25 = vrot.slane %v5701_v32, 2  ;;  %v17271_v39 = vadd.f32 1e-31, %v6337_v61 }
 0x458   : > { %v4492_v23 = vadd.f32 %v4491_v56, %v4490_v28  ;;  %v2625_v38 = vmax.f32 %v17253_v62, 0.0  ;;  %v17276_v53 = vadd.f32 %v16755_v31, %v14233_v54  ;;  %v17278_v57 = vadd.f32 %v5683_v40, %v5682_v3  ;;  %v20197_v45 = vld [vmem:[#allocation61_spill] sm:$0xff]  ;;  %v20261_v1 = vld [vmem:[#allocation7_spill] sm:$0xff] }
 0x459   : > { %v4501_v50 = vadd.f32 %v4500_v30, %v4499_v2  ;;  %v19088_v12 = vmax.f32 %v17259_v34, 0.0  ;;  %v17283_v41 = vadd.f32 %v16802_v17, %v14233_v54  ;;  %v5694_v46 = vadd.f32 %v5693_v7, %v5692_v36  ;;  %v20192_v36 = vld [vmem:[#allocation18_spill] sm:$0xff]  ;;  %10901 = vmatpush3.bf16.msra.mxu0 %v11554_v8 }
 0x45a   : > { %v4493_v4 = vrot.slane %v4492_v23, 2  ;;  %v19089_v31 = vmax.f32 %v17276_v53, 0.0  ;;  %v17291_v3 = vadd.f32 %v16839_v15, %v14233_v54  ;;  %v17293_v26 = vpop.eup %12057  ;;  %v6339_v20 = vmul.f32 %v20191_v35, %v5691_v19 }
 0x45b   : > { %v4502_v33 = vrot.slane %v4501_v50, 1  ;;  %v17296_v2 = vadd.f32 %v5702_v25, %v5701_v32  ;;  %v19086_v49 = vmax.f32 %v17283_v41, 0.0  ;;  %v20193_v56 = vunpack.i.l.bf16 %v20192_v36  ;;  %v20195_v32 = vld [vmem:[#allocation99_spill] sm:$0xff] }
 0x45c   : > { %v4494_v28 = vadd.f32 %v4493_v4, %v4492_v23  ;;  %v20194_v15 = vunpack.i.h.bf16 %v20192_v36  ;;  %v17309_v7 = vadd.f32 %v16844_v55, %v14233_v54  ;;  %v20198_v19 = vunpack.i.l.bf16 %v20197_v45  ;;  %v11555_v55 = vld [vmem:[%s18725_s7 + $0x68] sm:$0xff]  }
 0x45d   : > { %v4503_v17 = vadd.f32 %v4502_v33, %v4501_v50  ;;  %v3393_v40 = vmul.f32 %v20193_v56, %v2625_v38  ;;  %v20199_v50 = vunpack.i.h.bf16 %v20197_v45  ;;  %v17324_v33 = vadd.f32 %v16851_v11, %v14233_v54  ;;  %10902 = vmatprep.subr.bf16.mxu0 %v11555_v55 }
 0x45e   : > { %v4495_v61 = vrot.slane %v4494_v28, 1  ;;  %v3394_v30 = vmul.f32 %v20194_v15, %v19089_v31  ;;  %v3391_v25 = vmul.f32 %v20198_v19, %v19088_v12  ;;  %v5695_v29 = vrot.slane %v5694_v46, 2  ;;  %10903 = vmatpush3.bf16.msra.mxu0 %v11555_v55  ;;  %v20212_v55 = vld [vmem:[#allocation58_spill] sm:$0xff] }
 0x45f   : > { %v17312_v23 = vmul.f32 %v20195_v32, %v4503_v17  ;;  %v3392_v4 = vmul.f32 %v20199_v50, %v19086_v49  ;;  %v2629_v56 = vmax.f32 %v17291_v3, 0.0  ;;  %v19087_v19 = vmax.f32 %v17324_v33, 0.0  ;;  %v20200_v50 = vld [vmem:[#allocation48_spill] sm:$0xff]  ;;  %v20235_v3 = vld [vmem:[#allocation90_spill] sm:$0xff] }
 0x460   : > { %v4496_v35 = vadd.f32 %v4495_v61, %v4494_v28  ;;  %v4511_v17 = vadd.f32 %v3394_v30, %v3393_v40  ;;  %v19093_v28 = vmax.f32 %v17309_v7, 0.0  ;;  %v17343_v61 = vadd.f32 %v16859_v13, %v14233_v54  ;;  %v20204_v30 = vld [vmem:[#allocation23_spill] sm:$0xff] }
 0x461   : > { %20196 = vst [vmem:[#allocation65_spill] sm:$0xff] %v17312_v23  ;;  %v5054_v15 = vsub.f32 %v2621_v22, %v17312_v23  ;;  %v5055_v32 = vsub.f32 %v2622_v10, %v17312_v23  ;;  %v4504_v11 = vadd.f32 %v3392_v4, %v3391_v25  ;;  %v20202_v5 = vunpack.i.l.bf16 %v20178_v48 }
 0x462   : > { %v17338_v52 = vmul.f32 %v20200_v50, %v4496_v35  ;;  %v4512_v49 = vrot.slane %v4511_v17, 4  ;;  %v20203_v24 = vunpack.i.h.bf16 %v20178_v48  ;;  %v20205_v25 = vunpack.i.h.bf16 %v20204_v30  ;;  %v11556_v35 = vld [vmem:[%s18725_s7 + $0x70] sm:$0xff]  }
 0x463   : > { %v5182_v22 = vmul.f32 %v20202_v5, %v5054_v15  ;;  %v4505_v40 = vrot.slane %v4504_v11, 4  ;;  %v5696_v13 = vadd.f32 %v5695_v29, %v5694_v46  ;;  %v20206_v15 = vunpack.i.l.bf16 %v20204_v30  ;;  %10904 = vmatprep.subr.bf16.mxu0 %v11556_v35 }
 0x464   : > { %20201 = vst [vmem:[#allocation114_spill] sm:$0xff] %v17338_v52  ;;  %v5183_v10 = vmul.f32 %v20203_v24, %v5055_v32  ;;  %v3398_v4 = vmul.f32 %v20205_v25, %v19087_v19  ;;  %v5052_v8 = vsub.f32 %v2619_v63, %v17338_v52  ;;  %v5053_v48 = vsub.f32 %v2620_v0, %v17338_v52 }
 0x465   : > { %v3397_v32 = vmul.f32 %v20206_v15, %v2629_v56  ;;  %v5310_v50 = vmul.f32 %v5182_v22, %v5182_v22  ;;  %v4513_v24 = vadd.f32 %v4512_v49, %v4511_v17  ;;  %v4506_v25 = vadd.f32 %v4505_v40, %v4504_v11  ;;  %v20209_v15 = vld [vmem:[#allocation19_spill] sm:$0xff]  ;;  %10905 = vmatpush3.bf16.msra.mxu0 %v11556_v35 }
 0x466   : > { %v5311_v5 = vmul.f32 %v5183_v10, %v5183_v10  ;;  %v20207_v19 = vunpack.i.l.bf16 %v20183_v58  ;;  %v20208_v29 = vunpack.i.h.bf16 %v20183_v58  ;;  %v19090_v12 = vmax.f32 %v17343_v61, 0.0 }
 0x467   : > { %v4525_v63 = vadd.f32 %v3398_v4, %v3397_v32  ;;  %v4514_v0 = vrot.slane %v4513_v24, 2  ;;  %v4507_v31 = vrot.slane %v4506_v25, 2  ;;  %v20210_v22 = vunpack.i.l.bf16 %v20209_v15 }
 0x468   : > { %v5180_v46 = vmul.f32 %v20207_v19, %v5052_v8  ;;  %v5181_v43 = vmul.f32 %v20208_v29, %v5053_v48  ;;  %v5713_v47 = vadd.f32 %v5311_v5, %v5310_v50  ;;  %v20211_v58 = vunpack.i.h.bf16 %v20209_v15 }
 0x469   : > { %v3395_v10 = vmul.f32 %v20210_v22, %v19093_v28  ;;  %v4526_v11 = vrot.slane %v4525_v63, 4  ;;  %v17380_v40 = vadd.f32 1e-31, %v17269_v18  ;;  %v6338_v4 = vmul.f32 %v20212_v55, %v17278_v57  ;;  %v20213_v57 = vld [vmem:[#allocation43_spill] sm:$0xff] }
 0x46a   : > { %v5308_v49 = vmul.f32 %v5180_v46, %v5180_v46  ;;  %v5309_v17 = vmul.f32 %v5181_v43, %v5181_v43  ;;  %v3396_v19 = vmul.f32 %v20211_v58, %v19090_v12  ;;  %v4515_v8 = vadd.f32 %v4514_v0, %v4513_v24  ;;  %v20215_v0 = vld [vmem:[#allocation92_spill] sm:$0xff] }
 0x46b   : > { %v4508_v48 = vadd.f32 %v4507_v31, %v4506_v25  ;;  %v17384_v32 = vadd.f32 1e-31, %v6339_v20  ;;  %v4527_v5 = vadd.f32 %v4526_v11, %v4525_v63  ;;  %12059 = vrsqrt.f32 %v17271_v39 }
 0x46c   : > { %v17386_v50 = vadd.f32 %v5309_v17, %v5308_v49  ;;  %v4518_v46 = vadd.f32 %v3396_v19, %v3395_v10  ;;  %v5704_v29 = vrot.slane %v17296_v2, 1  ;;  %v4516_v43 = vrot.slane %v4515_v8, 1  ;;  %v20216_v17 = vld [vmem:[#allocation103_spill] sm:$0xff] }
 0x46d   : > { %v4509_v22 = vrot.slane %v4508_v48, 1  ;;  %v5697_v18 = vrot.slane %v5696_v13, 1  ;;  %v4528_v58 = vrot.slane %v4527_v5, 2  ;;  %v17392_v24 = vadd.f32 %v20213_v57, %v14233_v54  ;;  %v20217_v19 = vld [vmem:[#allocation39_spill] sm:$0xff] }
 0x46e   : > { %v4519_v12 = vrot.slane %v4518_v46, 4  ;;  %12061 = vrsqrt.f32 %v17380_v40  ;;  %v17398_v31 = vunpack.c.l.b16 %v6924_v6  ;;  %v4517_v20 = vadd.f32 %v4516_v43, %v4515_v8 }
 0x46f   : > { %v4510_v35 = vadd.f32 %v4509_v22, %v4508_v48  ;;  %12063 = vrsqrt.f32 %v17384_v32  ;;  %v17401_v25 = vadd.f32 1e-31, %v6338_v4  ;;  %v4529_v63 = vadd.f32 %v4528_v58, %v4527_v5  ;;  %v20218_v4 = vld [vmem:[#allocation96_spill] sm:$0xff] }
 0x470   : > { %20214 = vst [vmem:[#allocation73_spill] sm:$0xff] %v17398_v31  ;;  %v17405_v10 = vadd.f32 %v20215_v0, %v14233_v54  ;;  %v17408_v49 = vadd.f32 %v5704_v29, %v17296_v2  ;;  %v4937_v11 = vmul.f32 %v20216_v17, %v4517_v20  ;;  %v4520_v6 = vadd.f32 %v4519_v12, %v4518_v46 }
 0x471   : > { %v4936_v21 = vmul.f32 %v20217_v19, %v4510_v35  ;;  %v17412_v55 = vadd.f32 %v5697_v18, %v5696_v13  ;;  %v5714_v8 = vrot.slane %v5713_v47, 4  ;;  %v19092_v48 = vmax.f32 %v17392_v24, 0.0 }
 0x472   : > { %v17417_v5 = vadd.f32 %v20218_v4, %v14233_v54  ;;  %v5058_v43 = vsub.f32 %v2625_v38, %v4937_v11  ;;  %v20219_v2 = vmax.f32 %v17276_v53, 0.0  ;;  %v6929_v22 = vpack.c.bf16 %v4937_v11, %v4937_v11 }
 0x473   : > { %v4530_v58 = vrot.slane %v4529_v63, 1  ;;  %v20220_v57 = vmax.f32 %v17259_v34, 0.0  ;;  %v20221_v13 = vmax.f32 %v17283_v41, 0.0  ;;  %v6928_v18 = vpack.c.bf16 %v4936_v21, %v4936_v21  ;;  %v20226_v41 = vld [vmem:[#allocation35_spill] sm:$0xff] }
 0x474   : > { %v5059_v29 = vsub.f32 %v20219_v2, %v4937_v11  ;;  %v19091_v20 = vmax.f32 %v17405_v10, 0.0  ;;  %v20222_v35 = vunpack.i.l.bf16 %v20192_v36  ;;  %v20223_v62 = vunpack.i.h.bf16 %v20192_v36 }
 0x475   : > { %v5056_v12 = vsub.f32 %v20220_v57, %v4936_v21  ;;  %v5057_v46 = vsub.f32 %v20221_v13, %v4936_v21  ;;  %v7467_v17 = vunpack.c.l.b16 %v6929_v22  ;;  %v4521_v53 = vrot.slane %v4520_v6, 2  ;;  %v17440_v57 = vpop.eup %12059 }
 0x476   : > { %v5186_v0 = vmul.f32 %v20222_v35, %v5058_v43  ;;  %v5187_v38 = vmul.f32 %v20223_v62, %v5059_v29  ;;  %v20224_v11 = vunpack.i.l.bf16 %v20197_v45  ;;  %v20225_v34 = vunpack.i.h.bf16 %v20197_v45  ;;  %v11557_v45 = vld [vmem:[%s18725_s7 + $0x78] sm:$0xff]  }
 0x477   : > { %v7466_v2 = vunpack.c.l.b16 %v6928_v18  ;;  %v17438_v21 = vadd.f32 %v20226_v41, %v14233_v54  ;;  %v5715_v13 = vadd.f32 %v5714_v8, %v5713_v47  ;;  %v4531_v36 = vadd.f32 %v4530_v58, %v4529_v63  ;;  %v20228_v8 = vld [vmem:[#allocation135_spill] sm:$0xff]  ;;  %10906 = vmatprep.subr.bf16.mxu0 %v11557_v45 }
 0x478   : > { %v5184_v19 = vmul.f32 %v20224_v11, %v5056_v12  ;;  %v5185_v4 = vmul.f32 %v20225_v34, %v5057_v46  ;;  %v5314_v43 = vmul.f32 %v5186_v0, %v5186_v0  ;;  %v5315_v35 = vmul.f32 %v5187_v38, %v5187_v38  ;;  %v11558_v46 = vld [vmem:[%s18723_s5] sm:$0xff]   ;;  %v17452_v18 = vpop.eup %12061  ;;  %10907 = vmatpush3.bf16.msra.mxu0 %v11557_v45 }
 0x479   : > { %v5707_v29 = vrot.slane %v17386_v50, 4  ;;  %v17444_v12 = vsel %vm7162_vm2, %v7467_v17, %v7466_v2  ;;  %v17455_v63 = vmul.f32 %v20228_v8, %v4531_v36  ;;  %v4522_v58 = vadd.f32 %v4521_v53, %v4520_v6  ;;  %v17458_v38 = vpop.eup %12063  ;;  %v20229_v11 = vld [vmem:[#allocation94_spill] sm:$0xff]  ;;  %10916 = vmatprep.subr.bf16.mxu0 %v11558_v46 }
 0x47a   : > { %v5312_v22 = vmul.f32 %v5184_v19, %v5184_v19  ;;  %v5313_v62 = vmul.f32 %v5185_v4, %v5185_v4  ;;  %20227 = vst [vmem:[#allocation105_spill] sm:$0xff] %v17444_v12  ;;  %v5727_v47 = vadd.f32 %v5315_v35, %v5314_v43  ;;  %v19094_v0 = vmax.f32 %v17417_v5, 0.0 }
 0x47b   : > { %v20230_v19 = vunpack.i.l.bf16 %v20229_v11  ;;  %v20231_v4 = vunpack.i.h.bf16 %v20229_v11  ;;  %v5716_v43 = vrot.slane %v5715_v13, 2  ;;  %v5062_v53 = vsub.f32 %v2629_v56, %v17455_v63 }
 0x47c   : > { %v5720_v17 = vadd.f32 %v5313_v62, %v5312_v22  ;;  %v5728_v6 = vrot.slane %v5727_v47, 4  ;;  %v20232_v35 = vmax.f32 %v17324_v33, 0.0  ;;  %v5708_v22 = vadd.f32 %v5707_v29, %v17386_v50 }
 0x47d   : > { %v3401_v34 = vmul.f32 %v20230_v19, %v19092_v48  ;;  %v3402_v2 = vmul.f32 %v20231_v4, %v19091_v20  ;;  %v4523_v8 = vrot.slane %v4522_v58, 1  ;;  %v20233_v20 = vunpack.i.l.bf16 %v20204_v30 }
 0x47e   : > { %v5063_v36 = vsub.f32 %v20232_v35, %v17455_v63  ;;  %v5721_v62 = vrot.slane %v5720_v17, 4  ;;  %v5729_v4 = vadd.f32 %v5728_v6, %v5727_v47  ;;  %v20234_v28 = vunpack.i.h.bf16 %v20204_v30 }
 0x47f   : > { %v4539_v19 = vadd.f32 %v3402_v2, %v3401_v34  ;;  %v5190_v48 = vmul.f32 %v20233_v20, %v5062_v53  ;;  %v20236_v56 = vunpack.i.l.bf16 %v20235_v3  ;;  %v4524_v45 = vadd.f32 %v4523_v8, %v4522_v58 }
 0x480   : > { %v5191_v41 = vmul.f32 %v20234_v28, %v5063_v36  ;;  %v5722_v35 = vadd.f32 %v5721_v62, %v5720_v17  ;;  %v20237_v50 = vmax.f32 %v17438_v21, 0.0  ;;  %v20238_v29 = vunpack.i.h.bf16 %v20235_v3  ;;  %v20239_v28 = vld [vmem:[#allocation130_spill] sm:$0xff]  ;;  %v20240_v17 = vld [vmem:[#allocation64_spill] sm:$0xff] }
 0x481   : > { %v3399_v33 = vmul.f32 %v20236_v56, %v19094_v0  ;;  %v4540_v9 = vrot.slane %v4539_v19, 4  ;;  %12065 = vrsqrt.f32 %v17401_v25  ;;  %v5730_v47 = vrot.slane %v5729_v4, 2 }
 0x482   : > { %v3400_v46 = vmul.f32 %v20238_v29, %v20237_v50  ;;  %v5318_v20 = vmul.f32 %v5190_v48, %v5190_v48  ;;  %v5319_v34 = vmul.f32 %v5191_v41, %v5191_v41  ;;  %v5723_v30 = vrot.slane %v5722_v35, 2 }
 0x483   : > { %v17490_v2 = vmul.f32 %v20239_v28, %v4524_v45  ;;  %v4541_v6 = vadd.f32 %v4540_v9, %v4539_v19  ;;  %v6340_v58 = vmul.f32 %v20240_v17, %v17412_v55  ;;  %v5717_v36 = vadd.f32 %v5716_v43, %v5715_v13 }
 0x484   : > { %v4532_v53 = vadd.f32 %v3400_v46, %v3399_v33  ;;  %v5731_v62 = vadd.f32 %v5730_v47, %v5729_v4  ;;  %v5741_v8 = vadd.f32 %v5319_v34, %v5318_v20  ;;  %v5709_v56 = vrot.slane %v5708_v22, 2 }
 0x485   : > { %v5724_v0 = vadd.f32 %v5723_v30, %v5722_v35  ;;  %v20241_v50 = vmax.f32 %v17309_v7, 0.0  ;;  %v20242_v48 = vmax.f32 %v17343_v61, 0.0  ;;  %v4542_v9 = vrot.slane %v4541_v6, 2  ;;  %v20245_v35 = vld [vmem:[#allocation33_spill] sm:$0xff] }
 0x486   : > { %v5732_v45 = vrot.slane %v5731_v62, 1  ;;  %v5742_v28 = vrot.slane %v5741_v8, 4  ;;  %v4533_v19 = vrot.slane %v4532_v53, 4  ;;  %v20243_v55 = vunpack.i.l.bf16 %v20209_v15 }
 0x487   : > { %v5060_v29 = vsub.f32 %v20241_v50, %v17490_v2  ;;  %v5061_v41 = vsub.f32 %v20242_v48, %v17490_v2  ;;  %v5725_v33 = vrot.slane %v5724_v0, 1  ;;  %v20244_v43 = vunpack.i.h.bf16 %v20209_v15  ;;  %v20246_v48 = vld [vmem:[#allocation77_spill] sm:$0xff]  ;;  %v20247_v15 = vld [vmem:[#allocation36_spill] sm:$0xff] }
 0x488   : > { %v17506_v46 = vadd.f32 %v20245_v35, %v14233_v54  ;;  %v5733_v7 = vadd.f32 %v5732_v45, %v5731_v62  ;;  %v5743_v47 = vadd.f32 %v5742_v28, %v5741_v8  ;;  %v4543_v20 = vadd.f32 %v4542_v9, %v4541_v6  ;;  %v20248_v62 = vld [vmem:[#allocation78_spill] sm:$0xff]  ;;  %v20250_v28 = vld [vmem:[#allocation91_spill] sm:$0xff] }
 0x489   : > { %v5188_v13 = vmul.f32 %v20243_v55, %v5060_v29  ;;  %v5189_v4 = vmul.f32 %v20244_v43, %v5061_v41  ;;  %v4534_v61 = vadd.f32 %v4533_v19, %v4532_v53  ;;  %v5710_v34 = vadd.f32 %v5709_v56, %v5708_v22  ;;  %v20249_v56 = vld [vmem:[#allocation80_spill] sm:$0xff] }
 0x48a   : > { %v5726_v30 = vadd.f32 %v5725_v33, %v5724_v0  ;;  %v17509_v31 = vmul.f32 %v20246_v48, %v5733_v7  ;;  %v5744_v12 = vrot.slane %v5743_v47, 2  ;;  %v4544_v29 = vrot.slane %v4543_v20, 1  ;;  %v20256_v48 = vld [vmem:[#allocation6_spill] sm:$0xff] }
 0x48b   : > { %v5316_v17 = vmul.f32 %v5188_v13, %v5188_v13  ;;  %v5317_v50 = vmul.f32 %v5189_v4, %v5189_v4  ;;  %v4535_v55 = vrot.slane %v4534_v61, 2  ;;  %v19096_v35 = vmax.f32 %v17506_v46, 0.0  ;;  %v17519_v22 = vpop.eup %12065 }
 0x48c   : > { %v17512_v41 = vmul.f32 %v20247_v15, %v5726_v30  ;;  %v17517_v6 = vadd.f32 %v20248_v62, %v14233_v54  ;;  %v5745_v0 = vadd.f32 %v5744_v12, %v5743_v47  ;;  %v4545_v53 = vadd.f32 %v4544_v29, %v4543_v20  ;;  %v20251_v30 = vld [vmem:[#allocation49_spill] sm:$0xff]  ;;  %v20253_v20 = vld [vmem:[#allocation46_spill] sm:$0xff] }
 0x48d   : > { %v5734_v43 = vadd.f32 %v5317_v50, %v5316_v17  ;;  %v4536_v8 = vadd.f32 %v4535_v55, %v4534_v61  ;;  %v17523_v45 = vadd.f32 %v20249_v56, %v14233_v54  ;;  %v6341_v9 = vmul.f32 %v20250_v28, %v17408_v49  ;;  %v6241_v55 = vpop.permute.xlu0 %6240 }
 0x48e   : > { %v17527_v19 = vadd.f32 1e-31, %v6340_v58  ;;  %v19095_v13 = vmax.f32 %v17517_v6, 0.0  ;;  %v5718_v4 = vrot.slane %v5717_v36, 1  ;;  %v5711_v7 = vrot.slane %v5710_v34, 1 }
 0x48f   : > { %v5735_v33 = vrot.slane %v5734_v43, 4  ;;  %v17531_v17 = vmul.f32 %v20251_v30, %v4545_v53  ;;  %v4537_v12 = vrot.slane %v4536_v8, 1  ;;  %v20254_v61 = vunpack.i.l.bf16 %v20253_v20 }
 0x490   : > { %v20255_v49 = vunpack.i.h.bf16 %v20253_v20  ;;  %v17543_v29 = vadd.f32 %v20256_v48, %v14233_v54  ;;  %v5746_v15 = vrot.slane %v5745_v0, 1  ;;  %v20257_v62 = vmax.f32 %v17392_v24, 0.0 }
 0x491   : > { %20252 = vst [vmem:[#allocation74_spill] sm:$0xff] %v17531_v17  ;;  %v5736_v47 = vadd.f32 %v5735_v33, %v5734_v43  ;;  %v3405_v50 = vmul.f32 %v20254_v61, %v19096_v35  ;;  %v20258_v53 = vmax.f32 %v17405_v10, 0.0  ;;  %v4538_v30 = vadd.f32 %v4537_v12, %v4536_v8  ;;  %v20263_v8 = vld [vmem:[#allocation98_spill] sm:$0xff] }
 0x492   : > { %v3406_v58 = vmul.f32 %v20255_v49, %v19095_v13  ;;  %v5066_v43 = vsub.f32 %v20257_v62, %v17531_v17  ;;  %v19097_v49 = vmax.f32 %v17543_v29, 0.0  ;;  %v17553_v13 = vadd.f32 1e-31, %v6341_v9 }
 0x493   : > { %v5067_v56 = vsub.f32 %v20258_v53, %v17531_v17  ;;  %v5737_v33 = vrot.slane %v5736_v47, 2  ;;  %v5719_v54 = vadd.f32 %v5718_v4, %v5717_v36  ;;  %v20259_v48 = vunpack.i.l.bf16 %v20229_v11 }
 0x494   : > { %v4553_v61 = vadd.f32 %v3406_v58, %v3405_v50  ;;  %v20260_v24 = vunpack.i.h.bf16 %v20229_v11  ;;  %v5712_v60 = vadd.f32 %v5711_v7, %v5710_v34  ;;  %v17560_v10 = vmul.f32 %v20261_v1, %v4538_v30  ;;  %v6246_v30 = vpop.permute.xlu0 %6245 }
 0x495   : > { %v5194_v35 = vmul.f32 %v20259_v48, %v5066_v43  ;;  %v20264_v12 = vunpack.i.h.bf16 %v20263_v8  ;;  %v5738_v58 = vadd.f32 %v5737_v33, %v5736_v47  ;;  %v20265_v36 = vmax.f32 %v17523_v45, 0.0 }
 0x496   : > { %v5195_v62 = vmul.f32 %v20260_v24, %v5067_v56  ;;  %20262 = vst [vmem:[#allocation45_spill] sm:$0xff] %v17560_v10  ;;  %v4554_v53 = vrot.slane %v4553_v61, 4  ;;  %v20266_v4 = vunpack.i.l.bf16 %v20263_v8  ;;  %12067 = vrsqrt.f32 %v17527_v19 }
 0x497   : > { %v3404_v50 = vmul.f32 %v20264_v12, %v19097_v49  ;;  %v5322_v9 = vmul.f32 %v5194_v35, %v5194_v35  ;;  %v5747_v11 = vadd.f32 %v5746_v15, %v5745_v0  ;;  %v20267_v1 = vmax.f32 %v17417_v5, 0.0 }
 0x498   : > { %v5323_v28 = vmul.f32 %v5195_v62, %v5195_v62  ;;  %v3403_v43 = vmul.f32 %v20266_v4, %v20265_v36  ;;  %v20268_v7 = vmax.f32 %v17438_v21, 0.0  ;;  %v4555_v33 = vadd.f32 %v4554_v53, %v4553_v61 }
 0x499   : > { %v5064_v34 = vsub.f32 %v20267_v1, %v17560_v10  ;;  %v6343_v24 = vmul.f32 %v6246_v30, %v5719_v54  ;;  %v6342_v62 = vmul.f32 %v6241_v55, %v5712_v60  ;;  %v20269_v12 = vunpack.i.l.bf16 %v20235_v3 }
 0x49a   : > { %v5065_v56 = vsub.f32 %v20268_v7, %v17560_v10  ;;  %v5755_v47 = vadd.f32 %v5323_v28, %v5322_v9  ;;  %v4546_v48 = vadd.f32 %v3404_v50, %v3403_v43  ;;  %v20270_v15 = vunpack.i.h.bf16 %v20235_v3  ;;  %v20271_v7 = vld [vmem:[#allocation67_spill] sm:$0xff] }
 0x49b   : > { %v5192_v0 = vmul.f32 %v20269_v12, %v5064_v34  ;;  %v5739_v36 = vrot.slane %v5738_v58, 1  ;;  %v4556_v1 = vrot.slane %v4555_v33, 2  ;;  %v6347_v49 = vmul.f32 %v20271_v7, %v5747_v11 }
 0x49c   : > { %v5193_v5 = vmul.f32 %v20270_v15, %v5065_v56  ;;  %v5756_v4 = vrot.slane %v5755_v47, 4  ;;  %v4547_v21 = vrot.slane %v4546_v48, 4  ;;  %v6931_v35 = vpack.c.bf16 %v17455_v63, %v17455_v63 }
 0x49d   : > { %v5320_v28 = vmul.f32 %v5192_v0, %v5192_v0  ;;  %v17587_v54 = vadd.f32 1e-31, %v17509_v31  ;;  %v6930_v60 = vpack.c.bf16 %v17490_v2, %v17490_v2  ;;  %v4557_v55 = vadd.f32 %v4556_v1, %v4555_v33  ;;  %v20273_v2 = vld [vmem:[#allocation75_spill] sm:$0xff] }
 0x49e   : > { %v5321_v61 = vmul.f32 %v5193_v5, %v5193_v5  ;;  %v4548_v3 = vadd.f32 %v4547_v21, %v4546_v48  ;;  %v17591_v53 = vadd.f32 1e-31, %v6343_v24  ;;  %v17594_v50 = vadd.f32 1e-31, %v17512_v41  ;;  %v20274_v33 = vld [vmem:[#allocation83_spill] sm:$0xff]  ;;  %v20277_v5 = vld [vmem:[#allocation12_spill] sm:$0xff] }
 0x49f   : > { %v5757_v9 = vadd.f32 %v5756_v4, %v5755_v47  ;;  %v17596_v11 = vadd.f32 1e-31, %v6342_v62  ;;  %v5740_v63 = vadd.f32 %v5739_v36, %v5738_v58  ;;  %v4558_v34 = vrot.slane %v4557_v55, 1  ;;  %v20276_v62 = vld [vmem:[#allocation47_spill] sm:$0xff] }
 0x4a0   : > { %v5748_v43 = vadd.f32 %v5321_v61, %v5320_v28  ;;  %v4549_v56 = vrot.slane %v4548_v3, 2  ;;  %v17598_v30 = vadd.f32 1e-31, %v6347_v49  ;;  %v17600_v31 = vunpack.c.l.b16 %v6931_v35  ;;  %v17607_v0 = vpop.eup %12067 }
 0x4a1   : > { %v6641_v48 = vmul.f32 %v20274_v33, %v20273_v2  ;;  %12069 = vrsqrt.f32 %v17587_v54  ;;  %v17605_v24 = vunpack.c.l.b16 %v6930_v60  ;;  %v4559_v41 = vadd.f32 %v4558_v34, %v4557_v55 }
 0x4a2   : > { %20272 = vst [vmem:[#allocation86_spill] sm:$0xff] %v17600_v31  ;;  %v5749_v12 = vrot.slane %v5748_v43, 4  ;;  %v4550_v47 = vadd.f32 %v4549_v56, %v4548_v3  ;;  %12071 = vrsqrt.f32 %v17594_v50  ;;  %v5758_v58 = vrot.slane %v5757_v9, 2 }
 0x4a3   : > { %20275 = vst [vmem:[#allocation127_spill] sm:$0xff] %v17605_v24  ;;  %v6346_v15 = vmul.f32 %v20276_v62, %v5740_v63  ;;  %v17614_v36 = vmul.f32 %v20277_v5, %v4559_v41  ;;  %vm6642_vm9 = vcmp.eq.f32.partialorder %v20273_v2, inf  ;;  %12073 = vrsqrt.f32 %v17598_v30  ;;  %v20282_v63 = vld [vmem:[#allocation30_spill] sm:$0xff] }
 0x4a4   : > { %v5750_v35 = vadd.f32 %v5749_v12, %v5748_v43  ;;  %v4551_v4 = vrot.slane %v4550_v47, 1  ;;  %v6643_v7 = vsel %vm6642_vm9, %v20273_v2, %v6641_v48  ;;  %v20279_v28 = vmax.f32 %v17506_v46, 0.0  ;;  %v20281_v43 = vld [vmem:[#allocation117_spill] sm:$0xff] }
 0x4a5   : > { %20278 = vst [vmem:[#allocation62_spill] sm:$0xff] %v17614_v36  ;;  %v20280_v60 = vmax.f32 %v17517_v6, 0.0  ;;  %v6648_v34 = vmul.f32 %v20282_v63, %v20281_v43  ;;  %v5759_v56 = vadd.f32 %v5758_v58, %v5757_v9  ;;  %vm6644_vm7 = vcmp.eq.f32.partialorder %v20273_v2, 0.0  ;;  %v20285_v6 = vld [vmem:[#allocation63_spill] sm:$0xff]  ;;  %v20286_v9 = vld [vmem:[#allocation14_spill] sm:$0xff] }
 0x4a6   : > { %v5751_v1 = vrot.slane %v5750_v35, 2  ;;  %v5070_v61 = vsub.f32 %v20279_v28, %v17614_v36  ;;  %v4552_v3 = vadd.f32 %v4551_v4, %v4550_v47  ;;  %v6645_v33 = vand.u32 2147483648, %v20273_v2  ;;  %v20287_v58 = vld [vmem:[#allocation71_spill] sm:$0xff] }
 0x4a7   : > { %v5071_v55 = vsub.f32 %v20280_v60, %v17614_v36  ;;  %v17631_v41 = vadd.f32 1e-31, %v6346_v15  ;;  %v20283_v48 = vunpack.i.l.bf16 %v20253_v20  ;;  %v20284_v62 = vunpack.i.h.bf16 %v20253_v20 }
 0x4a8   : > { %v5752_v12 = vadd.f32 %v5751_v1, %v5750_v35  ;;  %v17638_v28 = vmul.f32 %v20285_v6, %v4552_v3  ;;  %v17640_v4 = vsel %vm6644_vm7, %v6645_v33, %v6643_v7  ;;  %vm6649_vm8 = vcmp.eq.f32.partialorder %v20281_v43, inf  ;;  %v20292_v6 = vld [vmem:[#allocation16_spill] sm:$0xff] }
 0x4a9   : > { %v5198_v46 = vmul.f32 %v20283_v48, %v5070_v61  ;;  %v5199_v5 = vmul.f32 %v20284_v62, %v5071_v55  ;;  %v6655_v35 = vmul.f32 %v20287_v58, %v20286_v9  ;;  %v20288_v1 = vmax.f32 %v17523_v45, 0.0  ;;  %v20293_v58 = vld [vmem:[#allocation118_spill] sm:$0xff] }
 0x4aa   : > { %v5753_v47 = vrot.slane %v5752_v12, 1  ;;  %v6650_v20 = vsel %vm6649_vm8, %v20281_v43, %v6648_v34  ;;  %v5760_v60 = vrot.slane %v5759_v56, 1  ;;  %v20289_v55 = vmax.f32 %v17543_v29, 0.0 }
 0x4ab   : > { %v5326_v2 = vmul.f32 %v5198_v46, %v5198_v46  ;;  %v5327_v15 = vmul.f32 %v5199_v5, %v5199_v5  ;;  %v5068_v61 = vsub.f32 %v20288_v1, %v17638_v28  ;;  %vm6651_vm12 = vcmp.eq.f32.partialorder %v20281_v43, 0.0  ;;  %v17654_v63 = vpop.eup %12069 }
 0x4ac   : > { %v5069_v3 = vsub.f32 %v20289_v55, %v17638_v28  ;;  %v6652_v7 = vand.u32 2147483648, %v20281_v43  ;;  %v5754_v33 = vadd.f32 %v5753_v47, %v5752_v12  ;;  %v20290_v46 = vunpack.i.l.bf16 %v20263_v8  ;;  %v17659_v45 = vpop.eup %12071  ;;  %v20294_v47 = vld [vmem:[#allocation26_spill] sm:$0xff] }
 0x4ad   : > { %v5769_v48 = vadd.f32 %v5327_v15, %v5326_v2  ;;  %vm6656_vm14 = vcmp.eq.f32.partialorder %v20286_v9, inf  ;;  %v20291_v34 = vunpack.i.h.bf16 %v20263_v8  ;;  %vm6658_vm15 = vcmp.eq.f32.partialorder %v20286_v9, 0.0  ;;  %v20295_v2 = vld [vmem:[#allocation52_spill] sm:$0xff] }
 0x4ae   : > { %v5196_v62 = vmul.f32 %v20290_v46, %v5068_v61  ;;  %v6657_v29 = vsel %vm6656_vm14, %v20286_v9, %v6655_v35  ;;  %v6662_v1 = vmul.f32 %v20293_v58, %v20292_v6  ;;  %v6669_v15 = vmul.f32 %v20295_v2, %v20294_v47  ;;  %v20296_v61 = vld [vmem:[#allocation100_spill] sm:$0xff]  ;;  %v17670_v46 = vpop.eup %12073 }
 0x4af   : > { %v5197_v5 = vmul.f32 %v20291_v34, %v5069_v3  ;;  %v5770_v55 = vrot.slane %v5769_v48, 4  ;;  %12075 = vrsqrt.f32 %v20296_v61  ;;  %v5761_v49 = vadd.f32 %v5760_v60, %v5759_v56 }
 0x4b0   : > { %v5324_v12 = vmul.f32 %v5196_v62, %v5196_v62  ;;  %v17674_v8 = vsel %vm6651_vm12, %v6652_v7, %v6650_v20  ;;  %v6659_v35 = vand.u32 2147483648, %v20286_v9  ;;  %v6348_v3 = vmul.f32 %v17120_v16, %v5754_v33  ;;  %v20297_v62 = vld [vmem:[#allocation104_spill] sm:$0xff] }
 0x4b1   : > { %v5325_v21 = vmul.f32 %v5197_v5, %v5197_v5  ;;  %v5771_v34 = vadd.f32 %v5770_v55, %v5769_v48  ;;  %vm6663_vm1 = vcmp.eq.f32.partialorder %v20292_v6, inf  ;;  %12077 = vrsqrt.f32 %v20297_v62  ;;  %v20298_v16 = vld [vmem:[#allocation128_spill] sm:$0xff]  ;;  %v20299_v55 = vld [vmem:[#allocation50_spill] sm:$0xff] }
 0x4b2   : > { %v17682_v2 = vsel %vm6658_vm15, %v6659_v35, %v6657_v29  ;;  %v6664_v56 = vsel %vm6663_vm1, %v20292_v6, %v6662_v1  ;;  %vm6670_vm6 = vcmp.eq.f32.partialorder %v20294_v47, inf  ;;  %v6666_v20 = vand.u32 2147483648, %v20292_v6 }
 0x4b3   : > { %v5762_v58 = vadd.f32 %v5325_v21, %v5324_v12  ;;  %v5772_v43 = vrot.slane %v5771_v34, 2  ;;  %v6671_v60 = vsel %vm6670_vm6, %v20294_v47, %v6669_v15  ;;  %12079 = vrsqrt.f32 %v20298_v16  ;;  %v20300_v12 = vld [vmem:[#allocation85_spill] sm:$0xff] }
 0x4b4   : > { %v17690_v7 = vmul.f32 %v17179_v27, %v5761_v49  ;;  %vm6665_vm9 = vcmp.eq.f32.partialorder %v20292_v6, 0.0  ;;  %v6673_v21 = vand.u32 2147483648, %v20294_v47  ;;  %v17694_v9 = vadd.f32 1e-31, %v6348_v3  ;;  %v20301_v27 = vld [vmem:[#allocation27_spill] sm:$0xff]  ;;  %v17708_v3 = vpop.permute.xlu1 %6280 }
 0x4b5   : > { %v5763_v33 = vrot.slane %v5762_v58, 4  ;;  %v5773_v48 = vadd.f32 %v5772_v43, %v5771_v34  ;;  %v17696_v5 = vsel %vm6665_vm9, %v6666_v20, %v6664_v56  ;;  %vm6672_vm7 = vcmp.eq.f32.partialorder %v20294_v47, 0.0  ;;  %v20302_v49 = vld [vmem:[#allocation131_spill] sm:$0xff]  ;;  %v20304_v56 = vld [vmem:[#allocation9_spill] sm:$0xff] }
 0x4b6   : > { %v17699_v1 = vsel %vm6672_vm7, %v6673_v21, %v6671_v60  ;;  %v6697_v15 = vmul.f32 %v20300_v12, %v20299_v55  ;;  %v6704_v35 = vmul.f32 %v20302_v49, %v20301_v27  ;;  %vm6677_vm8 = vcmp.eq.f32.partialorder %v20296_v61, inf }
 0x4b7   : > { %v5764_v29 = vadd.f32 %v5763_v33, %v5762_v58  ;;  %v5774_v31 = vrot.slane %v5773_v48, 1  ;;  %v6680_v6 = vand.u32 2147483648, %v20296_v61  ;;  %vm6684_vm12 = vcmp.eq.f32.partialorder %v20297_v62, inf  ;;  %v20303_v58 = vld [vmem:[#allocation112_spill] sm:$0xff] }
 0x4b8   : > { %vm6679_vm14 = vcmp.eq.f32.partialorder %v20296_v61, 0.0  ;;  %v6687_v47 = vand.u32 2147483648, %v20297_v62  ;;  %vm6691_vm15 = vcmp.eq.f32.partialorder %v20298_v16, inf  ;;  %v6711_v43 = vmul.f32 %v20304_v56, %v20303_v58  ;;  %v6286_v10 = vpop.permute.xlu1 %6285 }
 0x4b9   : > { %v5765_v34 = vrot.slane %v5764_v29, 2  ;;  %v12076_v20 = vpop.eup %12075  ;;  %vm6686_vm1 = vcmp.eq.f32.partialorder %v20297_v62, 0.0  ;;  %v6694_v60 = vand.u32 2147483648, %v20298_v16  ;;  %vm6698_vm6 = vcmp.eq.f32.partialorder %v20299_v55, inf }
 0x4ba   : > { %vm6700_vm9 = vcmp.eq.f32.partialorder %v20299_v55, 0.0  ;;  %vm6705_vm7 = vcmp.eq.f32.partialorder %v20301_v27, inf  ;;  %v6676_v21 = vmul.f32 %v12076_v20, %v20296_v61  ;;  %vm6693_vm0 = vcmp.eq.f32.partialorder %v20298_v16, 0.0  ;;  %v20306_v20 = vld [vmem:[#allocation129_spill] sm:$0xff] }
 0x4bb   : > { %v5766_v33 = vadd.f32 %v5765_v34, %v5764_v29  ;;  %v6699_v12 = vsel %vm6698_vm6, %v20299_v55, %v6697_v15  ;;  %v6706_v49 = vsel %vm6705_vm7, %v20301_v27, %v6704_v35  ;;  %v12078_v56 = vpop.eup %12077  ;;  %v5775_v17 = vadd.f32 %v5774_v31, %v5773_v48  ;;  %v20305_v34 = vld [vmem:[#allocation24_spill] sm:$0xff] }
 0x4bc   : > { %v6701_v24 = vand.u32 2147483648, %v20299_v55  ;;  %v6708_v37 = vand.u32 2147483648, %v20301_v27  ;;  %vm6712_vm13 = vcmp.eq.f32.partialorder %v20303_v58, inf  ;;  %v6683_v52 = vmul.f32 %v12078_v56, %v20297_v62 }
 0x4bd   : > { %vm6707_vm11 = vcmp.eq.f32.partialorder %v20301_v27, 0.0  ;;  %v6713_v29 = vsel %vm6712_vm13, %v20303_v58, %v6711_v43  ;;  %v6718_v36 = vmul.f32 %v20306_v20, %v20305_v34  ;;  %v12080_v15 = vpop.eup %12079  ;;  %v6715_v48 = vand.u32 2147483648, %v20303_v58 }
 0x4be   : > { %v6702_v35 = vsel %vm6700_vm9, %v6701_v24, %v6699_v12  ;;  %v6709_v31 = vsel %vm6707_vm11, %v6708_v37, %v6706_v49  ;;  %v6725_v23 = vmul.f32 %v17293_v26, %v17214_v59  ;;  %v5767_v44 = vrot.slane %v5766_v33, 1 }
 0x4bf   : > { %v6678_v27 = vsel %vm6677_vm8, %v20296_v61, %v6676_v21  ;;  %v6690_v43 = vmul.f32 %v12080_v15, %v20298_v16  ;;  %vm6714_vm13 = vcmp.eq.f32.partialorder %v20303_v58, 0.0  ;;  %v17742_v56 = vmul.f32 %v6286_v10, %v5775_v17 }
 0x4c0   : > { %v6685_v37 = vsel %vm6684_vm12, %v20297_v62, %v6683_v52  ;;  %v6716_v24 = vsel %vm6714_vm13, %v6715_v48, %v6713_v29  ;;  %vm6719_vm11 = vcmp.eq.f32.partialorder %v20305_v34, inf  ;;  %vm6726_vm8 = vcmp.eq.f32.partialorder %v17214_v59, inf }
 0x4c1   : > { %v6692_v26 = vsel %vm6691_vm15, %v20298_v16, %v6690_v43  ;;  %v6720_v55 = vsel %vm6719_vm11, %v20305_v34, %v6718_v36  ;;  %12081 = vrsqrt.f32 %v17139_v14  ;;  %v6681_v17 = vsel %vm6679_vm14, %v6680_v6, %v6678_v27 }
 0x4c2   : > { %vm6721_vm6 = vcmp.eq.f32.partialorder %v20305_v34, 0.0  ;;  %v6722_v52 = vand.u32 2147483648, %v20305_v34  ;;  %v6727_v10 = vsel %vm6726_vm8, %v17214_v59, %v6725_v23  ;;  %v17759_v58 = vadd.f32 %v5767_v44, %v5766_v33 }
 0x4c3   : > { %v6688_v21 = vsel %vm6686_vm1, %v6687_v47, %v6685_v37  ;;  %v6729_v36 = vand.u32 2147483648, %v17214_v59  ;;  %12083 = vrsqrt.f32 %v17244_v51  ;;  %v6695_v12 = vsel %vm6693_vm0, %v6694_v60, %v6692_v26 }
 0x4c4   : > { %v6723_v61 = vsel %vm6721_vm6, %v6722_v52, %v6720_v55  ;;  %vm6728_vm12 = vcmp.eq.f32.partialorder %v17214_v59, 0.0  ;;  %12085 = vrsqrt.f32 %v17242_v42  ;;  %vm6733_vm14 = vcmp.eq.f32.partialorder %v17139_v14, inf }
 0x4c5   : > { %v6730_v6 = vsel %vm6728_vm12, %v6729_v36, %v6727_v10  ;;  %v6736_v44 = vand.u32 2147483648, %v17139_v14  ;;  %v6985_v23 = vpack.c.bf16 %v17640_v4, %v17640_v4  ;;  %v6986_v62 = vpack.c.bf16 %v17674_v8, %v17674_v8 }
 0x4c6   : > { %vm6735_vm15 = vcmp.eq.f32.partialorder %v17139_v14, 0.0  ;;  %v6743_v16 = vand.u32 2147483648, %v17244_v51  ;;  %v6987_v59 = vpack.c.bf16 %v17682_v2, %v17682_v2  ;;  %v6988_v47 = vpack.c.bf16 %v17696_v5, %v17696_v5 }
 0x4c7   : > { %v6989_v60 = vpack.c.bf16 %v17699_v1, %v17699_v1  ;;  %vm6740_vm0 = vcmp.eq.f32.partialorder %v17244_v51, inf  ;;  %v6990_v33 = vpack.c.bf16 %v6681_v17, %v6681_v17  ;;  %v6991_v4 = vpack.c.bf16 %v6688_v21, %v6688_v21 }
 0x4c8   : > { %v6993_v49 = vpack.c.bf16 %v6702_v35, %v6702_v35  ;;  %v6994_v29 = vpack.c.bf16 %v6709_v31, %v6709_v31  ;;  %vm6742_vm1 = vcmp.eq.f32.partialorder %v17244_v51, 0.0  ;;  %v6992_v8 = vpack.c.bf16 %v6695_v12, %v6695_v12 }
 0x4c9   : > { %v6995_v34 = vpack.c.bf16 %v6716_v24, %v6716_v24  ;;  %v6997_v20 = vpack.c.bf16 %v6730_v6, %v6730_v6  ;;  %v7130_v15 = vunpack.c.l.b16 %v6985_v23  ;;  %vm6747_vm9 = vcmp.eq.f32.partialorder %v17242_v42, inf }
 0x4ca   : > { %v6996_v2 = vpack.c.bf16 %v6723_v61, %v6723_v61  ;;  %v7131_v48 = vunpack.c.l.b16 %v6986_v62  ;;  %v7132_v5 = vunpack.c.l.b16 %v6987_v59  ;;  %v6750_v27 = vand.u32 2147483648, %v17242_v42 }
 0x4cb   : > { %v7133_v1 = vunpack.c.l.b16 %v6988_v47  ;;  %v7134_v43 = vunpack.c.l.b16 %v6989_v60  ;;  %v7138_v37 = vunpack.c.l.b16 %v6993_v49  ;;  %v12082_v26 = vpop.eup %12081  ;;  %v7135_v55 = vunpack.c.l.b16 %v6990_v33 }
 0x4cc   : > { %v7136_v35 = vunpack.c.l.b16 %v6991_v4  ;;  %v7139_v31 = vunpack.c.l.b16 %v6994_v29  ;;  %v7140_v17 = vunpack.c.l.b16 %v6995_v34  ;;  %v6732_v52 = vmul.f32 %v12082_v26, %v17139_v14 }
 0x4cd   : > { %v7137_v24 = vunpack.c.l.b16 %v6992_v8  ;;  %v7142_v10 = vunpack.c.l.b16 %v6997_v20  ;;  %v7197_v21 = vsel %vm7162_vm2, %v7131_v48, %v7130_v15  ;;  %v12084_v36 = vpop.eup %12083  ;;  %v7141_v12 = vunpack.c.l.b16 %v6996_v2 }
 0x4ce   : > { %v7198_v61 = vsel %vm7164_vm3, %v7132_v5, %v7197_v21  ;;  %v7204_v6 = vsel %vm7162_vm2, %v7139_v31, %v7138_v37  ;;  %v6753_v23 = vmul.f32 %v17452_v18, %v17380_v40  ;;  %v12086_v62 = vpop.eup %12085  ;;  %v6734_v59 = vsel %vm6733_vm14, %v17139_v14, %v6732_v52 }
 0x4cf   : > { %v6739_v47 = vmul.f32 %v12084_v36, %v17244_v51  ;;  %v7199_v60 = vsel %vm7166_vm4, %v7133_v1, %v7198_v61  ;;  %v7205_v33 = vsel %vm7164_vm3, %v7140_v17, %v7204_v6  ;;  %v6737_v4 = vsel %vm6735_vm15, %v6736_v44, %v6734_v59 }
 0x4d0   : > { %v6746_v49 = vmul.f32 %v12086_v62, %v17242_v42  ;;  %v7200_v29 = vsel %vm7168_vm5, %v7134_v43, %v7199_v60  ;;  %v7206_v18 = vsel %vm7166_vm4, %v7141_v12, %v7205_v33  ;;  %v6998_v34 = vpack.c.bf16 %v6737_v4, %v6737_v4 }
 0x4d1   : > { %v6741_v8 = vsel %vm6740_vm0, %v17244_v51, %v6739_v47  ;;  %v7201_v20 = vsel %vm19111_vm10, %v7135_v55, %v7200_v29  ;;  %v7207_v15 = vsel %vm7168_vm5, %v7142_v10, %v7206_v18  ;;  %vm6749_vm7 = vcmp.eq.f32.partialorder %v17242_v42, 0.0 }
 0x4d2   : > { %v6744_v2 = vsel %vm6742_vm1, %v6743_v16, %v6741_v8  ;;  %v6748_v14 = vsel %vm6747_vm9, %v17242_v42, %v6746_v49  ;;  %vm20307_vm13 = vcmask 1046534   ;;  %v7143_v1 = vunpack.c.l.b16 %v6998_v34 }
 0x4d3   : > { %v7202_v44 = vsel %vm20307_vm13, %v7136_v35, %v7201_v20  ;;  %v6751_v48 = vsel %vm6749_vm7, %v6750_v27, %v6748_v14  ;;  %v6999_v5 = vpack.c.bf16 %v6744_v2, %v6744_v2  ;;  %vm20308_vm11 = vcmask 1047559   ;;  %vm20309_vm6 = vmmov %vm20307_vm13 }
 0x4d4   : > { %v7203_v43 = vsel %vm20308_vm11, %v7137_v24, %v7202_v44  ;;  %12087 = vrsqrt.f32 %v17631_v41  ;;  %v6350_v37 = vmul.f32 %v17708_v3, %v17759_v58  ;;  %v7000_v51 = vpack.c.bf16 %v6751_v48, %v6751_v48  ;;  %vm20310_vm14 = vmmov %vm20308_vm11 }
 0x4d5   : > { %vm6754_vm8 = vcmp.eq.f32.partialorder %v17380_v40, inf  ;;  %v17822_v16 = vadd.f32 1e-31, %v17690_v7  ;;  %v7144_v26 = vunpack.c.l.b16 %v6999_v5  ;;  %v7208_v42 = vsel %vm19111_vm10, %v7143_v1, %v7207_v15 }
 0x4d6   : > { %v6755_v27 = vsel %vm6754_vm8, %v17380_v40, %v6753_v23  ;;  %12089 = vrsqrt.f32 %v17694_v9  ;;  %v7145_v55 = vunpack.c.l.b16 %v7000_v51  ;;  %v6757_v35 = vand.u32 2147483648, %v17380_v40 }
 0x4d7   : > { %v6760_v31 = vmul.f32 %v17440_v57, %v17271_v39  ;;  %v17831_v3 = vadd.f32 1e-31, %v17742_v56  ;;  %v7209_v58 = vsel %vm20309_vm6, %v7144_v26, %v7208_v42  ;;  %vm6756_vm12 = vcmp.eq.f32.partialorder %v17380_v40, 0.0 }
 0x4d8   : > { %v6767_v7 = vmul.f32 %v17519_v22, %v17401_v25  ;;  %v17837_v17 = vadd.f32 1e-31, %v6350_v37  ;;  %v7210_v52 = vsel %vm20310_vm14, %v7145_v55, %v7209_v58  ;;  %v17840_v24 = vsel %vm6756_vm12, %v6757_v35, %v6755_v27 }
 0x4d9   : > { %v6774_v10 = vmul.f32 %v17458_v38, %v17384_v32  ;;  %v7227_v57 = vpack.c.b16 %v7210_v52, %v7203_v43  ;;  %vm6761_vm15 = vcmp.eq.f32.partialorder %v17271_v39, inf  ;;  %vm6763_vm0 = vcmp.eq.f32.partialorder %v17271_v39, 0.0 }
 0x4da   : > { %v6764_v56 = vand.u32 2147483648, %v17271_v39  ;;  %v6762_v40 = vsel %vm6761_vm15, %v17271_v39, %v6760_v31  ;;  %vm6768_vm1 = vcmp.eq.f32.partialorder %v17401_v25, inf  ;;  %vm6775_vm9 = vcmp.eq.f32.partialorder %v17384_v32, inf }
 0x4db   : > { %v6781_v22 = vmul.f32 %v17607_v0, %v17527_v19  ;;  %10888 = vmatprep.mubr.bf16.mxu0 %v7227_v57  ;;  %v6769_v21 = vsel %vm6768_vm1, %v17401_v25, %v6767_v7  ;;  %v6776_v38 = vsel %vm6775_vm9, %v17384_v32, %v6774_v10  ;;  %vm6782_vm7 = vcmp.eq.f32.partialorder %v17527_v19, inf }
 0x4dc   : > { %12091 = vrsqrt.f32 %v17553_v13  ;;  %v6771_v36 = vand.u32 2147483648, %v17401_v25  ;;  %v6778_v39 = vand.u32 2147483648, %v17384_v32  ;;  %v17860_v61 = vsel %vm6763_vm0, %v6764_v56, %v6762_v40 }
 0x4dd   : > { %v6783_v12 = vsel %vm6782_vm7, %v17527_v19, %v6781_v22  ;;  %12093 = vrsqrt.f32 %v17596_v11  ;;  %vm6770_vm13 = vcmp.eq.f32.partialorder %v17401_v25, 0.0  ;;  %vm6777_vm11 = vcmp.eq.f32.partialorder %v17384_v32, 0.0 }
 0x4de   : > { %v6785_v0 = vand.u32 2147483648, %v17527_v19  ;;  %v12088_v6 = vpop.eup %12087  ;;  %v17865_v23 = vsel %vm6770_vm13, %v6771_v36, %v6769_v21  ;;  %v17867_v62 = vsel %vm6777_vm11, %v6778_v39, %v6776_v38  ;;  %vm6784_vm8 = vcmp.eq.f32.partialorder %v17527_v19, 0.0 }
 0x4df   : > { %12095 = vrsqrt.f32 %v17591_v53  ;;  %vm6789_vm6 = vcmp.eq.f32.partialorder %v17553_v13, inf  ;;  %v6792_v47 = vand.u32 2147483648, %v17553_v13  ;;  %v6809_v32 = vmul.f32 %v17659_v45, %v17594_v50 }
 0x4e0   : > { %v17871_v59 = vsel %vm6784_vm8, %v6785_v0, %v6783_v12  ;;  %v12090_v25 = vpop.eup %12089  ;;  %vm6796_vm12 = vcmp.eq.f32.partialorder %v17596_v11, inf  ;;  %v6799_v60 = vand.u32 2147483648, %v17596_v11  ;;  %vm6810_vm14 = vcmp.eq.f32.partialorder %v17594_v50, inf }
 0x4e1   : > { %v6816_v19 = vmul.f32 %v17654_v63, %v17587_v54  ;;  %vm6791_vm15 = vcmp.eq.f32.partialorder %v17553_v13, 0.0  ;;  %vm6798_vm0 = vcmp.eq.f32.partialorder %v17596_v11, 0.0  ;;  %v6806_v33 = vand.u32 2147483648, %v17591_v53 }
 0x4e2   : > { %v6811_v4 = vsel %vm6810_vm14, %v17594_v50, %v6809_v32  ;;  %vm6812_vm1 = vcmp.eq.f32.partialorder %v17594_v50, 0.0  ;;  %v6823_v45 = vmul.f32 %v12088_v6, %v17631_v41  ;;  %vm6803_vm9 = vcmp.eq.f32.partialorder %v17591_v53, inf }
 0x4e3   : > { %v6813_v49 = vand.u32 2147483648, %v17594_v50  ;;  %vm6817_vm7 = vcmp.eq.f32.partialorder %v17587_v54, inf  ;;  %vm6819_vm13 = vcmp.eq.f32.partialorder %v17587_v54, 0.0  ;;  %v6830_v63 = vmul.f32 %v17670_v46, %v17598_v30 }
 0x4e4   : > { %vm6805_vm11 = vcmp.eq.f32.partialorder %v17591_v53, 0.0  ;;  %v6818_v29 = vsel %vm6817_vm7, %v17587_v54, %v6816_v19  ;;  %v6820_v18 = vand.u32 2147483648, %v17587_v54  ;;  %vm6824_vm8 = vcmp.eq.f32.partialorder %v17631_v41, inf }
 0x4e5   : > { %vm6826_vm14 = vcmp.eq.f32.partialorder %v17631_v41, 0.0  ;;  %v17899_v8 = vsel %vm6812_vm1, %v6813_v49, %v6811_v4  ;;  %v6825_v50 = vsel %vm6824_vm8, %v17631_v41, %v6823_v45  ;;  %vm6831_vm10 = vcmp.eq.f32.partialorder %v17598_v30, inf }
 0x4e6   : > { %v6837_v34 = vmul.f32 %v12090_v25, %v17694_v9  ;;  %v12092_v20 = vpop.eup %12091  ;;  %v6827_v46 = vand.u32 2147483648, %v17631_v41  ;;  %v6832_v15 = vsel %vm6831_vm10, %v17598_v30, %v6830_v63  ;;  %vm6838_vm7 = vcmp.eq.f32.partialorder %v17694_v9, inf }
 0x4e7   : > { %12097 = vrsqrt.f32 %v17822_v16  ;;  %v12094_v2 = vpop.eup %12093  ;;  %v6788_v14 = vmul.f32 %v12092_v20, %v17553_v13  ;;  %v6821_v44 = vsel %vm6819_vm13, %v6820_v18, %v6818_v29  ;;  %v6834_v48 = vand.u32 2147483648, %v17598_v30 }
 0x4e8   : > { %v6839_v5 = vsel %vm6838_vm7, %v17694_v9, %v6837_v34  ;;  %v6795_v1 = vmul.f32 %v12094_v2, %v17596_v11  ;;  %v6828_v43 = vsel %vm6826_vm14, %v6827_v46, %v6825_v50  ;;  %vm6833_vm10 = vcmp.eq.f32.partialorder %v17598_v30, 0.0  ;;  %v20311_v2 = vld [vmem:[#allocation40_spill] sm:$0xff] }
 0x4e9   : > { %v6841_v37 = vand.u32 2147483648, %v17694_v9  ;;  %v12096_v51 = vpop.eup %12095  ;;  %v6790_v26 = vsel %vm6789_vm6, %v17553_v13, %v6788_v14  ;;  %v6835_v54 = vsel %vm6833_vm10, %v6834_v48, %v6832_v15  ;;  %vm6840_vm1 = vcmp.eq.f32.partialorder %v17694_v9, 0.0 }
 0x4ea   : > { %12099 = vrsqrt.f32 %v17837_v17  ;;  %v6797_v42 = vsel %vm6796_vm12, %v17596_v11, %v6795_v1  ;;  %v6802_v41 = vmul.f32 %v12096_v51, %v17591_v53  ;;  %vm6845_vm13 = vcmp.eq.f32.partialorder %v17822_v16, inf }
 0x4eb   : > { %v6842_v27 = vsel %vm6840_vm1, %v6841_v37, %v6839_v5  ;;  %v6848_v30 = vand.u32 2147483648, %v17822_v16  ;;  %v6793_v55 = vsel %vm6791_vm15, %v6792_v47, %v6790_v26  ;;  %v6800_v35 = vsel %vm6798_vm0, %v6799_v60, %v6797_v42 }
 0x4ec   : > { %vm6847_vm6 = vcmp.eq.f32.partialorder %v17822_v16, 0.0  ;;  %v6855_v9 = vand.u32 2147483648, %v17837_v17  ;;  %12101 = vrsqrt.f32 %v17831_v3  ;;  %v6804_v31 = vsel %vm6803_vm9, %v17591_v53, %v6802_v41  ;;  %v20314_v41 = vld [vmem:[#allocation28_spill] sm:$0xff] }
 0x4ed   : > { %v6862_v58 = vand.u32 2147483648, %v17831_v3  ;;  %v7001_v7 = vpack.c.bf16 %v17840_v24, %v17840_v24  ;;  %v7002_v13 = vpack.c.bf16 %v17860_v61, %v17860_v61  ;;  %v6807_v11 = vsel %vm6805_vm11, %v6806_v33, %v6804_v31 }
 0x4ee   : > { %vm6852_vm12 = vcmp.eq.f32.partialorder %v17837_v17, inf  ;;  %v7003_v52 = vpack.c.bf16 %v17865_v23, %v17865_v23  ;;  %v7004_v10 = vpack.c.bf16 %v17867_v62, %v17867_v62  ;;  %v7005_v57 = vpack.c.bf16 %v17871_v59, %v17871_v59 }
 0x4ef   : > { %vm6854_vm15 = vcmp.eq.f32.partialorder %v17837_v17, 0.0  ;;  %v7006_v24 = vpack.c.bf16 %v6793_v55, %v6793_v55  ;;  %v7007_v56 = vpack.c.bf16 %v6800_v35, %v6800_v35  ;;  %v7008_v40 = vpack.c.bf16 %v6807_v11, %v6807_v11  ;;  %v20317_v35 = vld [vmem:[#allocation38_spill] sm:$0xff] }
 0x4f0   : > { %v7009_v53 = vpack.c.bf16 %v17899_v8, %v17899_v8  ;;  %vm6859_vm0 = vcmp.eq.f32.partialorder %v17831_v3, inf  ;;  %v7010_v22 = vpack.c.bf16 %v6821_v44, %v6821_v44  ;;  %v7011_v21 = vpack.c.bf16 %v6828_v43, %v6828_v43 }
 0x4f1   : > { %v7012_v38 = vpack.c.bf16 %v6835_v54, %v6835_v54  ;;  %v7013_v36 = vpack.c.bf16 %v6842_v27, %v6842_v27  ;;  %v12098_v39 = vpop.eup %12097  ;;  %vm6861_vm9 = vcmp.eq.f32.partialorder %v17831_v3, 0.0  ;;  %v7146_v12 = vunpack.c.l.b16 %v7001_v7 }
 0x4f2   : > { %v7147_v61 = vunpack.c.l.b16 %v7002_v13  ;;  %v7148_v0 = vunpack.c.l.b16 %v7003_v52  ;;  %v7149_v6 = vunpack.c.l.b16 %v7004_v10  ;;  %v6844_v23 = vmul.f32 %v12098_v39, %v17822_v16  ;;  %v20319_v52 = vld [vmem:[#allocation41_spill] sm:$0xff] }
 0x4f3   : > { %v7150_v62 = vunpack.c.l.b16 %v7005_v57  ;;  %v7151_v59 = vunpack.c.l.b16 %v7006_v24  ;;  %v7152_v47 = vunpack.c.l.b16 %v7007_v56  ;;  %v7153_v32 = vunpack.c.l.b16 %v7008_v40  ;;  %v20323_v40 = vld [vmem:[#allocation31_spill] sm:$0xff] }
 0x4f4   : > { %v7154_v25 = vunpack.c.l.b16 %v7009_v53  ;;  %v7155_v60 = vunpack.c.l.b16 %v7010_v22  ;;  %v7156_v19 = vunpack.c.l.b16 %v7011_v21  ;;  %v12100_v33 = vpop.eup %12099  ;;  %v6846_v4 = vsel %vm6845_vm13, %v17822_v16, %v6844_v23  ;;  %v20324_v53 = vld [vmem:[#allocation136_spill] sm:$0xff]  ;;  %v20325_v21 = vld [vmem:[#allocation59_spill] sm:$0xff] }
 0x4f5   : > { %v7157_v45 = vunpack.c.l.b16 %v7012_v38  ;;  %v7158_v49 = vunpack.c.l.b16 %v7013_v36  ;;  %v7211_v63 = vsel %vm7162_vm2, %v7147_v61, %v7146_v12  ;;  %v6849_v29 = vsel %vm6847_vm6, %v6848_v30, %v6846_v4  ;;  %v20326_v38 = vld [vmem:[#allocation37_spill] sm:$0xff] }
 0x4f6   : > { %v6851_v18 = vmul.f32 %v12100_v33, %v17837_v17  ;;  %v7212_v8 = vsel %vm7164_vm3, %v7148_v0, %v7211_v63  ;;  %v7218_v50 = vsel %vm7162_vm2, %v7155_v60, %v7154_v25  ;;  %v12102_v34 = vpop.eup %12101  ;;  %v7014_v20 = vpack.c.bf16 %v6849_v29, %v6849_v29  ;;  %v20329_v61 = vld [vmem:[#allocation97_spill] sm:$0xff]  ;;  %v20333_v25 = vld [vmem:[#allocation134_spill] sm:$0xff]  ;;  %v20336_v33 = vld [vmem:[#allocation68_spill] sm:$0xff] }
 0x4f7   : > { %v7213_v46 = vsel %vm7166_vm4, %v7149_v6, %v7212_v8  ;;  %v7219_v15 = vsel %vm7164_vm3, %v7156_v19, %v7218_v50  ;;  %v6879_v14 = vpack.c.bf16 %v20311_v2, %v20311_v2  ;;  %v6858_v44 = vmul.f32 %v12102_v34, %v17831_v3  ;;  %v20330_v6 = vld [vmem:[#allocation34_spill] sm:$0xff]  ;;  %v20335_v19 = vld [vmem:[#allocation53_spill] sm:$0xff]  ;;  %v20344_v8 = vld [vmem:[#allocation55_spill] sm:$0xff] }
 0x4f8   : > { %v6853_v16 = vsel %vm6852_vm12, %v17837_v17, %v6851_v18  ;;  %v7214_v48 = vsel %vm7168_vm5, %v7150_v62, %v7213_v46  ;;  %v7220_v5 = vsel %vm7166_vm4, %v7157_v45, %v7219_v15  ;;  %v7159_v43 = vunpack.c.l.b16 %v7014_v20  ;;  %v20331_v62 = vld [vmem:[#allocation126_spill] sm:$0xff]  ;;  %v20342_v29 = vld [vmem:[#allocation137_spill] sm:$0xff]  ;;  %v20348_v15 = vld [vmem:[#allocation60_spill] sm:$0xff] }
 0x4f9   : > { %v6856_v1 = vsel %vm6854_vm15, %v6855_v9, %v6853_v16  ;;  %vm20312_vm11 = vcmask 1045509   ;;  %v7221_v51 = vsel %vm7168_vm5, %v7158_v49, %v7220_v5  ;;  %v6860_v26 = vsel %vm6859_vm0, %v17831_v3, %v6858_v44  ;;  %v20321_v3 = vld [vmem:[#allocation87_spill] sm:$0xff]  ;;  %v20340_v49 = vld [vmem:[#allocation124_spill] sm:$0xff] }
 0x4fa   : > { %v7215_v37 = vsel %vm20312_vm11, %v7151_v59, %v7214_v48  ;;  %v7015_v54 = vpack.c.bf16 %v6856_v1, %v6856_v1  ;;  %vm20313_vm8 = vcmask 1046534   ;;  %v6887_v27 = vpack.c.bf16 %v20314_v41, %v20314_v41  ;;  %vm20316_vm7 = vmmov %vm20312_vm11  ;;  %v20352_v44 = vld [vmem:[#allocation119_spill] sm:$0xff]  ;;  %v20354_v5 = vld [vmem:[#allocation88_spill] sm:$0xff] }
 0x4fb   : > { %v7216_v42 = vsel %vm20313_vm8, %v7152_v47, %v7215_v37  ;;  %v6863_v17 = vsel %vm6861_vm9, %v6862_v58, %v6860_v26  ;;  %vm20315_vm14 = vcmask 1047559   ;;  %v7222_v55 = vsel %vm20316_vm7, %v7159_v43, %v7221_v51  ;;  %v20322_v58 = vld [vmem:[#allocation123_spill] sm:$0xff]  ;;  %vm20327_vm10 = vmmov %vm20316_vm7  ;;  %v20332_v47 = vld [vmem:[#allocation116_spill] sm:$0xff] }
 0x4fc   : > { %v7217_v30 = vsel %vm20315_vm14, %v7153_v32, %v7216_v42  ;;  %v20318_v9 = vpack.c.bf16 %v20317_v35, %v20317_v35  ;;  %v7016_v7 = vpack.c.bf16 %v6863_v17, %v6863_v17  ;;  %v7160_v13 = vunpack.c.l.b16 %v7015_v54  ;;  %vm20328_vm1 = vmmov %vm20313_vm8  ;;  %v20355_v26 = vld [vmem:[#allocation121_spill] sm:$0xff]  ;;  %v20356_v42 = vld [vmem:[#allocation44_spill] sm:$0xff] }
 0x4fd   : > { %v7417_v11 = vunpack.c.l.b16 %v6879_v14  ;;  %v20320_v10 = vpack.c.bf16 %v20319_v52, %v20319_v52  ;;  %v7425_v24 = vunpack.c.l.b16 %v6887_v27  ;;  %v7475_v56 = vsel %vm7164_vm3, %v20322_v58, %v20321_v3  ;;  %vm20334_vm13 = vmmov %vm20328_vm1  ;;  %v20358_v17 = vld [vmem:[#allocation111_spill] sm:$0xff]  ;;  %v20360_v35 = vld [vmem:[#allocation66_spill] sm:$0xff] }
 0x4fe   : > { %v7416_v31 = vunpack.c.l.b16 %v20318_v9  ;;  %v7482_v22 = vsel %vm7164_vm3, %v20324_v53, %v20323_v40  ;;  %v7492_v36 = vsel %vm20327_vm10, %v20326_v38, %v20325_v21  ;;  %v7161_v39 = vunpack.c.l.b16 %v7016_v7  ;;  %vm20337_vm6 = vmmov %vm20316_vm7  ;;  %v20363_v7 = vld [vmem:[#allocation56_spill] sm:$0xff]  ;;  %v20367_v58 = vld [vmem:[#allocation15_spill] sm:$0xff] }
 0x4ff   : > { %v7424_v57 = vunpack.c.l.b16 %v20320_v10  ;;  %v7223_v12 = vsel %vm20328_vm1, %v7160_v13, %v7222_v55  ;;  %v7476_v0 = vsel %vm7166_vm4, %v20329_v61, %v7475_v56  ;;  %v7483_v23 = vsel %vm7166_vm4, %v20330_v6, %v7482_v22  ;;  %vm20339_vm12 = vmmov %vm20315_vm14  ;;  %v20368_v53 = vld [vmem:[#allocation82_spill] sm:$0xff]  ;;  %v20369_v21 = vld [vmem:[#allocation21_spill] sm:$0xff] }
 0x500   : > { %v7477_v59 = vsel %vm7168_vm5, %v20331_v62, %v7476_v0  ;;  %v7484_v32 = vsel %vm7168_vm5, %v20332_v47, %v7483_v23  ;;  %v7493_v60 = vsel %vm20334_vm13, %v20333_v25, %v7492_v36  ;;  %v7499_v4 = vsel %vm20337_vm6, %v20336_v33, %v20335_v19  ;;  %vm20341_vm15 = vmmov %vm20337_vm6  ;;  %v20370_v36 = vld [vmem:[#allocation65_spill] sm:$0xff]  ;;  %v20373_v0 = vld [vmem:[#allocation70_spill] sm:$0xff] }
 0x501   : > { %v7224_v45 = vsel %vm20339_vm12, %v7161_v39, %v7223_v12  ;;  %v7478_v63 = vsel %vm20341_vm15, %v20340_v49, %v7477_v59  ;;  %vm20343_vm0 = vmmov %vm20337_vm6  ;;  %v6911_v1 = vpack.c.bf16 %v20354_v5, %v20354_v5  ;;  %v6934_v43 = vpack.c.bf16 %v17638_v28, %v17638_v28  ;;  %v20361_v28 = vld [vmem:[#allocation4_spill] sm:$0xff]  ;;  %v20371_v12 = vld [vmem:[#allocation42_spill] sm:$0xff] }
 0x502   : > { %v7485_v18 = vsel %vm20343_vm0, %v20342_v29, %v7484_v32  ;;  %vm20345_vm9 = vmmov %vm20339_vm12  ;;  %v7228_v34 = vpack.c.b16 %v7224_v45, %v7217_v30  ;;  %v6919_v54 = vpack.c.bf16 %v20355_v26, %v20355_v26  ;;  %v20357_v41 = vpack.c.bf16 %v20356_v42, %v20356_v42  ;;  %v20375_v23 = vld [vmem:[#allocation62_spill] sm:$0xff]  ;;  %v20380_v33 = vld [vmem:[#allocation17_spill] sm:$0xff] }
 0x503   : > { %v7494_v50 = vsel %vm20345_vm9, %v20344_v8, %v7493_v60  ;;  %vm20346_vm11 = vmmov %vm20328_vm1  ;;  %v20359_v30 = vpack.c.bf16 %v20358_v17, %v20358_v17  ;;  %v7503_v9 = vsel %vm7164_vm3, %v20361_v28, %v20360_v35  ;;  %v6927_v39 = vpack.c.bf16 %v20370_v36, %v20370_v36  ;;  %v20376_v59 = vld [vmem:[#allocation114_spill] sm:$0xff]  ;;  %v20385_v8 = vld [vmem:[#allocation105_spill] sm:$0xff] }
 0x504   : > { %v7479_v20 = vsel %vm20346_vm11, %v7416_v31, %v7478_v63  ;;  %vm20347_vm8 = vmmov %vm20328_vm1  ;;  %10889 = vmatmul.mubr.bf16.gmra.mrb[132].mxu0 %v7228_v34  ;;  %v7448_v27 = vunpack.c.l.b16 %v20357_v41  ;;  %v20362_v31 = vld [vmem:[#allocation20_spill] sm:$0xff]  ;;  %v7457_v40 = vunpack.c.l.b16 %v6919_v54  ;;  %v6935_v62 = vpack.c.bf16 %v20375_v23, %v20375_v23  ;;  %v20384_v29 = vld [vmem:[#allocation106_spill] sm:$0xff] }
 0x505   : > { %v7486_v46 = vsel %vm20347_vm8, %v7424_v57, %v7485_v18  ;;  %vm20349_vm14 = vmmov %vm20328_vm1  ;;  %v7456_v55 = vunpack.c.l.b16 %v20359_v30  ;;  %v7510_v13 = vsel %vm7164_vm3, %v20363_v7, %v20362_v31  ;;  %v7449_v57 = vunpack.c.l.b16 %v6911_v1  ;;  %v20391_v1 = vld [vmem:[#allocation29_spill] sm:$0xff]  ;;  %v12165_v26 = vld [vmem:[%s18723_s5] sm:$0xff]  }
 0x506   : > { %v7500_v2 = vsel %vm20349_vm14, %v20348_v15, %v7499_v4  ;;  %vm20350_vm7 = vmmov %vm20345_vm9  ;;  %v7511_v56 = vsel %vm7166_vm4, %v20367_v58, %v7510_v13  ;;  %v20377_v47 = vpack.c.bf16 %v20376_v59, %v20376_v59  ;;  %v7472_v19 = vunpack.c.l.b16 %v6934_v43  ;;  %v20381_v4 = vld [vmem:[#allocation57_spill] sm:$0xff]  ;;  %v6864_v17 = vld [vmem:[%s365_s20] sm:$0xff] }
 0x507   : > { %v7480_v14 = vsel %vm20350_vm7, %v7417_v11, %v7479_v20  ;;  %vm20351_vm10 = vmmov %vm20350_vm7  ;;  %v20364_v11 = vld [vmem:[#allocation45_spill] sm:$0xff]  ;;  %v7512_v38 = vsel %vm7168_vm5, %v20369_v21, %v7511_v56  ;;  %v7517_v45 = vsel %vm7164_vm3, %v20381_v4, %v20380_v33  ;;  %v20387_v20 = vld [vmem:[#allocation74_spill] sm:$0xff]  ;;  %v7465_v5 = vunpack.c.l.b16 %v6927_v39 }
 0x508   : > { %v7487_v16 = vsel %vm20351_vm10, %v7425_v24, %v7486_v46  ;;  %vm20353_vm1 = vmmov %vm20350_vm7  ;;  %v20365_v52 = vpack.c.bf16 %v20364_v11, %v20364_v11  ;;  %v20366_v24 = vld [vmem:[#allocation76_spill] sm:$0xff]  ;;  %v7464_v32 = vunpack.c.l.b16 %v20377_v47  ;;  %v7518_v18 = vsel %vm7166_vm4, %v20384_v29, %v7517_v45  ;;  %v6865_v30 = vld [vmem:[%s365_s20 + $0x8] sm:$0xff] }
 0x509   : > { %v7501_v48 = vsel %vm20353_vm1, %v20352_v44, %v7500_v2  ;;  %v7530_v37 = vpack.c.b16 %v7487_v16, %v7480_v14  ;;  %v7504_v3 = vsel %vm7166_vm4, %v20366_v24, %v7503_v9  ;;  %vm20372_vm13 = vmmov %vm20343_vm0  ;;  %v20388_v46 = vpack.c.bf16 %v20387_v20, %v20387_v20  ;;  %v20389_v14 = vld [vmem:[#allocation73_spill] sm:$0xff]  ;;  %v20390_v44 = vld [vmem:[#allocation86_spill] sm:$0xff] }
 0x50a   : > { %v7531_v51 = vpack.c.b16 %v7501_v48, %v7494_v50  ;;  %v7470_v10 = vunpack.c.l.b16 %v20365_v52  ;;  %v7505_v22 = vsel %vm7168_vm5, %v20368_v53, %v7504_v3  ;;  %vm20374_vm6 = vmmov %vm20343_vm0  ;;  %v20386_v50 = vld [vmem:[#allocation127_spill] sm:$0xff]  ;;  %v7519_v16 = vsel %vm7168_vm5, %v20389_v14, %v7518_v18  ;;  %v6866_v9 = vld [vmem:[%s365_s20 + $0x10] sm:$0xff] }
 0x50b   : > { %10908 = vmatprep.mubr.bf16.mxu0 %v7530_v37  ;;  %v7506_v61 = vsel %vm20372_vm13, %v20371_v12, %v7505_v22  ;;  %v7513_v6 = vsel %vm20374_vm6, %v20373_v0, %v7512_v38  ;;  %vm20378_vm12 = vmmov %vm20347_vm8  ;;  %v7524_v34 = vsel %vm7164_vm3, %v20386_v50, %v20385_v8  ;;  %v7471_v15 = vunpack.c.l.b16 %v20388_v46  ;;  %v6867_v31 = vld [vmem:[%s365_s20 + $0x18] sm:$0xff]  ;;  %v6868_v7 = vld [vmem:[%s365_s20 + $0x20] sm:$0xff] }
 0x50c   : > { %v7507_v25 = vsel %vm20378_vm12, %v7448_v27, %v7506_v61  ;;  %vm20379_vm15 = vmmov %vm20347_vm8  ;;  %v7525_v48 = vsel %vm7166_vm4, %v20390_v44, %v7524_v34  ;;  %10909 = vmatmul.mubr.bf16.vlgmr.msra.gmra.mrb[128].mxu0 %v7531_v51  ;;  %v7473_v54 = vunpack.c.l.b16 %v6935_v62  ;;  %v7651_v28 = vpack.c.bf16 %v6865_v30, %v6864_v17  ;;  %v6869_v13 = vld [vmem:[%s365_s20 + $0x28] sm:$0xff]  ;;  %v11559_v3 = vld [vmem:[%s18725_s7 + $0xc0] sm:$0xff]  }
 0x50d   : > { %v7514_v60 = vsel %vm20379_vm15, %v7456_v55, %v7513_v6  ;;  %vm20382_vm0 = vmmov %vm20353_vm1  ;;  %v7526_v37 = vsel %vm7168_vm5, %v7470_v10, %v7525_v48  ;;  %10917 = vmatpush3.bf16.msra.mxu0 %v12165_v26  ;;  %vm20397_vm13 = vcmask 130048   ;;  %v7652_v11 = vpack.c.bf16 %v6867_v31, %v6866_v9  ;;  %v6870_v10 = vld [vmem:[%s365_s20 + $0x30] sm:$0xff]  ;;  %v11560_v58 = vld [vmem:[%s18725_s7 + $0xc8] sm:$0xff]   ;;  %10926 = vmatprep.subr.bf16.mxu1 %v11559_v3 }
 0x50e   : > { %v7508_v49 = vsel %vm20382_vm0, %v7449_v57, %v7507_v25  ;;  %vm20383_vm9 = vmmov %vm20382_vm0  ;;  %v7653_v52 = vpack.c.bf16 %v6869_v13, %v6868_v7  ;;  %v6871_v57 = vld [vmem:[%s365_s20 + $0x38] sm:$0xff]  ;;  %10927 = vmatpush3.bf16.msra.mxu1 %v11559_v3  ;;  %v11561_v56 = vld [vmem:[%s18725_s7 + $0xd0] sm:$0xff]   ;;  %s376_s20 = scalar_lea.vmem %s18727_s9, %s9799_s16 }
 0x50f   : > { %v7515_v63 = vsel %vm20383_vm9, %v7457_v40, %v7514_v60  ;;  %vm20392_vm11 = vmmov %vm20374_vm6  ;;  %v7654_v24 = vpack.c.bf16 %v6871_v57, %v6870_v10  ;;  %10928 = vmatprep.subr.bf16.mxu1 %v11560_v58  ;;  %v20401_v40 = vld [vmem:[#allocation5_spill] sm:$0xff]  ;;  %v18142_v22 = vld [vmem:[%s18726_s8] sm:$0xff]  ;;  %vm12181_vm9 = vmmov 0  }
 0x510   : > { %v7532_v2 = vpack.c.b16 %v7515_v63, %v7508_v49  ;;  %v7520_v43 = vsel %vm20392_vm11, %v20391_v1, %v7519_v16  ;;  %vm20393_vm14 = vmmov %vm20374_vm6  ;;  %v7750_v53 = vsub.s32 2, %v20401_v40  ;;  %v11562_v34 = vld [vmem:[%s18725_s7 + $0xd8] sm:$0xff]   ;;  %v11563_v20 = vld [vmem:[%s18725_s7 + $0xe0] sm:$0xff]  }
 0x511   : > { %v7521_v42 = vsel %vm20347_vm8, %v7464_v32, %v7520_v43  ;;  %v7527_v41 = vsel %vm20393_vm14, %v7471_v15, %v7526_v37  ;;  %vm20394_vm7 = vmmov %vm20382_vm0  ;;  %v11564_v46 = vld [vmem:[%s18725_s7 + $0xe8] sm:$0xff]   ;;  %v11565_v15 = vld [vmem:[%s18725_s7 + $0xf0] sm:$0xff]  }
 0x512   : > { %10912 = vmatprep.mubr.bf16.mxu0 %v7532_v2  ;;  %v7522_v27 = vsel %vm20394_vm7, %v7465_v5, %v7521_v42  ;;  %vm20395_vm10 = vmmov %vm20347_vm8  ;;  %10929 = vmatpush3.bf16.msra.mxu1 %v11560_v58  ;;  %v7751_v21 = vrot.slane %v18142_v22, %v7750_v53 }
 0x513   : > { %v7528_v51 = vsel %vm20395_vm10, %v7472_v19, %v7527_v41  ;;  %vm20396_vm1 = vmmov %vm20382_vm0  ;;  %10930 = vmatprep.subr.bf16.mxu1 %v11561_v56  ;;  %vm8512_vm0 = vcmask 31744  }
 0x514   : > { %v7529_v55 = vsel %vm20396_vm1, %v7473_v54, %v7528_v51  ;;  %vm20398_vm6 = vmmov %vm20397_vm13 }
 0x515   : > { %v7533_v35 = vpack.c.b16 %v7529_v55, %v7522_v27  ;;  %vm20399_vm12 = vmmov %vm20398_vm6 }
 0x516   : > { %vm20400_vm15 = vmmov %vm20398_vm6  ;;  %10931 = vmatpush3.bf16.msra.mxu1 %v11561_v56 }
 0x517   : > { %10913 = vmatmul.mubr.bf16.gmra.mrb[132].mxu0 %v7533_v35  ;;  %10932 = vmatprep.subr.bf16.mxu1 %v11562_v34 }
 0x518   : > { %10918 = vmatprep.mubr.msk.bf16.mxu0 %vm20397_vm13, %v7651_v28 }
 0x51a   : > { %10933 = vmatpush3.bf16.msra.mxu1 %v11562_v34 }
 0x51b   : > { %10934 = vmatprep.subr.bf16.mxu1 %v11563_v20 }
 0x51e   : > { %10935 = vmatpush3.bf16.msra.mxu1 %v11563_v20 }
 0x51f   : > { %10919 = vmatmul.mubr.msk.bf16.vlgmr.msra.gmra.mrb[128].mxu0 %vm20398_vm6, %v7652_v11  ;;  %10936 = vmatprep.subr.bf16.mxu1 %v11564_v46 }
 0x520   : > { %10922 = vmatprep.mubr.msk.bf16.mxu0 %vm20399_vm12, %v7653_v52 }
 0x522   : > { %10937 = vmatpush3.bf16.msra.mxu1 %v11564_v46 }
 0x523   : > { %10938 = vmatprep.subr.bf16.mxu1 %v11565_v15 }
 0x526   : > { %10939 = vmatpush3.bf16.msra.mxu1 %v11565_v15 }
 0x527   : > { %10923 = vmatmul.mubr.msk.bf16.gmra.mrb[132].mxu0 %vm20400_vm15, %v7654_v24 }
 0x5f2   : > { %v10920_v38 = vpop.f32.mrb[128].mxu0 }
 0x5f3   : > { %v7709_v36 = vpop.f32.mrb[129].mxu0  ;;  %v7754_v0 = vadd.f32 %v10920_v38, %v7751_v21  ;;  %v18197_v38 = vld [vmem:[%s18725_s7 + $0x100] sm:$0xff]  }
 0x5f4   : > { %v7752_v39 = vadd.f32 %v7751_v21, %v7709_v36  ;;  %v10921_v12 = vpop.f32.mrb[130].mxu0  ;;  %v11575_v36 = vld [vmem:[%s18725_s7 + $0x140] sm:$0xff]  }
 0x5f5   : > { %v7712_v61 = vpop.f32.mrb[131].mxu0  ;;  %v7762_v59 = vmax.f32 %v7754_v0, 0.0  ;;  %v7755_v47 = vadd.f32 %v10921_v12, %v7751_v21  ;;  %10974 = vmatprep.subr.bf16.mxu0 %v11575_v36  ;;  %v11577_v12 = vld [vmem:[%s18725_s7 + $0x150] sm:$0xff]   ;;  %v11579_v0 = vld [vmem:[%s18725_s7 + $0x160] sm:$0xff]  }
 0x5f6   : > { %v7760_v6 = vmax.f32 %v7752_v39, 0.0  ;;  %v7753_v23 = vadd.f32 %v7751_v21, %v7712_v61  ;;  %v11576_v39 = vld [vmem:[%s18725_s7 + $0x148] sm:$0xff]   ;;  %10975 = vmatpush3.bf16.msra.mxu0 %v11575_v36  ;;  %v11578_v61 = vld [vmem:[%s18725_s7 + $0x158] sm:$0xff]  }
 0x5f7   : > { %v7763_v4 = vmax.f32 %v7755_v47, 0.0  ;;  %10976 = vmatprep.subr.bf16.mxu0 %v11576_v39 }
 0x5f8   : > { %v7761_v62 = vmax.f32 %v7753_v23, 0.0  ;;  %7768 = vadd.xlane.f32.xlu0 %v7760_v6 }
 0x5fa   : > { %7770 = vadd.xlane.f32.xlu1 %v7761_v62  ;;  %v10924_v32 = vpop.f32.mrb[132].mxu0  ;;  %10977 = vmatpush3.bf16.msra.mxu0 %v11576_v39 }
 0x5fb   : > { %v7725_v25 = vpop.f32.mrb[133].mxu0  ;;  %v7758_v45 = vadd.f32 %v10924_v32, %v7751_v21  ;;  %10978 = vmatprep.subr.bf16.mxu0 %v11577_v12 }
 0x5fc   : > { %v7756_v60 = vadd.f32 %v7751_v21, %v7725_v25  ;;  %7772 = vadd.xlane.f32.xlu0 %v7762_v59  ;;  %v10925_v19 = vpop.f32.mrb[134].mxu0 }
 0x5fd   : > { %v7728_v33 = vpop.f32.mrb[135].mxu0  ;;  %v7766_v29 = vmax.f32 %v7758_v45, 0.0  ;;  %v7759_v18 = vadd.f32 %v10925_v19, %v7751_v21 }
 0x5fe   : > { %v7764_v49 = vmax.f32 %v7756_v60, 0.0  ;;  %v7757_v63 = vadd.f32 %v7751_v21, %v7728_v33  ;;  %v11566_v21 = vld [vmem:[%s18725_s7 + $0xf8] sm:$0xff]   ;;  %10979 = vmatpush3.bf16.msra.mxu0 %v11577_v12 }
 0x5ff   : > { %v7767_v50 = vmax.f32 %v7759_v18, 0.0  ;;  %10940 = vmatprep.subr.bf16.mxu1 %v11566_v21  ;;  %10980 = vmatprep.subr.bf16.mxu0 %v11578_v61 }
 0x600   : > { %7774 = vadd.xlane.f32.xlu0 %v7763_v4  ;;  %7776 = vadd.xlane.f32.xlu1 %v7764_v49  ;;  %v7765_v8 = vmax.f32 %v7757_v63, 0.0 }
 0x601   : > { %10941 = vmatpush3.bf16.msra.mxu1 %v11566_v21 }
 0x602   : > { %10950 = vmatprep.subr.bf16.mxu1 %v18197_v38  ;;  %10981 = vmatpush3.bf16.msra.mxu0 %v11578_v61 }
 0x603   : > { %10982 = vmatprep.subr.bf16.mxu0 %v11579_v0 }
 0x604   : > { %7780 = vadd.xlane.f32.xlu1 %v7766_v29  ;;  %7778 = vadd.xlane.f32.xlu0 %v7765_v8 }
 0x606   : > { %10983 = vmatpush3.bf16.msra.mxu0 %v11579_v0  ;;  %v7883_v0 = vld [vmem:[%s18232_s23 + $0x10] sm:$0xff] }
 0x608   : > { %7782 = vadd.xlane.f32.xlu0 %v7767_v50 }
 0x685   : > { %v7769_v2 = vpop.xlane.xlu0 %7768 }
 0x686   : > { %v7785_v14 = vmul.f32 0.0078125, %v7769_v2 }
 0x687   : > { %v7771_v16 = vpop.xlane.xlu1 %7770 }
 0x688   : > { %v18159_v44 = vsub.f32 %v7760_v6, %v7785_v14  ;;  %v7786_v48 = vmul.f32 0.0078125, %v7771_v16  ;;  %v11580_v6 = vld [vmem:[%s18725_s7 + $0x168] sm:$0xff]  }
 0x689   : > { %v7773_v5 = vpop.xlane.xlu0 %7772  ;;  %10984 = vmatprep.subr.bf16.mxu0 %v11580_v6 }
 0x68a   : > { %v18161_v1 = vsub.f32 %v7761_v62, %v7786_v48  ;;  %v7787_v43 = vmul.f32 0.0078125, %v7773_v5  ;;  %v7801_v37 = vmul.f32 %v18159_v44, %v18159_v44  ;;  %10985 = vmatpush3.bf16.msra.mxu0 %v11580_v6  ;;  %v7884_v6 = vld [vmem:[%s18232_s23 + $0x18] sm:$0xff] }
 0x68c   : > { %v18165_v26 = vsub.f32 %v7762_v59, %v7787_v43  ;;  %7809 = vadd.xlane.f32.xlu1 %v7801_v37  ;;  %v7802_v54 = vmul.f32 %v18161_v1, %v18161_v1 }
 0x68d   : > { %v7775_v42 = vpop.xlane.xlu0 %7774  ;;  %v7777_v41 = vpop.xlane.xlu1 %7776 }
 0x68e   : > { %v7788_v27 = vmul.f32 0.0078125, %v7775_v42  ;;  %v7789_v51 = vmul.f32 0.0078125, %v7777_v41  ;;  %7811 = vadd.xlane.f32.xlu0 %v7802_v54  ;;  %v7803_v17 = vmul.f32 %v18165_v26, %v18165_v26 }
 0x690   : > { %v18171_v30 = vsub.f32 %v7763_v4, %v7788_v27  ;;  %v18173_v55 = vsub.f32 %v7764_v49, %v7789_v51  ;;  %7813 = vadd.xlane.f32.xlu1 %v7803_v17 }
 0x691   : > { %v7781_v35 = vpop.xlane.xlu1 %7780  ;;  %v7779_v28 = vpop.xlane.xlu0 %7778 }
 0x692   : > { %v7791_v9 = vmul.f32 0.0078125, %v7781_v35  ;;  %v7790_v31 = vmul.f32 0.0078125, %v7779_v28  ;;  %v7805_v7 = vmul.f32 %v18173_v55, %v18173_v55  ;;  %v7804_v13 = vmul.f32 %v18171_v30, %v18171_v30 }
 0x694   : > { %v18179_v11 = vsub.f32 %v7766_v29, %v7791_v9  ;;  %v18181_v52 = vsub.f32 %v7765_v8, %v7790_v31  ;;  %7817 = vadd.xlane.f32.xlu1 %v7805_v7  ;;  %7815 = vadd.xlane.f32.xlu0 %v7804_v13  ;;  %v7859_v29 = vsub.s32 3, %v20401_v40  ;;  %v7881_v9 = vld [vmem:[%s18232_s23] sm:$0xff]  ;;  %v7882_v31 = vld [vmem:[%s18232_s23 + $0x8] sm:$0xff] }
 0x695   : > { %v7783_v10 = vpop.xlane.xlu0 %7782 }
 0x696   : > { %v7792_v57 = vmul.f32 0.0078125, %v7783_v10  ;;  %v7807_v24 = vmul.f32 %v18179_v11, %v18179_v11  ;;  %v7806_v3 = vmul.f32 %v18181_v52, %v18181_v52  ;;  %v7860_v2 = vrot.slane %v18142_v22, %v7859_v29 }
 0x698   : > { %v18187_v58 = vsub.f32 %v7767_v50, %v7792_v57  ;;  %7821 = vadd.xlane.f32.xlu1 %v7807_v24  ;;  %7819 = vadd.xlane.f32.xlu0 %v7806_v3  ;;  %v7871_v50 = vsub.s32 4, %v20401_v40 }
 0x69a   : > { %v7808_v56 = vmul.f32 %v18187_v58, %v18187_v58  ;;  %v7872_v5 = vrot.slane %v18142_v22, %v7871_v50 }
 0x69c   : > { %7823 = vadd.xlane.f32.xlu0 %v7808_v56 }
 0x719   : > { %v7810_v23 = vpop.xlane.xlu1 %7809 }
 0x71a   : > { %v7825_v62 = vmul.f32 0.0078125, %v7810_v23 }
 0x71b   : > { %v7812_v59 = vpop.xlane.xlu0 %7811 }
 0x71c   : > { %v7833_v47 = vadd.f32 1e-05, %v7825_v62  ;;  %v7826_v32 = vmul.f32 0.0078125, %v7812_v59 }
 0x71d   : > { %v7814_v25 = vpop.xlane.xlu1 %7813 }
 0x71e   : > { %12103 = vrsqrt.f32 %v7833_v47  ;;  %v7834_v60 = vadd.f32 1e-05, %v7826_v32  ;;  %v7827_v19 = vmul.f32 0.0078125, %v7814_v25 }
 0x720   : > { %12105 = vrsqrt.f32 %v7834_v60  ;;  %v7835_v33 = vadd.f32 1e-05, %v7827_v19  ;;  %v7885_v19 = vld [vmem:[%s18232_s23 + $0x20] sm:$0xff] }
 0x721   : > { %v7818_v4 = vpop.xlane.xlu1 %7817  ;;  %v7816_v45 = vpop.xlane.xlu0 %7815 }
 0x722   : > { %12107 = vrsqrt.f32 %v7835_v33  ;;  %v7829_v49 = vmul.f32 0.0078125, %v7818_v4  ;;  %v7828_v63 = vmul.f32 0.0078125, %v7816_v45  ;;  %v7886_v33 = vld [vmem:[%s18232_s23 + $0x28] sm:$0xff] }
 0x724   : > { %v7837_v18 = vadd.f32 1e-05, %v7829_v49  ;;  %v7836_v8 = vadd.f32 1e-05, %v7828_v63 }
 0x725   : > { %v7822_v34 = vpop.xlane.xlu1 %7821  ;;  %v7820_v20 = vpop.xlane.xlu0 %7819 }
 0x726   : > { %12109 = vrsqrt.f32 %v7837_v18  ;;  %v7831_v46 = vmul.f32 0.0078125, %v7822_v34  ;;  %v7830_v15 = vmul.f32 0.0078125, %v7820_v20  ;;  %v7888_v20 = vld [vmem:[%s18232_s23 + $0x38] sm:$0xff] }
 0x727   : > { %12111 = vrsqrt.f32 %v7836_v8  ;;  %v7887_v8 = vld [vmem:[%s18232_s23 + $0x30] sm:$0xff] }
 0x728   : > { %v12104_v14 = vpop.eup %12103  ;;  %v7839_v16 = vadd.f32 1e-05, %v7831_v46  ;;  %v7838_v48 = vadd.f32 1e-05, %v7830_v15  ;;  %v11569_v15 = vld [vmem:[%s18725_s7 + $0x110] sm:$0xff]  }
 0x729   : > { %v7849_v43 = vmul.f32 %v12104_v14, %v18159_v44  ;;  %v7824_v37 = vpop.xlane.xlu0 %7823 }
 0x72a   : > { %v12106_v54 = vpop.eup %12105  ;;  %12113 = vrsqrt.f32 %v7839_v16  ;;  %v7832_v42 = vmul.f32 0.0078125, %v7824_v37  ;;  %v11574_v37 = vld [vmem:[%s18725_s7 + $0x138] sm:$0xff]  }
 0x72b   : > { %v7861_v41 = vmul.f32 %v7860_v2, %v7849_v43  ;;  %v7850_v27 = vmul.f32 %v12106_v54, %v18161_v1  ;;  %12115 = vrsqrt.f32 %v7838_v48  ;;  %v11570_v48 = vld [vmem:[%s18725_s7 + $0x118] sm:$0xff]   ;;  %v11573_v43 = vld [vmem:[%s18725_s7 + $0x130] sm:$0xff]  }
 0x72c   : > { %v12108_v51 = vpop.eup %12107  ;;  %v7840_v17 = vadd.f32 1e-05, %v7832_v42  ;;  %v11581_v54 = vld [vmem:[%s18725_s7 + $0x170] sm:$0xff]   ;;  %v11582_v42 = vld [vmem:[%s18725_s7 + $0x178] sm:$0xff]  }
 0x72d   : > { %v7873_v35 = vadd.f32 %v7872_v5, %v7861_v41  ;;  %v7862_v44 = vmul.f32 %v7860_v2, %v7850_v27  ;;  %v7851_v28 = vmul.f32 %v12108_v51, %v18165_v26  ;;  %10986 = vmatprep.subr.bf16.mxu0 %v11581_v54  ;;  %v11583_v41 = vld [vmem:[%s18721_s3] sm:$0xff]   ;;  %v11584_v27 = vld [vmem:[%s18721_s3 + $0x8] sm:$0xff]   ;;  %v7920_v51 = vsub.s32 5, %v20401_v40 }
 0x72e   : > { %12117 = vrsqrt.f32 %v7840_v17  ;;  %10987 = vmatpush3.bf16.msra.mxu0 %v11581_v54 }
 0x72f   : > { %v7874_v7 = vadd.f32 %v7872_v5, %v7862_v44  ;;  %v7863_v10 = vmul.f32 %v7860_v2, %v7851_v28  ;;  %v7889_v24 = vadd.f32 %v7881_v9, %v7873_v35  ;;  %10988 = vmatprep.subr.bf16.mxu0 %v11582_v42  ;;  %v7921_v17 = vrot.slane %v18142_v22, %v7920_v51 }
 0x730   : > { %v12110_v13 = vpop.eup %12109 }
 0x731   : > { %v12112_v57 = vpop.eup %12111  ;;  %v7890_v3 = vadd.f32 %v7882_v31, %v7874_v7  ;;  %v7853_v1 = vmul.f32 %v12110_v13, %v18173_v55  ;;  %v7875_v39 = vadd.f32 %v7872_v5, %v7863_v10 }
 0x732   : > { %v7852_v56 = vmul.f32 %v12112_v57, %v18171_v30  ;;  %10989 = vmatpush3.bf16.msra.mxu0 %v11582_v42 }
 0x733   : > { %v18240_v21 = vpack.c.bf16 %v7890_v3, %v7889_v24  ;;  %v7865_v26 = vmul.f32 %v7860_v2, %v7853_v1  ;;  %v7891_v47 = vadd.f32 %v7883_v0, %v7875_v39 }
 0x734   : > { %v12114_v36 = vpop.eup %12113  ;;  %v7864_v12 = vmul.f32 %v7860_v2, %v7852_v56 }
 0x735   : > { %v12116_v61 = vpop.eup %12115  ;;  %v7855_v23 = vmul.f32 %v12114_v36, %v18179_v11  ;;  %10942 = vmatprep.mubr.bf16.mxu1 %v18240_v21  ;;  %v7877_v32 = vadd.f32 %v7872_v5, %v7865_v26  ;;  %v11568_v11 = vld [vmem:[%s18725_s7 + $0x108] sm:$0xff]  }
 0x736   : > { %v7876_v62 = vadd.f32 %v7872_v5, %v7864_v12  ;;  %v7854_v55 = vmul.f32 %v12116_v61, %v18181_v52 }
 0x737   : > { %v7867_v30 = vmul.f32 %v7860_v2, %v7855_v23  ;;  %v7893_v18 = vadd.f32 %v7885_v19, %v7877_v32  ;;  %v11586_v19 = vld [vmem:[%s18721_s3 + $0x18] sm:$0xff]  }
 0x738   : > { %v12118_v59 = vpop.eup %12117  ;;  %v7892_v25 = vadd.f32 %v7884_v6, %v7876_v62  ;;  %v7866_v60 = vmul.f32 %v7860_v2, %v7854_v55 }
 0x739   : > { %v7856_v4 = vmul.f32 %v12118_v59, %v18187_v58  ;;  %v7879_v52 = vadd.f32 %v7872_v5, %v7867_v30 }
 0x73a   : > { %v7878_v45 = vadd.f32 %v7872_v5, %v7866_v60  ;;  %v18250_v49 = vpack.c.bf16 %v7892_v25, %v7891_v47  ;;  %v11585_v60 = vld [vmem:[%s18721_s3 + $0x10] sm:$0xff]  }
 0x73b   : > { %v7868_v63 = vmul.f32 %v7860_v2, %v7856_v4  ;;  %v7895_v14 = vadd.f32 %v7887_v8, %v7879_v52  ;;  %v11588_v4 = vld [vmem:[%s18721_s3 + $0x28] sm:$0xff]   ;;  %v8192_v52 = vsub.s32 7, %v20401_v40 }
 0x73c   : > { %v7894_v34 = vadd.f32 %v7886_v33, %v7878_v45  ;;  %10943 = vmatmul.mubr.bf16.vlgmr.msra.gmra.mrb[128].mxu1 %v18250_v49  ;;  %v11587_v33 = vld [vmem:[%s18721_s3 + $0x20] sm:$0xff]   ;;  %v11589_v45 = vld [vmem:[%s18721_s3 + $0x30] sm:$0xff]  }
 0x73d   : > { %v7880_v46 = vadd.f32 %v7872_v5, %v7868_v63  ;;  %10951 = vmatpush3.bf16.msra.mxu1 %v18197_v38  ;;  %v11571_v38 = vld [vmem:[%s18725_s7 + $0x120] sm:$0xff]   ;;  %v11572_v5 = vld [vmem:[%s18725_s7 + $0x128] sm:$0xff]   ;;  %v8193_v63 = vrot.slane %v18142_v22, %v8192_v52 }
 0x73e   : > { %10952 = vmatprep.subr.bf16.mxu1 %v11568_v11  ;;  %v18259_v58 = vpack.c.bf16 %v7894_v34, %v7893_v18  ;;  %v8054_v18 = vsub.s32 6, %v20401_v40 }
 0x73f   : > { %v7896_v16 = vadd.f32 %v7888_v20, %v7880_v46 }
 0x740   : > { %10946 = vmatprep.mubr.bf16.mxu1 %v18259_v58 }
 0x741   : > { %10953 = vmatpush3.bf16.msra.mxu1 %v11568_v11  ;;  %v18265_v2 = vpack.c.bf16 %v7896_v16, %v7895_v14  ;;  %v11590_v11 = vld [vmem:[%s18721_s3 + $0x38] sm:$0xff]  }
 0x742   : > { %10954 = vmatprep.subr.bf16.mxu1 %v11569_v15 }
 0x744   : > { %10947 = vmatmul.mubr.bf16.gmra.mrb[132].mxu1 %v18265_v2 }
 0x745   : > { %10955 = vmatpush3.bf16.msra.mxu1 %v11569_v15  ;;  %10966 = vmatprep.mubr.bf16.mxu1 %v18240_v21 }
 0x746   : > { %10956 = vmatprep.subr.bf16.mxu1 %v11570_v48 }
 0x749   : > { %10957 = vmatpush3.bf16.msra.mxu1 %v11570_v48 }
 0x74a   : > { %10958 = vmatprep.subr.bf16.mxu1 %v11571_v38 }
 0x74d   : > { %10959 = vmatpush3.bf16.msra.mxu1 %v11571_v38  ;;  %v18335_v38 = vrot.slane %v18142_v22, %v8054_v18 }
 0x74e   : > { %10960 = vmatprep.subr.bf16.mxu1 %v11572_v5 }
 0x751   : > { %10961 = vmatpush3.bf16.msra.mxu1 %v11572_v5 }
 0x752   : > { %10962 = vmatprep.subr.bf16.mxu1 %v11573_v43 }
 0x755   : > { %10963 = vmatpush3.bf16.msra.mxu1 %v11573_v43 }
 0x756   : > { %10964 = vmatprep.subr.bf16.mxu1 %v11574_v37 }
 0x759   : > { %10965 = vmatpush3.bf16.msra.mxu1 %v11574_v37 }
 0x75a   : > { %10998 = vmatprep.subr.bf16.mxu1 %v11583_v41 }
 0x75c   : > { %10967 = vmatmul.mubr.bf16.vlgmr.msra.gmra.mrb[136].mxu1 %v18250_v49 }
 0x75d   : > { %10970 = vmatprep.mubr.bf16.mxu1 %v18259_v58  ;;  %10999 = vmatpush3.bf16.msra.mxu1 %v11583_v41 }
 0x75e   : > { %11000 = vmatprep.subr.bf16.mxu1 %v11584_v27 }
 0x761   : > { %11001 = vmatpush3.bf16.msra.mxu1 %v11584_v27 }
 0x762   : > { %11002 = vmatprep.subr.bf16.mxu1 %v11585_v60 }
 0x764   : > { %10971 = vmatmul.mubr.bf16.gmra.mrb[140].mxu1 %v18265_v2 }
 0x765   : > { %11003 = vmatpush3.bf16.msra.mxu1 %v11585_v60 }
 0x766   : > { %11004 = vmatprep.subr.bf16.mxu1 %v11586_v19 }
 0x769   : > { %11005 = vmatpush3.bf16.msra.mxu1 %v11586_v19 }
 0x76a   : > { %11006 = vmatprep.subr.bf16.mxu1 %v11587_v33 }
 0x76d   : > { %11007 = vmatpush3.bf16.msra.mxu1 %v11587_v33 }
 0x76e   : > { %11008 = vmatprep.subr.bf16.mxu1 %v11588_v4 }
 0x771   : > { %11009 = vmatpush3.bf16.msra.mxu1 %v11588_v4 }
 0x772   : > { %11010 = vmatprep.subr.bf16.mxu1 %v11589_v45 }
 0x775   : > { %11011 = vmatpush3.bf16.msra.mxu1 %v11589_v45 }
 0x776   : > { %11012 = vmatprep.subr.bf16.mxu1 %v11590_v11 }
 0x779   : > { %11013 = vmatpush3.bf16.msra.mxu1 %v11590_v11 }
 0x80f   : > { %v10944_v35 = vpop.f32.mrb[128].mxu1 }
 0x810   : > { %v8004_v44 = vpop.f32.mrb[129].mxu1  ;;  %v8013_v9 = vadd.f32 %v10944_v35, %v7921_v17 }
 0x811   : > { %v10945_v28 = vpop.f32.mrb[130].mxu1  ;;  %v8005_v13 = vadd.f32 %v8004_v44, %v7921_v17 }
 0x812   : > { %v8016_v31 = vadd.f32 %v10945_v28, %v7921_v17  ;;  %v8007_v7 = vpop.f32.mrb[131].mxu1 }
 0x813   : > { %v8008_v10 = vadd.f32 %v8007_v7, %v7921_v17 }
 0x814   : > { %v8170_v57 = vpack.c.bf16 %v8016_v31, %v8013_v9 }
 0x815   : > { %v8169_v24 = vpack.c.bf16 %v8008_v10, %v8005_v13 }
 0x817   : > { %v10948_v3 = vpop.f32.mrb[132].mxu1  ;;  %10990 = vmatprep.mubr.bf16.mxu0 %v8169_v24 }
 0x818   : > { %v8020_v1 = vpop.f32.mrb[133].mxu1  ;;  %10991 = vmatmul.mubr.bf16.vlgmr.msra.gmra.mrb[136].mxu0 %v8170_v57  ;;  %v8029_v36 = vadd.f32 %v10948_v3, %v7921_v17 }
 0x819   : > { %v10949_v56 = vpop.f32.mrb[134].mxu1  ;;  %v8021_v12 = vadd.f32 %v8020_v1, %v7921_v17 }
 0x81a   : > { %v8032_v39 = vadd.f32 %v10949_v56, %v7921_v17  ;;  %v8023_v26 = vpop.f32.mrb[135].mxu1 }
 0x81b   : > { %v8024_v61 = vadd.f32 %v8023_v26, %v7921_v17 }
 0x81c   : > { %v8172_v0 = vpack.c.bf16 %v8032_v39, %v8029_v36 }
 0x81d   : > { %v8171_v6 = vpack.c.bf16 %v8024_v61, %v8021_v12 }
 0x81f   : > { %10994 = vmatprep.mubr.bf16.mxu0 %v8171_v6 }
 0x820   : > { %10995 = vmatmul.mubr.bf16.gmra.mrb[140].mxu0 %v8172_v0 }
 0x82f   : > { %v10968_v23 = vpop.f32.mrb[136].mxu1 }
 0x830   : > { %v8138_v62 = vpop.f32.mrb[137].mxu1  ;;  %v8147_v35 = vadd.f32 %v10968_v23, %v18335_v38 }
 0x831   : > { %v10969_v55 = vpop.f32.mrb[138].mxu1  ;;  %v8139_v44 = vadd.f32 %v8138_v62, %v18335_v38 }
 0x832   : > { %v8141_v30 = vpop.f32.mrb[139].mxu1  ;;  %v8150_v7 = vadd.f32 %v10969_v55, %v18335_v38 }
 0x833   : > { %v8142_v24 = vadd.f32 %v8141_v30, %v18335_v38 }
 0x837   : > { %v18303_v59 = vpop.f32.mrb[140].mxu1 }
 0x838   : > { %v18305_v47 = vpop.f32.mrb[141].mxu1 }
 0x839   : > { %v18307_v32 = vpop.f32.mrb[142].mxu1 }
 0x83a   : > { %v18309_v25 = vpop.f32.mrb[143].mxu1 }
 0x8eb   : > { %v10992_v8 = vpop.f32.mrb[136].mxu0 }
 0x8ec   : > { %v8285_v34 = vadd.f32 %v10992_v8, %v8193_v63  ;;  %v8276_v20 = vpop.f32.mrb[137].mxu0 }
 0x8ed   : > { %v8277_v46 = vadd.f32 %v8276_v20, %v8193_v63  ;;  %v10993_v15 = vpop.f32.mrb[138].mxu0 }
 0x8ee   : > { %v8319_v14 = vrot.slane %v8285_v34, 4  ;;  %v8288_v16 = vadd.f32 %v10993_v15, %v8193_v63  ;;  %v8279_v48 = vpop.f32.mrb[139].mxu0 }
 0x8ef   : > { %v8307_v5 = vrot.slane %v8277_v46, 4  ;;  %v8280_v43 = vadd.f32 %v8279_v48, %v8193_v63 }
 0x8f0   : > { %v8320_v37 = vadd.f32 %v8319_v14, %v8285_v34  ;;  %v8325_v54 = vrot.slane %v8288_v16, 4 }
 0x8f1   : > { %v8308_v42 = vadd.f32 %v8307_v5, %v8277_v46  ;;  %v8313_v41 = vrot.slane %v8280_v43, 4 }
 0x8f2   : > { %v8321_v27 = vrot.slane %v8320_v37, 2  ;;  %v8326_v17 = vadd.f32 %v8325_v54, %v8288_v16 }
 0x8f3   : > { %v8309_v28 = vrot.slane %v8308_v42, 2  ;;  %v8314_v9 = vadd.f32 %v8313_v41, %v8280_v43  ;;  %v10996_v31 = vpop.f32.mrb[140].mxu0 }
 0x8f4   : > { %v8322_v13 = vadd.f32 %v8321_v27, %v8320_v37  ;;  %v8327_v22 = vrot.slane %v8326_v17, 2  ;;  %v8301_v10 = vadd.f32 %v10996_v31, %v8193_v63  ;;  %v8292_v57 = vpop.f32.mrb[141].mxu0 }
 0x8f5   : > { %v8310_v3 = vadd.f32 %v8309_v28, %v8308_v42  ;;  %v8315_v1 = vrot.slane %v8314_v9, 2  ;;  %v8293_v56 = vadd.f32 %v8292_v57, %v8193_v63  ;;  %v10997_v36 = vpop.f32.mrb[142].mxu0 }
 0x8f6   : > { %v8323_v39 = vrot.slane %v8322_v13, 1  ;;  %v8328_v26 = vadd.f32 %v8327_v22, %v8326_v17  ;;  %v8343_v12 = vrot.slane %v8301_v10, 4  ;;  %v8304_v61 = vadd.f32 %v10997_v36, %v8193_v63  ;;  %v8295_v0 = vpop.f32.mrb[143].mxu0 }
 0x8f7   : > { %v8311_v6 = vrot.slane %v8310_v3, 1  ;;  %v8316_v23 = vadd.f32 %v8315_v1, %v8314_v9  ;;  %v8331_v62 = vrot.slane %v8293_v56, 4  ;;  %v8296_v60 = vadd.f32 %v8295_v0, %v8193_v63 }
 0x8f8   : > { %v8324_v55 = vadd.f32 %v8323_v39, %v8322_v13  ;;  %v8329_v19 = vrot.slane %v8328_v26, 1  ;;  %v8344_v33 = vadd.f32 %v8343_v12, %v8301_v10  ;;  %v8349_v4 = vrot.slane %v8304_v61, 4 }
 0x8f9   : > { %v8312_v45 = vadd.f32 %v8311_v6, %v8310_v3  ;;  %v8317_v11 = vrot.slane %v8316_v23, 1  ;;  %v8332_v30 = vadd.f32 %v8331_v62, %v8293_v56  ;;  %v8337_v52 = vrot.slane %v8296_v60, 4 }
 0x8fa   : > { %v8357_v8 = vmul.f32 0.125, %v8324_v55  ;;  %v8330_v34 = vadd.f32 %v8329_v19, %v8328_v26  ;;  %v8345_v20 = vrot.slane %v8344_v33, 2  ;;  %v8350_v46 = vadd.f32 %v8349_v4, %v8304_v61  ;;  %v11595_v4 = vld [vmem:[%s18724_s6 + $0xc0] sm:$0xff]  }
 0x8fb   : > { %v8355_v15 = vmul.f32 0.125, %v8312_v45  ;;  %v8318_v14 = vadd.f32 %v8317_v11, %v8316_v23  ;;  %v8333_v16 = vrot.slane %v8332_v30, 2  ;;  %v8338_v48 = vadd.f32 %v8337_v52, %v8296_v60  ;;  %v11594_v45 = vld [vmem:[%s18724_s6 + $0x8] sm:$0xff]   ;;  %10518 = vmatprep.subr.bf16.mxu1 %v11595_v4 }
 0x8fc   : > { %v8365_v5 = vmul.f32 %v8357_v8, %v8147_v35  ;;  %v8358_v43 = vmul.f32 0.125, %v8330_v34  ;;  %v8346_v37 = vadd.f32 %v8345_v20, %v8344_v33  ;;  %v8351_v63 = vrot.slane %v8350_v46, 2 }
 0x8fd   : > { %v8356_v54 = vmul.f32 0.125, %v8318_v14  ;;  %v8334_v42 = vadd.f32 %v8333_v16, %v8332_v30  ;;  %v8339_v41 = vrot.slane %v8338_v48, 2  ;;  %v8363_v27 = vmul.f32 %v8355_v15, %v8139_v44 }
 0x8fe   : > { %v8366_v17 = vmul.f32 %v8358_v43, %v8150_v7  ;;  %v8347_v28 = vrot.slane %v8346_v37, 1  ;;  %v8352_v9 = vadd.f32 %v8351_v63, %v8350_v46  ;;  %v8163_v35 = vadd.f32 %v18303_v59, %v18335_v38 }
 0x8ff   : > { %v8335_v31 = vrot.slane %v8334_v42, 1  ;;  %v8340_v13 = vadd.f32 %v8339_v41, %v8338_v48  ;;  %v8364_v22 = vmul.f32 %v8356_v54, %v8142_v24  ;;  %v8155_v44 = vadd.f32 %v18305_v47, %v18335_v38 }
 0x900   : > { %v8372_v10 = vpack.c.bf16 %v8366_v17, %v8365_v5  ;;  %v8348_v57 = vadd.f32 %v8347_v28, %v8346_v37  ;;  %v8353_v3 = vrot.slane %v8352_v9, 1  ;;  %v8166_v24 = vadd.f32 %v18307_v32, %v18335_v38  ;;  %v11591_v32 = vld [vmem:[%s18724_s6 + $0x40] sm:$0xff]  }
 0x901   : > { %v8336_v1 = vadd.f32 %v8335_v31, %v8334_v42  ;;  %v8341_v56 = vrot.slane %v8340_v13, 1  ;;  %v8371_v36 = vpack.c.bf16 %v8364_v22, %v8363_v27  ;;  %v8158_v6 = vadd.f32 %v18309_v25, %v18335_v38  ;;  %v11592_v25 = vld [vmem:[%s18724_s6] sm:$0xff]   ;;  %v11593_v38 = vld [vmem:[%s18724_s6 + $0x48] sm:$0xff]   ;;  %10478 = vmatprep.subr.bf16.mxu0 %v11591_v32 }
 0x902   : > { %v8361_v39 = vmul.f32 0.125, %v8348_v57  ;;  %v8354_v26 = vadd.f32 %v8353_v3, %v8352_v9  ;;  %v12176_v47 = vmov 1   ;;  %v12177_v33 = vmov 3   ;;  %10479 = vmatpush3.bf16.msra.mxu0 %v11592_v25 }
 0x903   : > { %v8359_v7 = vmul.f32 0.125, %v8336_v1  ;;  %v8342_v12 = vadd.f32 %v8341_v56, %v8340_v13  ;;  %11014 = vmatprep.mubr.bf16.mxu1 %v8371_v36  ;;  %11455 = vset.pattern.permute.xlu1 %v12176_v47 }
 0x904   : > { %v8362_v61 = vmul.f32 0.125, %v8354_v26  ;;  %11015 = vmatmul.mubr.bf16.vlgmr.msra.gmra.mrb[144].mxu1 %v8372_v10  ;;  %v8369_v0 = vmul.f32 %v8361_v39, %v8163_v35  ;;  %11456 = vset.pattern.permute.xlu0 %v12177_v33 }
 0x905   : > { %v8360_v23 = vmul.f32 0.125, %v8342_v12  ;;  %v8367_v62 = vmul.f32 %v8359_v7, %v8155_v44  ;;  %10480 = vmatprep.subr.bf16.mxu0 %v11593_v38 }
 0x906   : > { %v8370_v59 = vmul.f32 %v8362_v61, %v8166_v24  ;;  %10481 = vmatpush3.bf16.msra.mxu0 %v11594_v45 }
 0x907   : > { %v8368_v60 = vmul.f32 %v8360_v23, %v8158_v6 }
 0x908   : > { %v8374_v55 = vpack.c.bf16 %v8370_v59, %v8369_v0 }
 0x909   : > { %v8373_v19 = vpack.c.bf16 %v8368_v60, %v8367_v62 }
 0x90b   : > { %11018 = vmatprep.mubr.bf16.mxu1 %v8373_v19 }
 0x90c   : > { %11019 = vmatmul.mubr.bf16.gmra.mrb[148].mxu1 %v8374_v55 }
 0x9d7   : > { %v11016_v11 = vpop.f32.mrb[144].mxu1 }
 0x9d8   : > { %v8506_v30 = vmul.f32 0.17677669, %v11016_v11  ;;  %v8473_v52 = vpop.f32.mrb[145].mxu1 }
 0x9d9   : > { %v8504_v8 = vmul.f32 0.17677669, %v8473_v52  ;;  %v11017_v34 = vpop.f32.mrb[146].mxu1 }
 0x9da   : > { %v8527_v20 = vsel %vm8512_vm0, %v8506_v30, -inf  ;;  %v8507_v46 = vmul.f32 0.17677669, %v11017_v34  ;;  %v8476_v15 = vpop.f32.mrb[147].mxu1 }
 0x9db   : > { %v8528_v14 = vrot.slane %v8527_v20, 4  ;;  %v8513_v16 = vsel %vm8512_vm0, %v8504_v8, -inf  ;;  %v8505_v48 = vmul.f32 0.17677669, %v8476_v15 }
 0x9dc   : > { %v8514_v5 = vrot.slane %v8513_v16, 4  ;;  %v8534_v43 = vsel %vm8512_vm0, %v8507_v46, -inf }
 0x9dd   : > { %v8529_v37 = vmax.f32 %v8527_v20, %v8528_v14  ;;  %v8535_v63 = vrot.slane %v8534_v43, 4  ;;  %v8520_v54 = vsel %vm8512_vm0, %v8505_v48, -inf }
 0x9de   : > { %v8515_v42 = vmax.f32 %v8513_v16, %v8514_v5  ;;  %v8521_v41 = vrot.slane %v8520_v54, 4 }
 0x9df   : > { %v8530_v27 = vrot.slane %v8529_v37, 2  ;;  %v8536_v17 = vmax.f32 %v8534_v43, %v8535_v63  ;;  %v11020_v28 = vpop.f32.mrb[148].mxu1 }
 0x9e0   : > { %v8516_v9 = vrot.slane %v8515_v42, 2  ;;  %v8522_v31 = vmax.f32 %v8520_v54, %v8521_v41  ;;  %v8510_v13 = vmul.f32 0.17677669, %v11020_v28  ;;  %v8489_v22 = vpop.f32.mrb[149].mxu1 }
 0x9e1   : > { %v8531_v10 = vmax.f32 %v8529_v37, %v8530_v27  ;;  %v8537_v57 = vrot.slane %v8536_v17, 2  ;;  %v8508_v3 = vmul.f32 0.17677669, %v8489_v22  ;;  %v11021_v1 = vpop.f32.mrb[150].mxu1 }
 0x9e2   : > { %v8517_v56 = vmax.f32 %v8515_v42, %v8516_v9  ;;  %v8523_v36 = vrot.slane %v8522_v31, 2  ;;  %v8555_v35 = vsel %vm8512_vm0, %v8510_v13, -inf  ;;  %v8511_v39 = vmul.f32 0.17677669, %v11021_v1  ;;  %v8492_v26 = vpop.f32.mrb[151].mxu1 }
 0x9e3   : > { %v8532_v44 = vrot.slane %v8531_v10, 1  ;;  %v8538_v7 = vmax.f32 %v8536_v17, %v8537_v57  ;;  %v8556_v12 = vrot.slane %v8555_v35, 4  ;;  %v8541_v24 = vsel %vm8512_vm0, %v8508_v3, -inf }
 0x9e4   : > { %v8518_v61 = vrot.slane %v8517_v56, 1  ;;  %v8524_v0 = vmax.f32 %v8522_v31, %v8523_v36  ;;  %v8542_v6 = vrot.slane %v8541_v24, 4  ;;  %v8562_v23 = vsel %vm8512_vm0, %v8511_v39, -inf }
 0x9e5   : > { %v8533_v62 = vmax.f32 %v8531_v10, %v8532_v44  ;;  %v8539_v59 = vrot.slane %v8538_v7, 1  ;;  %v8557_v60 = vmax.f32 %v8555_v35, %v8556_v12  ;;  %v8563_v55 = vrot.slane %v8562_v23, 4 }
 0x9e6   : > { %v8519_v19 = vmax.f32 %v8517_v56, %v8518_v61  ;;  %v8525_v32 = vrot.slane %v8524_v0, 1  ;;  %v8543_v25 = vmax.f32 %v8541_v24, %v8542_v6  ;;  %v8509_v38 = vmul.f32 0.17677669, %v8492_v26 }
 0x9e7   : > { %v8571_v4 = vsub.f32 %v8506_v30, %v8533_v62  ;;  %v8540_v45 = vmax.f32 %v8538_v7, %v8539_v59  ;;  %v8558_v11 = vrot.slane %v8557_v60, 2  ;;  %v8564_v52 = vmax.f32 %v8562_v23, %v8563_v55 }
 0x9e8   : > { %v8569_v34 = vsub.f32 %v8504_v8, %v8519_v19  ;;  %v8526_v20 = vmax.f32 %v8524_v0, %v8525_v32  ;;  %v8544_v15 = vrot.slane %v8543_v25, 2  ;;  %v8548_v14 = vsel %vm8512_vm0, %v8509_v38, -inf }
 0x9e9   : > { %v8581_v16 = vmul.f32 1.442695, %v8571_v4  ;;  %v8572_v5 = vsub.f32 %v8507_v46, %v8540_v45  ;;  %v8559_v43 = vmax.f32 %v8557_v60, %v8558_v11  ;;  %v8565_v37 = vrot.slane %v8564_v52, 2 }
 0x9ea   : > { %v8577_v63 = vmul.f32 1.442695, %v8569_v34  ;;  %v8570_v54 = vsub.f32 %v8505_v48, %v8526_v20  ;;  %v8545_v42 = vmax.f32 %v8543_v25, %v8544_v15  ;;  %v8549_v41 = vrot.slane %v8548_v14, 4 }
 0x9eb   : > { %12119 = vpow2.f32 %v8581_v16  ;;  %v8583_v27 = vmul.f32 1.442695, %v8572_v5  ;;  %v8560_v17 = vrot.slane %v8559_v43, 1  ;;  %v8566_v30 = vmax.f32 %v8564_v52, %v8565_v37 }
 0x9ec   : > { %12121 = vpow2.f32 %v8577_v63  ;;  %v8579_v28 = vmul.f32 1.442695, %v8570_v54  ;;  %v8546_v9 = vrot.slane %v8545_v42, 1  ;;  %v8550_v8 = vmax.f32 %v8548_v14, %v8549_v41 }
 0x9ed   : > { %12123 = vpow2.f32 %v8583_v27  ;;  %v8561_v31 = vmax.f32 %v8559_v43, %v8560_v17  ;;  %v8567_v22 = vrot.slane %v8566_v30, 1 }
 0x9ee   : > { %12125 = vpow2.f32 %v8579_v28  ;;  %v8547_v10 = vmax.f32 %v8545_v42, %v8546_v9  ;;  %v8551_v46 = vrot.slane %v8550_v8, 2 }
 0x9ef   : > { %v8575_v57 = vsub.f32 %v8510_v13, %v8561_v31  ;;  %v8568_v1 = vmax.f32 %v8566_v30, %v8567_v22 }
 0x9f0   : > { %v8573_v56 = vsub.f32 %v8508_v3, %v8547_v10  ;;  %v8552_v48 = vmax.f32 %v8550_v8, %v8551_v46 }
 0x9f1   : > { %v8589_v36 = vmul.f32 1.442695, %v8575_v57  ;;  %v8576_v35 = vsub.f32 %v8511_v39, %v8568_v1 }
 0x9f2   : > { %v8585_v26 = vmul.f32 1.442695, %v8573_v56  ;;  %v8553_v44 = vrot.slane %v8552_v48, 1 }
 0x9f3   : > { %12127 = vpow2.f32 %v8589_v36  ;;  %v8591_v7 = vmul.f32 1.442695, %v8576_v35 }
 0x9f4   : > { %12129 = vpow2.f32 %v8585_v26  ;;  %v8554_v12 = vmax.f32 %v8552_v48, %v8553_v44 }
 0x9f5   : > { %v18374_v24 = vpop.eup %12119  ;;  %12131 = vpow2.f32 %v8591_v7 }
 0x9f6   : > { %v18376_v61 = vpop.eup %12121  ;;  %v8607_v0 = vsel %vm8512_vm0, %v18374_v24, 0.0  ;;  %v8574_v13 = vsub.f32 %v8509_v38, %v8554_v12 }
 0x9f7   : > { %v18380_v6 = vpop.eup %12123  ;;  %v8608_v3 = vrot.slane %v8607_v0, 4  ;;  %v8593_v39 = vsel %vm8512_vm0, %v18376_v61, 0.0 }
 0x9f8   : > { %v18384_v23 = vpop.eup %12125  ;;  %v8594_v62 = vrot.slane %v8593_v39, 4  ;;  %v8614_v59 = vsel %vm8512_vm0, %v18380_v6, 0.0  ;;  %v8587_v60 = vmul.f32 1.442695, %v8574_v13 }
 0x9f9   : > { %v8609_v55 = vadd.f32 %v8608_v3, %v8607_v0  ;;  %v8615_v19 = vrot.slane %v8614_v59, 4  ;;  %v8600_v32 = vsel %vm8512_vm0, %v18384_v23, 0.0 }
 0x9fa   : > { %v8595_v25 = vadd.f32 %v8594_v62, %v8593_v39  ;;  %v8601_v38 = vrot.slane %v8600_v32, 4  ;;  %12133 = vpow2.f32 %v8587_v60 }
 0x9fb   : > { %v8610_v4 = vrot.slane %v8609_v55, 2  ;;  %v8616_v45 = vadd.f32 %v8615_v19, %v8614_v59 }
 0x9fc   : > { %v8596_v11 = vrot.slane %v8595_v25, 2  ;;  %v8602_v52 = vadd.f32 %v8601_v38, %v8600_v32 }
 0x9fd   : > { %v18390_v34 = vpop.eup %12127  ;;  %v8611_v20 = vadd.f32 %v8610_v4, %v8609_v55  ;;  %v8617_v15 = vrot.slane %v8616_v45, 2 }
 0x9fe   : > { %v18392_v14 = vpop.eup %12129  ;;  %v8597_v16 = vadd.f32 %v8596_v11, %v8595_v25  ;;  %v8603_v5 = vrot.slane %v8602_v52, 2  ;;  %v8635_v43 = vsel %vm8512_vm0, %v18390_v34, 0.0 }
 0x9ff   : > { %v18396_v37 = vpop.eup %12131  ;;  %v8612_v63 = vrot.slane %v8611_v20, 1  ;;  %v8618_v54 = vadd.f32 %v8617_v15, %v8616_v45  ;;  %v8636_v42 = vrot.slane %v8635_v43, 4  ;;  %v8621_v41 = vsel %vm8512_vm0, %v18392_v14, 0.0 }
 0xa00   : > { %v8598_v27 = vrot.slane %v8597_v16, 1  ;;  %v8604_v17 = vadd.f32 %v8603_v5, %v8602_v52  ;;  %v8622_v30 = vrot.slane %v8621_v41, 4  ;;  %v8642_v28 = vsel %vm8512_vm0, %v18396_v37, 0.0 }
 0xa01   : > { %v8613_v9 = vadd.f32 %v8612_v63, %v8611_v20  ;;  %v8619_v8 = vrot.slane %v8618_v54, 1  ;;  %v8637_v31 = vadd.f32 %v8636_v42, %v8635_v43  ;;  %v8643_v22 = vrot.slane %v8642_v28, 4 }
 0xa02   : > { %v8599_v10 = vadd.f32 %v8598_v27, %v8597_v16  ;;  %v8605_v46 = vrot.slane %v8604_v17, 1  ;;  %v8623_v57 = vadd.f32 %v8622_v30, %v8621_v41  ;;  %v11596_v27 = vld [vmem:[%s18724_s6 + $0x80] sm:$0xff]  }
 0xa03   : > { %12135 = vrcp.f32 %v8613_v9  ;;  %v8620_v1 = vadd.f32 %v8619_v8, %v8618_v54  ;;  %v8638_v56 = vrot.slane %v8637_v31, 2  ;;  %v8644_v48 = vadd.f32 %v8643_v22, %v8642_v28  ;;  %10519 = vmatpush3.bf16.msra.mxu1 %v11596_v27  ;;  %v11600_v9 = vld [vmem:[%s18724_s6 + $0x88] sm:$0xff]   ;;  %v11601_v8 = vld [vmem:[%s18724_s6 + $0x58] sm:$0xff]  }
 0xa04   : > { %v18402_v36 = vpop.eup %12133  ;;  %12137 = vrcp.f32 %v8599_v10  ;;  %v8606_v35 = vadd.f32 %v8605_v46, %v8604_v17  ;;  %v8624_v26 = vrot.slane %v8623_v57, 2  ;;  %v12178_v28 = vmov 0  }
 0xa05   : > { %12139 = vrcp.f32 %v8620_v1  ;;  %v8639_v44 = vadd.f32 %v8638_v56, %v8637_v31  ;;  %v8645_v7 = vrot.slane %v8644_v48, 2  ;;  %v8628_v12 = vsel %vm8512_vm0, %v18402_v36, 0.0  ;;  %v11604_v56 = vld [vmem:[%s18724_s6 + $0x90] sm:$0xff]  }
 0xa06   : > { %12141 = vrcp.f32 %v8606_v35  ;;  %v8625_v0 = vadd.f32 %v8624_v26, %v8623_v57  ;;  %v8629_v13 = vrot.slane %v8628_v12, 4  ;;  %v11606_v35 = vld [vmem:[%s18724_s6 + $0x20] sm:$0xff]   ;;  %v11609_v26 = vld [vmem:[%s18724_s6 + $0x68] sm:$0xff]  }
 0xa07   : > { %v8640_v3 = vrot.slane %v8639_v44, 1  ;;  %v8646_v39 = vadd.f32 %v8645_v7, %v8644_v48  ;;  %v11605_v48 = vld [vmem:[%s18724_s6 + $0x60] sm:$0xff]  }
 0xa08   : > { %v8626_v62 = vrot.slane %v8625_v0, 1  ;;  %v8630_v59 = vadd.f32 %v8629_v13, %v8628_v12  ;;  %v11611_v7 = vld [vmem:[%s18724_s6 + $0xe0] sm:$0xff]   ;;  %v12179_v12 = vmov 2   ;;  %v11613_v13 = vld [vmem:[%s18724_s6 + $0x70] sm:$0xff]  }
 0xa09   : > { %v8641_v60 = vadd.f32 %v8640_v3, %v8639_v44  ;;  %v8647_v55 = vrot.slane %v8646_v39, 1  ;;  %v11610_v44 = vld [vmem:[%s18724_s6 + $0x28] sm:$0xff]  }
 0xa0a   : > { %v8631_v19 = vrot.slane %v8630_v59, 2  ;;  %v8627_v25 = vadd.f32 %v8626_v62, %v8625_v0  ;;  %v11612_v0 = vld [vmem:[%s18724_s6 + $0xa0] sm:$0xff]   ;;  %v11615_v3 = vld [vmem:[%s18724_s6 + $0xe8] sm:$0xff]   ;;  %v11617_v62 = vld [vmem:[%s18724_s6 + $0x78] sm:$0xff]  }
 0xa0b   : > { %12143 = vrcp.f32 %v8641_v60  ;;  %v8648_v32 = vadd.f32 %v8647_v55, %v8646_v39  ;;  %v11614_v39 = vld [vmem:[%s18724_s6 + $0x30] sm:$0xff]   ;;  %v11618_v55 = vld [vmem:[%s18724_s6 + $0x38] sm:$0xff]  }
 0xa0c   : > { %v8632_v38 = vadd.f32 %v8631_v19, %v8630_v59  ;;  %v11616_v59 = vld [vmem:[%s18724_s6 + $0xa8] sm:$0xff]   ;;  %v11619_v60 = vld [vmem:[%s18724_s6 + $0xf0] sm:$0xff]  }
 0xa0d   : > { %v12136_v4 = vpop.eup %12135  ;;  %12145 = vrcp.f32 %v8648_v32  ;;  %v11620_v19 = vld [vmem:[%s18724_s6 + $0xb0] sm:$0xff]   ;;  %v11621_v32 = vld [vmem:[%s18724_s6 + $0xf8] sm:$0xff]  }
 0xa0e   : > { %v12138_v45 = vpop.eup %12137  ;;  %v8633_v11 = vrot.slane %v8632_v38, 1  ;;  %12147 = vrcp.f32 %v8627_v25  ;;  %v8659_v16 = vmul.f32 %v12136_v4, %v18374_v24  ;;  %v11597_v24 = vld [vmem:[%s18724_s6 + $0x50] sm:$0xff]   ;;  %v11622_v25 = vld [vmem:[%s18724_s6 + $0xb8] sm:$0xff]  }
 0xa0f   : > { %v12140_v52 = vpop.eup %12139  ;;  %v8657_v43 = vmul.f32 %v12138_v45, %v18376_v61  ;;  %10482 = vmatprep.subr.bf16.mxu0 %v11597_v24 }
 0xa10   : > { %v12142_v20 = vpop.eup %12141  ;;  %v8634_v15 = vadd.f32 %v8633_v11, %v8632_v38  ;;  %v8660_v5 = vmul.f32 %v12140_v52, %v18380_v6  ;;  %v11598_v6 = vld [vmem:[%s18724_s6 + $0x10] sm:$0xff]  }
 0xa11   : > { %v8658_v63 = vmul.f32 %v12142_v20, %v18384_v23  ;;  %v11599_v23 = vld [vmem:[%s18724_s6 + $0xc8] sm:$0xff]   ;;  %10483 = vmatpush3.bf16.msra.mxu0 %v11598_v6 }
 0xa12   : > { %12149 = vrcp.f32 %v8634_v15  ;;  %v8666_v54 = vpack.c.bf16 %v8660_v5, %v8659_v16  ;;  %10520 = vmatprep.subr.bf16.mxu1 %v11599_v23  ;;  %10484 = vmatprep.subr.bf16.mxu0 %v11601_v8 }
 0xa13   : > { %v18410_v42 = vpack.c.bf16 %v8658_v63, %v8657_v43  ;;  %10521 = vmatpush3.bf16.msra.mxu1 %v11600_v9 }
 0xa15   : > { %v12144_v41 = vpop.eup %12143  ;;  %8734 = vperm.xlu0 %11456, %v18410_v42   ;;  %8694 = vperm.xlu1 %11455, %v18410_v42  }
 0xa16   : > { %v8663_v17 = vmul.f32 %v12144_v41, %v18390_v34  ;;  %v11602_v34 = vld [vmem:[%s18724_s6 + $0x18] sm:$0xff]  }
 0xa17   : > { %v12146_v61 = vpop.eup %12145  ;;  %10485 = vmatpush3.bf16.msra.mxu0 %v11602_v34 }
 0xa18   : > { %v8664_v30 = vmul.f32 %v12146_v61, %v18396_v37  ;;  %v12148_v31 = vpop.eup %12147  ;;  %v11603_v37 = vld [vmem:[%s18724_s6 + $0xd0] sm:$0xff]   ;;  %10486 = vmatprep.subr.bf16.mxu0 %v11605_v48 }
 0xa19   : > { %8698 = vperm.xlu1 %11455, %v8666_v54   ;;  %11464 = vset.pattern.permute.xlu0 %v12178_v28  ;;  %v8661_v46 = vmul.f32 %v12148_v31, %v18392_v14  ;;  %v11607_v14 = vld [vmem:[%s18724_s6 + $0xd8] sm:$0xff]   ;;  %v11629_v48 = vld [vmem:[%s18725_s7 + $0x1b0] sm:$0xff]  }
 0xa1a   : > { %v18435_v22 = vpack.c.bf16 %v8664_v30, %v8663_v17  ;;  %10522 = vmatprep.subr.bf16.mxu1 %v11603_v37 }
 0xa1b   : > { %10523 = vmatpush3.bf16.msra.mxu1 %v11604_v56  ;;  %10487 = vmatpush3.bf16.msra.mxu0 %v11606_v35  ;;  %v11628_v56 = vld [vmem:[%s18725_s7 + $0x1a8] sm:$0xff]   ;;  %v11630_v35 = vld [vmem:[%s18725_s7 + $0x1b8] sm:$0xff]  }
 0xa1c   : > { %v12150_v10 = vpop.eup %12149  ;;  %10524 = vmatprep.subr.bf16.mxu1 %v11607_v14  ;;  %10488 = vmatprep.subr.bf16.mxu0 %v11609_v26 }
 0xa1d   : > { %11457 = vset.pattern.permute.xlu1 %v12177_v33  ;;  %v8662_v57 = vmul.f32 %v12150_v10, %v18402_v36  ;;  %v11608_v36 = vld [vmem:[%s18724_s6 + $0x98] sm:$0xff]   ;;  %v12180_v10 = vmov 0.0  }
 0xa1e   : > { %8738 = vperm.xlu1 %11457, %v8666_v54  }
 0xa1f   : > { %v8667_v1 = vpack.c.bf16 %v8662_v57, %v8661_v46  ;;  %10525 = vmatpush3.bf16.msra.mxu1 %v11608_v36  ;;  %10489 = vmatpush3.bf16.msra.mxu0 %v11610_v44  ;;  %v11624_v46 = vld [vmem:[%s18725_s7 + $0x188] sm:$0xff]   ;;  %v11626_v57 = vld [vmem:[%s18725_s7 + $0x198] sm:$0xff]  }
 0xa20   : > { %10526 = vmatprep.subr.bf16.mxu1 %v11611_v7  ;;  %10490 = vmatprep.subr.bf16.mxu0 %v11613_v13 }
 0xa21   : > { %8681 = vperm.xlu0 %11464, %v8667_v1  }
 0xa22   : > { %11458 = vset.pattern.permute.xlu1 %v12178_v28 }
 0xa23   : > { %8676 = vperm.xlu1 %11458, %v8666_v54   ;;  %10527 = vmatpush3.bf16.msra.mxu1 %v11612_v0 }
 0xa24   : > { %10528 = vmatprep.subr.bf16.mxu1 %v11615_v3  ;;  %10491 = vmatpush3.bf16.msra.mxu0 %v11614_v39 }
 0xa25   : > { %11465 = vset.pattern.permute.xlu0 %v12177_v33  ;;  %10492 = vmatprep.subr.bf16.mxu0 %v11617_v62 }
 0xa26   : > { %8746 = vperm.xlu0 %11465, %v18435_v22  }
 0xa27   : > { %11459 = vset.pattern.permute.xlu1 %v12179_v12  ;;  %10529 = vmatpush3.bf16.msra.mxu1 %v11616_v59 }
 0xa28   : > { %8718 = vperm.xlu1 %11459, %v8666_v54   ;;  %10530 = vmatprep.subr.bf16.mxu1 %v11619_v60 }
 0xa29   : > { %10493 = vmatpush3.bf16.msra.mxu0 %v11618_v55 }
 0xa2a   : > { %11022 = vmatprep.subr.bf16.mxu0 %v12180_v10 }
 0xa2b   : > { %10531 = vmatpush3.bf16.msra.mxu1 %v11620_v19 }
 0xa2c   : > { %11460 = vset.pattern.permute.xlu1 %v12178_v28  ;;  %10532 = vmatprep.subr.bf16.mxu1 %v11621_v32 }
 0xa2d   : > { %8671 = vperm.xlu1 %11460, %v18410_v42  }
 0xa2f   : > { %10533 = vmatpush3.bf16.msra.mxu1 %v11622_v25 }
 0xa30   : > { %11042 = vmatprep.subr.bf16.mxu1 %v12180_v10 }
 0xa31   : > { %11461 = vset.pattern.permute.xlu1 %v12179_v12 }
 0xa32   : > { %8714 = vperm.xlu1 %11461, %v18410_v42  }
 0xa36   : > { %11462 = vset.pattern.permute.xlu1 %v12176_v47 }
 0xa37   : > { %8706 = vperm.xlu1 %11462, %v18435_v22  }
 0xa3b   : > { %8702 = vperm.xlu1 %11462, %v8667_v1  }
 0xa3f   : > { %11463 = vset.pattern.permute.xlu1 %v12177_v33 }
 0xa40   : > { %8742 = vperm.xlu1 %11463, %v8667_v1  }
 0xa44   : > { %11466 = vset.pattern.permute.xlu1 %v12179_v12 }
 0xa45   : > { %8722 = vperm.xlu1 %11466, %v8667_v1   ;;  %v11627_v1 = vld [vmem:[%s18725_s7 + $0x1a0] sm:$0xff]  }
 0xa49   : > { %11467 = vset.pattern.permute.xlu1 %v12178_v28 }
 0xa4a   : > { %8686 = vperm.xlu1 %11467, %v18435_v22  }
 0xa4e   : > { %11468 = vset.pattern.permute.xlu1 %v12179_v12 }
 0xa4f   : > { %8726 = vperm.xlu1 %11468, %v18435_v22  }
 0xa94   : > { %v8735_v38 = vpop.permute.xlu0 %8734  ;;  %v8695_v4 = vpop.permute.xlu1 %8694 }
 0xa95   : > { %v8749_v47 = vmul.bf16 %v8735_v38, %v18240_v21  ;;  %v8709_v45 = vmul.bf16 %v8695_v4, %v18240_v21 }
 0xa97   : > { %9041 = vmatprep.mubr.bf16.mxu0 %v8709_v45  ;;  %9106 = vmatprep.mubr.bf16.mxu1 %v8749_v47 }
 0xa98   : > { %v8699_v11 = vpop.permute.xlu1 %8698 }
 0xa99   : > { %v8710_v5 = vmul.bf16 %v8699_v11, %v18250_v49 }
 0xa9d   : > { %v8739_v33 = vpop.permute.xlu1 %8738 }
 0xa9e   : > { %v8750_v54 = vmul.bf16 %v8739_v33, %v18250_v49 }
 0xaa0   : > { %v8682_v27 = vpop.permute.xlu0 %8681 }
 0xaa1   : > { %v8691_v23 = vmul.bf16 %v8682_v27, %v18259_v58 }
 0xaa2   : > { %v8677_v52 = vpop.permute.xlu1 %8676 }
 0xaa3   : > { %v8690_v42 = vmul.bf16 %v8677_v52, %v18250_v49 }
 0xaa5   : > { %v8747_v28 = vpop.permute.xlu0 %8746 }
 0xaa7   : > { %v8719_v20 = vpop.permute.xlu1 %8718 }
 0xaa8   : > { %v8730_v24 = vmul.bf16 %v8719_v20, %v18250_v49  ;;  %v8752_v49 = vmul.bf16 %v8747_v28, %v18265_v2 }
 0xaac   : > { %v8672_v15 = vpop.permute.xlu1 %8671 }
 0xaad   : > { %v8689_v16 = vmul.bf16 %v8672_v15, %v18240_v21  ;;  %v18572_v15 = vld [vmem:[%s18726_s8 + $0x8] sm:$0x7f] }
 0xaaf   : > { %9042 = vmatmul.mubr.bf16.vlgmr.msra.gmra.mrb[144].mxu0 %v8689_v16 }
 0xab0   : > { %9049 = vmatprep.mubr.bf16.mxu0 %v8710_v5 }
 0xab1   : > { %v8715_v43 = vpop.permute.xlu1 %8714 }
 0xab2   : > { %v8729_v63 = vmul.bf16 %v8715_v43, %v18240_v21 }
 0xab4   : > { %9107 = vmatmul.mubr.bf16.vlgmr.msra.gmra.mrb[152].mxu1 %v8729_v63 }
 0xab5   : > { %9114 = vmatprep.mubr.bf16.mxu1 %v8750_v54 }
 0xab6   : > { %v8707_v41 = vpop.permute.xlu1 %8706 }
 0xab7   : > { %9050 = vmatmul.mubr.bf16.gmra.mrb[148].mxu0 %v8690_v42  ;;  %v8712_v21 = vmul.bf16 %v8707_v41, %v18265_v2 }
 0xaba   : > { %v8703_v61 = vpop.permute.xlu1 %8702 }
 0xabb   : > { %v8711_v6 = vmul.bf16 %v8703_v61, %v18259_v58 }
 0xabc   : > { %9115 = vmatmul.mubr.bf16.gmra.mrb[156].mxu1 %v8730_v24 }
 0xabd   : > { %9057 = vmatprep.mubr.bf16.mxu0 %v8711_v6 }
 0xabf   : > { %9058 = vmatmul.mubr.bf16.gmra.mrb[152].mxu0 %v8691_v23  ;;  %v8743_v17 = vpop.permute.xlu1 %8742  ;;  %v20402_v23 = vsub.s32 0, %v20401_v40 }
 0xac0   : > { %v8751_v30 = vmul.bf16 %v8743_v17, %v18259_v58  ;;  %9065 = vmatprep.mubr.bf16.mxu0 %v8712_v21 }
 0xac1   : > { %v18577_v21 = vrot.slane %v18572_v15, %v20402_v23 }
 0xac2   : > { %9122 = vmatprep.mubr.bf16.mxu1 %v8751_v30 }
 0xac4   : > { %v8723_v9 = vpop.permute.xlu1 %8722 }
 0xac5   : > { %v8731_v8 = vmul.bf16 %v8723_v9, %v18259_v58  ;;  %v11623_v58 = vld [vmem:[%s18725_s7 + $0x180] sm:$0xff]  }
 0xac6   : > { %11023 = vmatpush3.bf16.msra.mxu0 %v11623_v58 }
 0xac7   : > { %9123 = vmatmul.mubr.bf16.gmra.mrb[160].mxu1 %v8731_v8  ;;  %11024 = vmatprep.subr.bf16.mxu0 %v12180_v10 }
 0xac8   : > { %9130 = vmatprep.mubr.bf16.mxu1 %v8752_v49 }
 0xac9   : > { %v8687_v31 = vpop.permute.xlu1 %8686 }
 0xaca   : > { %v8692_v22 = vmul.bf16 %v8687_v31, %v18265_v2  ;;  %11025 = vmatpush3.bf16.msra.mxu0 %v11624_v46 }
 0xacb   : > { %11026 = vmatprep.subr.bf16.mxu0 %v12180_v10 }
 0xacc   : > { %9066 = vmatmul.mubr.bf16.gmra.mrb[156].mxu0 %v8692_v22 }
 0xacd   : > { %11038 = vmatprep.mubr.msk.bf16.mxu0 %vm12181_vm9, %v12180_v10 }
 0xace   : > { %v8727_v34 = vpop.permute.xlu1 %8726 }
 0xacf   : > { %v8732_v37 = vmul.bf16 %v8727_v34, %v18265_v2  ;;  %v11625_v2 = vld [vmem:[%s18725_s7 + $0x190] sm:$0xff]  }
 0xad0   : > { %11027 = vmatpush3.bf16.msra.mxu0 %v11625_v2 }
 0xad1   : > { %9131 = vmatmul.mubr.bf16.gmra.mrb[164].mxu1 %v8732_v37  ;;  %11028 = vmatprep.subr.bf16.mxu0 %v12180_v10 }
 0xad2   : > { %11058 = vmatprep.mubr.msk.bf16.mxu1 %vm12181_vm9, %v12180_v10 }
 0xad4   : > { %11029 = vmatpush3.bf16.msra.mxu0 %v11626_v57 }
 0xad5   : > { %11030 = vmatprep.subr.bf16.mxu0 %v12180_v10 }
 0xad8   : > { %11031 = vmatpush3.bf16.msra.mxu0 %v11627_v1 }
 0xad9   : > { %11032 = vmatprep.subr.bf16.mxu0 %v12180_v10 }
 0xadc   : > { %11033 = vmatpush3.bf16.msra.mxu0 %v11628_v56 }
 0xadd   : > { %11034 = vmatprep.subr.bf16.mxu0 %v12180_v10 }
 0xae0   : > { %11035 = vmatpush3.bf16.msra.mxu0 %v11629_v48 }
 0xae1   : > { %11036 = vmatprep.subr.bf16.mxu0 %v12180_v10 }
 0xae4   : > { %11037 = vmatpush3.bf16.msra.mxu0 %v11630_v35 }
 0xae5   : > { %11062 = vmatprep.subr.bf16.mxu0 %v12180_v10 }
 0xb82   : > { %v10494_v14 = vpop.f32.mrb[144].mxu0 }
 0xb83   : > { %v10495_v36 = vpop.f32.mrb[145].mxu0 }
 0xb84   : > { %v10496_v26 = vadd.f32 %v10495_v36, %v10494_v14  ;;  %v10497_v44 = vpop.f32.mrb[146].mxu0 }
 0xb85   : > { %v10498_v7 = vpop.f32.mrb[147].mxu0 }
 0xb86   : > { %v10499_v12 = vadd.f32 %v10498_v7, %v10497_v44 }
 0xb87   : > { %v10534_v0 = vpop.f32.mrb[152].mxu1 }
 0xb88   : > { %v10535_v13 = vpop.f32.mrb[153].mxu1 }
 0xb89   : > { %v10536_v3 = vadd.f32 %v10535_v13, %v10534_v0  ;;  %v10537_v39 = vpop.f32.mrb[154].mxu1 }
 0xb8a   : > { %v10500_v62 = vpop.f32.mrb[148].mxu0  ;;  %v10538_v59 = vpop.f32.mrb[155].mxu1 }
 0xb8b   : > { %v9109_v60 = vadd.f32 %v10536_v3, %v10496_v26  ;;  %v10539_v55 = vadd.f32 %v10538_v59, %v10537_v39  ;;  %v10501_v19 = vpop.f32.mrb[149].mxu0 }
 0xb8c   : > { %v10502_v32 = vadd.f32 %v10501_v19, %v10500_v62  ;;  %v10503_v25 = vpop.f32.mrb[150].mxu0 }
 0xb8d   : > { %v9139_v38 = vrot.slane %v9109_v60, 4  ;;  %v9112_v4 = vadd.f32 %v10539_v55, %v10499_v12  ;;  %v10504_v47 = vpop.f32.mrb[151].mxu0 }
 0xb8e   : > { %v10505_v45 = vadd.f32 %v10504_v47, %v10503_v25 }
 0xb8f   : > { %v9140_v11 = vadd.f32 %v9139_v38, %v9109_v60  ;;  %v9145_v33 = vrot.slane %v9112_v4, 4  ;;  %v10540_v52 = vpop.f32.mrb[156].mxu1 }
 0xb90   : > { %v10541_v20 = vpop.f32.mrb[157].mxu1 }
 0xb91   : > { %v9141_v16 = vrot.slane %v9140_v11, 2  ;;  %v9146_v5 = vadd.f32 %v9145_v33, %v9112_v4  ;;  %v10542_v43 = vadd.f32 %v10541_v20, %v10540_v52  ;;  %v10543_v63 = vpop.f32.mrb[158].mxu1 }
 0xb92   : > { %v10506_v54 = vpop.f32.mrb[152].mxu0  ;;  %v10544_v42 = vpop.f32.mrb[159].mxu1 }
 0xb93   : > { %v9142_v41 = vadd.f32 %v9141_v16, %v9140_v11  ;;  %v9147_v27 = vrot.slane %v9146_v5, 2  ;;  %v9117_v24 = vadd.f32 %v10542_v43, %v10502_v32  ;;  %v10545_v61 = vadd.f32 %v10544_v42, %v10543_v63  ;;  %v10507_v6 = vpop.f32.mrb[153].mxu0 }
 0xb94   : > { %v10508_v17 = vadd.f32 %v10507_v6, %v10506_v54  ;;  %v10509_v30 = vpop.f32.mrb[154].mxu0 }
 0xb95   : > { %v9143_v28 = vrot.slane %v9142_v41, 1  ;;  %v9148_v9 = vadd.f32 %v9147_v27, %v9146_v5  ;;  %v9151_v8 = vrot.slane %v9117_v24, 4  ;;  %v9120_v49 = vadd.f32 %v10545_v61, %v10505_v45  ;;  %v10510_v31 = vpop.f32.mrb[155].mxu0 }
 0xb96   : > { %v10511_v22 = vadd.f32 %v10510_v31, %v10509_v30 }
 0xb97   : > { %v9144_v34 = vadd.f32 %v9143_v28, %v9142_v41  ;;  %v9149_v37 = vrot.slane %v9148_v9, 1  ;;  %v9152_v58 = vadd.f32 %v9151_v8, %v9117_v24  ;;  %v9157_v46 = vrot.slane %v9120_v49, 4 }
 0xb99   : > { %v9191_v2 = vadd.f32 %v18577_v21, %v9144_v34  ;;  %v9150_v57 = vadd.f32 %v9149_v37, %v9148_v9  ;;  %v9153_v1 = vrot.slane %v9152_v58, 2  ;;  %v9158_v56 = vadd.f32 %v9157_v46, %v9120_v49 }
 0xb9a   : > { %v10546_v48 = vpop.f32.mrb[160].mxu1 }
 0xb9b   : > { %v9199_v35 = vmax.f32 %v9191_v2, 0.0  ;;  %v9192_v14 = vadd.f32 %v18577_v21, %v9150_v57  ;;  %v9154_v36 = vadd.f32 %v9153_v1, %v9152_v58  ;;  %v9159_v26 = vrot.slane %v9158_v56, 2  ;;  %v10547_v44 = vpop.f32.mrb[161].mxu1 }
 0xb9c   : > { %v10548_v7 = vadd.f32 %v10547_v44, %v10546_v48  ;;  %v10549_v12 = vpop.f32.mrb[162].mxu1 }
 0xb9d   : > { %v9200_v0 = vmax.f32 %v9192_v14, 0.0  ;;  %v9155_v13 = vrot.slane %v9154_v36, 1  ;;  %v9160_v3 = vadd.f32 %v9159_v26, %v9158_v56  ;;  %v10550_v39 = vpop.f32.mrb[163].mxu1  ;;  %v9207_v62 = vpack.c.bf16 %v9199_v35, %v9199_v35 }
 0xb9e   : > { %v9125_v59 = vadd.f32 %v10548_v7, %v10508_v17  ;;  %v10551_v60 = vadd.f32 %v10550_v39, %v10549_v12 }
 0xb9f   : > { %v9208_v55 = vpack.c.bf16 %v9200_v0, %v9200_v0  ;;  %v9156_v19 = vadd.f32 %v9155_v13, %v9154_v36  ;;  %v9161_v32 = vrot.slane %v9160_v3, 1  ;;  %v10512_v25 = vpop.f32.mrb[156].mxu0  ;;  %v9244_v16 = vunpack.c.l.b16 %v9207_v62 }
 0xba0   : > { %v9163_v38 = vrot.slane %v9125_v59, 4  ;;  %v9128_v4 = vadd.f32 %v10551_v60, %v10511_v22  ;;  %v10513_v47 = vpop.f32.mrb[157].mxu0 }
 0xba1   : > { %v9245_v45 = vunpack.c.l.b16 %v9208_v55  ;;  %v9193_v11 = vadd.f32 %v18577_v21, %v9156_v19  ;;  %v9162_v33 = vadd.f32 %v9161_v32, %v9160_v3  ;;  %v10514_v52 = vadd.f32 %v10513_v47, %v10512_v25  ;;  %v10515_v20 = vpop.f32.mrb[158].mxu0 }
 0xba2   : > { %v9164_v5 = vadd.f32 %v9163_v38, %v9125_v59  ;;  %v9169_v43 = vrot.slane %v9128_v4, 4  ;;  %v10516_v63 = vpop.f32.mrb[159].mxu0 }
 0xba3   : > { %v9252_v54 = vrot.slane %v9245_v45, 7  ;;  %v9201_v42 = vmax.f32 %v9193_v11, 0.0  ;;  %v9194_v41 = vadd.f32 %v18577_v21, %v9162_v33  ;;  %v10517_v27 = vadd.f32 %v10516_v63, %v10515_v20 }
 0xba4   : > { %v9165_v24 = vrot.slane %v9164_v5, 2  ;;  %v9170_v61 = vadd.f32 %v9169_v43, %v9128_v4  ;;  %v10552_v6 = vpop.f32.mrb[164].mxu1 }
 0xba5   : > { %v9253_v23 = vsel %vm7162_vm2, %v9252_v54, %v9244_v16  ;;  %v9209_v17 = vpack.c.bf16 %v9201_v42, %v9201_v42  ;;  %v9202_v30 = vmax.f32 %v9194_v41, 0.0  ;;  %v10553_v28 = vpop.f32.mrb[165].mxu1  ;;  %vm20403_vm2 = vmmov %vm20392_vm11 }
 0xba6   : > { %v9166_v9 = vadd.f32 %v9165_v24, %v9164_v5  ;;  %v9171_v8 = vrot.slane %v9170_v61, 2  ;;  %v10554_v49 = vadd.f32 %v10553_v28, %v10552_v6  ;;  %v10555_v31 = vpop.f32.mrb[166].mxu1 }
 0xba7   : > { %v9246_v22 = vunpack.c.l.b16 %v9209_v17  ;;  %v9210_v34 = vpack.c.bf16 %v9202_v30, %v9202_v30  ;;  %v10556_v37 = vpop.f32.mrb[167].mxu1 }
 0xba8   : > { %v9167_v58 = vrot.slane %v9166_v9, 1  ;;  %v9172_v46 = vadd.f32 %v9171_v8, %v9170_v61  ;;  %v9133_v2 = vadd.f32 %v10554_v49, %v10514_v52  ;;  %v10557_v57 = vadd.f32 %v10556_v37, %v10555_v31 }
 0xba9   : > { %v9254_v1 = vrot.slane %v9246_v22, 6  ;;  %v9247_v56 = vunpack.c.l.b16 %v9210_v34 }
 0xbaa   : > { %v9168_v48 = vadd.f32 %v9167_v58, %v9166_v9  ;;  %v9173_v35 = vrot.slane %v9172_v46, 1  ;;  %v9175_v14 = vrot.slane %v9133_v2, 4  ;;  %v9136_v36 = vadd.f32 %v10557_v57, %v10517_v27  ;;  %v11632_v57 = vld [vmem:[%s18725_s7 + $0x1c8] sm:$0xff]  }
 0xbab   : > { %v9255_v26 = vsel %vm7164_vm3, %v9254_v1, %v9253_v23  ;;  %v9256_v44 = vrot.slane %v9247_v56, 5  ;;  %vm20404_vm3 = vmmov %vm20347_vm8  ;;  %v11633_v1 = vld [vmem:[%s18725_s7 + $0x1d0] sm:$0xff]  }
 0xbac   : > { %v9195_v7 = vadd.f32 %v18577_v21, %v9168_v48  ;;  %v9174_v12 = vadd.f32 %v9173_v35, %v9172_v46  ;;  %v9176_v0 = vadd.f32 %v9175_v14, %v9133_v2  ;;  %v9181_v13 = vrot.slane %v9136_v36, 4  ;;  %v11631_v2 = vld [vmem:[%s18725_s7 + $0x1c0] sm:$0xff]  }
 0xbad   : > { %v9257_v3 = vsel %vm7166_vm4, %v9256_v44, %v9255_v26  ;;  %vm20405_vm4 = vmmov %vm20396_vm1  ;;  %11043 = vmatpush3.bf16.msra.mxu1 %v11631_v2  ;;  %v11635_v26 = vld [vmem:[%s18725_s7 + $0x1e0] sm:$0xff]   ;;  %v11636_v44 = vld [vmem:[%s18725_s7 + $0x1e8] sm:$0xff]  }
 0xbae   : > { %v9203_v39 = vmax.f32 %v9195_v7, 0.0  ;;  %v9196_v62 = vadd.f32 %v18577_v21, %v9174_v12  ;;  %v9177_v59 = vrot.slane %v9176_v0, 2  ;;  %v9182_v60 = vadd.f32 %v9181_v13, %v9136_v36  ;;  %11044 = vmatprep.subr.bf16.mxu1 %v12180_v10  ;;  %v11634_v36 = vld [vmem:[%s18725_s7 + $0x1d8] sm:$0xff]   ;;  %v11639_v7 = vld [vmem:[%s18725_s7 + $0x200] sm:$0xff]   ;;  %v11640_v12 = vld [vmem:[%s18725_s7 + $0x208] sm:$0xff]  }
 0xbaf   : > { %v11641_v13 = vld [vmem:[%s18725_s7 + $0x210] sm:$0xff]  }
 0xbb0   : > { %v9211_v55 = vpack.c.bf16 %v9203_v39, %v9203_v39  ;;  %v9204_v19 = vmax.f32 %v9196_v62, 0.0  ;;  %v9178_v32 = vadd.f32 %v9177_v59, %v9176_v0  ;;  %v9183_v25 = vrot.slane %v9182_v60, 2  ;;  %v11637_v0 = vld [vmem:[%s18725_s7 + $0x1f0] sm:$0xff]   ;;  %v11642_v39 = vld [vmem:[%s18725_s7 + $0x218] sm:$0xff]   ;;  %v11643_v62 = vld [vmem:[%s18725_s7 + $0x220] sm:$0xff]  }
 0xbb1   : > { %11045 = vmatpush3.bf16.msra.mxu1 %v11632_v57  ;;  %v11644_v59 = vld [vmem:[%s18725_s7 + $0x228] sm:$0xff]  }
 0xbb2   : > { %v9248_v38 = vunpack.c.l.b16 %v9211_v55  ;;  %v9212_v4 = vpack.c.bf16 %v9204_v19, %v9204_v19  ;;  %v9179_v47 = vrot.slane %v9178_v32, 1  ;;  %v9184_v45 = vadd.f32 %v9183_v25, %v9182_v60  ;;  %11046 = vmatprep.subr.bf16.mxu1 %v12180_v10 }
 0xbb4   : > { %v9258_v11 = vrot.slane %v9248_v38, 4  ;;  %v9249_v33 = vunpack.c.l.b16 %v9212_v4  ;;  %v9180_v52 = vadd.f32 %v9179_v47, %v9178_v32  ;;  %v9185_v20 = vrot.slane %v9184_v45, 1 }
 0xbb5   : > { %11047 = vmatpush3.bf16.msra.mxu1 %v11633_v1  ;;  %v9371_v32 = vrot.slane %v18572_v15, %v7750_v53  ;;  %v9376_v4 = vrot.slane %v18572_v15, %v7859_v29  ;;  %v11646_v53 = vld [vmem:[%s18725_s7 + $0x238] sm:$0xff]   ;;  %v11647_v29 = vld [vmem:[%s18725_s7 + $0x240] sm:$0xff]  }
 0xbb6   : > { %v9259_v16 = vsel %vm7168_vm5, %v9258_v11, %v9257_v3  ;;  %v9260_v5 = vrot.slane %v9249_v33, 3  ;;  %v9197_v43 = vadd.f32 %v18577_v21, %v9180_v52  ;;  %v9186_v63 = vadd.f32 %v9185_v20, %v9184_v45  ;;  %11048 = vmatprep.subr.bf16.mxu1 %v12180_v10  ;;  %v11638_v3 = vld [vmem:[%s18725_s7 + $0x1f8] sm:$0xff]   ;;  %v11645_v33 = vld [vmem:[%s18725_s7 + $0x230] sm:$0xff]   ;;  %v11648_v52 = vld [vmem:[%s18725_s7 + $0x248] sm:$0xff]  }
 0xbb7   : > { %v11649_v20 = vld [vmem:[%s18725_s7 + $0x250] sm:$0xff]  }
 0xbb8   : > { %v9205_v54 = vmax.f32 %v9197_v43, 0.0  ;;  %v9198_v42 = vadd.f32 %v18577_v21, %v9186_v63  ;;  %v9261_v41 = vsel %vm20403_vm2, %v9260_v5, %v9259_v16  ;;  %v20406_v21 = vsub.s32 1, %v20401_v40  ;;  %v11650_v16 = vld [vmem:[%s18725_s7 + $0x258] sm:$0xff]   ;;  %v11651_v5 = vld [vmem:[%s18725_s7 + $0x260] sm:$0xff]   ;;  %v11652_v43 = vld [vmem:[%s18725_s7 + $0x268] sm:$0xff]  }
 0xbb9   : > { %11049 = vmatpush3.bf16.msra.mxu1 %v11634_v36  ;;  %v9399_v63 = vrot.slane %v18572_v15, %v7871_v50  ;;  %v9510_v50 = vrot.slane %v18572_v15, %v7920_v51 }
 0xbba   : > { %v9213_v27 = vpack.c.bf16 %v9205_v54, %v9205_v54  ;;  %v9206_v24 = vmax.f32 %v9198_v42, 0.0  ;;  %v9235_v49 = vrot.slane %v18572_v15, %v20406_v21  ;;  %11050 = vmatprep.subr.bf16.mxu1 %v12180_v10 }
 0xbbc   : > { %v9250_v61 = vunpack.c.l.b16 %v9213_v27  ;;  %v9214_v6 = vpack.c.bf16 %v9206_v24, %v9206_v24 }
 0xbbd   : > { %11051 = vmatpush3.bf16.msra.mxu1 %v11635_v26 }
 0xbbe   : > { %v9262_v23 = vrot.slane %v9250_v61, 2  ;;  %v9251_v17 = vunpack.c.l.b16 %v9214_v6  ;;  %11052 = vmatprep.subr.bf16.mxu1 %v12180_v10 }
 0xbc0   : > { %v9264_v30 = vrot.slane %v9251_v17, 1  ;;  %v9263_v28 = vsel %vm20404_vm3, %v9262_v23, %v9261_v41  ;;  %v11653_v23 = vld [vmem:[%s18725_s7 + $0x270] sm:$0xff]   ;;  %v11654_v17 = vld [vmem:[%s18725_s7 + $0x278] sm:$0xff]  }
 0xbc1   : > { %11053 = vmatpush3.bf16.msra.mxu1 %v11636_v44 }
 0xbc2   : > { %v9265_v9 = vsel %vm20405_vm4, %v9264_v30, %v9263_v28  ;;  %11054 = vmatprep.subr.bf16.mxu1 %v12180_v10 }
 0xbc3   : > { %v9266_v8 = vpack.c.b16 %v9265_v9, %v9265_v9 }
 0xbc5   : > { %11039 = vmatmul.mubr.bf16.vlgmr.msra.gmra.mrb[160].mxu0 %v9266_v8  ;;  %11055 = vmatpush3.bf16.msra.mxu1 %v11637_v0 }
 0xbc6   : > { %11078 = vmatprep.mubr.msk.bf16.mxu0 %vm12181_vm9, %v12180_v10  ;;  %11063 = vmatpush3.bf16.msra.mxu0 %v11639_v7 }
 0xbc7   : > { %11064 = vmatprep.subr.bf16.mxu0 %v12180_v10  ;;  %11056 = vmatprep.subr.bf16.mxu1 %v12180_v10 }
 0xbc9   : > { %11057 = vmatpush3.bf16.msra.mxu1 %v11638_v3 }
 0xbca   : > { %11065 = vmatpush3.bf16.msra.mxu0 %v11640_v12  ;;  %11082 = vmatprep.subr.bf16.mxu1 %v12180_v10 }
 0xbcb   : > { %11066 = vmatprep.subr.bf16.mxu0 %v12180_v10 }
 0xbce   : > { %11067 = vmatpush3.bf16.msra.mxu0 %v11641_v13 }
 0xbcf   : > { %11068 = vmatprep.subr.bf16.mxu0 %v12180_v10 }
 0xbd2   : > { %11069 = vmatpush3.bf16.msra.mxu0 %v11642_v39 }
 0xbd3   : > { %11070 = vmatprep.subr.bf16.mxu0 %v12180_v10 }
 0xbd6   : > { %11071 = vmatpush3.bf16.msra.mxu0 %v11643_v62 }
 0xbd7   : > { %11072 = vmatprep.subr.bf16.mxu0 %v12180_v10 }
 0xbda   : > { %11073 = vmatpush3.bf16.msra.mxu0 %v11644_v59 }
 0xbdb   : > { %11074 = vmatprep.subr.bf16.mxu0 %v12180_v10 }
 0xbde   : > { %11075 = vmatpush3.bf16.msra.mxu0 %v11645_v33 }
 0xbdf   : > { %11076 = vmatprep.subr.bf16.mxu0 %v12180_v10 }
 0xbe2   : > { %11077 = vmatpush3.bf16.msra.mxu0 %v11646_v53 }
 0xc98   : > { %v9350_v31 = vpop.f32.mrb[160].mxu0 }
 0xc99   : > { %v9351_v22 = vadd.f32 %v9350_v31, %v9235_v49  ;;  %v11040_v34 = vpop.f32.mrb[161].mxu0 }
 0xc9a   : > { %v9353_v37 = vpop.f32.mrb[162].mxu0 }
 0xc9b   : > { %v9356_v58 = vmax.f32 %v9351_v22, 0.0  ;;  %v11041_v46 = vpop.f32.mrb[163].mxu0 }
 0xc9d   : > { %9357 = vadd.xlane.f32.xlu0 %v9356_v58 }
 0xd2a   : > { %v9358_v56 = vpop.xlane.xlu0 %9357 }
 0xd2b   : > { %v9359_v48 = vmul.f32 0.0078125, %v9358_v56 }
 0xd2d   : > { %v9360_v35 = vsub.f32 %v9356_v58, %v9359_v48 }
 0xd2f   : > { %v9361_v14 = vmul.f32 %v9360_v35, %v9360_v35 }
 0xd31   : > { %9362 = vadd.xlane.f32.xlu1 %v9361_v14 }
 0xdbe   : > { %v9363_v60 = vpop.xlane.xlu1 %9362 }
 0xdbf   : > { %v9364_v55 = vmul.f32 0.0078125, %v9363_v60 }
 0xdc1   : > { %v9365_v19 = vadd.f32 1e-05, %v9364_v55 }
 0xdc3   : > { %12151 = vrsqrt.f32 %v9365_v19 }
 0xdcd   : > { %v12152_v25 = vpop.eup %12151 }
 0xdce   : > { %v9367_v38 = vmul.f32 %v12152_v25, %v9360_v35 }
 0xdd0   : > { %v9372_v47 = vmul.f32 %v9371_v32, %v9367_v38 }
 0xdd2   : > { %v9377_v45 = vadd.f32 %v9376_v4, %v9372_v47 }
 0xdd4   : > { %v9378_v11 = vpack.c.bf16 %v9377_v45, %v9377_v45 }
 0xdd6   : > { %11059 = vmatmul.mubr.bf16.vlgmr.msra.gmra.mrb[168].mxu1 %v9378_v11 }
 0xdd7   : > { %11098 = vmatprep.mubr.msk.bf16.mxu1 %vm12181_vm9, %v12180_v10  ;;  %11083 = vmatpush3.bf16.msra.mxu1 %v11647_v29 }
 0xdd8   : > { %11084 = vmatprep.subr.bf16.mxu1 %v12180_v10 }
 0xddb   : > { %11085 = vmatpush3.bf16.msra.mxu1 %v11648_v52 }
 0xddc   : > { %11086 = vmatprep.subr.bf16.mxu1 %v12180_v10 }
 0xddf   : > { %11087 = vmatpush3.bf16.msra.mxu1 %v11649_v20 }
 0xde0   : > { %11088 = vmatprep.subr.bf16.mxu1 %v12180_v10 }
 0xde3   : > { %11089 = vmatpush3.bf16.msra.mxu1 %v11650_v16 }
 0xde4   : > { %11090 = vmatprep.subr.bf16.mxu1 %v12180_v10 }
 0xde7   : > { %11091 = vmatpush3.bf16.msra.mxu1 %v11651_v5 }
 0xde8   : > { %11092 = vmatprep.subr.bf16.mxu1 %v12180_v10 }
 0xdeb   : > { %11093 = vmatpush3.bf16.msra.mxu1 %v11652_v43 }
 0xdec   : > { %11094 = vmatprep.subr.bf16.mxu1 %v12180_v10 }
 0xdef   : > { %11095 = vmatpush3.bf16.msra.mxu1 %v11653_v23 }
 0xdf0   : > { %11096 = vmatprep.subr.bf16.mxu1 %v12180_v10  ;;  %v9621_v10 = vrot.slane %v18572_v15, %v8054_v18 }
 0xdf3   : > { %11097 = vmatpush3.bf16.msra.mxu1 %v11654_v17 }
 0xea9   : > { %v9482_v54 = vpop.f32.mrb[168].mxu1 }
 0xeaa   : > { %v9483_v42 = vadd.f32 %v9482_v54, %v9399_v63  ;;  %v11060_v41 = vpop.f32.mrb[169].mxu1 }
 0xeab   : > { %v9485_v27 = vpop.f32.mrb[170].mxu1 }
 0xeac   : > { %v9488_v24 = vmax.f32 %v9483_v42, 0.0  ;;  %v11061_v61 = vpop.f32.mrb[171].mxu1 }
 0xeae   : > { %v9489_v6 = vpack.c.bf16 %v9488_v24, %v9488_v24 }
 0xeb0   : > { %11079 = vmatmul.mubr.bf16.vlgmr.msra.gmra.mrb[164].mxu0 %v9489_v6 }
 0xf83   : > { %v9593_v30 = vpop.f32.mrb[164].mxu0 }
 0xf84   : > { %v9594_v28 = vadd.f32 %v9593_v30, %v9510_v50  ;;  %v11080_v9 = vpop.f32.mrb[165].mxu0 }
 0xf85   : > { %v9596_v8 = vpop.f32.mrb[166].mxu0 }
 0xf86   : > { %v9599_v21 = vmax.f32 %v9594_v28, 0.0  ;;  %v11081_v49 = vpop.f32.mrb[167].mxu0 }
 0xf88   : > { %v9600_v31 = vpack.c.bf16 %v9599_v21, %v9599_v21 }
 0xf8a   : > { %11099 = vmatmul.mubr.bf16.vlgmr.msra.gmra.mrb[172].mxu1 %v9600_v31 }
0x105d   : > { %v9704_v51 = vpop.f32.mrb[172].mxu1 }
0x105e   : > { %v9705_v22 = vadd.f32 %v9704_v51, %v9621_v10  ;;  %v11100_v34 = vpop.f32.mrb[173].mxu1 }
0x105f   : > { %v9707_v37 = vpop.f32.mrb[174].mxu1 }
0x1060   : > { %9710 = vst [vmem:[%s376_s20] sm:$0xff] %v9705_v22  ;;  %v11101_v58 = vpop.f32.mrb[175].mxu1 }
0x1061 PF: > { %s19_s30 = sadd.s32 1, %s12173_s30  }
0x1062   : > { %p16_p6 = scmp.ge.s32.totalorder %s19_s30, 4  }
0x1064   :  { %18 = sbr.rel (!%p16_p6) target bundleno = 1 (0x1), region = 101 }

</bundles_post_ra>
